<compile_context>
chip_gen: v7x
topology: tpu7x:2x2x1
jax: 0.10.0
libtpu: 0.0.40
codegen_flags: <defaults>
</compile_context>

<pallas_src>
import jax
import jax.numpy as jnp
from jax import lax
from jax.experimental import pallas as pl
from jax.experimental.pallas import tpu as pltpu

_EPS = 1e-5


def _round_up(x, m):
    return (x + m - 1) // m * m


def _pick_tile_rows(h, target=8):
    """Largest divisor of h that is <= target (keeps row-slab tiles small)."""
    for th in range(min(h, target), 0, -1):
        if h % th == 0:
            return th
    return 1


def _shift_rows(z, d):
    """out[i] = z[i + d] for d in {-1, 0, +1}; vacated rows are zero.

    Realizes the horizontal (dw) conv taps on the flattened (n, h, w) axis.
    Rows shifted in from outside only ever land on padding columns, which are
    masked before use.
    """
    if d == 0:
        return z
    zero = jnp.zeros((1, z.shape[1]), z.dtype)
    if d > 0:
        return jnp.concatenate([z[1:, :], zero], axis=0)
    return jnp.concatenate([zero, z[:-1, :]], axis=0)


def _make_conv_kernel(real_w, pre_affine):
    """3x3 conv over one row slab; optionally fuses BN(prev)+ReLU on its input."""

    def body(x_hbm, w_ref, scale_ref, shift_ref, y_ref, stats_ref, xs_ref):
        nb, th2, wp, cp = xs_ref.shape
        th = th2 - 2
        i = pl.program_id(0)
        nt = pl.num_programs(0)
        r0 = i * th

        # ---- manual halo load: input rows [r0-1, r0+th] into the scratch ----
        pltpu.sync_copy(x_hbm.at[:, pl.ds(r0, th), :, :],
                        xs_ref.at[:, 1:th + 1, :, :])

        @pl.when(i > 0)
        def _():
            pltpu.sync_copy(x_hbm.at[:, pl.ds(r0 - 1, 1), :, :],
                            xs_ref.at[:, 0:1, :, :])

        @pl.when(i < nt - 1)
        def _():
            pltpu.sync_copy(x_hbm.at[:, pl.ds(r0 + th, 1), :, :],
                            xs_ref.at[:, th + 1:th + 2, :, :])

        # Real data lives in columns [1, real_w]; cols 0 and >= real_w+1 are
        # the conv zero padding / lane-alignment padding.
        col = lax.broadcasted_iota(jnp.int32, (1, 1, wp, cp), 2)
        cmask = (col >= 1) & (col <= real_w)

        if pre_affine:
            # Fused BatchNorm(previous conv) + ReLU on the loaded tile (incl.
            # halo rows), then re-zero padding columns so the conv below still
            # sees exact zero padding.
            act = jnp.maximum(
                xs_ref[...] * scale_ref[...] + shift_ref[...], 0.0)
            xs_ref[...] = jnp.where(cmask, act, 0.0)

        # Out-of-image halo rows must be exactly zero (done after the optional
        # affine so relu(shift) never leaks into the spatial padding).
        @pl.when(i == 0)
        def _():
            xs_ref[:, 0:1, :, :] = jnp.zeros((nb, 1, wp, cp), jnp.float32)

        @pl.when(i == nt - 1)
        def _():
            xs_ref[:, th + 1:th + 2, :, :] = jnp.zeros((nb, 1, wp, cp),
                                                       jnp.float32)

        # ---- 3x3 conv as 9 MXU matmuls (K = N = 128-padded channels) -------
        m = nb * th * wp
        acc = None
        for dh in range(3):
            s = xs_ref[:, dh:dh + th, :, :].reshape(m, cp)
            for dw in range(3):
                z = jnp.dot(s, w_ref[dh * 3 + dw],
                            preferred_element_type=jnp.float32)
                z = _shift_rows(z, dw - 1)
                acc = z if acc is None else acc + z

        y = jnp.where(cmask, acc.reshape(nb, th, wp, cp), 0.0)
        y_ref[...] = y

        # ---- per-tile BatchNorm partials (sum, sum of squares) --------------
        yf = y.reshape(m, cp)
        psum = jnp.sum(yf, axis=0, keepdims=True)
        psumsq = jnp.sum(yf * yf, axis=0, keepdims=True)
        stats_ref[...] = jnp.concatenate([psum, psumsq], axis=0)[None]

    if pre_affine:
        return body

    def body_no_affine(x_hbm, w_ref, y_ref, stats_ref, xs_ref):
        body(x_hbm, w_ref, None, None, y_ref, stats_ref, xs_ref)

    return body_no_affine


def _conv_pass(x, w9, scale, shift, real_w, tile_rows):
    n, h, wp, cp = x.shape
    nt = h // tile_rows
    pre_affine = scale is not None
    kernel = _make_conv_kernel(real_w, pre_affine)

    vmem = pl.BlockSpec(memory_space=pltpu.MemorySpace.VMEM)
    in_specs = [pl.BlockSpec(memory_space=pl.ANY),  # activation stays in HBM
                vmem]                                # weights
    args = [x, w9]
    if pre_affine:
        in_specs += [vmem, vmem]
        args += [scale.reshape(1, 1, 1, cp), shift.reshape(1, 1, 1, cp)]

    y, stats = pl.pallas_call(
        kernel,
        grid=(nt,),
        in_specs=in_specs,
        out_specs=(
            pl.BlockSpec((n, tile_rows, wp, cp), lambda i: (0, i, 0, 0)),
            pl.BlockSpec((1, 2, cp), lambda i: (i, 0, 0)),
        ),
        out_shape=(
            jax.ShapeDtypeStruct((n, h, wp, cp), jnp.float32),
            jax.ShapeDtypeStruct((nt, 2, cp), jnp.float32),
        ),
        scratch_shapes=[pltpu.VMEM((n, tile_rows + 2, wp, cp), jnp.float32)],
        compiler_params=pltpu.CompilerParams(
            dimension_semantics=("parallel",),
            vmem_limit_bytes=32 * 1024 * 1024),
    )(*args)
    return y, stats


def _bn_relu_kernel(y_ref, scale_ref, shift_ref, o_ref):
    o_ref[...] = jnp.maximum(y_ref[...] * scale_ref[...] + shift_ref[...], 0.0)


def _bn_relu_pass(y, scale, shift, tile_rows):
    n, h, wp, cp = y.shape
    nt = h // tile_rows
    blk = pl.BlockSpec((n, tile_rows, wp, cp), lambda i: (0, i, 0, 0))
    vmem = pl.BlockSpec(memory_space=pltpu.MemorySpace.VMEM)
    return pl.pallas_call(
        _bn_relu_kernel,
        grid=(nt,),
        in_specs=[blk, vmem, vmem],
        out_specs=blk,
        out_shape=jax.ShapeDtypeStruct((n, h, wp, cp), jnp.float32),
        compiler_params=pltpu.CompilerParams(
            dimension_semantics=("parallel",),
            vmem_limit_bytes=32 * 1024 * 1024),
    )(y, scale.reshape(1, 1, 1, cp), shift.reshape(1, 1, 1, cp))


def _bn_affine_from_stats(stats, gamma, beta, count):
    """Training-mode BN (biased var) folded into per-channel scale/shift."""
    s = jnp.sum(stats[:, 0, :], axis=0)
    ss = jnp.sum(stats[:, 1, :], axis=0)
    mean = s / count
    var = jnp.maximum(ss / count - mean * mean, 0.0)
    scale = gamma * lax.rsqrt(var + _EPS)
    shift = beta - mean * scale
    return scale, shift


def double_conv(x_nchw, w1_hwio, g1, b1, w2_hwio, g2, b2, tile_rows=None):
    """PyTorch-compatible wrapper: NCHW in, NCHW out."""
    n, cin, h, w = x_nchw.shape
    cout = w1_hwio.shape[-1]
    cp = _round_up(max(cin, cout), 128)       # lane-dense channel padding
    wp = _round_up(w + 2, 8)                  # width + conv pad, 8-aligned
    th = tile_rows if tile_rows is not None else _pick_tile_rows(h)

    # NCHW -> NHWC, one left zero column at wp=0, alignment padding on the
    # right, channels padded to CP.  Fused by XLA with the relayout we need
    # anyway, so no extra HBM round trip.
    x = jnp.transpose(x_nchw, (0, 2, 3, 1)).astype(jnp.float32)
    x = jnp.pad(x, ((0, 0), (0, 0), (1, wp - w - 1), (0, cp - cin)))

    def prep_w(wt, ci):
        wt = jnp.pad(wt.astype(jnp.float32),
                     ((0, 0), (0, 0), (0, cp - ci), (0, cp - cout)))
        return wt.reshape(9, cp, cp)

    w1 = prep_w(w1_hwio, cin)
    w2 = prep_w(w2_hwio, cout)
    g1p = jnp.pad(g1.astype(jnp.float32), (0, cp - cout))
    b1p = jnp.pad(b1.astype(jnp.float32), (0, cp - cout))
    g2p = jnp.pad(g2.astype(jnp.float32), (0, cp - cout))
    b2p = jnp.pad(b2.astype(jnp.float32), (0, cp - cout))

    count = n * h * w

    # Pass 1: conv1 + BN1 partial statistics.
    y1, st1 = _conv_pass(x, w1, None, None, w, th)
    sc1, sh1 = _bn_affine_from_stats(st1, g1p, b1p, count)

    # Pass 2: (BN1 + ReLU) fused into the input load, conv2 + BN2 partials.
    y2, st2 = _conv_pass(y1, w2, sc1, sh1, w, th)
    sc2, sh2 = _bn_affine_from_stats(st2, g2p, b2p, count)

    # Pass 3: BN2 + ReLU (lane-dense blocked stores).
    out = _bn_relu_pass(y2, sc2, sh2, th)

    # Crop padding and go back to NCHW (single fused XLA relayout).
    out = out[:, :, 1:w + 1, :cout]
    return jnp.transpose(out, (0, 3, 1, 2))


def _reference(x_nchw, w1, g1, b1, w2, g2, b2):
    """Pure-JAX reference (f32 conv + training-mode BN + ReLU)."""
    x = jnp.transpose(x_nchw, (0, 2, 3, 1)).astype(jnp.float32)

    def conv(v, wt):
        return lax.conv_general_dilated(
            v, wt, (1, 1), ((1, 1), (1, 1)),
            dimension_numbers=("NHWC", "HWIO", "NHWC"),
            precision=lax.Precision.HIGHEST)

    def bn_relu(yv, g, b):
        mean = jnp.mean(yv, axis=(0, 1, 2), keepdims=True)
        var = jnp.mean((yv - mean) ** 2, axis=(0, 1, 2), keepdims=True)
        return jnp.maximum((yv - mean) * lax.rsqrt(var + _EPS) * g + b, 0.0)

    yv = bn_relu(conv(x, w1), g1, b1)
    yv = bn_relu(conv(yv, w2), g2, b2)
    return jnp.transpose(yv, (0, 3, 1, 2))


if __name__ == "__main__":
    key = jax.random.PRNGKey(0)
    ks = jax.random.split(key, 7)

    N, Cin, Cout, H, W = 2, 4, 8, 16, 16
    x = jax.random.normal(ks[0], (N, Cin, H, W), jnp.float32)

    # Deterministic synthetic parameters (conv weights in HWIO layout).
    w1 = 0.1 * jax.random.normal(ks[1], (3, 3, Cin, Cout), jnp.float32)
    w2 = 0.1 * jax.random.normal(ks[2], (3, 3, Cout, Cout), jnp.float32)
    g1 = 1.0 + 0.1 * jax.random.normal(ks[3], (Cout,), jnp.float32)
    b1 = 0.1 * jax.random.normal(ks[4], (Cout,), jnp.float32)
    g2 = 1.0 + 0.1 * jax.random.normal(ks[5], (Cout,), jnp.float32)
    b2 = 0.1 * jax.random.normal(ks[6], (Cout,), jnp.float32)

    out = jax.jit(double_conv)(x, w1, g1, b1, w2, g2, b2)
    jax.block_until_ready(out)

    ref = _reference(x, w1, g1, b1, w2, g2, b2)
    assert out.shape == (N, Cout, H, W), out.shape
    err = float(jnp.max(jnp.abs(out - ref)))
    # Tolerance leaves headroom for bf16 multiplier passes the MXU may use for
    # f32 matmuls at default precision; structural bugs (halo / BN / masking)
    # would show up as O(1) errors.
    assert jnp.allclose(out, ref, rtol=1e-2, atol=1e-2), f"max abs err {err}"

    print("KERNEL_OK")
</pallas_src>

<mosaic_0001>
module attributes {stable_mosaic.version = 11 : i64} {
  func.func @body_no_affine(%arg0: i32, %arg1: memref<2x16x24x128xf32, #tpu.memory_space<any>>, %arg2: memref<9x128x128xf32, #tpu.memory_space<vmem>>, %arg3: memref<2x8x24x128xf32, #tpu.memory_space<vmem>>, %arg4: memref<1x2x128xf32, #tpu.memory_space<vmem>>, %arg5: memref<2x10x24x128xf32, #tpu.memory_space<vmem>>) attributes {dimension_semantics = [#tpu.dimension_semantics<parallel>], iteration_bounds = array<i64: 2>, scalar_prefetch = 0 : i64, scratch_operands = 1 : i64, tpu.core_type = #tpu.core_type<tc>, window_params = [{}, {pipeline_mode = #tpu.pipeline_mode<synchronous>, transform_indices = @transform_1, window_bounds = array<i64: 9, 128, 128>}, {transform_indices = @transform_2, window_bounds = array<i64: 2, 8, 24, 128>}, {transform_indices = @transform_3, window_bounds = array<i64: 1, 2, 128>}]} {
    %c8_i32 = arith.constant 8 : i32
    %0 = arith.muli %arg0, %c8_i32 : i32
    "tpu.region"() ({
      %93 = tpu.sem_alloc : memref<!tpu.dma_semaphore, #tpu.memory_space<semaphore_mem>>
      %c0_i32_61 = arith.constant 0 : i32
      %c0_i32_62 = arith.constant 0 : i32
      %c0_i32_63 = arith.constant 0 : i32
      %94 = tpu.memref_slice %arg1[%c0_i32_61, %0, %c0_i32_62, %c0_i32_63] : memref<2x16x24x128xf32, #tpu.memory_space<any>> -> memref<2x8x24x128xf32, #tpu.memory_space<any>>
      %c0_i32_64 = arith.constant 0 : i32
      %c1_i32_65 = arith.constant 1 : i32
      %c0_i32_66 = arith.constant 0 : i32
      %c0_i32_67 = arith.constant 0 : i32
      %95 = tpu.memref_slice %arg5[%c0_i32_64, %c1_i32_65, %c0_i32_66, %c0_i32_67] : memref<2x10x24x128xf32, #tpu.memory_space<vmem>> -> memref<2x8x24x128xf32, #tpu.memory_space<vmem>>
      tpu.enqueue_dma source(%94 : memref<2x8x24x128xf32, #tpu.memory_space<any>>) target(%95 : memref<2x8x24x128xf32, #tpu.memory_space<vmem>>) target_semaphore(%93 : memref<!tpu.dma_semaphore, #tpu.memory_space<semaphore_mem>>)
      %c0_i32_68 = arith.constant 0 : i32
      %c0_i32_69 = arith.constant 0 : i32
      %c0_i32_70 = arith.constant 0 : i32
      %96 = tpu.memref_slice %arg1[%c0_i32_68, %0, %c0_i32_69, %c0_i32_70] : memref<2x16x24x128xf32, #tpu.memory_space<any>> -> memref<2x8x24x128xf32, #tpu.memory_space<any>>
      %c0_i32_71 = arith.constant 0 : i32
      %c1_i32_72 = arith.constant 1 : i32
      %c0_i32_73 = arith.constant 0 : i32
      %c0_i32_74 = arith.constant 0 : i32
      %97 = tpu.memref_slice %arg5[%c0_i32_71, %c1_i32_72, %c0_i32_73, %c0_i32_74] : memref<2x10x24x128xf32, #tpu.memory_space<vmem>> -> memref<2x8x24x128xf32, #tpu.memory_space<vmem>>
      tpu.wait_dma2 semaphore(%93 : memref<!tpu.dma_semaphore, #tpu.memory_space<semaphore_mem>>) src(%96 : memref<2x8x24x128xf32, #tpu.memory_space<any>>) dst(%97 : memref<2x8x24x128xf32, #tpu.memory_space<vmem>>)
      tpu.yield
    }) : () -> ()
    %c0_i32 = arith.constant 0 : i32
    %1 = arith.cmpi sgt, %arg0, %c0_i32 : i32
    %2 = arith.extui %1 : i1 to i32
    %c0_i32_0 = arith.constant 0 : i32
    %3 = arith.cmpi ne, %2, %c0_i32_0 : i32
    scf.if %3 {
      %c1_i32_61 = arith.constant 1 : i32
      %93 = arith.subi %0, %c1_i32_61 : i32
      "tpu.region"() ({
        %94 = tpu.sem_alloc : memref<!tpu.dma_semaphore, #tpu.memory_space<semaphore_mem>>
        %c0_i32_62 = arith.constant 0 : i32
        %c0_i32_63 = arith.constant 0 : i32
        %c0_i32_64 = arith.constant 0 : i32
        %95 = tpu.memref_slice %arg1[%c0_i32_62, %93, %c0_i32_63, %c0_i32_64] : memref<2x16x24x128xf32, #tpu.memory_space<any>> -> memref<2x1x24x128xf32, #tpu.memory_space<any>>
        %c0_i32_65 = arith.constant 0 : i32
        %c0_i32_66 = arith.constant 0 : i32
        %c0_i32_67 = arith.constant 0 : i32
        %c0_i32_68 = arith.constant 0 : i32
        %96 = tpu.memref_slice %arg5[%c0_i32_65, %c0_i32_66, %c0_i32_67, %c0_i32_68] : memref<2x10x24x128xf32, #tpu.memory_space<vmem>> -> memref<2x1x24x128xf32, #tpu.memory_space<vmem>>
        tpu.enqueue_dma source(%95 : memref<2x1x24x128xf32, #tpu.memory_space<any>>) target(%96 : memref<2x1x24x128xf32, #tpu.memory_space<vmem>>) target_semaphore(%94 : memref<!tpu.dma_semaphore, #tpu.memory_space<semaphore_mem>>)
        %c0_i32_69 = arith.constant 0 : i32
        %c0_i32_70 = arith.constant 0 : i32
        %c0_i32_71 = arith.constant 0 : i32
        %97 = tpu.memref_slice %arg1[%c0_i32_69, %93, %c0_i32_70, %c0_i32_71] : memref<2x16x24x128xf32, #tpu.memory_space<any>> -> memref<2x1x24x128xf32, #tpu.memory_space<any>>
        %c0_i32_72 = arith.constant 0 : i32
        %c0_i32_73 = arith.constant 0 : i32
        %c0_i32_74 = arith.constant 0 : i32
        %c0_i32_75 = arith.constant 0 : i32
        %98 = tpu.memref_slice %arg5[%c0_i32_72, %c0_i32_73, %c0_i32_74, %c0_i32_75] : memref<2x10x24x128xf32, #tpu.memory_space<vmem>> -> memref<2x1x24x128xf32, #tpu.memory_space<vmem>>
        tpu.wait_dma2 semaphore(%94 : memref<!tpu.dma_semaphore, #tpu.memory_space<semaphore_mem>>) src(%97 : memref<2x1x24x128xf32, #tpu.memory_space<any>>) dst(%98 : memref<2x1x24x128xf32, #tpu.memory_space<vmem>>)
        tpu.yield
      }) : () -> ()
    } else {
    }
    %c1_i32 = arith.constant 1 : i32
    %4 = arith.cmpi slt, %arg0, %c1_i32 : i32
    %5 = arith.extui %4 : i1 to i32
    %c0_i32_1 = arith.constant 0 : i32
    %6 = arith.cmpi ne, %5, %c0_i32_1 : i32
    scf.if %6 {
      %c8_i32_61 = arith.constant 8 : i32
      %93 = arith.addi %0, %c8_i32_61 : i32
      "tpu.region"() ({
        %94 = tpu.sem_alloc : memref<!tpu.dma_semaphore, #tpu.memory_space<semaphore_mem>>
        %c0_i32_62 = arith.constant 0 : i32
        %c0_i32_63 = arith.constant 0 : i32
        %c0_i32_64 = arith.constant 0 : i32
        %95 = tpu.memref_slice %arg1[%c0_i32_62, %93, %c0_i32_63, %c0_i32_64] : memref<2x16x24x128xf32, #tpu.memory_space<any>> -> memref<2x1x24x128xf32, #tpu.memory_space<any>>
        %c0_i32_65 = arith.constant 0 : i32
        %c9_i32 = arith.constant 9 : i32
        %c0_i32_66 = arith.constant 0 : i32
        %c0_i32_67 = arith.constant 0 : i32
        %96 = tpu.memref_slice %arg5[%c0_i32_65, %c9_i32, %c0_i32_66, %c0_i32_67] : memref<2x10x24x128xf32, #tpu.memory_space<vmem>> -> memref<2x1x24x128xf32, #tpu.memory_space<vmem>>
        tpu.enqueue_dma source(%95 : memref<2x1x24x128xf32, #tpu.memory_space<any>>) target(%96 : memref<2x1x24x128xf32, #tpu.memory_space<vmem>>) target_semaphore(%94 : memref<!tpu.dma_semaphore, #tpu.memory_space<semaphore_mem>>)
        %c0_i32_68 = arith.constant 0 : i32
        %c0_i32_69 = arith.constant 0 : i32
        %c0_i32_70 = arith.constant 0 : i32
        %97 = tpu.memref_slice %arg1[%c0_i32_68, %93, %c0_i32_69, %c0_i32_70] : memref<2x16x24x128xf32, #tpu.memory_space<any>> -> memref<2x1x24x128xf32, #tpu.memory_space<any>>
        %c0_i32_71 = arith.constant 0 : i32
        %c9_i32_72 = arith.constant 9 : i32
        %c0_i32_73 = arith.constant 0 : i32
        %c0_i32_74 = arith.constant 0 : i32
        %98 = tpu.memref_slice %arg5[%c0_i32_71, %c9_i32_72, %c0_i32_73, %c0_i32_74] : memref<2x10x24x128xf32, #tpu.memory_space<vmem>> -> memref<2x1x24x128xf32, #tpu.memory_space<vmem>>
        tpu.wait_dma2 semaphore(%94 : memref<!tpu.dma_semaphore, #tpu.memory_space<semaphore_mem>>) src(%97 : memref<2x1x24x128xf32, #tpu.memory_space<any>>) dst(%98 : memref<2x1x24x128xf32, #tpu.memory_space<vmem>>)
        tpu.yield
      }) : () -> ()
    } else {
    }
    %7 = tpu.iota {dimensions = array<i32: 2>} : vector<1x1x24x128xi32>
    %c1_i32_2 = arith.constant 1 : i32
    %8 = vector.broadcast %c1_i32_2 : i32 to vector<1x1x24x128xi32>
    %9 = arith.cmpi sge, %7, %8 : vector<1x1x24x128xi32>
    %c16_i32 = arith.constant 16 : i32
    %10 = vector.broadcast %c16_i32 : i32 to vector<1x1x24x128xi32>
    %11 = arith.cmpi sle, %7, %10 : vector<1x1x24x128xi32>
    %12 = arith.andi %9, %11 : vector<1x1x24x128xi1>
    %c0_i32_3 = arith.constant 0 : i32
    %13 = arith.cmpi eq, %arg0, %c0_i32_3 : i32
    %14 = arith.extui %13 : i1 to i32
    %c0_i32_4 = arith.constant 0 : i32
    %15 = arith.cmpi ne, %14, %c0_i32_4 : i32
    scf.if %15 {
      %cst_61 = arith.constant 0.000000e+00 : f32
      %93 = vector.broadcast %cst_61 : f32 to vector<2x1x24x128xf32>
      %c0_62 = arith.constant 0 : index
      %c0_63 = arith.constant 0 : index
      %c0_64 = arith.constant 0 : index
      %c0_65 = arith.constant 0 : index
      %94 = vector.load %arg5[%c0_62, %c0_63, %c0_64, %c0_65] : memref<2x10x24x128xf32, #tpu.memory_space<vmem>>, vector<2x1x24x128xf32>
      tpu.vector_store %arg5[%c0_62, %c0_63, %c0_64, %c0_65], %93 {strides = array<i32>} : memref<2x10x24x128xf32, #tpu.memory_space<vmem>>, vector<2x1x24x128xf32>,
    } else {
    }
    %c1_i32_5 = arith.constant 1 : i32
    %16 = arith.cmpi eq, %arg0, %c1_i32_5 : i32
    %17 = arith.extui %16 : i1 to i32
    %c0_i32_6 = arith.constant 0 : i32
    %18 = arith.cmpi ne, %17, %c0_i32_6 : i32
    scf.if %18 {
      %cst_61 = arith.constant 0.000000e+00 : f32
      %93 = vector.broadcast %cst_61 : f32 to vector<2x1x24x128xf32>
      %c0_62 = arith.constant 0 : index
      %c9 = arith.constant 9 : index
      %c0_63 = arith.constant 0 : index
      %c0_64 = arith.constant 0 : index
      %94 = vector.load %arg5[%c0_62, %c9, %c0_63, %c0_64] : memref<2x10x24x128xf32, #tpu.memory_space<vmem>>, vector<2x1x24x128xf32>
      tpu.vector_store %arg5[%c0_62, %c9, %c0_63, %c0_64], %93 {strides = array<i32>} : memref<2x10x24x128xf32, #tpu.memory_space<vmem>>, vector<2x1x24x128xf32>,
    } else {
    }
    %c0 = arith.constant 0 : index
    %c0_7 = arith.constant 0 : index
    %c0_8 = arith.constant 0 : index
    %c0_9 = arith.constant 0 : index
    %19 = vector.load %arg5[%c0, %c0_7, %c0_8, %c0_9] : memref<2x10x24x128xf32, #tpu.memory_space<vmem>>, vector<2x8x24x128xf32>
    %20 = vector.shape_cast %19 : vector<2x8x24x128xf32> to vector<384x128xf32>
    %c0_10 = arith.constant 0 : index
    %c0_11 = arith.constant 0 : index
    %c0_12 = arith.constant 0 : index
    %21 = vector.load %arg2[%c0_10, %c0_11, %c0_12] : memref<9x128x128xf32, #tpu.memory_space<vmem>>, vector<1x128x128xf32>
    %22 = vector.shape_cast %21 : vector<1x128x128xf32> to vector<128x128xf32>
    %cst = arith.constant dense<0.000000e+00> : vector<384x128xf32>
    %23 = tpu.matmul %20, %22, %cst {dimension_numbers = #tpu.dot_dimension_numbers<[1], [0], [0], [1], [0, 0, 1, 1], [], []>} : vector<384x128xf32>, vector<128x128xf32>, vector<384x128xf32> -> vector<384x128xf32>
    %cst_13 = arith.constant 0.000000e+00 : f32
    %24 = vector.broadcast %cst_13 : f32 to vector<1x128xf32>
    %25 = vector.extract_strided_slice %23 {offsets = [0, 0], sizes = [383, 128], strides = [1, 1]} : vector<384x128xf32> to vector<383x128xf32>
    %26 = tpu.concatenate %24, %25 in 0 : vector<1x128xf32>, vector<383x128xf32> -> vector<384x128xf32>
    %c1 = arith.constant 1 : index
    %c0_14 = arith.constant 0 : index
    %c0_15 = arith.constant 0 : index
    %27 = vector.load %arg2[%c1, %c0_14, %c0_15] : memref<9x128x128xf32, #tpu.memory_space<vmem>>, vector<1x128x128xf32>
    %28 = vector.shape_cast %27 : vector<1x128x128xf32> to vector<128x128xf32>
    %cst_16 = arith.constant dense<0.000000e+00> : vector<384x128xf32>
    %29 = tpu.matmul %20, %28, %cst_16 {dimension_numbers = #tpu.dot_dimension_numbers<[1], [0], [0], [1], [0, 0, 1, 1], [], []>} : vector<384x128xf32>, vector<128x128xf32>, vector<384x128xf32> -> vector<384x128xf32>
    %30 = arith.addf %26, %29 : vector<384x128xf32>
    %c2 = arith.constant 2 : index
    %c0_17 = arith.constant 0 : index
    %c0_18 = arith.constant 0 : index
    %31 = vector.load %arg2[%c2, %c0_17, %c0_18] : memref<9x128x128xf32, #tpu.memory_space<vmem>>, vector<1x128x128xf32>
    %32 = vector.shape_cast %31 : vector<1x128x128xf32> to vector<128x128xf32>
    %cst_19 = arith.constant dense<0.000000e+00> : vector<384x128xf32>
    %33 = tpu.matmul %20, %32, %cst_19 {dimension_numbers = #tpu.dot_dimension_numbers<[1], [0], [0], [1], [0, 0, 1, 1], [], []>} : vector<384x128xf32>, vector<128x128xf32>, vector<384x128xf32> -> vector<384x128xf32>
    %cst_20 = arith.constant 0.000000e+00 : f32
    %34 = vector.broadcast %cst_20 : f32 to vector<1x128xf32>
    %35 = vector.extract_strided_slice %33 {offsets = [1, 0], sizes = [383, 128], strides = [1, 1]} : vector<384x128xf32> to vector<383x128xf32>
    %36 = tpu.concatenate %35, %34 in 0 : vector<383x128xf32>, vector<1x128xf32> -> vector<384x128xf32>
    %37 = arith.addf %30, %36 : vector<384x128xf32>
    %c0_21 = arith.constant 0 : index
    %c1_22 = arith.constant 1 : index
    %c0_23 = arith.constant 0 : index
    %c0_24 = arith.constant 0 : index
    %38 = vector.load %arg5[%c0_21, %c1_22, %c0_23, %c0_24] : memref<2x10x24x128xf32, #tpu.memory_space<vmem>>, vector<2x8x24x128xf32>
    %39 = vector.shape_cast %38 : vector<2x8x24x128xf32> to vector<384x128xf32>
    %c3 = arith.constant 3 : index
    %c0_25 = arith.constant 0 : index
    %c0_26 = arith.constant 0 : index
    %40 = vector.load %arg2[%c3, %c0_25, %c0_26] : memref<9x128x128xf32, #tpu.memory_space<vmem>>, vector<1x128x128xf32>
    %41 = vector.shape_cast %40 : vector<1x128x128xf32> to vector<128x128xf32>
    %cst_27 = arith.constant dense<0.000000e+00> : vector<384x128xf32>
    %42 = tpu.matmul %39, %41, %cst_27 {dimension_numbers = #tpu.dot_dimension_numbers<[1], [0], [0], [1], [0, 0, 1, 1], [], []>} : vector<384x128xf32>, vector<128x128xf32>, vector<384x128xf32> -> vector<384x128xf32>
    %cst_28 = arith.constant 0.000000e+00 : f32
    %43 = vector.broadcast %cst_28 : f32 to vector<1x128xf32>
    %44 = vector.extract_strided_slice %42 {offsets = [0, 0], sizes = [383, 128], strides = [1, 1]} : vector<384x128xf32> to vector<383x128xf32>
    %45 = tpu.concatenate %43, %44 in 0 : vector<1x128xf32>, vector<383x128xf32> -> vector<384x128xf32>
    %46 = arith.addf %37, %45 : vector<384x128xf32>
    %c4 = arith.constant 4 : index
    %c0_29 = arith.constant 0 : index
    %c0_30 = arith.constant 0 : index
    %47 = vector.load %arg2[%c4, %c0_29, %c0_30] : memref<9x128x128xf32, #tpu.memory_space<vmem>>, vector<1x128x128xf32>
    %48 = vector.shape_cast %47 : vector<1x128x128xf32> to vector<128x128xf32>
    %cst_31 = arith.constant dense<0.000000e+00> : vector<384x128xf32>
    %49 = tpu.matmul %39, %48, %cst_31 {dimension_numbers = #tpu.dot_dimension_numbers<[1], [0], [0], [1], [0, 0, 1, 1], [], []>} : vector<384x128xf32>, vector<128x128xf32>, vector<384x128xf32> -> vector<384x128xf32>
    %50 = arith.addf %46, %49 : vector<384x128xf32>
    %c5 = arith.constant 5 : index
    %c0_32 = arith.constant 0 : index
    %c0_33 = arith.constant 0 : index
    %51 = vector.load %arg2[%c5, %c0_32, %c0_33] : memref<9x128x128xf32, #tpu.memory_space<vmem>>, vector<1x128x128xf32>
    %52 = vector.shape_cast %51 : vector<1x128x128xf32> to vector<128x128xf32>
    %cst_34 = arith.constant dense<0.000000e+00> : vector<384x128xf32>
    %53 = tpu.matmul %39, %52, %cst_34 {dimension_numbers = #tpu.dot_dimension_numbers<[1], [0], [0], [1], [0, 0, 1, 1], [], []>} : vector<384x128xf32>, vector<128x128xf32>, vector<384x128xf32> -> vector<384x128xf32>
    %cst_35 = arith.constant 0.000000e+00 : f32
    %54 = vector.broadcast %cst_35 : f32 to vector<1x128xf32>
    %55 = vector.extract_strided_slice %53 {offsets = [1, 0], sizes = [383, 128], strides = [1, 1]} : vector<384x128xf32> to vector<383x128xf32>
    %56 = tpu.concatenate %55, %54 in 0 : vector<383x128xf32>, vector<1x128xf32> -> vector<384x128xf32>
    %57 = arith.addf %50, %56 : vector<384x128xf32>
    %c0_36 = arith.constant 0 : index
    %c2_37 = arith.constant 2 : index
    %c0_38 = arith.constant 0 : index
    %c0_39 = arith.constant 0 : index
    %58 = vector.load %arg5[%c0_36, %c2_37, %c0_38, %c0_39] : memref<2x10x24x128xf32, #tpu.memory_space<vmem>>, vector<2x8x24x128xf32>
    %59 = vector.shape_cast %58 : vector<2x8x24x128xf32> to vector<384x128xf32>
    %c6 = arith.constant 6 : index
    %c0_40 = arith.constant 0 : index
    %c0_41 = arith.constant 0 : index
    %60 = vector.load %arg2[%c6, %c0_40, %c0_41] : memref<9x128x128xf32, #tpu.memory_space<vmem>>, vector<1x128x128xf32>
    %61 = vector.shape_cast %60 : vector<1x128x128xf32> to vector<128x128xf32>
    %cst_42 = arith.constant dense<0.000000e+00> : vector<384x128xf32>
    %62 = tpu.matmul %59, %61, %cst_42 {dimension_numbers = #tpu.dot_dimension_numbers<[1], [0], [0], [1], [0, 0, 1, 1], [], []>} : vector<384x128xf32>, vector<128x128xf32>, vector<384x128xf32> -> vector<384x128xf32>
    %cst_43 = arith.constant 0.000000e+00 : f32
    %63 = vector.broadcast %cst_43 : f32 to vector<1x128xf32>
    %64 = vector.extract_strided_slice %62 {offsets = [0, 0], sizes = [383, 128], strides = [1, 1]} : vector<384x128xf32> to vector<383x128xf32>
    %65 = tpu.concatenate %63, %64 in 0 : vector<1x128xf32>, vector<383x128xf32> -> vector<384x128xf32>
    %66 = arith.addf %57, %65 : vector<384x128xf32>
    %c7 = arith.constant 7 : index
    %c0_44 = arith.constant 0 : index
    %c0_45 = arith.constant 0 : index
    %67 = vector.load %arg2[%c7, %c0_44, %c0_45] : memref<9x128x128xf32, #tpu.memory_space<vmem>>, vector<1x128x128xf32>
    %68 = vector.shape_cast %67 : vector<1x128x128xf32> to vector<128x128xf32>
    %cst_46 = arith.constant dense<0.000000e+00> : vector<384x128xf32>
    %69 = tpu.matmul %59, %68, %cst_46 {dimension_numbers = #tpu.dot_dimension_numbers<[1], [0], [0], [1], [0, 0, 1, 1], [], []>} : vector<384x128xf32>, vector<128x128xf32>, vector<384x128xf32> -> vector<384x128xf32>
    %70 = arith.addf %66, %69 : vector<384x128xf32>
    %c8 = arith.constant 8 : index
    %c0_47 = arith.constant 0 : index
    %c0_48 = arith.constant 0 : index
    %71 = vector.load %arg2[%c8, %c0_47, %c0_48] : memref<9x128x128xf32, #tpu.memory_space<vmem>>, vector<1x128x128xf32>
    %72 = vector.shape_cast %71 : vector<1x128x128xf32> to vector<128x128xf32>
    %cst_49 = arith.constant dense<0.000000e+00> : vector<384x128xf32>
    %73 = tpu.matmul %59, %72, %cst_49 {dimension_numbers = #tpu.dot_dimension_numbers<[1], [0], [0], [1], [0, 0, 1, 1], [], []>} : vector<384x128xf32>, vector<128x128xf32>, vector<384x128xf32> -> vector<384x128xf32>
    %cst_50 = arith.constant 0.000000e+00 : f32
    %74 = vector.broadcast %cst_50 : f32 to vector<1x128xf32>
    %75 = vector.extract_strided_slice %73 {offsets = [1, 0], sizes = [383, 128], strides = [1, 1]} : vector<384x128xf32> to vector<383x128xf32>
    %76 = tpu.concatenate %75, %74 in 0 : vector<383x128xf32>, vector<1x128xf32> -> vector<384x128xf32>
    %77 = arith.addf %70, %76 : vector<384x128xf32>
    %78 = vector.shape_cast %77 : vector<384x128xf32> to vector<2x8x24x128xf32>
    %cst_51 = arith.constant 0.000000e+00 : f32
    %79 = vector.shape_cast %12 : vector<1x1x24x128xi1> to vector<1x1x24x128xi1>
    %80 = vector.broadcast %79 : vector<1x1x24x128xi1> to vector<2x8x24x128xi1>
    %81 = vector.broadcast %cst_51 : f32 to vector<2x8x24x128xf32>
    %82 = arith.select %80, %78, %81 : vector<2x8x24x128xi1>, vector<2x8x24x128xf32>
    %c0_52 = arith.constant 0 : index
    %c0_53 = arith.constant 0 : index
    %c0_54 = arith.constant 0 : index
    %c0_55 = arith.constant 0 : index
    %83 = vector.load %arg3[%c0_52, %c0_53, %c0_54, %c0_55] : memref<2x8x24x128xf32, #tpu.memory_space<vmem>>, vector<2x8x24x128xf32>
    tpu.vector_store %arg3[%c0_52, %c0_53, %c0_54, %c0_55], %82 {strides = array<i32>} : memref<2x8x24x128xf32, #tpu.memory_space<vmem>>, vector<2x8x24x128xf32>,
    %84 = vector.shape_cast %82 : vector<2x8x24x128xf32> to vector<384x128xf32>
    %cst_56 = arith.constant dense<0.000000e+00> : vector<128xf32>
    %85 = vector.multi_reduction <add>, %84, %cst_56 [0] : vector<384x128xf32> to vector<128xf32>
    %86 = vector.shape_cast %85 : vector<128xf32> to vector<1x128xf32>
    %87 = arith.mulf %84, %84 : vector<384x128xf32>
    %cst_57 = arith.constant dense<0.000000e+00> : vector<128xf32>
    %88 = vector.multi_reduction <add>, %87, %cst_57 [0] : vector<384x128xf32> to vector<128xf32>
    %89 = vector.shape_cast %88 : vector<128xf32> to vector<1x128xf32>
    %90 = tpu.concatenate %86, %89 in 0 : vector<1x128xf32>, vector<1x128xf32> -> vector<2x128xf32>
    %91 = vector.shape_cast %90 : vector<2x128xf32> to vector<1x2x128xf32>
    %c0_58 = arith.constant 0 : index
    %c0_59 = arith.constant 0 : index
    %c0_60 = arith.constant 0 : index
    %92 = vector.load %arg4[%c0_58, %c0_59, %c0_60] : memref<1x2x128xf32, #tpu.memory_space<vmem>>, vector<1x2x128xf32>
    tpu.vector_store %arg4[%c0_58, %c0_59, %c0_60], %91 {strides = array<i32>} : memref<1x2x128xf32, #tpu.memory_space<vmem>>, vector<1x2x128xf32>,
    return
  }
  func.func @transform_1(%arg0: i32) -> (i32, i32, i32) {
    %c0_i32 = arith.constant 0 : i32
    %c0_i32_0 = arith.constant 0 : i32
    %c0_i32_1 = arith.constant 0 : i32
    %c0_i32_2 = arith.constant 0 : i32
    return %c0_i32, %c0_i32_0, %c0_i32_1 : i32, i32, i32
  }
  func.func @transform_2(%arg0: i32) -> (i32, i32, i32, i32) {
    %c0_i32 = arith.constant 0 : i32
    %c0_i32_0 = arith.constant 0 : i32
    %c0_i32_1 = arith.constant 0 : i32
    %c0_i32_2 = arith.constant 0 : i32
    return %c0_i32, %arg0, %c0_i32_0, %c0_i32_1 : i32, i32, i32, i32
  }
  func.func @transform_3(%arg0: i32) -> (i32, i32, i32) {
    %c0_i32 = arith.constant 0 : i32
    %c0_i32_0 = arith.constant 0 : i32
    %c0_i32_1 = arith.constant 0 : i32
    return %arg0, %c0_i32, %c0_i32_0 : i32, i32, i32
  }
}

module attributes {stable_mosaic.version = 11 : i64} {
  func.func @_bn_relu_kernel(%arg0: i32, %arg1: memref<2x8x24x128xf32, #tpu.memory_space<vmem>>, %arg2: memref<1x1x1x128xf32, #tpu.memory_space<vmem>>, %arg3: memref<1x1x1x128xf32, #tpu.memory_space<vmem>>, %arg4: memref<2x8x24x128xf32, #tpu.memory_space<vmem>>) attributes {dimension_semantics = [#tpu.dimension_semantics<parallel>], iteration_bounds = array<i64: 2>, scalar_prefetch = 0 : i64, scratch_operands = 0 : i64, tpu.core_type = #tpu.core_type<tc>, window_params = [{transform_indices = @transform_0, window_bounds = array<i64: 2, 8, 24, 128>}, {pipeline_mode = #tpu.pipeline_mode<synchronous>, transform_indices = @transform_1, window_bounds = array<i64: 1, 1, 1, 128>}, {pipeline_mode = #tpu.pipeline_mode<synchronous>, transform_indices = @transform_2, window_bounds = array<i64: 1, 1, 1, 128>}, {transform_indices = @transform_3, window_bounds = array<i64: 2, 8, 24, 128>}]} {
    %c0 = arith.constant 0 : index
    %c0_0 = arith.constant 0 : index
    %c0_1 = arith.constant 0 : index
    %c0_2 = arith.constant 0 : index
    %0 = vector.load %arg1[%c0, %c0_0, %c0_1, %c0_2] : memref<2x8x24x128xf32, #tpu.memory_space<vmem>>, vector<2x8x24x128xf32>
    %c0_3 = arith.constant 0 : index
    %c0_4 = arith.constant 0 : index
    %c0_5 = arith.constant 0 : index
    %c0_6 = arith.constant 0 : index
    %1 = vector.load %arg2[%c0_3, %c0_4, %c0_5, %c0_6] : memref<1x1x1x128xf32, #tpu.memory_space<vmem>>, vector<1x1x1x128xf32>
    %2 = vector.broadcast %1 : vector<1x1x1x128xf32> to vector<2x8x24x128xf32>
    %3 = arith.mulf %0, %2 : vector<2x8x24x128xf32>
    %c0_7 = arith.constant 0 : index
    %c0_8 = arith.constant 0 : index
    %c0_9 = arith.constant 0 : index
    %c0_10 = arith.constant 0 : index
    %4 = vector.load %arg3[%c0_7, %c0_8, %c0_9, %c0_10] : memref<1x1x1x128xf32, #tpu.memory_space<vmem>>, vector<1x1x1x128xf32>
    %5 = vector.broadcast %4 : vector<1x1x1x128xf32> to vector<2x8x24x128xf32>
    %6 = arith.addf %3, %5 : vector<2x8x24x128xf32>
    %cst = arith.constant 0.000000e+00 : f32
    %7 = vector.broadcast %cst : f32 to vector<2x8x24x128xf32>
    %8 = arith.maximumf %6, %7 : vector<2x8x24x128xf32>
    %c0_11 = arith.constant 0 : index
    %c0_12 = arith.constant 0 : index
    %c0_13 = arith.constant 0 : index
    %c0_14 = arith.constant 0 : index
    %9 = vector.load %arg4[%c0_11, %c0_12, %c0_13, %c0_14] : memref<2x8x24x128xf32, #tpu.memory_space<vmem>>, vector<2x8x24x128xf32>
    tpu.vector_store %arg4[%c0_11, %c0_12, %c0_13, %c0_14], %8 {strides = array<i32>} : memref<2x8x24x128xf32, #tpu.memory_space<vmem>>, vector<2x8x24x128xf32>,
    return
  }
  func.func @transform_0(%arg0: i32) -> (i32, i32, i32, i32) {
    %c0_i32 = arith.constant 0 : i32
    %c0_i32_0 = arith.constant 0 : i32
    %c0_i32_1 = arith.constant 0 : i32
    %c0_i32_2 = arith.constant 0 : i32
    return %c0_i32, %arg0, %c0_i32_0, %c0_i32_1 : i32, i32, i32, i32
  }
  func.func @transform_1(%arg0: i32) -> (i32, i32, i32, i32) {
    %c0_i32 = arith.constant 0 : i32
    %c0_i32_0 = arith.constant 0 : i32
    %c0_i32_1 = arith.constant 0 : i32
    %c0_i32_2 = arith.constant 0 : i32
    %c0_i32_3 = arith.constant 0 : i32
    return %c0_i32, %c0_i32_0, %c0_i32_1, %c0_i32_2 : i32, i32, i32, i32
  }
  func.func @transform_2(%arg0: i32) -> (i32, i32, i32, i32) {
    %c0_i32 = arith.constant 0 : i32
    %c0_i32_0 = arith.constant 0 : i32
    %c0_i32_1 = arith.constant 0 : i32
    %c0_i32_2 = arith.constant 0 : i32
    %c0_i32_3 = arith.constant 0 : i32
    return %c0_i32, %c0_i32_0, %c0_i32_1, %c0_i32_2 : i32, i32, i32, i32
  }
  func.func @transform_3(%arg0: i32) -> (i32, i32, i32, i32) {
    %c0_i32 = arith.constant 0 : i32
    %c0_i32_0 = arith.constant 0 : i32
    %c0_i32_1 = arith.constant 0 : i32
    %c0_i32_2 = arith.constant 0 : i32
    return %c0_i32, %arg0, %c0_i32_0, %c0_i32_1 : i32, i32, i32, i32
  }
}

module attributes {stable_mosaic.version = 11 : i64} {
  func.func @body(%arg0: i32, %arg1: memref<2x16x24x128xf32, #tpu.memory_space<any>>, %arg2: memref<9x128x128xf32, #tpu.memory_space<vmem>>, %arg3: memref<1x1x1x128xf32, #tpu.memory_space<vmem>>, %arg4: memref<1x1x1x128xf32, #tpu.memory_space<vmem>>, %arg5: memref<2x8x24x128xf32, #tpu.memory_space<vmem>>, %arg6: memref<1x2x128xf32, #tpu.memory_space<vmem>>, %arg7: memref<2x10x24x128xf32, #tpu.memory_space<vmem>>) attributes {dimension_semantics = [#tpu.dimension_semantics<parallel>], iteration_bounds = array<i64: 2>, scalar_prefetch = 0 : i64, scratch_operands = 1 : i64, tpu.core_type = #tpu.core_type<tc>, window_params = [{}, {pipeline_mode = #tpu.pipeline_mode<synchronous>, transform_indices = @transform_1, window_bounds = array<i64: 9, 128, 128>}, {pipeline_mode = #tpu.pipeline_mode<synchronous>, transform_indices = @transform_2, window_bounds = array<i64: 1, 1, 1, 128>}, {pipeline_mode = #tpu.pipeline_mode<synchronous>, transform_indices = @transform_3, window_bounds = array<i64: 1, 1, 1, 128>}, {transform_indices = @transform_4, window_bounds = array<i64: 2, 8, 24, 128>}, {transform_indices = @transform_5, window_bounds = array<i64: 1, 2, 128>}]} {
    %c8_i32 = arith.constant 8 : i32
    %0 = arith.muli %arg0, %c8_i32 : i32
    "tpu.region"() ({
      %107 = tpu.sem_alloc : memref<!tpu.dma_semaphore, #tpu.memory_space<semaphore_mem>>
      %c0_i32_79 = arith.constant 0 : i32
      %c0_i32_80 = arith.constant 0 : i32
      %c0_i32_81 = arith.constant 0 : i32
      %108 = tpu.memref_slice %arg1[%c0_i32_79, %0, %c0_i32_80, %c0_i32_81] : memref<2x16x24x128xf32, #tpu.memory_space<any>> -> memref<2x8x24x128xf32, #tpu.memory_space<any>>
      %c0_i32_82 = arith.constant 0 : i32
      %c1_i32_83 = arith.constant 1 : i32
      %c0_i32_84 = arith.constant 0 : i32
      %c0_i32_85 = arith.constant 0 : i32
      %109 = tpu.memref_slice %arg7[%c0_i32_82, %c1_i32_83, %c0_i32_84, %c0_i32_85] : memref<2x10x24x128xf32, #tpu.memory_space<vmem>> -> memref<2x8x24x128xf32, #tpu.memory_space<vmem>>
      tpu.enqueue_dma source(%108 : memref<2x8x24x128xf32, #tpu.memory_space<any>>) target(%109 : memref<2x8x24x128xf32, #tpu.memory_space<vmem>>) target_semaphore(%107 : memref<!tpu.dma_semaphore, #tpu.memory_space<semaphore_mem>>)
      %c0_i32_86 = arith.constant 0 : i32
      %c0_i32_87 = arith.constant 0 : i32
      %c0_i32_88 = arith.constant 0 : i32
      %110 = tpu.memref_slice %arg1[%c0_i32_86, %0, %c0_i32_87, %c0_i32_88] : memref<2x16x24x128xf32, #tpu.memory_space<any>> -> memref<2x8x24x128xf32, #tpu.memory_space<any>>
      %c0_i32_89 = arith.constant 0 : i32
      %c1_i32_90 = arith.constant 1 : i32
      %c0_i32_91 = arith.constant 0 : i32
      %c0_i32_92 = arith.constant 0 : i32
      %111 = tpu.memref_slice %arg7[%c0_i32_89, %c1_i32_90, %c0_i32_91, %c0_i32_92] : memref<2x10x24x128xf32, #tpu.memory_space<vmem>> -> memref<2x8x24x128xf32, #tpu.memory_space<vmem>>
      tpu.wait_dma2 semaphore(%107 : memref<!tpu.dma_semaphore, #tpu.memory_space<semaphore_mem>>) src(%110 : memref<2x8x24x128xf32, #tpu.memory_space<any>>) dst(%111 : memref<2x8x24x128xf32, #tpu.memory_space<vmem>>)
      tpu.yield
    }) : () -> ()
    %c0_i32 = arith.constant 0 : i32
    %1 = arith.cmpi sgt, %arg0, %c0_i32 : i32
    %2 = arith.extui %1 : i1 to i32
    %c0_i32_0 = arith.constant 0 : i32
    %3 = arith.cmpi ne, %2, %c0_i32_0 : i32
    scf.if %3 {
      %c1_i32_79 = arith.constant 1 : i32
      %107 = arith.subi %0, %c1_i32_79 : i32
      "tpu.region"() ({
        %108 = tpu.sem_alloc : memref<!tpu.dma_semaphore, #tpu.memory_space<semaphore_mem>>
        %c0_i32_80 = arith.constant 0 : i32
        %c0_i32_81 = arith.constant 0 : i32
        %c0_i32_82 = arith.constant 0 : i32
        %109 = tpu.memref_slice %arg1[%c0_i32_80, %107, %c0_i32_81, %c0_i32_82] : memref<2x16x24x128xf32, #tpu.memory_space<any>> -> memref<2x1x24x128xf32, #tpu.memory_space<any>>
        %c0_i32_83 = arith.constant 0 : i32
        %c0_i32_84 = arith.constant 0 : i32
        %c0_i32_85 = arith.constant 0 : i32
        %c0_i32_86 = arith.constant 0 : i32
        %110 = tpu.memref_slice %arg7[%c0_i32_83, %c0_i32_84, %c0_i32_85, %c0_i32_86] : memref<2x10x24x128xf32, #tpu.memory_space<vmem>> -> memref<2x1x24x128xf32, #tpu.memory_space<vmem>>
        tpu.enqueue_dma source(%109 : memref<2x1x24x128xf32, #tpu.memory_space<any>>) target(%110 : memref<2x1x24x128xf32, #tpu.memory_space<vmem>>) target_semaphore(%108 : memref<!tpu.dma_semaphore, #tpu.memory_space<semaphore_mem>>)
        %c0_i32_87 = arith.constant 0 : i32
        %c0_i32_88 = arith.constant 0 : i32
        %c0_i32_89 = arith.constant 0 : i32
        %111 = tpu.memref_slice %arg1[%c0_i32_87, %107, %c0_i32_88, %c0_i32_89] : memref<2x16x24x128xf32, #tpu.memory_space<any>> -> memref<2x1x24x128xf32, #tpu.memory_space<any>>
        %c0_i32_90 = arith.constant 0 : i32
        %c0_i32_91 = arith.constant 0 : i32
        %c0_i32_92 = arith.constant 0 : i32
        %c0_i32_93 = arith.constant 0 : i32
        %112 = tpu.memref_slice %arg7[%c0_i32_90, %c0_i32_91, %c0_i32_92, %c0_i32_93] : memref<2x10x24x128xf32, #tpu.memory_space<vmem>> -> memref<2x1x24x128xf32, #tpu.memory_space<vmem>>
        tpu.wait_dma2 semaphore(%108 : memref<!tpu.dma_semaphore, #tpu.memory_space<semaphore_mem>>) src(%111 : memref<2x1x24x128xf32, #tpu.memory_space<any>>) dst(%112 : memref<2x1x24x128xf32, #tpu.memory_space<vmem>>)
        tpu.yield
      }) : () -> ()
    } else {
    }
    %c1_i32 = arith.constant 1 : i32
    %4 = arith.cmpi slt, %arg0, %c1_i32 : i32
    %5 = arith.extui %4 : i1 to i32
    %c0_i32_1 = arith.constant 0 : i32
    %6 = arith.cmpi ne, %5, %c0_i32_1 : i32
    scf.if %6 {
      %c8_i32_79 = arith.constant 8 : i32
      %107 = arith.addi %0, %c8_i32_79 : i32
      "tpu.region"() ({
        %108 = tpu.sem_alloc : memref<!tpu.dma_semaphore, #tpu.memory_space<semaphore_mem>>
        %c0_i32_80 = arith.constant 0 : i32
        %c0_i32_81 = arith.constant 0 : i32
        %c0_i32_82 = arith.constant 0 : i32
        %109 = tpu.memref_slice %arg1[%c0_i32_80, %107, %c0_i32_81, %c0_i32_82] : memref<2x16x24x128xf32, #tpu.memory_space<any>> -> memref<2x1x24x128xf32, #tpu.memory_space<any>>
        %c0_i32_83 = arith.constant 0 : i32
        %c9_i32 = arith.constant 9 : i32
        %c0_i32_84 = arith.constant 0 : i32
        %c0_i32_85 = arith.constant 0 : i32
        %110 = tpu.memref_slice %arg7[%c0_i32_83, %c9_i32, %c0_i32_84, %c0_i32_85] : memref<2x10x24x128xf32, #tpu.memory_space<vmem>> -> memref<2x1x24x128xf32, #tpu.memory_space<vmem>>
        tpu.enqueue_dma source(%109 : memref<2x1x24x128xf32, #tpu.memory_space<any>>) target(%110 : memref<2x1x24x128xf32, #tpu.memory_space<vmem>>) target_semaphore(%108 : memref<!tpu.dma_semaphore, #tpu.memory_space<semaphore_mem>>)
        %c0_i32_86 = arith.constant 0 : i32
        %c0_i32_87 = arith.constant 0 : i32
        %c0_i32_88 = arith.constant 0 : i32
        %111 = tpu.memref_slice %arg1[%c0_i32_86, %107, %c0_i32_87, %c0_i32_88] : memref<2x16x24x128xf32, #tpu.memory_space<any>> -> memref<2x1x24x128xf32, #tpu.memory_space<any>>
        %c0_i32_89 = arith.constant 0 : i32
        %c9_i32_90 = arith.constant 9 : i32
        %c0_i32_91 = arith.constant 0 : i32
        %c0_i32_92 = arith.constant 0 : i32
        %112 = tpu.memref_slice %arg7[%c0_i32_89, %c9_i32_90, %c0_i32_91, %c0_i32_92] : memref<2x10x24x128xf32, #tpu.memory_space<vmem>> -> memref<2x1x24x128xf32, #tpu.memory_space<vmem>>
        tpu.wait_dma2 semaphore(%108 : memref<!tpu.dma_semaphore, #tpu.memory_space<semaphore_mem>>) src(%111 : memref<2x1x24x128xf32, #tpu.memory_space<any>>) dst(%112 : memref<2x1x24x128xf32, #tpu.memory_space<vmem>>)
        tpu.yield
      }) : () -> ()
    } else {
    }
    %7 = tpu.iota {dimensions = array<i32: 2>} : vector<1x1x24x128xi32>
    %c1_i32_2 = arith.constant 1 : i32
    %8 = vector.broadcast %c1_i32_2 : i32 to vector<1x1x24x128xi32>
    %9 = arith.cmpi sge, %7, %8 : vector<1x1x24x128xi32>
    %c16_i32 = arith.constant 16 : i32
    %10 = vector.broadcast %c16_i32 : i32 to vector<1x1x24x128xi32>
    %11 = arith.cmpi sle, %7, %10 : vector<1x1x24x128xi32>
    %12 = arith.andi %9, %11 : vector<1x1x24x128xi1>
    %c0 = arith.constant 0 : index
    %c0_3 = arith.constant 0 : index
    %c0_4 = arith.constant 0 : index
    %c0_5 = arith.constant 0 : index
    %13 = vector.load %arg7[%c0, %c0_3, %c0_4, %c0_5] : memref<2x10x24x128xf32, #tpu.memory_space<vmem>>, vector<2x10x24x128xf32>
    %c0_6 = arith.constant 0 : index
    %c0_7 = arith.constant 0 : index
    %c0_8 = arith.constant 0 : index
    %c0_9 = arith.constant 0 : index
    %14 = vector.load %arg3[%c0_6, %c0_7, %c0_8, %c0_9] : memref<1x1x1x128xf32, #tpu.memory_space<vmem>>, vector<1x1x1x128xf32>
    %15 = vector.broadcast %14 : vector<1x1x1x128xf32> to vector<2x10x24x128xf32>
    %16 = arith.mulf %13, %15 : vector<2x10x24x128xf32>
    %c0_10 = arith.constant 0 : index
    %c0_11 = arith.constant 0 : index
    %c0_12 = arith.constant 0 : index
    %c0_13 = arith.constant 0 : index
    %17 = vector.load %arg4[%c0_10, %c0_11, %c0_12, %c0_13] : memref<1x1x1x128xf32, #tpu.memory_space<vmem>>, vector<1x1x1x128xf32>
    %18 = vector.broadcast %17 : vector<1x1x1x128xf32> to vector<2x10x24x128xf32>
    %19 = arith.addf %16, %18 : vector<2x10x24x128xf32>
    %cst = arith.constant 0.000000e+00 : f32
    %20 = vector.broadcast %cst : f32 to vector<2x10x24x128xf32>
    %21 = arith.maximumf %19, %20 : vector<2x10x24x128xf32>
    %cst_14 = arith.constant 0.000000e+00 : f32
    %22 = vector.shape_cast %12 : vector<1x1x24x128xi1> to vector<1x1x24x128xi1>
    %23 = vector.broadcast %22 : vector<1x1x24x128xi1> to vector<2x10x24x128xi1>
    %24 = vector.broadcast %cst_14 : f32 to vector<2x10x24x128xf32>
    %25 = arith.select %23, %21, %24 : vector<2x10x24x128xi1>, vector<2x10x24x128xf32>
    %c0_15 = arith.constant 0 : index
    %c0_16 = arith.constant 0 : index
    %c0_17 = arith.constant 0 : index
    %c0_18 = arith.constant 0 : index
    %26 = vector.load %arg7[%c0_15, %c0_16, %c0_17, %c0_18] : memref<2x10x24x128xf32, #tpu.memory_space<vmem>>, vector<2x10x24x128xf32>
    tpu.vector_store %arg7[%c0_15, %c0_16, %c0_17, %c0_18], %25 {strides = array<i32>} : memref<2x10x24x128xf32, #tpu.memory_space<vmem>>, vector<2x10x24x128xf32>,
    %c0_i32_19 = arith.constant 0 : i32
    %27 = arith.cmpi eq, %arg0, %c0_i32_19 : i32
    %28 = arith.extui %27 : i1 to i32
    %c0_i32_20 = arith.constant 0 : i32
    %29 = arith.cmpi ne, %28, %c0_i32_20 : i32
    scf.if %29 {
      %cst_79 = arith.constant 0.000000e+00 : f32
      %107 = vector.broadcast %cst_79 : f32 to vector<2x1x24x128xf32>
      %c0_80 = arith.constant 0 : index
      %c0_81 = arith.constant 0 : index
      %c0_82 = arith.constant 0 : index
      %c0_83 = arith.constant 0 : index
      %108 = vector.load %arg7[%c0_80, %c0_81, %c0_82, %c0_83] : memref<2x10x24x128xf32, #tpu.memory_space<vmem>>, vector<2x1x24x128xf32>
      tpu.vector_store %arg7[%c0_80, %c0_81, %c0_82, %c0_83], %107 {strides = array<i32>} : memref<2x10x24x128xf32, #tpu.memory_space<vmem>>, vector<2x1x24x128xf32>,
    } else {
    }
    %c1_i32_21 = arith.constant 1 : i32
    %30 = arith.cmpi eq, %arg0, %c1_i32_21 : i32
    %31 = arith.extui %30 : i1 to i32
    %c0_i32_22 = arith.constant 0 : i32
    %32 = arith.cmpi ne, %31, %c0_i32_22 : i32
    scf.if %32 {
      %cst_79 = arith.constant 0.000000e+00 : f32
      %107 = vector.broadcast %cst_79 : f32 to vector<2x1x24x128xf32>
      %c0_80 = arith.constant 0 : index
      %c9 = arith.constant 9 : index
      %c0_81 = arith.constant 0 : index
      %c0_82 = arith.constant 0 : index
      %108 = vector.load %arg7[%c0_80, %c9, %c0_81, %c0_82] : memref<2x10x24x128xf32, #tpu.memory_space<vmem>>, vector<2x1x24x128xf32>
      tpu.vector_store %arg7[%c0_80, %c9, %c0_81, %c0_82], %107 {strides = array<i32>} : memref<2x10x24x128xf32, #tpu.memory_space<vmem>>, vector<2x1x24x128xf32>,
    } else {
    }
    %c0_23 = arith.constant 0 : index
    %c0_24 = arith.constant 0 : index
    %c0_25 = arith.constant 0 : index
    %c0_26 = arith.constant 0 : index
    %33 = vector.load %arg7[%c0_23, %c0_24, %c0_25, %c0_26] : memref<2x10x24x128xf32, #tpu.memory_space<vmem>>, vector<2x8x24x128xf32>
    %34 = vector.shape_cast %33 : vector<2x8x24x128xf32> to vector<384x128xf32>
    %c0_27 = arith.constant 0 : index
    %c0_28 = arith.constant 0 : index
    %c0_29 = arith.constant 0 : index
    %35 = vector.load %arg2[%c0_27, %c0_28, %c0_29] : memref<9x128x128xf32, #tpu.memory_space<vmem>>, vector<1x128x128xf32>
    %36 = vector.shape_cast %35 : vector<1x128x128xf32> to vector<128x128xf32>
    %cst_30 = arith.constant dense<0.000000e+00> : vector<384x128xf32>
    %37 = tpu.matmul %34, %36, %cst_30 {dimension_numbers = #tpu.dot_dimension_numbers<[1], [0], [0], [1], [0, 0, 1, 1], [], []>} : vector<384x128xf32>, vector<128x128xf32>, vector<384x128xf32> -> vector<384x128xf32>
    %cst_31 = arith.constant 0.000000e+00 : f32
    %38 = vector.broadcast %cst_31 : f32 to vector<1x128xf32>
    %39 = vector.extract_strided_slice %37 {offsets = [0, 0], sizes = [383, 128], strides = [1, 1]} : vector<384x128xf32> to vector<383x128xf32>
    %40 = tpu.concatenate %38, %39 in 0 : vector<1x128xf32>, vector<383x128xf32> -> vector<384x128xf32>
    %c1 = arith.constant 1 : index
    %c0_32 = arith.constant 0 : index
    %c0_33 = arith.constant 0 : index
    %41 = vector.load %arg2[%c1, %c0_32, %c0_33] : memref<9x128x128xf32, #tpu.memory_space<vmem>>, vector<1x128x128xf32>
    %42 = vector.shape_cast %41 : vector<1x128x128xf32> to vector<128x128xf32>
    %cst_34 = arith.constant dense<0.000000e+00> : vector<384x128xf32>
    %43 = tpu.matmul %34, %42, %cst_34 {dimension_numbers = #tpu.dot_dimension_numbers<[1], [0], [0], [1], [0, 0, 1, 1], [], []>} : vector<384x128xf32>, vector<128x128xf32>, vector<384x128xf32> -> vector<384x128xf32>
    %44 = arith.addf %40, %43 : vector<384x128xf32>
    %c2 = arith.constant 2 : index
    %c0_35 = arith.constant 0 : index
    %c0_36 = arith.constant 0 : index
    %45 = vector.load %arg2[%c2, %c0_35, %c0_36] : memref<9x128x128xf32, #tpu.memory_space<vmem>>, vector<1x128x128xf32>
    %46 = vector.shape_cast %45 : vector<1x128x128xf32> to vector<128x128xf32>
    %cst_37 = arith.constant dense<0.000000e+00> : vector<384x128xf32>
    %47 = tpu.matmul %34, %46, %cst_37 {dimension_numbers = #tpu.dot_dimension_numbers<[1], [0], [0], [1], [0, 0, 1, 1], [], []>} : vector<384x128xf32>, vector<128x128xf32>, vector<384x128xf32> -> vector<384x128xf32>
    %cst_38 = arith.constant 0.000000e+00 : f32
    %48 = vector.broadcast %cst_38 : f32 to vector<1x128xf32>
    %49 = vector.extract_strided_slice %47 {offsets = [1, 0], sizes = [383, 128], strides = [1, 1]} : vector<384x128xf32> to vector<383x128xf32>
    %50 = tpu.concatenate %49, %48 in 0 : vector<383x128xf32>, vector<1x128xf32> -> vector<384x128xf32>
    %51 = arith.addf %44, %50 : vector<384x128xf32>
    %c0_39 = arith.constant 0 : index
    %c1_40 = arith.constant 1 : index
    %c0_41 = arith.constant 0 : index
    %c0_42 = arith.constant 0 : index
    %52 = vector.load %arg7[%c0_39, %c1_40, %c0_41, %c0_42] : memref<2x10x24x128xf32, #tpu.memory_space<vmem>>, vector<2x8x24x128xf32>
    %53 = vector.shape_cast %52 : vector<2x8x24x128xf32> to vector<384x128xf32>
    %c3 = arith.constant 3 : index
    %c0_43 = arith.constant 0 : index
    %c0_44 = arith.constant 0 : index
    %54 = vector.load %arg2[%c3, %c0_43, %c0_44] : memref<9x128x128xf32, #tpu.memory_space<vmem>>, vector<1x128x128xf32>
    %55 = vector.shape_cast %54 : vector<1x128x128xf32> to vector<128x128xf32>
    %cst_45 = arith.constant dense<0.000000e+00> : vector<384x128xf32>
    %56 = tpu.matmul %53, %55, %cst_45 {dimension_numbers = #tpu.dot_dimension_numbers<[1], [0], [0], [1], [0, 0, 1, 1], [], []>} : vector<384x128xf32>, vector<128x128xf32>, vector<384x128xf32> -> vector<384x128xf32>
    %cst_46 = arith.constant 0.000000e+00 : f32
    %57 = vector.broadcast %cst_46 : f32 to vector<1x128xf32>
    %58 = vector.extract_strided_slice %56 {offsets = [0, 0], sizes = [383, 128], strides = [1, 1]} : vector<384x128xf32> to vector<383x128xf32>
    %59 = tpu.concatenate %57, %58 in 0 : vector<1x128xf32>, vector<383x128xf32> -> vector<384x128xf32>
    %60 = arith.addf %51, %59 : vector<384x128xf32>
    %c4 = arith.constant 4 : index
    %c0_47 = arith.constant 0 : index
    %c0_48 = arith.constant 0 : index
    %61 = vector.load %arg2[%c4, %c0_47, %c0_48] : memref<9x128x128xf32, #tpu.memory_space<vmem>>, vector<1x128x128xf32>
    %62 = vector.shape_cast %61 : vector<1x128x128xf32> to vector<128x128xf32>
    %cst_49 = arith.constant dense<0.000000e+00> : vector<384x128xf32>
    %63 = tpu.matmul %53, %62, %cst_49 {dimension_numbers = #tpu.dot_dimension_numbers<[1], [0], [0], [1], [0, 0, 1, 1], [], []>} : vector<384x128xf32>, vector<128x128xf32>, vector<384x128xf32> -> vector<384x128xf32>
    %64 = arith.addf %60, %63 : vector<384x128xf32>
    %c5 = arith.constant 5 : index
    %c0_50 = arith.constant 0 : index
    %c0_51 = arith.constant 0 : index
    %65 = vector.load %arg2[%c5, %c0_50, %c0_51] : memref<9x128x128xf32, #tpu.memory_space<vmem>>, vector<1x128x128xf32>
    %66 = vector.shape_cast %65 : vector<1x128x128xf32> to vector<128x128xf32>
    %cst_52 = arith.constant dense<0.000000e+00> : vector<384x128xf32>
    %67 = tpu.matmul %53, %66, %cst_52 {dimension_numbers = #tpu.dot_dimension_numbers<[1], [0], [0], [1], [0, 0, 1, 1], [], []>} : vector<384x128xf32>, vector<128x128xf32>, vector<384x128xf32> -> vector<384x128xf32>
    %cst_53 = arith.constant 0.000000e+00 : f32
    %68 = vector.broadcast %cst_53 : f32 to vector<1x128xf32>
    %69 = vector.extract_strided_slice %67 {offsets = [1, 0], sizes = [383, 128], strides = [1, 1]} : vector<384x128xf32> to vector<383x128xf32>
    %70 = tpu.concatenate %69, %68 in 0 : vector<383x128xf32>, vector<1x128xf32> -> vector<384x128xf32>
    %71 = arith.addf %64, %70 : vector<384x128xf32>
    %c0_54 = arith.constant 0 : index
    %c2_55 = arith.constant 2 : index
    %c0_56 = arith.constant 0 : index
    %c0_57 = arith.constant 0 : index
    %72 = vector.load %arg7[%c0_54, %c2_55, %c0_56, %c0_57] : memref<2x10x24x128xf32, #tpu.memory_space<vmem>>, vector<2x8x24x128xf32>
    %73 = vector.shape_cast %72 : vector<2x8x24x128xf32> to vector<384x128xf32>
    %c6 = arith.constant 6 : index
    %c0_58 = arith.constant 0 : index
    %c0_59 = arith.constant 0 : index
    %74 = vector.load %arg2[%c6, %c0_58, %c0_59] : memref<9x128x128xf32, #tpu.memory_space<vmem>>, vector<1x128x128xf32>
    %75 = vector.shape_cast %74 : vector<1x128x128xf32> to vector<128x128xf32>
    %cst_60 = arith.constant dense<0.000000e+00> : vector<384x128xf32>
    %76 = tpu.matmul %73, %75, %cst_60 {dimension_numbers = #tpu.dot_dimension_numbers<[1], [0], [0], [1], [0, 0, 1, 1], [], []>} : vector<384x128xf32>, vector<128x128xf32>, vector<384x128xf32> -> vector<384x128xf32>
    %cst_61 = arith.constant 0.000000e+00 : f32
    %77 = vector.broadcast %cst_61 : f32 to vector<1x128xf32>
    %78 = vector.extract_strided_slice %76 {offsets = [0, 0], sizes = [383, 128], strides = [1, 1]} : vector<384x128xf32> to vector<383x128xf32>
    %79 = tpu.concatenate %77, %78 in 0 : vector<1x128xf32>, vector<383x128xf32> -> vector<384x128xf32>
    %80 = arith.addf %71, %79 : vector<384x128xf32>
    %c7 = arith.constant 7 : index
    %c0_62 = arith.constant 0 : index
    %c0_63 = arith.constant 0 : index
    %81 = vector.load %arg2[%c7, %c0_62, %c0_63] : memref<9x128x128xf32, #tpu.memory_space<vmem>>, vector<1x128x128xf32>
    %82 = vector.shape_cast %81 : vector<1x128x128xf32> to vector<128x128xf32>
    %cst_64 = arith.constant dense<0.000000e+00> : vector<384x128xf32>
    %83 = tpu.matmul %73, %82, %cst_64 {dimension_numbers = #tpu.dot_dimension_numbers<[1], [0], [0], [1], [0, 0, 1, 1], [], []>} : vector<384x128xf32>, vector<128x128xf32>, vector<384x128xf32> -> vector<384x128xf32>
    %84 = arith.addf %80, %83 : vector<384x128xf32>
    %c8 = arith.constant 8 : index
    %c0_65 = arith.constant 0 : index
    %c0_66 = arith.constant 0 : index
    %85 = vector.load %arg2[%c8, %c0_65, %c0_66] : memref<9x128x128xf32, #tpu.memory_space<vmem>>, vector<1x128x128xf32>
    %86 = vector.shape_cast %85 : vector<1x128x128xf32> to vector<128x128xf32>
    %cst_67 = arith.constant dense<0.000000e+00> : vector<384x128xf32>
    %87 = tpu.matmul %73, %86, %cst_67 {dimension_numbers = #tpu.dot_dimension_numbers<[1], [0], [0], [1], [0, 0, 1, 1], [], []>} : vector<384x128xf32>, vector<128x128xf32>, vector<384x128xf32> -> vector<384x128xf32>
    %cst_68 = arith.constant 0.000000e+00 : f32
    %88 = vector.broadcast %cst_68 : f32 to vector<1x128xf32>
    %89 = vector.extract_strided_slice %87 {offsets = [1, 0], sizes = [383, 128], strides = [1, 1]} : vector<384x128xf32> to vector<383x128xf32>
    %90 = tpu.concatenate %89, %88 in 0 : vector<383x128xf32>, vector<1x128xf32> -> vector<384x128xf32>
    %91 = arith.addf %84, %90 : vector<384x128xf32>
    %92 = vector.shape_cast %91 : vector<384x128xf32> to vector<2x8x24x128xf32>
    %cst_69 = arith.constant 0.000000e+00 : f32
    %93 = vector.shape_cast %12 : vector<1x1x24x128xi1> to vector<1x1x24x128xi1>
    %94 = vector.broadcast %93 : vector<1x1x24x128xi1> to vector<2x8x24x128xi1>
    %95 = vector.broadcast %cst_69 : f32 to vector<2x8x24x128xf32>
    %96 = arith.select %94, %92, %95 : vector<2x8x24x128xi1>, vector<2x8x24x128xf32>
    %c0_70 = arith.constant 0 : index
    %c0_71 = arith.constant 0 : index
    %c0_72 = arith.constant 0 : index
    %c0_73 = arith.constant 0 : index
    %97 = vector.load %arg5[%c0_70, %c0_71, %c0_72, %c0_73] : memref<2x8x24x128xf32, #tpu.memory_space<vmem>>, vector<2x8x24x128xf32>
    tpu.vector_store %arg5[%c0_70, %c0_71, %c0_72, %c0_73], %96 {strides = array<i32>} : memref<2x8x24x128xf32, #tpu.memory_space<vmem>>, vector<2x8x24x128xf32>,
    %98 = vector.shape_cast %96 : vector<2x8x24x128xf32> to vector<384x128xf32>
    %cst_74 = arith.constant dense<0.000000e+00> : vector<128xf32>
    %99 = vector.multi_reduction <add>, %98, %cst_74 [0] : vector<384x128xf32> to vector<128xf32>
    %100 = vector.shape_cast %99 : vector<128xf32> to vector<1x128xf32>
    %101 = arith.mulf %98, %98 : vector<384x128xf32>
    %cst_75 = arith.constant dense<0.000000e+00> : vector<128xf32>
    %102 = vector.multi_reduction <add>, %101, %cst_75 [0] : vector<384x128xf32> to vector<128xf32>
    %103 = vector.shape_cast %102 : vector<128xf32> to vector<1x128xf32>
    %104 = tpu.concatenate %100, %103 in 0 : vector<1x128xf32>, vector<1x128xf32> -> vector<2x128xf32>
    %105 = vector.shape_cast %104 : vector<2x128xf32> to vector<1x2x128xf32>
    %c0_76 = arith.constant 0 : index
    %c0_77 = arith.constant 0 : index
    %c0_78 = arith.constant 0 : index
    %106 = vector.load %arg6[%c0_76, %c0_77, %c0_78] : memref<1x2x128xf32, #tpu.memory_space<vmem>>, vector<1x2x128xf32>
    tpu.vector_store %arg6[%c0_76, %c0_77, %c0_78], %105 {strides = array<i32>} : memref<1x2x128xf32, #tpu.memory_space<vmem>>, vector<1x2x128xf32>,
    return
  }
  func.func @transform_1(%arg0: i32) -> (i32, i32, i32) {
    %c0_i32 = arith.constant 0 : i32
    %c0_i32_0 = arith.constant 0 : i32
    %c0_i32_1 = arith.constant 0 : i32
    %c0_i32_2 = arith.constant 0 : i32
    return %c0_i32, %c0_i32_0, %c0_i32_1 : i32, i32, i32
  }
  func.func @transform_2(%arg0: i32) -> (i32, i32, i32, i32) {
    %c0_i32 = arith.constant 0 : i32
    %c0_i32_0 = arith.constant 0 : i32
    %c0_i32_1 = arith.constant 0 : i32
    %c0_i32_2 = arith.constant 0 : i32
    %c0_i32_3 = arith.constant 0 : i32
    return %c0_i32, %c0_i32_0, %c0_i32_1, %c0_i32_2 : i32, i32, i32, i32
  }
  func.func @transform_3(%arg0: i32) -> (i32, i32, i32, i32) {
    %c0_i32 = arith.constant 0 : i32
    %c0_i32_0 = arith.constant 0 : i32
    %c0_i32_1 = arith.constant 0 : i32
    %c0_i32_2 = arith.constant 0 : i32
    %c0_i32_3 = arith.constant 0 : i32
    return %c0_i32, %c0_i32_0, %c0_i32_1, %c0_i32_2 : i32, i32, i32, i32
  }
  func.func @transform_4(%arg0: i32) -> (i32, i32, i32, i32) {
    %c0_i32 = arith.constant 0 : i32
    %c0_i32_0 = arith.constant 0 : i32
    %c0_i32_1 = arith.constant 0 : i32
    %c0_i32_2 = arith.constant 0 : i32
    return %c0_i32, %arg0, %c0_i32_0, %c0_i32_1 : i32, i32, i32, i32
  }
  func.func @transform_5(%arg0: i32) -> (i32, i32, i32) {
    %c0_i32 = arith.constant 0 : i32
    %c0_i32_0 = arith.constant 0 : i32
    %c0_i32_1 = arith.constant 0 : i32
    return %arg0, %c0_i32, %c0_i32_0 : i32, i32, i32
  }
}

</mosaic_0001>

<bundles_post_ra>
// kernel: double_conv.5
= control target key start
LH: loop header
LB: loop body
LE: loop exit
PB: predicated region body
PF: predicated region fallthrough
CT: control target
= control target key end

     0   :  { %s1019_s12 = smov 0   ;;  %s1021_s13 = smov 0   ;;  %s1487_s0 = inlined_call_operand.vmem [shape: f32[2,16,24,128], index: 0, kind: input, shape index: {}]   ;;  %s1488_s1 = inlined_call_operand.vmem [shape: f32[1,1,1,128], index: 1, kind: input, shape index: {}]   ;;  %s1489_s2 = inlined_call_operand.vmem [shape: f32[1,1,1,128], index: 2, kind: input, shape index: {}]   ;;  %s1490_s3 = inlined_call_operand.vmem [shape: f32[2,16,24,128], index: 3, kind: output, shape index: {}]  }
   0x1   :  { %s1023_s14 = smov 0  }
   0x2 LB: > { %s932_s15 = sadd.s32 4294967295, %s997_s14   ;;  %s1036_s16 = sadd.s32 1, %s997_s14   ;;  %s997_s14 = sphi %s1023_s14, %s1494_s14   ;;  %s993_s13 = sphi %s1021_s13, %s1493_s13   ;;  %s989_s12 = sphi %s1019_s12, %s1492_s12  }
   0x3   : > { %s17_s17 = ssub.s32 %s997_s14, %s1036_s16  ;;  %s20_s18 = sadd.s32 1, %s993_s13 }
   0x4   : > { %p18_p0 = scmp.eq.s32.totalorder %s17_s17, 0  ;;  %p27_p1 = scmp.ne.s32.totalorder %s993_s13, %s989_s12 }
   0x5   : > { %p28_p2 = scmp.eq.s32.totalorder %s997_s14, 0  ;;  %p99_p3 = scmp.eq.s32.totalorder %s932_s15, 1 }
   0x6   : > { %s1047_s19 = scalar_select %p18_p0, %s993_s13, %s20_s18  }
   0x7   : > { %p29_p4 = por %p28_p2, %p27_p1  ;;  %p1049_p5 = por %p99_p3, %p27_p1 }
   0x8   : > { %p935_p6 = scmp.ge.s32.totalorder %s997_s14, 2 }
   0xa   : > { %127 = sbr.rel (%p935_p6) target bundleno = 46 (0x2e), region = 24 }
  0x11   : > { %130 = sbr.rel (!%p29_p4) target bundleno = 46 (0x2e), region = 28  ;;  %s132_s21 = sand.u32 (%p29_p4), 1, %s993_s13  }
  0x12   : > { %s948_s22 = smul.u32 (%p29_p4), 192, %s997_s14 }
  0x13   : > { %s947_s23 = smul.u32 (%p29_p4), 384, %s132_s21 }
  0x14   : > { %s1059_s26 = scalar_lea.vmem (%p29_p4), %s1487_s0, %s948_s22 }
  0x15   : > { %v260_v0 = vld [vmem:[%s1059_s26] sm:$0xff] (%p29_p4)  ;;  %v262_v1 = vld [vmem:[%s1059_s26 + $0x8] sm:$0xff] (%p29_p4)  ;;  %v264_v2 = vld [vmem:[%s1059_s26 + $0x10] sm:$0xff] (%p29_p4)  ;;  %s1064_s27 = scalar_lea.vmem (%p29_p4), [#allocation2], %s947_s23 }
  0x16   : > { %261 = vst [vmem:[%s1064_s27] sm:$0xff] (%p29_p4), %v260_v0  ;;  %263 = vst [vmem:[%s1064_s27 + $0x8] sm:$0xff] (%p29_p4), %v262_v1  ;;  %v266_v3 = vld [vmem:[%s1059_s26 + $0x18] sm:$0xff] (%p29_p4)  ;;  %v268_v4 = vld [vmem:[%s1059_s26 + $0x20] sm:$0xff] (%p29_p4) }
  0x17   : > { %265 = vst [vmem:[%s1064_s27 + $0x10] sm:$0xff] (%p29_p4), %v264_v2  ;;  %v270_v5 = vld [vmem:[%s1059_s26 + $0x28] sm:$0xff] (%p29_p4)  ;;  %267 = vst [vmem:[%s1064_s27 + $0x18] sm:$0xff] (%p29_p4), %v266_v3  ;;  %v272_v6 = vld [vmem:[%s1059_s26 + $0x30] sm:$0xff] (%p29_p4) }
  0x18   : > { %269 = vst [vmem:[%s1064_s27 + $0x20] sm:$0xff] %v268_v4  ;;  %271 = vst [vmem:[%s1064_s27 + $0x28] sm:$0xff] %v270_v5  ;;  %v274_v7 = vld [vmem:[%s1059_s26 + $0x38] sm:$0xff]  ;;  %v276_v8 = vld [vmem:[%s1059_s26 + $0x40] sm:$0xff] }
  0x19   : > { %273 = vst [vmem:[%s1064_s27 + $0x30] sm:$0xff] %v272_v6  ;;  %275 = vst [vmem:[%s1064_s27 + $0x38] sm:$0xff] %v274_v7  ;;  %v278_v9 = vld [vmem:[%s1059_s26 + $0x48] sm:$0xff]  ;;  %v280_v10 = vld [vmem:[%s1059_s26 + $0x50] sm:$0xff] }
  0x1a   : > { %277 = vst [vmem:[%s1064_s27 + $0x40] sm:$0xff] %v276_v8  ;;  %v282_v11 = vld [vmem:[%s1059_s26 + $0x58] sm:$0xff]  ;;  %279 = vst [vmem:[%s1064_s27 + $0x48] sm:$0xff] %v278_v9  ;;  %v284_v12 = vld [vmem:[%s1059_s26 + $0x60] sm:$0xff] }
  0x1b   : > { %281 = vst [vmem:[%s1064_s27 + $0x50] sm:$0xff] %v280_v10  ;;  %283 = vst [vmem:[%s1064_s27 + $0x58] sm:$0xff] %v282_v11  ;;  %v286_v13 = vld [vmem:[%s1059_s26 + $0x68] sm:$0xff]  ;;  %v288_v14 = vld [vmem:[%s1059_s26 + $0x70] sm:$0xff] }
  0x1c   : > { %285 = vst [vmem:[%s1064_s27 + $0x60] sm:$0xff] %v284_v12  ;;  %287 = vst [vmem:[%s1064_s27 + $0x68] sm:$0xff] %v286_v13  ;;  %v290_v15 = vld [vmem:[%s1059_s26 + $0x78] sm:$0xff]  ;;  %v292_v16 = vld [vmem:[%s1059_s26 + $0x80] sm:$0xff] }
  0x1d   : > { %289 = vst [vmem:[%s1064_s27 + $0x70] sm:$0xff] %v288_v14  ;;  %v294_v17 = vld [vmem:[%s1059_s26 + $0x88] sm:$0xff]  ;;  %291 = vst [vmem:[%s1064_s27 + $0x78] sm:$0xff] %v290_v15  ;;  %v296_v18 = vld [vmem:[%s1059_s26 + $0x90] sm:$0xff] }
  0x1e   : > { %293 = vst [vmem:[%s1064_s27 + $0x80] sm:$0xff] %v292_v16  ;;  %295 = vst [vmem:[%s1064_s27 + $0x88] sm:$0xff] %v294_v17  ;;  %v298_v19 = vld [vmem:[%s1059_s26 + $0x98] sm:$0xff]  ;;  %v300_v20 = vld [vmem:[%s1059_s26 + $0xa0] sm:$0xff] }
  0x1f   : > { %297 = vst [vmem:[%s1064_s27 + $0x90] sm:$0xff] %v296_v18  ;;  %299 = vst [vmem:[%s1064_s27 + $0x98] sm:$0xff] %v298_v19  ;;  %v302_v21 = vld [vmem:[%s1059_s26 + $0xa8] sm:$0xff]  ;;  %v304_v22 = vld [vmem:[%s1059_s26 + $0xb0] sm:$0xff] }
  0x20   : > { %301 = vst [vmem:[%s1064_s27 + $0xa0] sm:$0xff] %v300_v20  ;;  %v306_v23 = vld [vmem:[%s1059_s26 + $0xb8] sm:$0xff]  ;;  %303 = vst [vmem:[%s1064_s27 + $0xa8] sm:$0xff] %v302_v21  ;;  %v308_v24 = vld [vmem:[%s1059_s26 + $0x180] sm:$0xff] }
  0x21   : > { %305 = vst [vmem:[%s1064_s27 + $0xb0] sm:$0xff] %v304_v22  ;;  %307 = vst [vmem:[%s1064_s27 + $0xb8] sm:$0xff] %v306_v23  ;;  %v310_v25 = vld [vmem:[%s1059_s26 + $0x188] sm:$0xff]  ;;  %v312_v26 = vld [vmem:[%s1059_s26 + $0x190] sm:$0xff] }
  0x22   : > { %309 = vst [vmem:[%s1064_s27 + $0xc0] sm:$0xff] %v308_v24  ;;  %311 = vst [vmem:[%s1064_s27 + $0xc8] sm:$0xff] %v310_v25  ;;  %v314_v27 = vld [vmem:[%s1059_s26 + $0x198] sm:$0xff]  ;;  %v316_v28 = vld [vmem:[%s1059_s26 + $0x1a0] sm:$0xff] }
  0x23   : > { %313 = vst [vmem:[%s1064_s27 + $0xd0] sm:$0xff] %v312_v26  ;;  %v318_v29 = vld [vmem:[%s1059_s26 + $0x1a8] sm:$0xff]  ;;  %315 = vst [vmem:[%s1064_s27 + $0xd8] sm:$0xff] %v314_v27  ;;  %v320_v30 = vld [vmem:[%s1059_s26 + $0x1b0] sm:$0xff] }
  0x24   : > { %317 = vst [vmem:[%s1064_s27 + $0xe0] sm:$0xff] %v316_v28  ;;  %319 = vst [vmem:[%s1064_s27 + $0xe8] sm:$0xff] %v318_v29  ;;  %v322_v31 = vld [vmem:[%s1059_s26 + $0x1b8] sm:$0xff]  ;;  %v324_v32 = vld [vmem:[%s1059_s26 + $0x1c0] sm:$0xff] }
  0x25   : > { %321 = vst [vmem:[%s1064_s27 + $0xf0] sm:$0xff] %v320_v30  ;;  %323 = vst [vmem:[%s1064_s27 + $0xf8] sm:$0xff] %v322_v31  ;;  %v326_v33 = vld [vmem:[%s1059_s26 + $0x1c8] sm:$0xff]  ;;  %v328_v34 = vld [vmem:[%s1059_s26 + $0x1d0] sm:$0xff] }
  0x26   : > { %325 = vst [vmem:[%s1064_s27 + $0x100] sm:$0xff] %v324_v32  ;;  %v330_v35 = vld [vmem:[%s1059_s26 + $0x1d8] sm:$0xff]  ;;  %327 = vst [vmem:[%s1064_s27 + $0x108] sm:$0xff] %v326_v33  ;;  %v332_v36 = vld [vmem:[%s1059_s26 + $0x1e0] sm:$0xff] }
  0x27   : > { %329 = vst [vmem:[%s1064_s27 + $0x110] sm:$0xff] %v328_v34  ;;  %331 = vst [vmem:[%s1064_s27 + $0x118] sm:$0xff] %v330_v35  ;;  %v334_v37 = vld [vmem:[%s1059_s26 + $0x1e8] sm:$0xff]  ;;  %v336_v38 = vld [vmem:[%s1059_s26 + $0x1f0] sm:$0xff] }
  0x28   : > { %333 = vst [vmem:[%s1064_s27 + $0x120] sm:$0xff] %v332_v36  ;;  %335 = vst [vmem:[%s1064_s27 + $0x128] sm:$0xff] %v334_v37  ;;  %v338_v39 = vld [vmem:[%s1059_s26 + $0x1f8] sm:$0xff]  ;;  %v340_v40 = vld [vmem:[%s1059_s26 + $0x200] sm:$0xff] }
  0x29   : > { %337 = vst [vmem:[%s1064_s27 + $0x130] sm:$0xff] %v336_v38  ;;  %v342_v41 = vld [vmem:[%s1059_s26 + $0x208] sm:$0xff]  ;;  %339 = vst [vmem:[%s1064_s27 + $0x138] sm:$0xff] %v338_v39  ;;  %v344_v42 = vld [vmem:[%s1059_s26 + $0x210] sm:$0xff] }
  0x2a   : > { %341 = vst [vmem:[%s1064_s27 + $0x140] sm:$0xff] %v340_v40  ;;  %343 = vst [vmem:[%s1064_s27 + $0x148] sm:$0xff] %v342_v41  ;;  %v346_v43 = vld [vmem:[%s1059_s26 + $0x218] sm:$0xff]  ;;  %v348_v44 = vld [vmem:[%s1059_s26 + $0x220] sm:$0xff] }
  0x2b   : > { %345 = vst [vmem:[%s1064_s27 + $0x150] sm:$0xff] %v344_v42  ;;  %347 = vst [vmem:[%s1064_s27 + $0x158] sm:$0xff] %v346_v43  ;;  %v350_v45 = vld [vmem:[%s1059_s26 + $0x228] sm:$0xff]  ;;  %v352_v46 = vld [vmem:[%s1059_s26 + $0x230] sm:$0xff] }
  0x2c   : > { %349 = vst [vmem:[%s1064_s27 + $0x160] sm:$0xff] %v348_v44  ;;  %v354_v47 = vld [vmem:[%s1059_s26 + $0x238] sm:$0xff]  ;;  %351 = vst [vmem:[%s1064_s27 + $0x168] sm:$0xff] %v350_v45 }
  0x2d   : > { %353 = vst [vmem:[%s1064_s27 + $0x170] sm:$0xff] %v352_v46  ;;  %355 = vst [vmem:[%s1064_s27 + $0x178] sm:$0xff] %v354_v47 }
  0x2e PF: > { %p939_p7 = scmp.ge.s32.totalorder %s997_s14, 1  ;;  %p360_p8 = scmp.lt.s32.totalorder %s997_s14, 3 }
  0x30   : > { %p361_p9 = pnand %p939_p7, %p360_p8 }
  0x31   : > { %s367_s28 = sand.u32 (!%p361_p9), 1, %s989_s12   ;;  %v1167_v48 = vld [vmem:[%s1488_s1] ss:$0 sm:$0xff] (!%p361_p9) }
  0x32   : > { %364 = sbr.rel (%p361_p9) target bundleno = 117 (0x75), region = 66  ;;  %v1172_v49 = vld [vmem:[%s1489_s2] ss:$0 sm:$0xff] (!%p361_p9) }
  0x33   : > { %s1162_s29 = smul.u32 (!%p361_p9), 384, %s367_s28 }
  0x35   : > { %s1175_s7 = scalar_lea.vmem (!%p361_p9), [#allocation2], %s1162_s29  ;;  %s1209_s8 = scalar_lea.vmem (!%p361_p9), [#allocation3], %s1162_s29 }
  0x36   : > { %v391_v50 = vld [vmem:[%s1175_s7] sm:$0xff] (!%p361_p9)  ;;  %v392_v51 = vld [vmem:[%s1175_s7 + $0x8] sm:$0xff] (!%p361_p9)  ;;  %v393_v52 = vld [vmem:[%s1175_s7 + $0x10] sm:$0xff] (!%p361_p9) }
  0x37   : > { %v446_v53 = vmul.f32 (!%p361_p9), %v1167_v48, %v391_v50  ;;  %v447_v54 = vmul.f32 (!%p361_p9), %v1167_v48, %v392_v51  ;;  %v448_v55 = vmul.f32 (!%p361_p9), %v1167_v48, %v393_v52  ;;  %v394_v56 = vld [vmem:[%s1175_s7 + $0x18] sm:$0xff] (!%p361_p9)  ;;  %v395_v57 = vld [vmem:[%s1175_s7 + $0x20] sm:$0xff] (!%p361_p9)  ;;  %v396_v58 = vld [vmem:[%s1175_s7 + $0x28] sm:$0xff] (!%p361_p9) }
  0x38   : > { %v449_v59 = vmul.f32 (!%p361_p9), %v1167_v48, %v394_v56  ;;  %v450_v60 = vmul.f32 (!%p361_p9), %v1167_v48, %v395_v57  ;;  %v451_v61 = vmul.f32 (!%p361_p9), %v1167_v48, %v396_v58  ;;  %v397_v62 = vld [vmem:[%s1175_s7 + $0x30] sm:$0xff] (!%p361_p9)  ;;  %v398_v63 = vld [vmem:[%s1175_s7 + $0x38] sm:$0xff] (!%p361_p9)  ;;  %v399_v8 = vld [vmem:[%s1175_s7 + $0x40] sm:$0xff] (!%p361_p9) }
  0x39   : > { %v501_v0 = vadd.f32 %v1172_v49, %v446_v53  ;;  %v502_v1 = vadd.f32 %v1172_v49, %v447_v54  ;;  %v503_v2 = vadd.f32 %v1172_v49, %v448_v55  ;;  %v452_v3 = vmul.f32 %v1167_v48, %v397_v62  ;;  %v400_v9 = vld [vmem:[%s1175_s7 + $0x48] sm:$0xff]  ;;  %v401_v10 = vld [vmem:[%s1175_s7 + $0x50] sm:$0xff]  ;;  %v402_v15 = vld [vmem:[%s1175_s7 + $0x58] sm:$0xff]  ;;  %s950_s9 = smul.u32 (%p1049_p5), 192, %s932_s15 }
  0x3a   : > { %v504_v4 = vadd.f32 %v1172_v49, %v449_v59  ;;  %v505_v5 = vadd.f32 %v1172_v49, %v450_v60  ;;  %v506_v6 = vadd.f32 %v1172_v49, %v451_v61  ;;  %v453_v7 = vmul.f32 %v1167_v48, %v398_v63  ;;  %v403_v16 = vld [vmem:[%s1175_s7 + $0x60] sm:$0xff]  ;;  %v404_v17 = vld [vmem:[%s1175_s7 + $0x68] sm:$0xff]  ;;  %v405_v22 = vld [vmem:[%s1175_s7 + $0x70] sm:$0xff] }
  0x3b   : > { %v549_v11 = vmax.f32 %v501_v0, 0.0  ;;  %v550_v12 = vmax.f32 %v502_v1, 0.0  ;;  %v551_v13 = vmax.f32 %v503_v2, 0.0  ;;  %v507_v14 = vadd.f32 %v1172_v49, %v452_v3  ;;  %v406_v27 = vld [vmem:[%s1175_s7 + $0x78] sm:$0xff]  ;;  %v407_v40 = vld [vmem:[%s1175_s7 + $0x80] sm:$0xff]  ;;  %v408_v41 = vld [vmem:[%s1175_s7 + $0x88] sm:$0xff]  ;;  %s1385_s12 = scalar_lea.vmem (%p1049_p5), %s1490_s3, %s950_s9 }
  0x3c   : > { %v552_v18 = vmax.f32 %v504_v4, 0.0  ;;  %v553_v19 = vmax.f32 %v505_v5, 0.0  ;;  %v554_v20 = vmax.f32 %v506_v6, 0.0  ;;  %v508_v21 = vadd.f32 %v1172_v49, %v453_v7  ;;  %v409_v42 = vld [vmem:[%s1175_s7 + $0x90] sm:$0xff]  ;;  %v410_v47 = vld [vmem:[%s1175_s7 + $0x98] sm:$0xff]  ;;  %v411_v50 = vld [vmem:[%s1175_s7 + $0xa0] sm:$0xff] }
  0x3d   : > { %597 = vst [vmem:[%s1209_s8] sm:$0xff] %v549_v11  ;;  %598 = vst [vmem:[%s1209_s8 + $0x8] sm:$0xff] %v550_v12  ;;  %v555_v23 = vmax.f32 %v507_v14, 0.0  ;;  %v454_v24 = vmul.f32 %v1167_v48, %v399_v8  ;;  %v455_v25 = vmul.f32 %v1167_v48, %v400_v9  ;;  %v456_v26 = vmul.f32 %v1167_v48, %v401_v10  ;;  %v412_v51 = vld [vmem:[%s1175_s7 + $0xa8] sm:$0xff]  ;;  %v413_v56 = vld [vmem:[%s1175_s7 + $0xb0] sm:$0xff] }
  0x3e   : > { %599 = vst [vmem:[%s1209_s8 + $0x10] sm:$0xff] %v551_v13  ;;  %600 = vst [vmem:[%s1209_s8 + $0x18] sm:$0xff] %v552_v18  ;;  %v556_v28 = vmax.f32 %v508_v21, 0.0  ;;  %v457_v29 = vmul.f32 %v1167_v48, %v402_v15  ;;  %v458_v30 = vmul.f32 %v1167_v48, %v403_v16  ;;  %v459_v31 = vmul.f32 %v1167_v48, %v404_v17  ;;  %v414_v61 = vld [vmem:[%s1175_s7 + $0xb8] sm:$0xff]  ;;  %v415_v10 = vld [vmem:[%s1175_s7 + $0xc0] sm:$0xff] }
  0x3f   : > { %601 = vst [vmem:[%s1209_s8 + $0x20] sm:$0xff] %v553_v19  ;;  %602 = vst [vmem:[%s1209_s8 + $0x28] sm:$0xff] %v554_v20  ;;  %v509_v32 = vadd.f32 %v1172_v49, %v454_v24  ;;  %v510_v33 = vadd.f32 %v1172_v49, %v455_v25  ;;  %v511_v34 = vadd.f32 %v1172_v49, %v456_v26  ;;  %v416_v11 = vld [vmem:[%s1175_s7 + $0xc8] sm:$0xff]  ;;  %v417_v12 = vld [vmem:[%s1175_s7 + $0xd0] sm:$0xff] }
  0x40   : > { %603 = vst [vmem:[%s1209_s8 + $0x30] sm:$0xff] %v555_v23  ;;  %v460_v35 = vmul.f32 %v1167_v48, %v405_v22  ;;  %604 = vst [vmem:[%s1209_s8 + $0x38] sm:$0xff] %v556_v28  ;;  %v512_v36 = vadd.f32 %v1172_v49, %v457_v29  ;;  %v513_v37 = vadd.f32 %v1172_v49, %v458_v30  ;;  %v418_v17 = vld [vmem:[%s1175_s7 + $0xd8] sm:$0xff]  ;;  %v419_v18 = vld [vmem:[%s1175_s7 + $0xe0] sm:$0xff] }
  0x41   : > { %v514_v38 = vadd.f32 %v1172_v49, %v459_v31  ;;  %v461_v39 = vmul.f32 %v1167_v48, %v406_v27  ;;  %v557_v43 = vmax.f32 %v509_v32, 0.0  ;;  %v558_v44 = vmax.f32 %v510_v33, 0.0  ;;  %v420_v19 = vld [vmem:[%s1175_s7 + $0xe8] sm:$0xff]  ;;  %v421_v24 = vld [vmem:[%s1175_s7 + $0xf0] sm:$0xff]  ;;  %v422_v29 = vld [vmem:[%s1175_s7 + $0xf8] sm:$0xff] }
  0x42   : > { %v559_v45 = vmax.f32 %v511_v34, 0.0  ;;  %v515_v46 = vadd.f32 %v1172_v49, %v460_v35  ;;  %v560_v52 = vmax.f32 %v512_v36, 0.0  ;;  %v561_v53 = vmax.f32 %v513_v37, 0.0 }
  0x43   : > { %v562_v54 = vmax.f32 %v514_v38, 0.0  ;;  %v516_v55 = vadd.f32 %v1172_v49, %v461_v39  ;;  %605 = vst [vmem:[%s1209_s8 + $0x40] sm:$0xff] %v557_v43  ;;  %606 = vst [vmem:[%s1209_s8 + $0x48] sm:$0xff] %v558_v44  ;;  %v462_v58 = vmul.f32 %v1167_v48, %v407_v40  ;;  %v463_v59 = vmul.f32 %v1167_v48, %v408_v41  ;;  %v424_v43 = vld [vmem:[%s1175_s7 + $0x108] sm:$0xff]  ;;  %v425_v44 = vld [vmem:[%s1175_s7 + $0x110] sm:$0xff] }
  0x44   : > { %607 = vst [vmem:[%s1209_s8 + $0x50] sm:$0xff] %v559_v45  ;;  %v563_v57 = vmax.f32 %v515_v46, 0.0  ;;  %v464_v60 = vmul.f32 %v1167_v48, %v409_v42  ;;  %608 = vst [vmem:[%s1209_s8 + $0x58] sm:$0xff] %v560_v52  ;;  %v465_v63 = vmul.f32 %v1167_v48, %v410_v47  ;;  %v466_v0 = vmul.f32 %v1167_v48, %v411_v50  ;;  %v423_v42 = vld [vmem:[%s1175_s7 + $0x100] sm:$0xff] }
  0x45   : > { %609 = vst [vmem:[%s1209_s8 + $0x60] sm:$0xff] %v561_v53  ;;  %610 = vst [vmem:[%s1209_s8 + $0x68] sm:$0xff] %v562_v54  ;;  %v564_v62 = vmax.f32 %v516_v55, 0.0  ;;  %v467_v1 = vmul.f32 %v1167_v48, %v412_v51  ;;  %v517_v2 = vadd.f32 %v1172_v49, %v462_v58  ;;  %v518_v3 = vadd.f32 %v1172_v49, %v463_v59  ;;  %v426_v51 = vld [vmem:[%s1175_s7 + $0x118] sm:$0xff]  ;;  %v427_v52 = vld [vmem:[%s1175_s7 + $0x120] sm:$0xff] }
  0x46   : > { %611 = vst [vmem:[%s1209_s8 + $0x70] sm:$0xff] %v563_v57  ;;  %v519_v4 = vadd.f32 %v1172_v49, %v464_v60  ;;  %v468_v5 = vmul.f32 %v1167_v48, %v413_v56  ;;  %v520_v6 = vadd.f32 %v1172_v49, %v465_v63  ;;  %v521_v7 = vadd.f32 %v1172_v49, %v466_v0  ;;  %v428_v53 = vld [vmem:[%s1175_s7 + $0x128] sm:$0xff]  ;;  %v429_v58 = vld [vmem:[%s1175_s7 + $0x130] sm:$0xff]  ;;  %v430_v63 = vld [vmem:[%s1175_s7 + $0x138] sm:$0xff] }
  0x47   : > { %612 = vst [vmem:[%s1209_s8 + $0x78] sm:$0xff] %v564_v62  ;;  %v522_v8 = vadd.f32 %v1172_v49, %v467_v1  ;;  %v469_v9 = vmul.f32 %v1167_v48, %v414_v61  ;;  %v565_v13 = vmax.f32 %v517_v2, 0.0  ;;  %v566_v14 = vmax.f32 %v518_v3, 0.0 }
  0x48   : > { %v567_v15 = vmax.f32 %v519_v4, 0.0  ;;  %v523_v16 = vadd.f32 %v1172_v49, %v468_v5  ;;  %v568_v20 = vmax.f32 %v520_v6, 0.0  ;;  %v569_v21 = vmax.f32 %v521_v7, 0.0 }
  0x49   : > { %v570_v22 = vmax.f32 %v522_v8, 0.0  ;;  %v524_v23 = vadd.f32 %v1172_v49, %v469_v9  ;;  %613 = vst [vmem:[%s1209_s8 + $0x80] sm:$0xff] %v565_v13  ;;  %614 = vst [vmem:[%s1209_s8 + $0x88] sm:$0xff] %v566_v14  ;;  %v470_v26 = vmul.f32 %v1167_v48, %v415_v10  ;;  %v471_v27 = vmul.f32 %v1167_v48, %v416_v11  ;;  %v432_v13 = vld [vmem:[%s1175_s7 + $0x148] sm:$0xff]  ;;  %v433_v14 = vld [vmem:[%s1175_s7 + $0x150] sm:$0xff] }
  0x4a   : > { %615 = vst [vmem:[%s1209_s8 + $0x90] sm:$0xff] %v567_v15  ;;  %v571_v25 = vmax.f32 %v523_v16, 0.0  ;;  %v472_v28 = vmul.f32 %v1167_v48, %v417_v12  ;;  %616 = vst [vmem:[%s1209_s8 + $0x98] sm:$0xff] %v568_v20  ;;  %v473_v31 = vmul.f32 %v1167_v48, %v418_v17  ;;  %v474_v32 = vmul.f32 %v1167_v48, %v419_v18  ;;  %v431_v12 = vld [vmem:[%s1175_s7 + $0x140] sm:$0xff] }
  0x4b   : > { %617 = vst [vmem:[%s1209_s8 + $0xa0] sm:$0xff] %v569_v21  ;;  %618 = vst [vmem:[%s1209_s8 + $0xa8] sm:$0xff] %v570_v22  ;;  %v572_v30 = vmax.f32 %v524_v23, 0.0  ;;  %v475_v33 = vmul.f32 %v1167_v48, %v420_v19  ;;  %v525_v34 = vadd.f32 %v1172_v49, %v470_v26  ;;  %v526_v35 = vadd.f32 %v1172_v49, %v471_v27  ;;  %v434_v19 = vld [vmem:[%s1175_s7 + $0x158] sm:$0xff]  ;;  %v435_v20 = vld [vmem:[%s1175_s7 + $0x160] sm:$0xff] }
  0x4c   : > { %619 = vst [vmem:[%s1209_s8 + $0xb0] sm:$0xff] %v571_v25  ;;  %v527_v36 = vadd.f32 %v1172_v49, %v472_v28  ;;  %v476_v37 = vmul.f32 %v1167_v48, %v421_v24  ;;  %v528_v38 = vadd.f32 %v1172_v49, %v473_v31  ;;  %v529_v39 = vadd.f32 %v1172_v49, %v474_v32  ;;  %v436_v21 = vld [vmem:[%s1175_s7 + $0x168] sm:$0xff]  ;;  %v437_v26 = vld [vmem:[%s1175_s7 + $0x170] sm:$0xff]  ;;  %v438_v31 = vld [vmem:[%s1175_s7 + $0x178] sm:$0xff] }
  0x4d   : > { %620 = vst [vmem:[%s1209_s8 + $0xb8] sm:$0xff] %v572_v30  ;;  %v530_v40 = vadd.f32 %v1172_v49, %v475_v33  ;;  %v477_v41 = vmul.f32 %v1167_v48, %v422_v29  ;;  %v573_v45 = vmax.f32 %v525_v34, 0.0  ;;  %v574_v46 = vmax.f32 %v526_v35, 0.0 }
  0x4e   : > { %v575_v47 = vmax.f32 %v527_v36, 0.0  ;;  %v531_v50 = vadd.f32 %v1172_v49, %v476_v37  ;;  %v576_v54 = vmax.f32 %v528_v38, 0.0  ;;  %v577_v55 = vmax.f32 %v529_v39, 0.0 }
  0x4f   : > { %v578_v56 = vmax.f32 %v530_v40, 0.0  ;;  %v532_v57 = vadd.f32 %v1172_v49, %v477_v41  ;;  %621 = vst [vmem:[%s1209_s8 + $0xc0] sm:$0xff] %v573_v45  ;;  %622 = vst [vmem:[%s1209_s8 + $0xc8] sm:$0xff] %v574_v46  ;;  %v478_v60 = vmul.f32 %v1167_v48, %v423_v42  ;;  %v479_v61 = vmul.f32 %v1167_v48, %v424_v43 }
  0x50   : > { %623 = vst [vmem:[%s1209_s8 + $0xd0] sm:$0xff] %v575_v47  ;;  %v579_v59 = vmax.f32 %v531_v50, 0.0  ;;  %v480_v62 = vmul.f32 %v1167_v48, %v425_v44  ;;  %624 = vst [vmem:[%s1209_s8 + $0xd8] sm:$0xff] %v576_v54  ;;  %v481_v1 = vmul.f32 %v1167_v48, %v426_v51  ;;  %v482_v2 = vmul.f32 %v1167_v48, %v427_v52 }
  0x51   : > { %625 = vst [vmem:[%s1209_s8 + $0xe0] sm:$0xff] %v577_v55  ;;  %626 = vst [vmem:[%s1209_s8 + $0xe8] sm:$0xff] %v578_v56  ;;  %v580_v0 = vmax.f32 %v532_v57, 0.0  ;;  %v483_v3 = vmul.f32 %v1167_v48, %v428_v53  ;;  %v533_v4 = vadd.f32 %v1172_v49, %v478_v60  ;;  %v534_v5 = vadd.f32 %v1172_v49, %v479_v61  ;;  %v779_v55 = vld [vmem:[%s1209_s8 + $0x8] sm:$0xff] (%p1049_p5)  ;;  %v781_v56 = vld [vmem:[%s1209_s8 + $0x10] sm:$0xff] (%p1049_p5) }
  0x52   : > { %627 = vst [vmem:[%s1209_s8 + $0xf0] sm:$0xff] %v579_v59  ;;  %v535_v6 = vadd.f32 %v1172_v49, %v480_v62  ;;  %v484_v7 = vmul.f32 %v1167_v48, %v429_v58  ;;  %v536_v8 = vadd.f32 %v1172_v49, %v481_v1  ;;  %v537_v9 = vadd.f32 %v1172_v49, %v482_v2  ;;  %v783_v57 = vld [vmem:[%s1209_s8 + $0x18] sm:$0xff] (%p1049_p5)  ;;  %v785_v58 = vld [vmem:[%s1209_s8 + $0x20] sm:$0xff] (%p1049_p5)  ;;  %v787_v59 = vld [vmem:[%s1209_s8 + $0x28] sm:$0xff] (%p1049_p5) }
  0x53   : > { %628 = vst [vmem:[%s1209_s8 + $0xf8] sm:$0xff] %v580_v0  ;;  %v538_v10 = vadd.f32 %v1172_v49, %v483_v3  ;;  %v485_v11 = vmul.f32 %v1167_v48, %v430_v63  ;;  %v581_v15 = vmax.f32 %v533_v4, 0.0  ;;  %v582_v16 = vmax.f32 %v534_v5, 0.0  ;;  %v789_v60 = vld [vmem:[%s1209_s8 + $0x30] sm:$0xff] (%p1049_p5)  ;;  %v791_v61 = vld [vmem:[%s1209_s8 + $0x38] sm:$0xff] (%p1049_p5)  ;;  %v793_v62 = vld [vmem:[%s1209_s8 + $0x40] sm:$0xff] (%p1049_p5) }
  0x54   : > { %v583_v17 = vmax.f32 %v535_v6, 0.0  ;;  %v539_v18 = vadd.f32 %v1172_v49, %v484_v7  ;;  %v584_v22 = vmax.f32 %v536_v8, 0.0  ;;  %v585_v23 = vmax.f32 %v537_v9, 0.0  ;;  %780 = vst [vmem:[%s1385_s12 + $0x8] sm:$0xff] (%p1049_p5), %v779_v55  ;;  %782 = vst [vmem:[%s1385_s12 + $0x10] sm:$0xff] (%p1049_p5), %v781_v56  ;;  %v795_v63 = vld [vmem:[%s1209_s8 + $0x48] sm:$0xff] (%p1049_p5) }
  0x55   : > { %v586_v24 = vmax.f32 %v538_v10, 0.0  ;;  %v540_v25 = vadd.f32 %v1172_v49, %v485_v11  ;;  %629 = vst [vmem:[%s1209_s8 + $0x100] sm:$0xff] %v581_v15  ;;  %630 = vst [vmem:[%s1209_s8 + $0x108] sm:$0xff] %v582_v16  ;;  %v486_v28 = vmul.f32 %v1167_v48, %v431_v12  ;;  %v487_v29 = vmul.f32 %v1167_v48, %v432_v13  ;;  %v797_v0 = vld [vmem:[%s1209_s8 + $0x50] sm:$0xff] (%p1049_p5)  ;;  %v799_v1 = vld [vmem:[%s1209_s8 + $0x58] sm:$0xff] (%p1049_p5) }
  0x56   : > { %631 = vst [vmem:[%s1209_s8 + $0x110] sm:$0xff] %v583_v17  ;;  %v587_v27 = vmax.f32 %v539_v18, 0.0  ;;  %v488_v30 = vmul.f32 %v1167_v48, %v433_v14  ;;  %632 = vst [vmem:[%s1209_s8 + $0x118] sm:$0xff] %v584_v22  ;;  %v489_v33 = vmul.f32 %v1167_v48, %v434_v19  ;;  %v490_v34 = vmul.f32 %v1167_v48, %v435_v20  ;;  %v801_v2 = vld [vmem:[%s1209_s8 + $0x60] sm:$0xff] (%p1049_p5)  ;;  %v803_v3 = vld [vmem:[%s1209_s8 + $0x68] sm:$0xff] (%p1049_p5) }
  0x57   : > { %633 = vst [vmem:[%s1209_s8 + $0x120] sm:$0xff] %v585_v23  ;;  %634 = vst [vmem:[%s1209_s8 + $0x128] sm:$0xff] %v586_v24  ;;  %v588_v32 = vmax.f32 %v540_v25, 0.0  ;;  %v491_v35 = vmul.f32 %v1167_v48, %v436_v21  ;;  %v541_v36 = vadd.f32 %v1172_v49, %v486_v28  ;;  %v542_v37 = vadd.f32 %v1172_v49, %v487_v29  ;;  %v805_v4 = vld [vmem:[%s1209_s8 + $0x70] sm:$0xff] (%p1049_p5)  ;;  %v807_v5 = vld [vmem:[%s1209_s8 + $0x78] sm:$0xff] (%p1049_p5) }
  0x58   : > { %635 = vst [vmem:[%s1209_s8 + $0x130] sm:$0xff] %v587_v27  ;;  %v543_v38 = vadd.f32 %v1172_v49, %v488_v30  ;;  %v492_v39 = vmul.f32 %v1167_v48, %v437_v26  ;;  %v544_v40 = vadd.f32 %v1172_v49, %v489_v33  ;;  %v545_v41 = vadd.f32 %v1172_v49, %v490_v34  ;;  %v809_v6 = vld [vmem:[%s1209_s8 + $0x80] sm:$0xff] (%p1049_p5)  ;;  %v811_v7 = vld [vmem:[%s1209_s8 + $0x88] sm:$0xff] (%p1049_p5)  ;;  %v813_v8 = vld [vmem:[%s1209_s8 + $0x90] sm:$0xff] (%p1049_p5) }
  0x59   : > { %636 = vst [vmem:[%s1209_s8 + $0x138] sm:$0xff] %v588_v32  ;;  %v546_v42 = vadd.f32 %v1172_v49, %v491_v35  ;;  %v493_v43 = vmul.f32 %v1167_v48, %v438_v31  ;;  %v589_v44 = vmax.f32 %v541_v36, 0.0  ;;  %v590_v45 = vmax.f32 %v542_v37, 0.0  ;;  %651 = sbr.rel (!%p1049_p5) target bundleno = 117 (0x75), region = 74  ;;  %784 = vst [vmem:[%s1385_s12 + $0x18] sm:$0xff] (%p1049_p5), %v783_v57  ;;  %v815_v9 = vld [vmem:[%s1209_s8 + $0x98] sm:$0xff] (%p1049_p5) }
  0x5a   : > { %v591_v46 = vmax.f32 %v543_v38, 0.0  ;;  %v547_v47 = vadd.f32 %v1172_v49, %v492_v39  ;;  %v592_v50 = vmax.f32 %v544_v40, 0.0  ;;  %v593_v51 = vmax.f32 %v545_v41, 0.0  ;;  %786 = vst [vmem:[%s1385_s12 + $0x20] sm:$0xff] (%p1049_p5), %v785_v58  ;;  %788 = vst [vmem:[%s1385_s12 + $0x28] sm:$0xff] (%p1049_p5), %v787_v59  ;;  %v817_v10 = vld [vmem:[%s1209_s8 + $0xa0] sm:$0xff] (%p1049_p5) }
  0x5b   : > { %v594_v52 = vmax.f32 %v546_v42, 0.0  ;;  %v548_v53 = vadd.f32 %v1172_v49, %v493_v43  ;;  %637 = vst [vmem:[%s1209_s8 + $0x140] sm:$0xff] %v589_v44  ;;  %638 = vst [vmem:[%s1209_s8 + $0x148] sm:$0xff] %v590_v45  ;;  %v777_v49 = vld [vmem:[%s1209_s8] sm:$0xff] (%p1049_p5)  ;;  %v819_v11 = vld [vmem:[%s1209_s8 + $0xa8] sm:$0xff] (%p1049_p5) }
  0x5c   : > { %639 = vst [vmem:[%s1209_s8 + $0x150] sm:$0xff] %v591_v46  ;;  %v595_v54 = vmax.f32 %v547_v47, 0.0  ;;  %640 = vst [vmem:[%s1209_s8 + $0x158] sm:$0xff] %v592_v50  ;;  %v821_v12 = vld [vmem:[%s1209_s8 + $0xb0] sm:$0xff] (%p1049_p5)  ;;  %v823_v13 = vld [vmem:[%s1209_s8 + $0xb8] sm:$0xff] (%p1049_p5) }
  0x5d   : > { %641 = vst [vmem:[%s1209_s8 + $0x160] sm:$0xff] %v593_v51  ;;  %642 = vst [vmem:[%s1209_s8 + $0x168] sm:$0xff] %v594_v52  ;;  %v596_v48 = vmax.f32 %v548_v53, 0.0  ;;  %v825_v14 = vld [vmem:[%s1209_s8 + $0xc0] sm:$0xff] (%p1049_p5)  ;;  %v827_v15 = vld [vmem:[%s1209_s8 + $0xc8] sm:$0xff] (%p1049_p5) }
  0x5e   : > { %643 = vst [vmem:[%s1209_s8 + $0x170] sm:$0xff] %v595_v54  ;;  %778 = vst [vmem:[%s1385_s12] sm:$0xff] (%p1049_p5), %v777_v49  ;;  %v829_v16 = vld [vmem:[%s1209_s8 + $0xd0] sm:$0xff] (%p1049_p5)  ;;  %v831_v17 = vld [vmem:[%s1209_s8 + $0xd8] sm:$0xff] (%p1049_p5) }
  0x5f   : > { %644 = vst [vmem:[%s1209_s8 + $0x178] sm:$0xff] %v596_v48  ;;  %790 = vst [vmem:[%s1385_s12 + $0x30] sm:$0xff] (%p1049_p5), %v789_v60  ;;  %v833_v18 = vld [vmem:[%s1209_s8 + $0xe0] sm:$0xff] (%p1049_p5)  ;;  %v835_v19 = vld [vmem:[%s1209_s8 + $0xe8] sm:$0xff] (%p1049_p5) }
  0x60   : > { %792 = vst [vmem:[%s1385_s12 + $0x38] sm:$0xff] %v791_v61  ;;  %794 = vst [vmem:[%s1385_s12 + $0x40] sm:$0xff] %v793_v62  ;;  %v837_v20 = vld [vmem:[%s1209_s8 + $0xf0] sm:$0xff]  ;;  %v839_v21 = vld [vmem:[%s1209_s8 + $0xf8] sm:$0xff] }
  0x61   : > { %796 = vst [vmem:[%s1385_s12 + $0x48] sm:$0xff] %v795_v63  ;;  %798 = vst [vmem:[%s1385_s12 + $0x50] sm:$0xff] %v797_v0  ;;  %v841_v22 = vld [vmem:[%s1209_s8 + $0x100] sm:$0xff]  ;;  %v843_v23 = vld [vmem:[%s1209_s8 + $0x108] sm:$0xff] }
  0x62   : > { %800 = vst [vmem:[%s1385_s12 + $0x58] sm:$0xff] %v799_v1  ;;  %802 = vst [vmem:[%s1385_s12 + $0x60] sm:$0xff] %v801_v2  ;;  %v845_v24 = vld [vmem:[%s1209_s8 + $0x110] sm:$0xff]  ;;  %v847_v25 = vld [vmem:[%s1209_s8 + $0x118] sm:$0xff] }
  0x63   : > { %804 = vst [vmem:[%s1385_s12 + $0x68] sm:$0xff] %v803_v3  ;;  %806 = vst [vmem:[%s1385_s12 + $0x70] sm:$0xff] %v805_v4  ;;  %v849_v26 = vld [vmem:[%s1209_s8 + $0x120] sm:$0xff]  ;;  %v851_v27 = vld [vmem:[%s1209_s8 + $0x128] sm:$0xff] }
  0x64   : > { %808 = vst [vmem:[%s1385_s12 + $0x78] sm:$0xff] %v807_v5  ;;  %810 = vst [vmem:[%s1385_s12 + $0x80] sm:$0xff] %v809_v6  ;;  %v853_v28 = vld [vmem:[%s1209_s8 + $0x130] sm:$0xff]  ;;  %v855_v29 = vld [vmem:[%s1209_s8 + $0x138] sm:$0xff] }
  0x65   : > { %812 = vst [vmem:[%s1385_s12 + $0x88] sm:$0xff] %v811_v7  ;;  %814 = vst [vmem:[%s1385_s12 + $0x90] sm:$0xff] %v813_v8  ;;  %v857_v30 = vld [vmem:[%s1209_s8 + $0x140] sm:$0xff]  ;;  %v859_v31 = vld [vmem:[%s1209_s8 + $0x148] sm:$0xff] }
  0x66   : > { %816 = vst [vmem:[%s1385_s12 + $0x98] sm:$0xff] %v815_v9  ;;  %818 = vst [vmem:[%s1385_s12 + $0xa0] sm:$0xff] %v817_v10  ;;  %v861_v32 = vld [vmem:[%s1209_s8 + $0x150] sm:$0xff]  ;;  %v863_v33 = vld [vmem:[%s1209_s8 + $0x158] sm:$0xff] }
  0x67   : > { %820 = vst [vmem:[%s1385_s12 + $0xa8] sm:$0xff] %v819_v11  ;;  %822 = vst [vmem:[%s1385_s12 + $0xb0] sm:$0xff] %v821_v12  ;;  %v865_v34 = vld [vmem:[%s1209_s8 + $0x160] sm:$0xff]  ;;  %v867_v35 = vld [vmem:[%s1209_s8 + $0x168] sm:$0xff] }
  0x68   : > { %824 = vst [vmem:[%s1385_s12 + $0xb8] sm:$0xff] %v823_v13  ;;  %826 = vst [vmem:[%s1385_s12 + $0x180] sm:$0xff] %v825_v14  ;;  %v869_v36 = vld [vmem:[%s1209_s8 + $0x170] sm:$0xff]  ;;  %v871_v37 = vld [vmem:[%s1209_s8 + $0x178] sm:$0xff] }
  0x69   : > { %828 = vst [vmem:[%s1385_s12 + $0x188] sm:$0xff] %v827_v15  ;;  %830 = vst [vmem:[%s1385_s12 + $0x190] sm:$0xff] %v829_v16 }
  0x6a   : > { %832 = vst [vmem:[%s1385_s12 + $0x198] sm:$0xff] %v831_v17  ;;  %834 = vst [vmem:[%s1385_s12 + $0x1a0] sm:$0xff] %v833_v18 }
  0x6b   : > { %836 = vst [vmem:[%s1385_s12 + $0x1a8] sm:$0xff] %v835_v19  ;;  %838 = vst [vmem:[%s1385_s12 + $0x1b0] sm:$0xff] %v837_v20 }
  0x6c   : > { %840 = vst [vmem:[%s1385_s12 + $0x1b8] sm:$0xff] %v839_v21  ;;  %842 = vst [vmem:[%s1385_s12 + $0x1c0] sm:$0xff] %v841_v22 }
  0x6d   : > { %844 = vst [vmem:[%s1385_s12 + $0x1c8] sm:$0xff] %v843_v23  ;;  %846 = vst [vmem:[%s1385_s12 + $0x1d0] sm:$0xff] %v845_v24 }
  0x6e   : > { %848 = vst [vmem:[%s1385_s12 + $0x1d8] sm:$0xff] %v847_v25  ;;  %850 = vst [vmem:[%s1385_s12 + $0x1e0] sm:$0xff] %v849_v26 }
  0x6f   : > { %852 = vst [vmem:[%s1385_s12 + $0x1e8] sm:$0xff] %v851_v27  ;;  %854 = vst [vmem:[%s1385_s12 + $0x1f0] sm:$0xff] %v853_v28 }
  0x70   : > { %856 = vst [vmem:[%s1385_s12 + $0x1f8] sm:$0xff] %v855_v29  ;;  %858 = vst [vmem:[%s1385_s12 + $0x200] sm:$0xff] %v857_v30 }
  0x71   : > { %860 = vst [vmem:[%s1385_s12 + $0x208] sm:$0xff] %v859_v31  ;;  %862 = vst [vmem:[%s1385_s12 + $0x210] sm:$0xff] %v861_v32 }
  0x72   : > { %864 = vst [vmem:[%s1385_s12 + $0x218] sm:$0xff] %v863_v33  ;;  %866 = vst [vmem:[%s1385_s12 + $0x220] sm:$0xff] %v865_v34 }
  0x73   : > { %868 = vst [vmem:[%s1385_s12 + $0x228] sm:$0xff] %v867_v35  ;;  %870 = vst [vmem:[%s1385_s12 + $0x230] sm:$0xff] %v869_v36 }
  0x74   : > { %872 = vst [vmem:[%s1385_s12 + $0x238] sm:$0xff] %v871_v37 }
  0x75 PF: > { %p10_p10 = scmp.ge.s32.totalorder %s1036_s16, 4   ;;  %s1492_s12 = smov %s993_s13 }
  0x76   : > { %s1493_s13 = smov %s1047_s19  ;;  %s1494_s14 = smov %s1036_s16 }
  0x77   :  { %12 = sbr.rel (!%p10_p10) target bundleno = 2 (0x2), region = 143 }

// kernel: double_conv.3
= control target key start
LH: loop header
LB: loop body
LE: loop exit
PB: predicated region body
PF: predicated region fallthrough
CT: control target
= control target key end

     0   :  { %s8051_s12 = smov 0   ;;  %s8053_s13 = smov 0   ;;  %s10287_s0 = inlined_call_operand.vmem [shape: f32[2,16,24,128], index: 0, kind: input, shape index: {}]   ;;  %s10288_s1 = inlined_call_operand.vmem [shape: f32[9,128,128], index: 1, kind: input, shape index: {}]   ;;  %s10289_s2 = inlined_call_operand.vmem [shape: f32[2,16,24,128], index: 2, kind: output, shape index: {0}]   ;;  %s10290_s3 = inlined_call_operand.vmem [shape: f32[2,2,128], index: 3, kind: output, shape index: {1}]  }
   0x1   :  { %s8055_s14 = smov 0  }
   0x2 LB: > { %s8062_s15 = sadd.s32 4294967295, %s8027_s14   ;;  %s8064_s16 = sadd.s32 1, %s8027_s14   ;;  %s8027_s14 = sphi %s8055_s14, %s10500_s14   ;;  %s8023_s13 = sphi %s8053_s13, %s10499_s13   ;;  %s8019_s12 = sphi %s8051_s12, %s10498_s12  }
   0x3   : > { %s39_s17 = ssub.s32 %s8027_s14, %s8064_s16  ;;  %s42_s18 = sadd.s32 1, %s8023_s13 }
   0x4   : > { %p40_p0 = scmp.eq.s32.totalorder %s39_s17, 0  ;;  %p52_p1 = scmp.ne.s32.totalorder %s8023_s13, %s8019_s12 }
   0x5   : > { %p53_p2 = scmp.eq.s32.totalorder %s8062_s15, 1  ;;  %p5619_p3 = scmp.ge.s32.totalorder %s8027_s14, 1 }
   0x6   : > { %s8071_s19 = scalar_select %p40_p0, %s8023_s13, %s42_s18  }
   0x7   : > { %p8073_p4 = por %p53_p2, %p52_p1  ;;  %p106_p5 = scmp.lt.s32.totalorder %s8027_s14, 3 }
   0x9   : > { %p107_p6 = pnand %p5619_p3, %p106_p5 }
   0xb   : > { %110 = sbr.rel (%p107_p6) target bundleno = 815 (0x32f), region = 24 }
  0x12   : > { %s117_s21 = sand.u32 1, %s8019_s12   ;;  %p127_p7 = scmp.lt.s32.totalorder %s8062_s15, 1 }
  0x13   : > { %s7923_s22 = smul.u32 384, %s117_s21  ;;  %s5621_s23 = sshll.u32 %s8062_s15, 3 }
  0x14   : > { %s128_s24 = scalar_select %p127_p7, %s8062_s15, 1 }
  0x15   : > { %s8085_s29 = scalar_lea.vmem [#allocation3], %s7923_s22 }
  0x16   : > { %s5620_s25 = sshll.u32 %s128_s24, 1 }
  0x17   : > { %s8083_s28 = scalar_lea.vmem %s10290_s3, %s5620_s25 }
  0x18   : > { %s5622_s30 = smul.u32 192, %s8062_s15 }
  0x1a   : > { %s8093_s6 = scalar_lea.vmem %s10287_s0, %s5622_s30 }
  0x1b   : > { %v169_v0 = vld [vmem:[%s8093_s6] sm:$0xff]  ;;  %v171_v1 = vld [vmem:[%s8093_s6 + $0x8] sm:$0xff]  ;;  %v173_v2 = vld [vmem:[%s8093_s6 + $0x10] sm:$0xff] }
  0x1c   : > { %170 = vst [vmem:[#allocation2 + $0x18] sm:$0xff] %v169_v0  ;;  %172 = vst [vmem:[#allocation2 + $0x20] sm:$0xff] %v171_v1  ;;  %v175_v3 = vld [vmem:[%s8093_s6 + $0x18] sm:$0xff]  ;;  %v177_v4 = vld [vmem:[%s8093_s6 + $0x20] sm:$0xff] }
  0x1d   : > { %174 = vst [vmem:[#allocation2 + $0x28] sm:$0xff] %v173_v2  ;;  %v179_v5 = vld [vmem:[%s8093_s6 + $0x28] sm:$0xff]  ;;  %176 = vst [vmem:[#allocation2 + $0x30] sm:$0xff] %v175_v3  ;;  %v181_v6 = vld [vmem:[%s8093_s6 + $0x30] sm:$0xff] }
  0x1e   : > { %178 = vst [vmem:[#allocation2 + $0x38] sm:$0xff] %v177_v4  ;;  %180 = vst [vmem:[#allocation2 + $0x40] sm:$0xff] %v179_v5  ;;  %v183_v7 = vld [vmem:[%s8093_s6 + $0x38] sm:$0xff]  ;;  %v185_v8 = vld [vmem:[%s8093_s6 + $0x40] sm:$0xff] }
  0x1f   : > { %182 = vst [vmem:[#allocation2 + $0x48] sm:$0xff] %v181_v6  ;;  %184 = vst [vmem:[#allocation2 + $0x50] sm:$0xff] %v183_v7  ;;  %v187_v9 = vld [vmem:[%s8093_s6 + $0x48] sm:$0xff]  ;;  %v189_v10 = vld [vmem:[%s8093_s6 + $0x50] sm:$0xff] }
  0x20   : > { %186 = vst [vmem:[#allocation2 + $0x58] sm:$0xff] %v185_v8  ;;  %v191_v11 = vld [vmem:[%s8093_s6 + $0x58] sm:$0xff]  ;;  %188 = vst [vmem:[#allocation2 + $0x60] sm:$0xff] %v187_v9  ;;  %v193_v12 = vld [vmem:[%s8093_s6 + $0x60] sm:$0xff] }
  0x21   : > { %190 = vst [vmem:[#allocation2 + $0x68] sm:$0xff] %v189_v10  ;;  %192 = vst [vmem:[#allocation2 + $0x70] sm:$0xff] %v191_v11  ;;  %v195_v13 = vld [vmem:[%s8093_s6 + $0x68] sm:$0xff]  ;;  %v197_v14 = vld [vmem:[%s8093_s6 + $0x70] sm:$0xff] }
  0x22   : > { %194 = vst [vmem:[#allocation2 + $0x78] sm:$0xff] %v193_v12  ;;  %196 = vst [vmem:[#allocation2 + $0x80] sm:$0xff] %v195_v13  ;;  %v199_v15 = vld [vmem:[%s8093_s6 + $0x78] sm:$0xff]  ;;  %v201_v16 = vld [vmem:[%s8093_s6 + $0x80] sm:$0xff] }
  0x23   : > { %198 = vst [vmem:[#allocation2 + $0x88] sm:$0xff] %v197_v14  ;;  %v203_v17 = vld [vmem:[%s8093_s6 + $0x88] sm:$0xff]  ;;  %200 = vst [vmem:[#allocation2 + $0x90] sm:$0xff] %v199_v15  ;;  %v205_v18 = vld [vmem:[%s8093_s6 + $0x90] sm:$0xff] }
  0x24   : > { %202 = vst [vmem:[#allocation2 + $0x98] sm:$0xff] %v201_v16  ;;  %204 = vst [vmem:[#allocation2 + $0xa0] sm:$0xff] %v203_v17  ;;  %v207_v19 = vld [vmem:[%s8093_s6 + $0x98] sm:$0xff]  ;;  %v209_v20 = vld [vmem:[%s8093_s6 + $0xa0] sm:$0xff] }
  0x25   : > { %206 = vst [vmem:[#allocation2 + $0xa8] sm:$0xff] %v205_v18  ;;  %208 = vst [vmem:[#allocation2 + $0xb0] sm:$0xff] %v207_v19  ;;  %v211_v21 = vld [vmem:[%s8093_s6 + $0xa8] sm:$0xff]  ;;  %v213_v22 = vld [vmem:[%s8093_s6 + $0xb0] sm:$0xff] }
  0x26   : > { %210 = vst [vmem:[#allocation2 + $0xb8] sm:$0xff] %v209_v20  ;;  %v215_v23 = vld [vmem:[%s8093_s6 + $0xb8] sm:$0xff]  ;;  %212 = vst [vmem:[#allocation2 + $0xc0] sm:$0xff] %v211_v21  ;;  %v217_v24 = vld [vmem:[%s8093_s6 + $0x180] sm:$0xff] }
  0x27   : > { %214 = vst [vmem:[#allocation2 + $0xc8] sm:$0xff] %v213_v22  ;;  %216 = vst [vmem:[#allocation2 + $0xd0] sm:$0xff] %v215_v23  ;;  %v219_v25 = vld [vmem:[%s8093_s6 + $0x188] sm:$0xff]  ;;  %v221_v26 = vld [vmem:[%s8093_s6 + $0x190] sm:$0xff] }
  0x28   : > { %218 = vst [vmem:[#allocation2 + $0x108] sm:$0xff] %v217_v24  ;;  %220 = vst [vmem:[#allocation2 + $0x110] sm:$0xff] %v219_v25  ;;  %v223_v27 = vld [vmem:[%s8093_s6 + $0x198] sm:$0xff]  ;;  %v225_v28 = vld [vmem:[%s8093_s6 + $0x1a0] sm:$0xff] }
  0x29   : > { %222 = vst [vmem:[#allocation2 + $0x118] sm:$0xff] %v221_v26  ;;  %v227_v29 = vld [vmem:[%s8093_s6 + $0x1a8] sm:$0xff]  ;;  %224 = vst [vmem:[#allocation2 + $0x120] sm:$0xff] %v223_v27  ;;  %v229_v30 = vld [vmem:[%s8093_s6 + $0x1b0] sm:$0xff] }
  0x2a   : > { %226 = vst [vmem:[#allocation2 + $0x128] sm:$0xff] %v225_v28  ;;  %228 = vst [vmem:[#allocation2 + $0x130] sm:$0xff] %v227_v29  ;;  %v231_v31 = vld [vmem:[%s8093_s6 + $0x1b8] sm:$0xff]  ;;  %v233_v32 = vld [vmem:[%s8093_s6 + $0x1c0] sm:$0xff] }
  0x2b   : > { %230 = vst [vmem:[#allocation2 + $0x138] sm:$0xff] %v229_v30  ;;  %232 = vst [vmem:[#allocation2 + $0x140] sm:$0xff] %v231_v31  ;;  %v235_v33 = vld [vmem:[%s8093_s6 + $0x1c8] sm:$0xff]  ;;  %v237_v34 = vld [vmem:[%s8093_s6 + $0x1d0] sm:$0xff] }
  0x2c   : > { %234 = vst [vmem:[#allocation2 + $0x148] sm:$0xff] %v233_v32  ;;  %v239_v35 = vld [vmem:[%s8093_s6 + $0x1d8] sm:$0xff]  ;;  %236 = vst [vmem:[#allocation2 + $0x150] sm:$0xff] %v235_v33  ;;  %v241_v36 = vld [vmem:[%s8093_s6 + $0x1e0] sm:$0xff] }
  0x2d   : > { %238 = vst [vmem:[#allocation2 + $0x158] sm:$0xff] %v237_v34  ;;  %240 = vst [vmem:[#allocation2 + $0x160] sm:$0xff] %v239_v35  ;;  %v243_v37 = vld [vmem:[%s8093_s6 + $0x1e8] sm:$0xff]  ;;  %v245_v38 = vld [vmem:[%s8093_s6 + $0x1f0] sm:$0xff] }
  0x2e   : > { %242 = vst [vmem:[#allocation2 + $0x168] sm:$0xff] %v241_v36  ;;  %244 = vst [vmem:[#allocation2 + $0x170] sm:$0xff] %v243_v37  ;;  %v247_v39 = vld [vmem:[%s8093_s6 + $0x1f8] sm:$0xff]  ;;  %v249_v40 = vld [vmem:[%s8093_s6 + $0x200] sm:$0xff] }
  0x2f   : > { %246 = vst [vmem:[#allocation2 + $0x178] sm:$0xff] %v245_v38  ;;  %v251_v41 = vld [vmem:[%s8093_s6 + $0x208] sm:$0xff]  ;;  %248 = vst [vmem:[#allocation2 + $0x180] sm:$0xff] %v247_v39  ;;  %v253_v42 = vld [vmem:[%s8093_s6 + $0x210] sm:$0xff] }
  0x30   : > { %250 = vst [vmem:[#allocation2 + $0x188] sm:$0xff] %v249_v40  ;;  %252 = vst [vmem:[#allocation2 + $0x190] sm:$0xff] %v251_v41  ;;  %v255_v43 = vld [vmem:[%s8093_s6 + $0x218] sm:$0xff]  ;;  %v257_v44 = vld [vmem:[%s8093_s6 + $0x220] sm:$0xff] }
  0x31   : > { %254 = vst [vmem:[#allocation2 + $0x198] sm:$0xff] %v253_v42  ;;  %256 = vst [vmem:[#allocation2 + $0x1a0] sm:$0xff] %v255_v43  ;;  %v259_v45 = vld [vmem:[%s8093_s6 + $0x228] sm:$0xff]  ;;  %v261_v46 = vld [vmem:[%s8093_s6 + $0x230] sm:$0xff] }
  0x32   : > { %258 = vst [vmem:[#allocation2 + $0x1a8] sm:$0xff] %v257_v44  ;;  %v263_v47 = vld [vmem:[%s8093_s6 + $0x238] sm:$0xff]  ;;  %260 = vst [vmem:[#allocation2 + $0x1b0] sm:$0xff] %v259_v45 }
  0x33   : > { %262 = vst [vmem:[#allocation2 + $0x1b8] sm:$0xff] %v261_v46  ;;  %264 = vst [vmem:[#allocation2 + $0x1c0] sm:$0xff] %v263_v47 }
  0x34   : > { %272 = vsyncadd [#allocation4], 6144 }
  0x35   : > { %8011 = dma.done.wait [#allocation4], 6144 }
  0x36   : > { %8012 = vsyncadd [#allocation4], 4294961152  ;;  %p5623_p8 = scmp.le.s32.totalorder %s8062_s15, 0 }
  0x37   : > { %s5624_s7 = sadd.s32 (!%p5623_p8), 4294967295, %s5621_s23 }
  0x38   : > { %281 = sbr.rel (%p5623_p8) target bundleno = 73 (0x49), region = 63 }
  0x3f   : > { %s283_s8 = smul.u32 24, %s5624_s7 }
  0x41   : > { %s284_s11 = scalar_lea.vmem %s10287_s0, %s283_s8 }
  0x42   : > { %v319_v48 = vld [vmem:[%s284_s11] sm:$0xff]  ;;  %v321_v49 = vld [vmem:[%s284_s11 + $0x8] sm:$0xff]  ;;  %v323_v50 = vld [vmem:[%s284_s11 + $0x10] sm:$0xff] }
  0x43   : > { %320 = vst [vmem:[#allocation2] sm:$0xff] %v319_v48  ;;  %322 = vst [vmem:[#allocation2 + $0x8] sm:$0xff] %v321_v49  ;;  %v325_v51 = vld [vmem:[%s284_s11 + $0x180] sm:$0xff]  ;;  %v327_v52 = vld [vmem:[%s284_s11 + $0x188] sm:$0xff] }
  0x44   : > { %324 = vst [vmem:[#allocation2 + $0x10] sm:$0xff] %v323_v50  ;;  %v329_v53 = vld [vmem:[%s284_s11 + $0x190] sm:$0xff]  ;;  %326 = vst [vmem:[#allocation2 + $0xf0] sm:$0xff] %v325_v51 }
  0x45   : > { %328 = vst [vmem:[#allocation2 + $0xf8] sm:$0xff] %v327_v52  ;;  %330 = vst [vmem:[#allocation2 + $0x100] sm:$0xff] %v329_v53 }
  0x46   : > { %338 = vsyncadd [#allocation6], 768 }
  0x47   : > { %8013 = dma.done.wait [#allocation6], 768 }
  0x48   : > { %8014 = vsyncadd [#allocation6], 4294966528 }
  0x49 PF: > { %p5625_p9 = scmp.ge.s32.totalorder %s8062_s15, 1 }
  0x4b   : > { %347 = sbr.rel (%p5625_p9) target bundleno = 89 (0x59), region = 102 }
  0x52   : > { %v5628_v54 = vld [vmem:[%s8093_s6 + $0xc0] sm:$0xff]  ;;  %v5629_v55 = vld [vmem:[%s8093_s6 + $0xc8] sm:$0xff]  ;;  %v5630_v56 = vld [vmem:[%s8093_s6 + $0xd0] sm:$0xff] }
  0x53   : > { %387 = vst [vmem:[#allocation2 + $0xd8] sm:$0xff] %v5628_v54  ;;  %389 = vst [vmem:[#allocation2 + $0xe0] sm:$0xff] %v5629_v55  ;;  %v5631_v57 = vld [vmem:[%s8093_s6 + $0x240] sm:$0xff]  ;;  %v5632_v58 = vld [vmem:[%s8093_s6 + $0x248] sm:$0xff] }
  0x54   : > { %391 = vst [vmem:[#allocation2 + $0xe8] sm:$0xff] %v5630_v56  ;;  %v5633_v59 = vld [vmem:[%s8093_s6 + $0x250] sm:$0xff]  ;;  %393 = vst [vmem:[#allocation2 + $0x1c8] sm:$0xff] %v5631_v57 }
  0x55   : > { %395 = vst [vmem:[#allocation2 + $0x1d0] sm:$0xff] %v5632_v58  ;;  %397 = vst [vmem:[#allocation2 + $0x1d8] sm:$0xff] %v5633_v59 }
  0x56   : > { %405 = vsyncadd [#allocation8], 768 }
  0x57   : > { %8015 = dma.done.wait [#allocation8], 768 }
  0x58   : > { %8016 = vsyncadd [#allocation8], 4294966528 }
  0x59 PF: > { %v411_v60 = vlaneseq  ;;  %p5636_p10 = scmp.ne.s32.totalorder %s8062_s15, 0 }
  0x5a   : > { %v8029_v63 = vmov (!%p5636_p10), 0.0  }
  0x5b   : > { %v8156_v61 = vshrl.u32 %v411_v60, 7  ;;  %427 = sbr.rel (%p5636_p10) target bundleno = 98 (0x62), region = 141  ;;  %428 = vst [vmem:[#allocation2] sm:$0xff] (!%p5636_p10), %v8029_v63  ;;  %429 = vst [vmem:[#allocation2 + $0x8] sm:$0xff] (!%p5636_p10), %v8029_v63 }
  0x5c   : > { %430 = vst [vmem:[#allocation2 + $0x10] sm:$0xff] (!%p5636_p10), %v8029_v63  ;;  %431 = vst [vmem:[#allocation2 + $0xf0] sm:$0xff] (!%p5636_p10), %v8029_v63 }
  0x5d   : > { %10358 = vst [vmem:[#allocation13_spill] sm:$0xff] %v8156_v61  ;;  %v8159_v62 = vadd.s32 16, %v8156_v61  ;;  %vm415_vm0 = vcmp.ge.s32.totalorder %v8156_v61, 1  ;;  %432 = vst [vmem:[#allocation2 + $0xf8] sm:$0xff] (!%p5636_p10), %v8029_v63 }
  0x5e   : > { %433 = vst [vmem:[#allocation2 + $0x100] sm:$0xff] (!%p5636_p10), %v8029_v63 }
  0x5f   : > { %10359 = vst [vmem:[#allocation14_spill] sm:$0xff] %v8159_v62  ;;  %vm420_vm1 = vcmp.le.s32.totalorder %v8159_v62, 16 }
  0x62 PF: > { %p5637_p11 = scmp.ne.s32.totalorder %s8062_s15, 1 }
  0x63   : > { %v8030_v0 = vmov (!%p5637_p11), 0.0  }
  0x64   : > { %437 = sbr.rel (%p5637_p11) target bundleno = 107 (0x6b), region = 145  ;;  %439 = vst [vmem:[#allocation2 + $0xd8] sm:$0xff] (!%p5637_p11), %v8030_v0  ;;  %440 = vst [vmem:[#allocation2 + $0xe0] sm:$0xff] (!%p5637_p11), %v8030_v0 }
  0x65   : > { %441 = vst [vmem:[#allocation2 + $0xe8] sm:$0xff] (!%p5637_p11), %v8030_v0  ;;  %442 = vst [vmem:[#allocation2 + $0x1c8] sm:$0xff] (!%p5637_p11), %v8030_v0 }
  0x66   : > { %443 = vst [vmem:[#allocation2 + $0x1d0] sm:$0xff] (!%p5637_p11), %v8030_v0  ;;  %444 = vst [vmem:[#allocation2 + $0x1d8] sm:$0xff] (!%p5637_p11), %v8030_v0 }
  0x6b PF: > { %v493_v1 = vld [vmem:[%s10288_s1] sm:$0xff]  ;;  %v494_v2 = vld [vmem:[%s10288_s1 + $0x8] sm:$0xff]  ;;  %v495_v3 = vld [vmem:[%s10288_s1 + $0x10] sm:$0xff]  ;;  %vm862_vm2 = vcmask 1040384   ;;  %vm1747_vm3 = vcmask 1046528   ;;  %s10179_s22 = scalar_lea.vmem (%p8073_p4), %s10289_s2, %s5622_s30 }
  0x6c   : > { %v7283_v4 = vpack.c.bf16 %v494_v2, %v493_v1  ;;  %v496_v5 = vld [vmem:[%s10288_s1 + $0x18] sm:$0xff]  ;;  %v497_v7 = vld [vmem:[%s10288_s1 + $0x20] sm:$0xff]  ;;  %v498_v8 = vld [vmem:[%s10288_s1 + $0x28] sm:$0xff] }
  0x6d   : > { %v7287_v6 = vpack.c.bf16 %v496_v5, %v495_v3  ;;  %v7291_v9 = vpack.c.bf16 %v498_v8, %v497_v7  ;;  %v8183_v10 = vld [vmem:[#allocation2] sm:$0xff]  ;;  %v8185_v11 = vld [vmem:[#allocation2 + $0xf0] sm:$0xff]  ;;  %v500_v13 = vld [vmem:[%s10288_s1 + $0x38] sm:$0xff] }
  0x6e   : > { %7284 = vmatprep.subr.bf16.mxu0 %v7283_v4  ;;  %7571 = vmatprep.subr.bf16.mxu1 %v7283_v4  ;;  %v499_v12 = vld [vmem:[%s10288_s1 + $0x30] sm:$0xff]  ;;  %v501_v15 = vld [vmem:[%s10288_s1 + $0x40] sm:$0xff]  ;;  %v502_v16 = vld [vmem:[%s10288_s1 + $0x48] sm:$0xff] }
  0x6f   : > { %7286 = vmatpush3.bf16.msra.mxu0 %v7283_v4  ;;  %7579 = vmatpush3.bf16.msra.mxu1 %v7283_v4  ;;  %v7295_v14 = vpack.c.bf16 %v500_v13, %v499_v12  ;;  %v7299_v17 = vpack.c.bf16 %v502_v16, %v501_v15  ;;  %v503_v18 = vld [vmem:[%s10288_s1 + $0x50] sm:$0xff]  ;;  %v504_v19 = vld [vmem:[%s10288_s1 + $0x58] sm:$0xff]  ;;  %v505_v21 = vld [vmem:[%s10288_s1 + $0x60] sm:$0xff] }
  0x70   : > { %7288 = vmatprep.subr.bf16.mxu0 %v7287_v6  ;;  %7572 = vmatprep.subr.bf16.mxu1 %v7287_v6  ;;  %v7303_v20 = vpack.c.bf16 %v504_v19, %v503_v18  ;;  %v506_v22 = vld [vmem:[%s10288_s1 + $0x68] sm:$0xff]  ;;  %v507_v24 = vld [vmem:[%s10288_s1 + $0x70] sm:$0xff]  ;;  %v508_v25 = vld [vmem:[%s10288_s1 + $0x78] sm:$0xff] }
  0x71   : > { %6379 = vmatprep.mubr.f32.mxu0 %v8183_v10  ;;  %6415 = vmatprep.mubr.f32.mxu1 %v8185_v11  ;;  %v7307_v23 = vpack.c.bf16 %v506_v22, %v505_v21  ;;  %v7311_v26 = vpack.c.bf16 %v508_v25, %v507_v24  ;;  %v5654_v27 = vld [vmem:[%s10288_s1 + $0x100] sm:$0xff]  ;;  %v5655_v28 = vld [vmem:[%s10288_s1 + $0x108] sm:$0xff]  ;;  %v5656_v33 = vld [vmem:[%s10288_s1 + $0x110] sm:$0xff] }
  0x72   : > { %v5638_v29 = vld [vmem:[%s10288_s1 + $0x80] sm:$0xff]  ;;  %v5639_v30 = vld [vmem:[%s10288_s1 + $0x88] sm:$0xff]  ;;  %v7347_v31 = vpack.c.bf16 %v5655_v28, %v5654_v27  ;;  %v5657_v34 = vld [vmem:[%s10288_s1 + $0x118] sm:$0xff] }
  0x73   : > { %7290 = vmatpush3.bf16.msra.mxu0 %v7287_v6  ;;  %7580 = vmatpush3.bf16.msra.mxu1 %v7287_v6  ;;  %v7315_v32 = vpack.c.bf16 %v5639_v30, %v5638_v29  ;;  %v5640_v35 = vld [vmem:[%s10288_s1 + $0x90] sm:$0xff]  ;;  %v5641_v36 = vld [vmem:[%s10288_s1 + $0x98] sm:$0xff]  ;;  %v8243_v37 = vld [vmem:[#allocation2 + $0x8] sm:$0xff]  ;;  %v7351_v41 = vpack.c.bf16 %v5657_v34, %v5656_v33 }
  0x74   : > { %7292 = vmatprep.subr.bf16.mxu0 %v7291_v9  ;;  %7573 = vmatprep.subr.bf16.mxu1 %v7291_v9  ;;  %v8245_v38 = vld [vmem:[#allocation2 + $0xf8] sm:$0xff]  ;;  %v8247_v39 = vld [vmem:[#allocation2 + $0x10] sm:$0xff]  ;;  %v8249_v40 = vld [vmem:[#allocation2 + $0x100] sm:$0xff]  ;;  %v7319_v42 = vpack.c.bf16 %v5641_v36, %v5640_v35 }
  0x75   : > { %v5658_v43 = vld [vmem:[%s10288_s1 + $0x120] sm:$0xff]  ;;  %v5659_v44 = vld [vmem:[%s10288_s1 + $0x128] sm:$0xff]  ;;  %v8266_v47 = vld [vmem:[#allocation2 + $0x18] sm:$0xff] }
  0x76   : > { %v5642_v45 = vld [vmem:[%s10288_s1 + $0xa0] sm:$0xff]  ;;  %v5643_v46 = vld [vmem:[%s10288_s1 + $0xa8] sm:$0xff]  ;;  %v8273_v50 = vld [vmem:[#allocation2 + $0x110] sm:$0xff]  ;;  %v7355_v51 = vpack.c.bf16 %v5659_v44, %v5658_v43 }
  0x77   : > { %7294 = vmatpush3.bf16.msra.mxu0 %v7291_v9  ;;  %7581 = vmatpush3.bf16.msra.mxu1 %v7291_v9  ;;  %v8268_v48 = vld [vmem:[#allocation2 + $0x108] sm:$0xff]  ;;  %v8271_v49 = vld [vmem:[#allocation2 + $0x20] sm:$0xff]  ;;  %v7323_v52 = vpack.c.bf16 %v5643_v46, %v5642_v45  ;;  %v5660_v53 = vld [vmem:[%s10288_s1 + $0x130] sm:$0xff] }
  0x78   : > { %7296 = vmatprep.subr.bf16.mxu0 %v7295_v14  ;;  %7574 = vmatprep.subr.bf16.mxu1 %v7295_v14  ;;  %v5661_v54 = vld [vmem:[%s10288_s1 + $0x138] sm:$0xff]  ;;  %v5644_v55 = vld [vmem:[%s10288_s1 + $0xb0] sm:$0xff]  ;;  %v8291_v57 = vld [vmem:[#allocation2 + $0x28] sm:$0xff] }
  0x79   : > { %v5645_v56 = vld [vmem:[%s10288_s1 + $0xb8] sm:$0xff]  ;;  %v8295_v59 = vld [vmem:[#allocation2 + $0x30] sm:$0xff]  ;;  %v8297_v60 = vld [vmem:[#allocation2 + $0x120] sm:$0xff]  ;;  %v7359_v63 = vpack.c.bf16 %v5661_v54, %v5660_v53 }
  0x7a   : > { %v8293_v58 = vld [vmem:[#allocation2 + $0x118] sm:$0xff]  ;;  %v7327_v0 = vpack.c.bf16 %v5645_v56, %v5644_v55  ;;  %v5662_v1 = vld [vmem:[%s10288_s1 + $0x140] sm:$0xff]  ;;  %v5663_v2 = vld [vmem:[%s10288_s1 + $0x148] sm:$0xff] }
  0x7b   : > { %7298 = vmatpush3.bf16.msra.mxu0 %v7295_v14  ;;  %7582 = vmatpush3.bf16.msra.mxu1 %v7295_v14  ;;  %v5646_v3 = vld [vmem:[%s10288_s1 + $0xc0] sm:$0xff]  ;;  %v5647_v4 = vld [vmem:[%s10288_s1 + $0xc8] sm:$0xff]  ;;  %v8315_v5 = vld [vmem:[#allocation2 + $0x38] sm:$0xff]  ;;  %v7363_v9 = vpack.c.bf16 %v5663_v2, %v5662_v1 }
  0x7c   : > { %7300 = vmatprep.subr.bf16.mxu0 %v7299_v17  ;;  %7575 = vmatprep.subr.bf16.mxu1 %v7299_v17  ;;  %v8317_v6 = vld [vmem:[#allocation2 + $0x128] sm:$0xff]  ;;  %v8319_v7 = vld [vmem:[#allocation2 + $0x40] sm:$0xff]  ;;  %v8321_v8 = vld [vmem:[#allocation2 + $0x130] sm:$0xff]  ;;  %v7331_v12 = vpack.c.bf16 %v5647_v4, %v5646_v3 }
  0x7d   : > { %v5664_v13 = vld [vmem:[%s10288_s1 + $0x150] sm:$0xff]  ;;  %v5665_v14 = vld [vmem:[%s10288_s1 + $0x158] sm:$0xff]  ;;  %v5667_v24 = vld [vmem:[%s10288_s1 + $0x168] sm:$0xff] }
  0x7e   : > { %v5648_v15 = vld [vmem:[%s10288_s1 + $0xd0] sm:$0xff]  ;;  %v5649_v16 = vld [vmem:[%s10288_s1 + $0xd8] sm:$0xff]  ;;  %v7367_v21 = vpack.c.bf16 %v5665_v14, %v5664_v13  ;;  %v5650_v25 = vld [vmem:[%s10288_s1 + $0xe0] sm:$0xff] }
  0x7f   : > { %7302 = vmatpush3.bf16.msra.mxu0 %v7299_v17  ;;  %7583 = vmatpush3.bf16.msra.mxu1 %v7299_v17  ;;  %v8339_v17 = vld [vmem:[#allocation2 + $0x48] sm:$0xff]  ;;  %v8341_v18 = vld [vmem:[#allocation2 + $0x138] sm:$0xff]  ;;  %v8343_v19 = vld [vmem:[#allocation2 + $0x50] sm:$0xff]  ;;  %v7335_v22 = vpack.c.bf16 %v5649_v16, %v5648_v15 }
  0x80   : > { %7304 = vmatprep.subr.bf16.mxu0 %v7303_v20  ;;  %7576 = vmatprep.subr.bf16.mxu1 %v7303_v20  ;;  %v8363_v27 = vld [vmem:[#allocation2 + $0x58] sm:$0xff]  ;;  %v8365_v28 = vld [vmem:[#allocation2 + $0x148] sm:$0xff]  ;;  %v8367_v29 = vld [vmem:[#allocation2 + $0x60] sm:$0xff] }
  0x81   : > { %v8369_v30 = vld [vmem:[#allocation2 + $0x150] sm:$0xff]  ;;  %v5669_v34 = vld [vmem:[%s10288_s1 + $0x178] sm:$0xff]  ;;  %v8393_v44 = vld [vmem:[#allocation2 + $0x160] sm:$0xff] }
  0x82   : > { %v5668_v33 = vld [vmem:[%s10288_s1 + $0x170] sm:$0xff]  ;;  %v5653_v36 = vld [vmem:[%s10288_s1 + $0xf8] sm:$0xff]  ;;  %v5670_v53 = vld [vmem:[%s10288_s1 + $0x180] sm:$0xff] }
  0x83   : > { %7306 = vmatpush3.bf16.msra.mxu0 %v7303_v20  ;;  %7584 = vmatpush3.bf16.msra.mxu1 %v7303_v20  ;;  %v8345_v20 = vld [vmem:[#allocation2 + $0x140] sm:$0xff]  ;;  %v5652_v35 = vld [vmem:[%s10288_s1 + $0xf0] sm:$0xff]  ;;  %v7375_v45 = vpack.c.bf16 %v5669_v34, %v5668_v33  ;;  %v5671_v54 = vld [vmem:[%s10288_s1 + $0x188] sm:$0xff] }
  0x84   : > { %7308 = vmatprep.subr.bf16.mxu0 %v7307_v23  ;;  %7577 = vmatprep.subr.bf16.mxu1 %v7307_v23  ;;  %v8391_v43 = vld [vmem:[#allocation2 + $0x70] sm:$0xff]  ;;  %v7343_v46 = vpack.c.bf16 %v5653_v36, %v5652_v35  ;;  %v8411_v55 = vld [vmem:[#allocation2 + $0x78] sm:$0xff]  ;;  %v8413_v56 = vld [vmem:[#allocation2 + $0x168] sm:$0xff]  ;;  %v7379_v2 = vpack.c.bf16 %v5671_v54, %v5670_v53 }
  0x85   : > { %v8423_v3 = vld [vmem:[#allocation2 + $0x88] sm:$0xff]  ;;  %v8425_v4 = vld [vmem:[#allocation2 + $0x178] sm:$0xff]  ;;  %v8439_v15 = vld [vmem:[#allocation2 + $0xa0] sm:$0xff] }
  0x86   : > { %v8435_v13 = vld [vmem:[#allocation2 + $0x98] sm:$0xff]  ;;  %v8437_v14 = vld [vmem:[#allocation2 + $0x188] sm:$0xff]  ;;  %v8441_v16 = vld [vmem:[#allocation2 + $0x190] sm:$0xff] }
  0x87   : > { %7310 = vmatpush3.bf16.msra.mxu0 %v7307_v23  ;;  %7585 = vmatpush3.bf16.msra.mxu1 %v7307_v23  ;;  %v5666_v23 = vld [vmem:[%s10288_s1 + $0x160] sm:$0xff]  ;;  %v5672_v33 = vld [vmem:[%s10288_s1 + $0x190] sm:$0xff]  ;;  %v5673_v34 = vld [vmem:[%s10288_s1 + $0x198] sm:$0xff] }
  0x88   : > { %7312 = vmatprep.subr.bf16.mxu0 %v7311_v26  ;;  %7578 = vmatprep.subr.bf16.mxu1 %v7311_v26  ;;  %v7383_v36 = vpack.c.bf16 %v5673_v34, %v5672_v33  ;;  %v5708_v53 = vld [vmem:[%s10288_s1 + $0x2b0] sm:$0xff]  ;;  %v5709_v54 = vld [vmem:[%s10288_s1 + $0x2b8] sm:$0xff]  ;;  %v5711_v33 = vld [vmem:[%s10288_s1 + $0x2c8] sm:$0xff] }
  0x89   : > { %v5678_v34 = vld [vmem:[%s10288_s1 + $0x1c0] sm:$0xff] }
  0x8a   : > { %v9018_v62 = vld [vmem:[#allocation2 + $0x60] sm:$0xff] }
  0x8b   : > { %7314 = vmatpush3.bf16.msra.mxu0 %v7311_v26  ;;  %7586 = vmatpush3.bf16.msra.mxu1 %v7311_v26  ;;  %v5651_v26 = vld [vmem:[%s10288_s1 + $0xe8] sm:$0xff]  ;;  %10369 = vst [vmem:[#allocation24_spill] sm:$0xff] %v9018_v62 }
  0x8c   : > { %7348 = vmatprep.subr.bf16.mxu0 %v7347_v31  ;;  %7316 = vmatprep.subr.bf16.mxu1 %v7315_v32 }
  0x8e   : > { %6380 = vmatmul.mubr.f32.vlgmr.msra.gmra.mrb[0].mxu0 %v8243_v37  ;;  %6416 = vmatmul.mubr.f32.vlgmr.msra.gmra.mrb[0].mxu1 %v8245_v38 }
  0x8f   : > { %7350 = vmatpush3.bf16.msra.mxu0 %v7347_v31  ;;  %6382 = vmatprep.mubr.f32.mxu0 %v8247_v39  ;;  %v7371_v31 = vpack.c.bf16 %v5667_v24, %v5666_v23  ;;  %v8451_v23 = vld [vmem:[#allocation2 + $0xb0] sm:$0xff]  ;;  %v8453_v24 = vld [vmem:[#allocation2 + $0x1a0] sm:$0xff] }
  0x90   : > { %6418 = vmatprep.mubr.f32.mxu1 %v8249_v40  ;;  %7318 = vmatpush3.bf16.msra.mxu1 %v7315_v32  ;;  %v7339_v32 = vpack.c.bf16 %v5651_v26, %v5650_v25  ;;  %v8459_v25 = vld [vmem:[#allocation2 + $0xb8] sm:$0xff]  ;;  %v8461_v26 = vld [vmem:[#allocation2 + $0x1a8] sm:$0xff] }
  0x91   : > { %7352 = vmatprep.subr.bf16.mxu0 %v7351_v41  ;;  %7320 = vmatprep.subr.bf16.mxu1 %v7319_v42 }
  0x92   : > { %6383 = vmatmul.mubr.f32.gmra.mrb[2].mxu0 %v8266_v47  ;;  %6419 = vmatmul.mubr.f32.gmra.mrb[2].mxu1 %v8268_v48 }
  0x93   : > { %6385 = vmatprep.mubr.f32.mxu0 %v8271_v49  ;;  %6421 = vmatprep.mubr.f32.mxu1 %v8273_v50 }
  0x94   : > { %7354 = vmatpush3.bf16.msra.mxu0 %v7351_v41  ;;  %7322 = vmatpush3.bf16.msra.mxu1 %v7319_v42  ;;  %v8387_v41 = vld [vmem:[#allocation2 + $0x68] sm:$0xff]  ;;  %v8389_v42 = vld [vmem:[#allocation2 + $0x158] sm:$0xff] }
  0x95   : > { %7356 = vmatprep.subr.bf16.mxu0 %v7355_v51  ;;  %7324 = vmatprep.subr.bf16.mxu1 %v7323_v52 }
  0x96   : > { %6386 = vmatmul.mubr.f32.gmra.mrb[4].mxu0 %v8291_v57  ;;  %6422 = vmatmul.mubr.f32.gmra.mrb[4].mxu1 %v8293_v58 }
  0x97   : > { %6388 = vmatprep.mubr.f32.mxu0 %v8295_v59  ;;  %6424 = vmatprep.mubr.f32.mxu1 %v8297_v60 }
  0x98   : > { %7358 = vmatpush3.bf16.msra.mxu0 %v7355_v51  ;;  %7326 = vmatpush3.bf16.msra.mxu1 %v7323_v52  ;;  %v5702_v51 = vld [vmem:[%s10288_s1 + $0x280] sm:$0xff]  ;;  %v5703_v52 = vld [vmem:[%s10288_s1 + $0x288] sm:$0xff] }
  0x99   : > { %7360 = vmatprep.subr.bf16.mxu0 %v7359_v63  ;;  %7328 = vmatprep.subr.bf16.mxu1 %v7327_v0  ;;  %v7443_v1 = vpack.c.bf16 %v5703_v52, %v5702_v51  ;;  %v5674_v51 = vld [vmem:[%s10288_s1 + $0x1a0] sm:$0xff] }
  0x9a   : > { %6389 = vmatmul.mubr.f32.gmra.mrb[6].mxu0 %v8315_v5  ;;  %6425 = vmatmul.mubr.f32.gmra.mrb[6].mxu1 %v8317_v6 }
  0x9b   : > { %6391 = vmatprep.mubr.f32.mxu0 %v8319_v7  ;;  %6427 = vmatprep.mubr.f32.mxu1 %v8321_v8 }
  0x9c   : > { %7362 = vmatpush3.bf16.msra.mxu0 %v7359_v63  ;;  %7330 = vmatpush3.bf16.msra.mxu1 %v7327_v0  ;;  %v8415_v63 = vld [vmem:[#allocation2 + $0x80] sm:$0xff]  ;;  %v8417_v0 = vld [vmem:[#allocation2 + $0x170] sm:$0xff] }
  0x9d   : > { %7364 = vmatprep.subr.bf16.mxu0 %v7363_v9  ;;  %7332 = vmatprep.subr.bf16.mxu1 %v7331_v12 }
  0x9e   : > { %6392 = vmatmul.mubr.f32.gmra.mrb[8].mxu0 %v8339_v17  ;;  %6428 = vmatmul.mubr.f32.gmra.mrb[8].mxu1 %v8341_v18 }
  0x9f   : > { %6394 = vmatprep.mubr.f32.mxu0 %v8343_v19  ;;  %6430 = vmatprep.mubr.f32.mxu1 %v8345_v20 }
  0xa0   : > { %7366 = vmatpush3.bf16.msra.mxu0 %v7363_v9  ;;  %7334 = vmatpush3.bf16.msra.mxu1 %v7331_v12  ;;  %v8427_v9 = vld [vmem:[#allocation2 + $0x90] sm:$0xff]  ;;  %v8429_v12 = vld [vmem:[#allocation2 + $0x180] sm:$0xff] }
  0xa1   : > { %7368 = vmatprep.subr.bf16.mxu0 %v7367_v21  ;;  %7336 = vmatprep.subr.bf16.mxu1 %v7335_v22 }
  0xa2   : > { %6395 = vmatmul.mubr.f32.gmra.mrb[10].mxu0 %v8363_v27  ;;  %6431 = vmatmul.mubr.f32.gmra.mrb[10].mxu1 %v8365_v28 }
  0xa3   : > { %6397 = vmatprep.mubr.f32.mxu0 %v8367_v29  ;;  %6433 = vmatprep.mubr.f32.mxu1 %v8369_v30 }
  0xa4   : > { %7370 = vmatpush3.bf16.msra.mxu0 %v7367_v21  ;;  %7338 = vmatpush3.bf16.msra.mxu1 %v7335_v22  ;;  %v8447_v21 = vld [vmem:[#allocation2 + $0xa8] sm:$0xff]  ;;  %v8449_v22 = vld [vmem:[#allocation2 + $0x198] sm:$0xff] }
  0xa5   : > { %7372 = vmatprep.subr.bf16.mxu0 %v7371_v31  ;;  %7340 = vmatprep.subr.bf16.mxu1 %v7339_v32 }
  0xa6   : > { %6398 = vmatmul.mubr.f32.gmra.mrb[12].mxu0 %v8387_v41  ;;  %6434 = vmatmul.mubr.f32.gmra.mrb[12].mxu1 %v8389_v42 }
  0xa7   : > { %6400 = vmatprep.mubr.f32.mxu0 %v8391_v43  ;;  %6436 = vmatprep.mubr.f32.mxu1 %v8393_v44 }
  0xa8   : > { %7374 = vmatpush3.bf16.msra.mxu0 %v7371_v31  ;;  %7342 = vmatpush3.bf16.msra.mxu1 %v7339_v32  ;;  %v5704_v31 = vld [vmem:[%s10288_s1 + $0x290] sm:$0xff]  ;;  %v5705_v32 = vld [vmem:[%s10288_s1 + $0x298] sm:$0xff] }
  0xa9   : > { %7376 = vmatprep.subr.bf16.mxu0 %v7375_v45  ;;  %7344 = vmatprep.subr.bf16.mxu1 %v7343_v46  ;;  %v7447_v35 = vpack.c.bf16 %v5705_v32, %v5704_v31  ;;  %v5710_v32 = vld [vmem:[%s10288_s1 + $0x2c0] sm:$0xff] }
  0xaa   : > { %6401 = vmatmul.mubr.f32.gmra.mrb[14].mxu0 %v8411_v55  ;;  %6437 = vmatmul.mubr.f32.gmra.mrb[14].mxu1 %v8413_v56 }
  0xab   : > { %6403 = vmatprep.mubr.f32.mxu0 %v8415_v63  ;;  %6439 = vmatprep.mubr.f32.mxu1 %v8417_v0 }
  0xac   : > { %7378 = vmatpush3.bf16.msra.mxu0 %v7375_v45  ;;  %7346 = vmatpush3.bf16.msra.mxu1 %v7343_v46  ;;  %v5706_v45 = vld [vmem:[%s10288_s1 + $0x2a0] sm:$0xff]  ;;  %v5707_v46 = vld [vmem:[%s10288_s1 + $0x2a8] sm:$0xff] }
  0xad   : > { %7444 = vmatprep.subr.bf16.mxu0 %v7443_v1  ;;  %7380 = vmatprep.subr.bf16.mxu1 %v7379_v2 }
  0xae   : > { %6404 = vmatmul.mubr.f32.gmra.mrb[16].mxu0 %v8423_v3  ;;  %6440 = vmatmul.mubr.f32.gmra.mrb[16].mxu1 %v8425_v4 }
  0xaf   : > { %6406 = vmatprep.mubr.f32.mxu0 %v8427_v9  ;;  %6442 = vmatprep.mubr.f32.mxu1 %v8429_v12 }
  0xb2   : > { %6407 = vmatmul.mubr.f32.gmra.mrb[18].mxu0 %v8435_v13  ;;  %6443 = vmatmul.mubr.f32.gmra.mrb[18].mxu1 %v8437_v14 }
  0xb3   : > { %6409 = vmatprep.mubr.f32.mxu0 %v8439_v15  ;;  %6445 = vmatprep.mubr.f32.mxu1 %v8441_v16 }
  0xb6   : > { %6410 = vmatmul.mubr.f32.gmra.mrb[20].mxu0 %v8447_v21  ;;  %6446 = vmatmul.mubr.f32.gmra.mrb[20].mxu1 %v8449_v22 }
  0xb7   : > { %6412 = vmatprep.mubr.f32.mxu0 %v8451_v23  ;;  %6448 = vmatprep.mubr.f32.mxu1 %v8453_v24 }
  0xba   : > { %6413 = vmatmul.mubr.f32.gmra.mrb[22].mxu0 %v8459_v25  ;;  %6449 = vmatmul.mubr.f32.gmra.mrb[22].mxu1 %v8461_v26 }
  0xbb   : > { %6483 = vmatprep.mubr.f32.mxu1 %v8183_v10  ;;  %6587 = vmatprep.mubr.f32.mxu0 %v8183_v10  ;;  %v5675_v10 = vld [vmem:[%s10288_s1 + $0x1a8] sm:$0xff] }
  0xbc   : > { %v7387_v52 = vpack.c.bf16 %v5675_v10, %v5674_v51  ;;  %v5713_v51 = vld [vmem:[%s10288_s1 + $0x2d8] sm:$0xff]  ;;  %v5680_v10 = vld [vmem:[%s10288_s1 + $0x1d0] sm:$0xff] }
  0xbe   : > { %6484 = vmatmul.mubr.f32.vlgmr.msra.gmra.mrb[24].mxu1 %v8243_v37  ;;  %6588 = vmatmul.mubr.f32.vlgmr.msra.gmra.mrb[24].mxu0 %v8243_v37  ;;  %v7451_v37 = vpack.c.bf16 %v5707_v46, %v5706_v45  ;;  %v5712_v46 = vld [vmem:[%s10288_s1 + $0x2d0] sm:$0xff] }
  0xbf   : > { %7446 = vmatpush3.bf16.msra.mxu0 %v7443_v1  ;;  %6486 = vmatprep.mubr.f32.mxu1 %v8247_v39  ;;  %v5677_v1 = vld [vmem:[%s10288_s1 + $0x1b8] sm:$0xff] }
  0xc0   : > { %6590 = vmatprep.mubr.f32.mxu0 %v8247_v39  ;;  %7382 = vmatpush3.bf16.msra.mxu1 %v7379_v2  ;;  %v5676_v39 = vld [vmem:[%s10288_s1 + $0x1b0] sm:$0xff]  ;;  %v7455_v2 = vpack.c.bf16 %v5709_v54, %v5708_v53  ;;  %v5714_v54 = vld [vmem:[%s10288_s1 + $0x2e0] sm:$0xff] }
  0xc1   : > { %7448 = vmatprep.subr.bf16.mxu0 %v7447_v35  ;;  %7384 = vmatprep.subr.bf16.mxu1 %v7383_v36  ;;  %v7391_v31 = vpack.c.bf16 %v5677_v1, %v5676_v39  ;;  %v5715_v39 = vld [vmem:[%s10288_s1 + $0x2e8] sm:$0xff]  ;;  %v5682_v1 = vld [vmem:[%s10288_s1 + $0x1e0] sm:$0xff] }
  0xc2   : > { %6487 = vmatmul.mubr.f32.gmra.mrb[26].mxu1 %v8266_v47  ;;  %6591 = vmatmul.mubr.f32.gmra.mrb[26].mxu0 %v8266_v47 }
  0xc3   : > { %6489 = vmatprep.mubr.f32.mxu1 %v8271_v49  ;;  %6593 = vmatprep.mubr.f32.mxu0 %v8271_v49 }
  0xc4   : > { %7450 = vmatpush3.bf16.msra.mxu0 %v7447_v35  ;;  %7386 = vmatpush3.bf16.msra.mxu1 %v7383_v36  ;;  %v5679_v35 = vld [vmem:[%s10288_s1 + $0x1c8] sm:$0xff]  ;;  %v7459_v36 = vpack.c.bf16 %v5711_v33, %v5710_v32  ;;  %v5716_v33 = vld [vmem:[%s10288_s1 + $0x2f0] sm:$0xff] }
  0xc5   : > { %7452 = vmatprep.subr.bf16.mxu0 %v7451_v37  ;;  %7388 = vmatprep.subr.bf16.mxu1 %v7387_v52  ;;  %v7395_v45 = vpack.c.bf16 %v5679_v35, %v5678_v34  ;;  %v5717_v34 = vld [vmem:[%s10288_s1 + $0x2f8] sm:$0xff]  ;;  %v5684_v35 = vld [vmem:[%s10288_s1 + $0x1f0] sm:$0xff] }
  0xc6   : > { %6490 = vmatmul.mubr.f32.gmra.mrb[28].mxu1 %v8291_v57  ;;  %6594 = vmatmul.mubr.f32.gmra.mrb[28].mxu0 %v8291_v57 }
  0xc7   : > { %6492 = vmatprep.mubr.f32.mxu1 %v8295_v59  ;;  %6596 = vmatprep.mubr.f32.mxu0 %v8295_v59 }
  0xc8   : > { %7454 = vmatpush3.bf16.msra.mxu0 %v7451_v37  ;;  %7390 = vmatpush3.bf16.msra.mxu1 %v7387_v52  ;;  %v5681_v37 = vld [vmem:[%s10288_s1 + $0x1d8] sm:$0xff]  ;;  %v7463_v52 = vpack.c.bf16 %v5713_v51, %v5712_v46  ;;  %v5718_v51 = vld [vmem:[%s10288_s1 + $0x300] sm:$0xff] }
  0xc9   : > { %7456 = vmatprep.subr.bf16.mxu0 %v7455_v2  ;;  %7392 = vmatprep.subr.bf16.mxu1 %v7391_v31  ;;  %v7399_v53 = vpack.c.bf16 %v5681_v37, %v5680_v10  ;;  %v5719_v10 = vld [vmem:[%s10288_s1 + $0x308] sm:$0xff]  ;;  %v5686_v37 = vld [vmem:[%s10288_s1 + $0x200] sm:$0xff] }
  0xca   : > { %6493 = vmatmul.mubr.f32.gmra.mrb[30].mxu1 %v8315_v5  ;;  %6597 = vmatmul.mubr.f32.gmra.mrb[30].mxu0 %v8315_v5 }
  0xcb   : > { %6495 = vmatprep.mubr.f32.mxu1 %v8319_v7  ;;  %6599 = vmatprep.mubr.f32.mxu0 %v8319_v7 }
  0xcc   : > { %7458 = vmatpush3.bf16.msra.mxu0 %v7455_v2  ;;  %7394 = vmatpush3.bf16.msra.mxu1 %v7391_v31  ;;  %v5683_v2 = vld [vmem:[%s10288_s1 + $0x1e8] sm:$0xff]  ;;  %v7467_v31 = vpack.c.bf16 %v5715_v39, %v5714_v54  ;;  %v5689_v39 = vld [vmem:[%s10288_s1 + $0x218] sm:$0xff] }
  0xcd   : > { %7460 = vmatprep.subr.bf16.mxu0 %v7459_v36  ;;  %7396 = vmatprep.subr.bf16.mxu1 %v7395_v45  ;;  %v7403_v32 = vpack.c.bf16 %v5683_v2, %v5682_v1 }
  0xce   : > { %6496 = vmatmul.mubr.f32.gmra.mrb[32].mxu1 %v8339_v17  ;;  %6600 = vmatmul.mubr.f32.gmra.mrb[32].mxu0 %v8339_v17 }
  0xcf   : > { %6498 = vmatprep.mubr.f32.mxu1 %v8343_v19  ;;  %6602 = vmatprep.mubr.f32.mxu0 %v8343_v19 }
  0xd0   : > { %7462 = vmatpush3.bf16.msra.mxu0 %v7459_v36  ;;  %7398 = vmatpush3.bf16.msra.mxu1 %v7395_v45  ;;  %v5685_v36 = vld [vmem:[%s10288_s1 + $0x1f8] sm:$0xff]  ;;  %v7471_v45 = vpack.c.bf16 %v5717_v34, %v5716_v33  ;;  %v5690_v33 = vld [vmem:[%s10288_s1 + $0x220] sm:$0xff] }
  0xd1   : > { %7464 = vmatprep.subr.bf16.mxu0 %v7463_v52  ;;  %7400 = vmatprep.subr.bf16.mxu1 %v7399_v53  ;;  %v7407_v46 = vpack.c.bf16 %v5685_v36, %v5684_v35  ;;  %v5724_v35 = vld [vmem:[%s10288_s1 + $0x330] sm:$0xff]  ;;  %v5725_v36 = vld [vmem:[%s10288_s1 + $0x338] sm:$0xff] }
  0xd2   : > { %6499 = vmatmul.mubr.f32.gmra.mrb[34].mxu1 %v8363_v27  ;;  %6603 = vmatmul.mubr.f32.gmra.mrb[34].mxu0 %v8363_v27 }
  0xd3   : > { %6501 = vmatprep.mubr.f32.mxu1 %v8367_v29  ;;  %6605 = vmatprep.mubr.f32.mxu0 %v8367_v29 }
  0xd4   : > { %7466 = vmatpush3.bf16.msra.mxu0 %v7463_v52  ;;  %7402 = vmatpush3.bf16.msra.mxu1 %v7399_v53  ;;  %v5687_v52 = vld [vmem:[%s10288_s1 + $0x208] sm:$0xff]  ;;  %v8591_v53 = vpack.c.bf16 %v5719_v10, %v5718_v51  ;;  %v5726_v51 = vld [vmem:[%s10288_s1 + $0x340] sm:$0xff] }
  0xd5   : > { %7468 = vmatprep.subr.bf16.mxu0 %v7467_v31  ;;  %7404 = vmatprep.subr.bf16.mxu1 %v7403_v32  ;;  %v8593_v54 = vpack.c.bf16 %v5687_v52, %v5686_v37  ;;  %v5727_v10 = vld [vmem:[%s10288_s1 + $0x348] sm:$0xff] }
  0xd6   : > { %6502 = vmatmul.mubr.f32.gmra.mrb[36].mxu1 %v8387_v41  ;;  %6606 = vmatmul.mubr.f32.gmra.mrb[36].mxu0 %v8387_v41  ;;  %v5695_v37 = vld [vmem:[%s10288_s1 + $0x248] sm:$0xff] }
  0xd7   : > { %6504 = vmatprep.mubr.f32.mxu1 %v8391_v43  ;;  %6608 = vmatprep.mubr.f32.mxu0 %v8391_v43 }
  0xd8   : > { %7470 = vmatpush3.bf16.msra.mxu0 %v7467_v31  ;;  %7406 = vmatpush3.bf16.msra.mxu1 %v7403_v32  ;;  %v5722_v31 = vld [vmem:[%s10288_s1 + $0x320] sm:$0xff]  ;;  %v5723_v32 = vld [vmem:[%s10288_s1 + $0x328] sm:$0xff] }
  0xd9   : > { %7472 = vmatprep.subr.bf16.mxu0 %v7471_v45  ;;  %7408 = vmatprep.subr.bf16.mxu1 %v7407_v46 }
  0xda   : > { %6505 = vmatmul.mubr.f32.gmra.mrb[38].mxu1 %v8411_v55  ;;  %6609 = vmatmul.mubr.f32.gmra.mrb[38].mxu0 %v8411_v55 }
  0xdb   : > { %6507 = vmatprep.mubr.f32.mxu1 %v8415_v63  ;;  %6611 = vmatprep.mubr.f32.mxu0 %v8415_v63 }
  0xdc   : > { %7474 = vmatpush3.bf16.msra.mxu0 %v7471_v45  ;;  %7410 = vmatpush3.bf16.msra.mxu1 %v7407_v46  ;;  %v5693_v45 = vld [vmem:[%s10288_s1 + $0x238] sm:$0xff] }
  0xdd   : > { %7476 = vmatprep.subr.bf16.mxu0 %v8591_v53  ;;  %7412 = vmatprep.subr.bf16.mxu1 %v8593_v54 }
  0xde   : > { %6508 = vmatmul.mubr.f32.gmra.mrb[40].mxu1 %v8423_v3  ;;  %6612 = vmatmul.mubr.f32.gmra.mrb[40].mxu0 %v8423_v3 }
  0xdf   : > { %6510 = vmatprep.mubr.f32.mxu1 %v8427_v9  ;;  %6614 = vmatprep.mubr.f32.mxu0 %v8427_v9 }
  0xe2   : > { %6511 = vmatmul.mubr.f32.gmra.mrb[42].mxu1 %v8435_v13  ;;  %6615 = vmatmul.mubr.f32.gmra.mrb[42].mxu0 %v8435_v13 }
  0xe3   : > { %6513 = vmatprep.mubr.f32.mxu1 %v8439_v15  ;;  %6617 = vmatprep.mubr.f32.mxu0 %v8439_v15 }
  0xe6   : > { %6514 = vmatmul.mubr.f32.gmra.mrb[44].mxu1 %v8447_v21  ;;  %6618 = vmatmul.mubr.f32.gmra.mrb[44].mxu0 %v8447_v21 }
  0xe7   : > { %6516 = vmatprep.mubr.f32.mxu1 %v8451_v23  ;;  %6620 = vmatprep.mubr.f32.mxu0 %v8451_v23 }
  0xea   : > { %6517 = vmatmul.mubr.f32.gmra.mrb[46].mxu1 %v8459_v25  ;;  %6621 = vmatmul.mubr.f32.gmra.mrb[46].mxu0 %v8459_v25 }
  0xeb   : > { %6519 = vmatprep.mubr.f32.mxu1 %v8185_v11  ;;  %6623 = vmatprep.mubr.f32.mxu0 %v8185_v11  ;;  %v5720_v11 = vld [vmem:[%s10288_s1 + $0x310] sm:$0xff] }
  0xee   : > { %6520 = vmatmul.mubr.f32.gmra.mrb[48].mxu1 %v8245_v38  ;;  %6624 = vmatmul.mubr.f32.gmra.mrb[48].mxu0 %v8245_v38  ;;  %v5721_v38 = vld [vmem:[%s10288_s1 + $0x318] sm:$0xff] }
  0xef   : > { %6522 = vmatprep.mubr.f32.mxu1 %v8249_v40  ;;  %6626 = vmatprep.mubr.f32.mxu0 %v8249_v40  ;;  %v5688_v40 = vld [vmem:[%s10288_s1 + $0x210] sm:$0xff]  ;;  %v7479_v1 = vpack.c.bf16 %v5721_v38, %v5720_v11  ;;  %v5697_v11 = vld [vmem:[%s10288_s1 + $0x258] sm:$0xff] }
  0xf0   : > { %v7415_v2 = vpack.c.bf16 %v5689_v39, %v5688_v40  ;;  %v5730_v40 = vld [vmem:[%s10288_s1 + $0x360] sm:$0xff]  ;;  %v5731_v39 = vld [vmem:[%s10288_s1 + $0x368] sm:$0xff] }
  0xf2   : > { %6523 = vmatmul.mubr.f32.gmra.mrb[50].mxu1 %v8268_v48  ;;  %6627 = vmatmul.mubr.f32.gmra.mrb[50].mxu0 %v8268_v48 }
  0xf3   : > { %6525 = vmatprep.mubr.f32.mxu1 %v8273_v50  ;;  %6629 = vmatprep.mubr.f32.mxu0 %v8273_v50 }
  0xf6   : > { %6526 = vmatmul.mubr.f32.gmra.mrb[52].mxu1 %v8293_v58  ;;  %6630 = vmatmul.mubr.f32.gmra.mrb[52].mxu0 %v8293_v58 }
  0xf7   : > { %6528 = vmatprep.mubr.f32.mxu1 %v8297_v60  ;;  %6632 = vmatprep.mubr.f32.mxu0 %v8297_v60 }
  0xfa   : > { %6529 = vmatmul.mubr.f32.gmra.mrb[54].mxu1 %v8317_v6  ;;  %6633 = vmatmul.mubr.f32.gmra.mrb[54].mxu0 %v8317_v6 }
  0xfb   : > { %6531 = vmatprep.mubr.f32.mxu1 %v8321_v8  ;;  %6635 = vmatprep.mubr.f32.mxu0 %v8321_v8 }
  0xfe   : > { %6532 = vmatmul.mubr.f32.gmra.mrb[56].mxu1 %v8341_v18  ;;  %6636 = vmatmul.mubr.f32.gmra.mrb[56].mxu0 %v8341_v18 }
  0xff   : > { %6534 = vmatprep.mubr.f32.mxu1 %v8345_v20  ;;  %6638 = vmatprep.mubr.f32.mxu0 %v8345_v20 }
 0x102   : > { %6535 = vmatmul.mubr.f32.gmra.mrb[58].mxu1 %v8365_v28  ;;  %6639 = vmatmul.mubr.f32.gmra.mrb[58].mxu0 %v8365_v28 }
 0x103   : > { %6537 = vmatprep.mubr.f32.mxu1 %v8369_v30  ;;  %6641 = vmatprep.mubr.f32.mxu0 %v8369_v30 }
 0x106   : > { %6538 = vmatmul.mubr.f32.gmra.mrb[60].mxu1 %v8389_v42  ;;  %6642 = vmatmul.mubr.f32.gmra.mrb[60].mxu0 %v8389_v42 }
 0x107   : > { %6540 = vmatprep.mubr.f32.mxu1 %v8393_v44  ;;  %6644 = vmatprep.mubr.f32.mxu0 %v8393_v44 }
 0x10a   : > { %6541 = vmatmul.mubr.f32.gmra.mrb[62].mxu1 %v8413_v56  ;;  %6645 = vmatmul.mubr.f32.gmra.mrb[62].mxu0 %v8413_v56 }
 0x10b   : > { %6543 = vmatprep.mubr.f32.mxu1 %v8417_v0  ;;  %6647 = vmatprep.mubr.f32.mxu0 %v8417_v0 }
 0x10e   : > { %6544 = vmatmul.mubr.f32.gmra.mrb[64].mxu1 %v8425_v4  ;;  %6648 = vmatmul.mubr.f32.gmra.mrb[64].mxu0 %v8425_v4 }
 0x10f   : > { %6546 = vmatprep.mubr.f32.mxu1 %v8429_v12  ;;  %6650 = vmatprep.mubr.f32.mxu0 %v8429_v12 }
 0x112   : > { %6547 = vmatmul.mubr.f32.gmra.mrb[66].mxu1 %v8437_v14  ;;  %6651 = vmatmul.mubr.f32.gmra.mrb[66].mxu0 %v8437_v14 }
 0x113   : > { %6549 = vmatprep.mubr.f32.mxu1 %v8441_v16  ;;  %6653 = vmatprep.mubr.f32.mxu0 %v8441_v16 }
 0x116   : > { %6550 = vmatmul.mubr.f32.gmra.mrb[68].mxu1 %v8449_v22  ;;  %6654 = vmatmul.mubr.f32.gmra.mrb[68].mxu0 %v8449_v22 }
 0x117   : > { %6552 = vmatprep.mubr.f32.mxu1 %v8453_v24  ;;  %6656 = vmatprep.mubr.f32.mxu0 %v8453_v24 }
 0x11a   : > { %6553 = vmatmul.mubr.f32.gmra.mrb[70].mxu1 %v8461_v26  ;;  %6657 = vmatmul.mubr.f32.gmra.mrb[70].mxu0 %v8461_v26 }
 0x11b   : > { %6691 = vmatprep.mubr.f32.mxu1 %v8266_v47  ;;  %6899 = vmatprep.mubr.f32.mxu0 %v8266_v47  ;;  %v5691_v47 = vld [vmem:[%s10288_s1 + $0x228] sm:$0xff] }
 0x11c   : > { %v7419_v34 = vpack.c.bf16 %v5691_v47, %v5690_v33  ;;  %v5701_v33 = vld [vmem:[%s10288_s1 + $0x278] sm:$0xff] }
 0x11e   : > { %6692 = vmatmul.mubr.f32.vlgmr.msra.gmra.mrb[72].mxu1 %v8271_v49  ;;  %6900 = vmatmul.mubr.f32.vlgmr.msra.gmra.mrb[72].mxu0 %v8271_v49  ;;  %v7483_v49 = vpack.c.bf16 %v5723_v32, %v5722_v31  ;;  %v5732_v31 = vld [vmem:[%s10288_s1 + $0x370] sm:$0xff]  ;;  %v5733_v32 = vld [vmem:[%s10288_s1 + $0x378] sm:$0xff] }
 0x11f   : > { %7478 = vmatpush3.bf16.msra.mxu0 %v8591_v53  ;;  %6694 = vmatprep.mubr.f32.mxu1 %v8291_v57  ;;  %v5728_v53 = vld [vmem:[%s10288_s1 + $0x350] sm:$0xff] }
 0x120   : > { %6902 = vmatprep.mubr.f32.mxu0 %v8291_v57  ;;  %7414 = vmatpush3.bf16.msra.mxu1 %v8593_v54  ;;  %v5692_v57 = vld [vmem:[%s10288_s1 + $0x230] sm:$0xff]  ;;  %v5729_v54 = vld [vmem:[%s10288_s1 + $0x358] sm:$0xff] }
 0x121   : > { %7480 = vmatprep.subr.bf16.mxu0 %v7479_v1  ;;  %7416 = vmatprep.subr.bf16.mxu1 %v7415_v2  ;;  %v7423_v46 = vpack.c.bf16 %v5693_v45, %v5692_v57 }
 0x122   : > { %6695 = vmatmul.mubr.f32.gmra.mrb[74].mxu1 %v8295_v59  ;;  %6903 = vmatmul.mubr.f32.gmra.mrb[74].mxu0 %v8295_v59  ;;  %v7487_v59 = vpack.c.bf16 %v5725_v36, %v5724_v35  ;;  %v5735_v35 = vld [vmem:[%s10288_s1 + $0x388] sm:$0xff] }
 0x123   : > { %6697 = vmatprep.mubr.f32.mxu1 %v8315_v5  ;;  %6905 = vmatprep.mubr.f32.mxu0 %v8315_v5  ;;  %v5694_v5 = vld [vmem:[%s10288_s1 + $0x240] sm:$0xff] }
 0x124   : > { %7482 = vmatpush3.bf16.msra.mxu0 %v7479_v1  ;;  %7418 = vmatpush3.bf16.msra.mxu1 %v7415_v2  ;;  %v7427_v52 = vpack.c.bf16 %v5695_v37, %v5694_v5  ;;  %v5699_v1 = vld [vmem:[%s10288_s1 + $0x268] sm:$0xff] }
 0x125   : > { %7484 = vmatprep.subr.bf16.mxu0 %v7483_v49  ;;  %7420 = vmatprep.subr.bf16.mxu1 %v7419_v34 }
 0x126   : > { %6698 = vmatmul.mubr.f32.gmra.mrb[76].mxu1 %v8319_v7  ;;  %6906 = vmatmul.mubr.f32.gmra.mrb[76].mxu0 %v8319_v7  ;;  %v7491_v7 = vpack.c.bf16 %v5727_v10, %v5726_v51 }
 0x127   : > { %6700 = vmatprep.mubr.f32.mxu1 %v8339_v17  ;;  %6908 = vmatprep.mubr.f32.mxu0 %v8339_v17  ;;  %v5696_v17 = vld [vmem:[%s10288_s1 + $0x250] sm:$0xff] }
 0x128   : > { %7486 = vmatpush3.bf16.msra.mxu0 %v7483_v49  ;;  %7422 = vmatpush3.bf16.msra.mxu1 %v7419_v34  ;;  %v7431_v38 = vpack.c.bf16 %v5697_v11, %v5696_v17  ;;  %v5750_v49 = vld [vmem:[%s10288_s1 + $0x400] sm:$0xff]  ;;  %v5751_v34 = vld [vmem:[%s10288_s1 + $0x408] sm:$0xff] }
 0x129   : > { %7488 = vmatprep.subr.bf16.mxu0 %v7487_v59  ;;  %7424 = vmatprep.subr.bf16.mxu1 %v7423_v46 }
 0x12a   : > { %6701 = vmatmul.mubr.f32.gmra.mrb[78].mxu1 %v8343_v19  ;;  %6909 = vmatmul.mubr.f32.gmra.mrb[78].mxu0 %v8343_v19  ;;  %v7495_v19 = vpack.c.bf16 %v5729_v54, %v5728_v53 }
 0x12b   : > { %6703 = vmatprep.mubr.f32.mxu1 %v8363_v27  ;;  %6911 = vmatprep.mubr.f32.mxu0 %v8363_v27  ;;  %v5698_v27 = vld [vmem:[%s10288_s1 + $0x260] sm:$0xff] }
 0x12c   : > { %7490 = vmatpush3.bf16.msra.mxu0 %v7487_v59  ;;  %7426 = vmatpush3.bf16.msra.mxu1 %v7423_v46  ;;  %v7435_v2 = vpack.c.bf16 %v5699_v1, %v5698_v27 }
 0x12d   : > { %7492 = vmatprep.subr.bf16.mxu0 %v7491_v7  ;;  %7428 = vmatprep.subr.bf16.mxu1 %v7427_v52 }
 0x12e   : > { %6704 = vmatmul.mubr.f32.gmra.mrb[80].mxu1 %v8367_v29  ;;  %6912 = vmatmul.mubr.f32.gmra.mrb[80].mxu0 %v8367_v29  ;;  %v7499_v29 = vpack.c.bf16 %v5731_v39, %v5730_v40 }
 0x12f   : > { %6706 = vmatprep.mubr.f32.mxu1 %v8387_v41  ;;  %6914 = vmatprep.mubr.f32.mxu0 %v8387_v41  ;;  %v5700_v41 = vld [vmem:[%s10288_s1 + $0x270] sm:$0xff] }
 0x130   : > { %7494 = vmatpush3.bf16.msra.mxu0 %v7491_v7  ;;  %7430 = vmatpush3.bf16.msra.mxu1 %v7427_v52  ;;  %v7439_v47 = vpack.c.bf16 %v5701_v33, %v5700_v41 }
 0x131   : > { %7496 = vmatprep.subr.bf16.mxu0 %v7495_v19  ;;  %7432 = vmatprep.subr.bf16.mxu1 %v7431_v38 }
 0x132   : > { %6707 = vmatmul.mubr.f32.gmra.mrb[82].mxu1 %v8391_v43  ;;  %6915 = vmatmul.mubr.f32.gmra.mrb[82].mxu0 %v8391_v43  ;;  %v7503_v43 = vpack.c.bf16 %v5733_v32, %v5732_v31 }
 0x133   : > { %6709 = vmatprep.mubr.f32.mxu1 %v8411_v55  ;;  %6917 = vmatprep.mubr.f32.mxu0 %v8411_v55  ;;  %v5734_v55 = vld [vmem:[%s10288_s1 + $0x380] sm:$0xff] }
 0x134   : > { %7498 = vmatpush3.bf16.msra.mxu0 %v7495_v19  ;;  %7434 = vmatpush3.bf16.msra.mxu1 %v7431_v38  ;;  %v8793_v36 = vpack.c.bf16 %v5735_v35, %v5734_v55  ;;  %v8915_v35 = vld [vmem:[#allocation2 + $0x1b0] sm:$0xff] }
 0x135   : > { %7500 = vmatprep.subr.bf16.mxu0 %v7499_v29  ;;  %7436 = vmatprep.subr.bf16.mxu1 %v7435_v2 }
 0x136   : > { %6710 = vmatmul.mubr.f32.gmra.mrb[84].mxu1 %v8415_v63  ;;  %6918 = vmatmul.mubr.f32.gmra.mrb[84].mxu0 %v8415_v63  ;;  %v8791_v63 = vpack.c.bf16 %v5751_v34, %v5750_v49 }
 0x137   : > { %6712 = vmatprep.mubr.f32.mxu1 %v8423_v3  ;;  %6920 = vmatprep.mubr.f32.mxu0 %v8423_v3  ;;  %v8809_v3 = vld [vmem:[#allocation2 + $0xc0] sm:$0xff] }
 0x138   : > { %7502 = vmatpush3.bf16.msra.mxu0 %v7499_v29  ;;  %7438 = vmatpush3.bf16.msra.mxu1 %v7435_v2 }
 0x139   : > { %7504 = vmatprep.subr.bf16.mxu0 %v7503_v43  ;;  %7440 = vmatprep.subr.bf16.mxu1 %v7439_v47 }
 0x13a   : > { %6713 = vmatmul.mubr.f32.gmra.mrb[86].mxu1 %v8427_v9  ;;  %6921 = vmatmul.mubr.f32.gmra.mrb[86].mxu0 %v8427_v9  ;;  %v8811_v9 = vld [vmem:[#allocation2 + $0xc8] sm:$0xff] }
 0x13b   : > { %6715 = vmatprep.mubr.f32.mxu1 %v8435_v13  ;;  %6923 = vmatprep.mubr.f32.mxu0 %v8435_v13  ;;  %v8817_v13 = vld [vmem:[#allocation2 + $0xd0] sm:$0xff] }
 0x13c   : > { %7506 = vmatpush3.bf16.msra.mxu0 %v7503_v43  ;;  %7442 = vmatpush3.bf16.msra.mxu1 %v7439_v47 }
 0x13d   : > { %7540 = vmatprep.subr.bf16.mxu0 %v8791_v63  ;;  %7508 = vmatprep.subr.bf16.mxu1 %v8793_v36 }
 0x13e   : > { %6716 = vmatmul.mubr.f32.gmra.mrb[88].mxu1 %v8439_v15  ;;  %6924 = vmatmul.mubr.f32.gmra.mrb[88].mxu0 %v8439_v15 }
 0x13f   : > { %6718 = vmatprep.mubr.f32.mxu1 %v8447_v21  ;;  %6926 = vmatprep.mubr.f32.mxu0 %v8447_v21 }
 0x142   : > { %6719 = vmatmul.mubr.f32.gmra.mrb[90].mxu1 %v8451_v23  ;;  %6927 = vmatmul.mubr.f32.gmra.mrb[90].mxu0 %v8451_v23 }
 0x143   : > { %6721 = vmatprep.mubr.f32.mxu1 %v8459_v25  ;;  %6929 = vmatprep.mubr.f32.mxu0 %v8459_v25 }
 0x146   : > { %6722 = vmatmul.mubr.f32.gmra.mrb[92].mxu1 %v8809_v3  ;;  %6930 = vmatmul.mubr.f32.gmra.mrb[92].mxu0 %v8809_v3 }
 0x147   : > { %6724 = vmatprep.mubr.f32.mxu1 %v8811_v9  ;;  %6932 = vmatprep.mubr.f32.mxu0 %v8811_v9 }
 0x14a   : > { %6725 = vmatmul.mubr.f32.gmra.mrb[94].mxu1 %v8817_v13  ;;  %6933 = vmatmul.mubr.f32.gmra.mrb[94].mxu0 %v8817_v13 }
 0x14b   : > { %6727 = vmatprep.mubr.f32.mxu1 %v8268_v48  ;;  %6935 = vmatprep.mubr.f32.mxu0 %v8268_v48 }
 0x14e   : > { %6728 = vmatmul.mubr.f32.gmra.mrb[96].mxu1 %v8273_v50  ;;  %6936 = vmatmul.mubr.f32.gmra.mrb[96].mxu0 %v8273_v50 }
 0x14f   : > { %6730 = vmatprep.mubr.f32.mxu1 %v8293_v58  ;;  %6938 = vmatprep.mubr.f32.mxu0 %v8293_v58 }
 0x152   : > { %6731 = vmatmul.mubr.f32.gmra.mrb[98].mxu1 %v8297_v60  ;;  %6939 = vmatmul.mubr.f32.gmra.mrb[98].mxu0 %v8297_v60 }
 0x153   : > { %6733 = vmatprep.mubr.f32.mxu1 %v8317_v6  ;;  %6941 = vmatprep.mubr.f32.mxu0 %v8317_v6 }
 0x156   : > { %6734 = vmatmul.mubr.f32.gmra.mrb[100].mxu1 %v8321_v8  ;;  %6942 = vmatmul.mubr.f32.gmra.mrb[100].mxu0 %v8321_v8 }
 0x157   : > { %6736 = vmatprep.mubr.f32.mxu1 %v8341_v18  ;;  %6944 = vmatprep.mubr.f32.mxu0 %v8341_v18 }
 0x15a   : > { %6737 = vmatmul.mubr.f32.gmra.mrb[102].mxu1 %v8345_v20  ;;  %6945 = vmatmul.mubr.f32.gmra.mrb[102].mxu0 %v8345_v20 }
 0x15b   : > { %6739 = vmatprep.mubr.f32.mxu1 %v8365_v28  ;;  %6947 = vmatprep.mubr.f32.mxu0 %v8365_v28 }
 0x15e   : > { %6740 = vmatmul.mubr.f32.gmra.mrb[104].mxu1 %v8369_v30  ;;  %6948 = vmatmul.mubr.f32.gmra.mrb[104].mxu0 %v8369_v30 }
 0x15f   : > { %6742 = vmatprep.mubr.f32.mxu1 %v8389_v42  ;;  %6950 = vmatprep.mubr.f32.mxu0 %v8389_v42 }
 0x161   : > { %v6381_v48 = vpop.f32.mrb[0].mxu0  ;;  %v6417_v50 = vpop.f32.mrb[0].mxu1 }
 0x162   : > { %v864_v58 = vrot.slane %v6381_v48, 7  ;;  %v8843_v60 = vpop.f32.mrb[1].mxu0  ;;  %6743 = vmatmul.mubr.f32.gmra.mrb[106].mxu1 %v8393_v44  ;;  %6951 = vmatmul.mubr.f32.gmra.mrb[106].mxu0 %v8393_v44  ;;  %v912_v6 = vrot.slane %v6417_v50, 7  ;;  %v8847_v8 = vpop.f32.mrb[1].mxu1  ;;  %v8917_v48 = vld [vmem:[#allocation2 + $0x1b8] sm:$0xff] }
 0x163   : > { %v10291_v18 = vrot.slane %v8843_v60, 7  ;;  %v10292_v20 = vrot.slane %v8847_v8, 7  ;;  %6745 = vmatprep.mubr.f32.mxu1 %v8413_v56  ;;  %6953 = vmatprep.mubr.f32.mxu0 %v8413_v56 }
 0x165   : > { %v8856_v28 = vsel %vm862_vm2, %v10291_v18, %v864_v58  ;;  %v8861_v30 = vsel %vm862_vm2, %v10292_v20, %v912_v6  ;;  %v6384_v42 = vpop.f32.mrb[2].mxu0  ;;  %v6420_v44 = vpop.f32.mrb[2].mxu1  ;;  %v7955_v18 = vld [vmem:[#allocation2 + $0x38] sm:$0xff] }
 0x166   : > { %v868_v15 = vrot.slane %v6384_v42, 7  ;;  %v916_v21 = vrot.slane %v6420_v44, 7  ;;  %v585_v23 = vpop.f32.mrb[3].mxu0  ;;  %v705_v25 = vpop.f32.mrb[3].mxu1  ;;  %6746 = vmatmul.mubr.f32.gmra.mrb[108].mxu1 %v8417_v0  ;;  %6954 = vmatmul.mubr.f32.gmra.mrb[108].mxu0 %v8417_v0  ;;  %v9016_v20 = vld [vmem:[#allocation2 + $0x58] sm:$0xff] }
 0x167   : > { %v866_v56 = vrot.slane %v585_v23, 7  ;;  %v914_v57 = vrot.slane %v705_v25, 7  ;;  %6748 = vmatprep.mubr.f32.mxu1 %v8425_v4  ;;  %6956 = vmatprep.mubr.f32.mxu0 %v8425_v4  ;;  %10368 = vst [vmem:[#allocation23_spill] sm:$0xff] %v9016_v20 }
 0x169   : > { %v8868_v45 = vsel %vm862_vm2, %v864_v58, %v866_v56  ;;  %v8871_v59 = vsel %vm862_vm2, %v866_v56, %v868_v15  ;;  %v8874_v46 = vsel %vm862_vm2, %v912_v6, %v914_v57  ;;  %v8877_v51 = vsel %vm862_vm2, %v914_v57, %v916_v21  ;;  %v6387_v10 = vpop.f32.mrb[4].mxu0  ;;  %v6423_v0 = vpop.f32.mrb[4].mxu1  ;;  %v8935_v57 = vld [vmem:[#allocation2 + $0x1c0] sm:$0xff] }
 0x16a   : > { %v872_v5 = vrot.slane %v6387_v10, 7  ;;  %v920_v37 = vrot.slane %v6423_v0, 7  ;;  %v595_v7 = vpop.f32.mrb[5].mxu0  ;;  %v715_v52 = vpop.f32.mrb[5].mxu1  ;;  %6749 = vmatmul.mubr.f32.gmra.mrb[110].mxu1 %v8429_v12  ;;  %6957 = vmatmul.mubr.f32.gmra.mrb[110].mxu0 %v8429_v12  ;;  %v8937_v10 = vld [vmem:[#allocation2 + $0x30] sm:$0xff] }
 0x16b   : > { %v870_v4 = vrot.slane %v595_v7, 7  ;;  %v918_v53 = vrot.slane %v715_v52, 7  ;;  %6751 = vmatprep.mubr.f32.mxu1 %v8437_v14  ;;  %6959 = vmatprep.mubr.f32.mxu0 %v8437_v14 }
 0x16d   : > { %v8884_v54 = vsel %vm862_vm2, %v868_v15, %v870_v4  ;;  %v8887_v17 = vsel %vm862_vm2, %v870_v4, %v872_v5  ;;  %v8890_v11 = vsel %vm862_vm2, %v916_v21, %v918_v53  ;;  %v8893_v19 = vsel %vm862_vm2, %v918_v53, %v920_v37  ;;  %v6390_v38 = vpop.f32.mrb[6].mxu0  ;;  %v6426_v12 = vpop.f32.mrb[6].mxu1  ;;  %v5752_v53 = vld [vmem:[%s10288_s1 + $0x410] sm:$0xff] }
 0x16e   : > { %v876_v40 = vrot.slane %v6390_v38, 7  ;;  %v924_v39 = vrot.slane %v6426_v12, 7  ;;  %v605_v27 = vpop.f32.mrb[7].mxu0  ;;  %v725_v1 = vpop.f32.mrb[7].mxu1  ;;  %6752 = vmatmul.mubr.f32.gmra.mrb[112].mxu1 %v8441_v16  ;;  %6960 = vmatmul.mubr.f32.gmra.mrb[112].mxu0 %v8441_v16  ;;  %v5753_v38 = vld [vmem:[%s10288_s1 + $0x418] sm:$0xff] }
 0x16f   : > { %v874_v14 = vrot.slane %v605_v27, 7  ;;  %v922_v29 = vrot.slane %v725_v1, 7  ;;  %6754 = vmatprep.mubr.f32.mxu1 %v8449_v22  ;;  %6962 = vmatprep.mubr.f32.mxu0 %v8449_v22 }
 0x171   : > { %v8900_v2 = vsel %vm862_vm2, %v872_v5, %v874_v14  ;;  %v8903_v31 = vsel %vm862_vm2, %v874_v14, %v876_v40  ;;  %v8906_v32 = vsel %vm862_vm2, %v920_v37, %v922_v29  ;;  %v8909_v41 = vsel %vm862_vm2, %v922_v29, %v924_v39  ;;  %v6393_v33 = vpop.f32.mrb[8].mxu0  ;;  %v6429_v16 = vpop.f32.mrb[8].mxu1  ;;  %v7951_v29 = vld [vmem:[#allocation2 + $0x18] sm:$0xff] }
 0x172   : > { %v880_v43 = vrot.slane %v6393_v33, 7  ;;  %v928_v47 = vrot.slane %v6429_v16, 7  ;;  %v615_v49 = vpop.f32.mrb[9].mxu0  ;;  %v735_v34 = vpop.f32.mrb[9].mxu1  ;;  %6755 = vmatmul.mubr.f32.gmra.mrb[114].mxu1 %v8453_v24  ;;  %6963 = vmatmul.mubr.f32.gmra.mrb[114].mxu0 %v8453_v24  ;;  %v8960_v33 = vld [vmem:[#allocation2 + $0x38] sm:$0xff]  ;;  %v7543_v16 = vpack.c.bf16 %v5753_v38, %v5752_v53  ;;  %v7953_v53 = vld [vmem:[#allocation2 + $0x28] sm:$0xff] }
 0x173   : > { %v878_v22 = vrot.slane %v615_v49, 7  ;;  %v926_v55 = vrot.slane %v735_v34, 7  ;;  %6757 = vmatprep.mubr.f32.mxu1 %v8461_v26  ;;  %6965 = vmatprep.mubr.f32.mxu0 %v8461_v26  ;;  %10360 = vst [vmem:[#allocation15_spill] sm:$0xff] %v8960_v33  ;;  %v8984_v38 = vld [vmem:[#allocation2 + $0x48] sm:$0xff] }
 0x174   : > { %10364 = vst [vmem:[#allocation19_spill] sm:$0xff] %v8984_v38 }
 0x175   : > { %v8920_v50 = vsel %vm862_vm2, %v876_v40, %v878_v22  ;;  %v8923_v58 = vsel %vm862_vm2, %v878_v22, %v880_v43  ;;  %v8926_v6 = vsel %vm862_vm2, %v924_v39, %v926_v55  ;;  %v8929_v24 = vsel %vm862_vm2, %v926_v55, %v928_v47  ;;  %v6396_v42 = vpop.f32.mrb[10].mxu0  ;;  %v6432_v44 = vpop.f32.mrb[10].mxu1 }
 0x176   : > { %v884_v15 = vrot.slane %v6396_v42, 7  ;;  %v932_v26 = vrot.slane %v6432_v44, 7  ;;  %v625_v21 = vpop.f32.mrb[11].mxu0  ;;  %v745_v23 = vpop.f32.mrb[11].mxu1  ;;  %6758 = vmatmul.mubr.f32.gmra.mrb[116].mxu1 %v8915_v35  ;;  %6966 = vmatmul.mubr.f32.gmra.mrb[116].mxu0 %v8915_v35  ;;  %v8974_v42 = vld [vmem:[#allocation2 + $0x40] sm:$0xff]  ;;  %v5736_v44 = vld [vmem:[%s10288_s1 + $0x390] sm:$0xff] }
 0x177   : > { %v882_v25 = vrot.slane %v625_v21, 7  ;;  %v930_v56 = vrot.slane %v745_v23, 7  ;;  %6760 = vmatprep.mubr.f32.mxu1 %v8917_v48  ;;  %6968 = vmatprep.mubr.f32.mxu0 %v8917_v48  ;;  %10363 = vst [vmem:[#allocation18_spill] sm:$0xff] %v8974_v42 }
 0x179   : > { %v8940_v0 = vsel %vm862_vm2, %v880_v43, %v882_v25  ;;  %v8943_v5 = vsel %vm862_vm2, %v882_v25, %v884_v15  ;;  %v8946_v37 = vsel %vm862_vm2, %v928_v47, %v930_v56  ;;  %v8949_v7 = vsel %vm862_vm2, %v930_v56, %v932_v26  ;;  %v6399_v52 = vpop.f32.mrb[12].mxu0  ;;  %v6435_v4 = vpop.f32.mrb[12].mxu1  ;;  %v7952_v56 = vld [vmem:[#allocation2 + $0x20] sm:$0xff] }
 0x17a   : > { %v888_v12 = vrot.slane %v6399_v52, 7  ;;  %v936_v40 = vrot.slane %v6435_v4, 7  ;;  %v635_v39 = vpop.f32.mrb[13].mxu0  ;;  %v755_v27 = vpop.f32.mrb[13].mxu1  ;;  %6761 = vmatmul.mubr.f32.gmra.mrb[118].mxu1 %v8935_v57  ;;  %6969 = vmatmul.mubr.f32.gmra.mrb[118].mxu0 %v8935_v57 }
 0x17b   : > { %v886_v1 = vrot.slane %v635_v39, 7  ;;  %v934_v14 = vrot.slane %v755_v27, 7  ;;  %6795 = vmatprep.mubr.f32.mxu1 %v7951_v29  ;;  %7003 = vmatprep.mubr.f32.mxu0 %v8937_v10  ;;  %v8988_v39 = vld [vmem:[#allocation2 + $0x50] sm:$0xff] }
 0x17c   : > { %10365 = vst [vmem:[#allocation20_spill] sm:$0xff] %v8988_v39 }
 0x17d   : > { %v8963_v43 = vsel %vm862_vm2, %v884_v15, %v886_v1  ;;  %v8966_v47 = vsel %vm862_vm2, %v886_v1, %v888_v12  ;;  %v8969_v49 = vsel %vm862_vm2, %v932_v26, %v934_v14  ;;  %v8972_v34 = vsel %vm862_vm2, %v934_v14, %v936_v40  ;;  %v6402_v22 = vpop.f32.mrb[14].mxu0  ;;  %v6438_v55 = vpop.f32.mrb[14].mxu1  ;;  %v5737_v15 = vld [vmem:[%s10288_s1 + $0x398] sm:$0xff]  ;;  %v5754_v1 = vld [vmem:[%s10288_s1 + $0x420] sm:$0xff] }
 0x17e   : > { %10361 = vst [vmem:[#allocation16_spill] sm:$0xff] %v8969_v49  ;;  %10362 = vst [vmem:[#allocation17_spill] sm:$0xff] %v8972_v34  ;;  %v892_v21 = vrot.slane %v6402_v22, 7  ;;  %v940_v23 = vrot.slane %v6438_v55, 7  ;;  %v645_v25 = vpop.f32.mrb[15].mxu0  ;;  %v765_v26 = vpop.f32.mrb[15].mxu1  ;;  %6796 = vmatmul.mubr.f32.vlgmr.msra.gmra.mrb[24].mxu1 %v7952_v56  ;;  %7004 = vmatmul.mubr.f32.vlgmr.msra.gmra.mrb[120].mxu0 %v8960_v33  ;;  %v7511_v27 = vpack.c.bf16 %v5737_v15, %v5736_v44 }
 0x17f   : > { %v890_v52 = vrot.slane %v645_v25, 7  ;;  %v938_v4 = vrot.slane %v765_v26, 7  ;;  %7542 = vmatpush3.bf16.msra.mxu0 %v8791_v63  ;;  %6798 = vmatprep.mubr.f32.mxu1 %v7953_v53  ;;  %v5755_v44 = vld [vmem:[%s10288_s1 + $0x428] sm:$0xff]  ;;  %v9072_v34 = vld [vmem:[#allocation2 + $0x80] sm:$0xff]  ;;  %v10381_v33 = vrot.slane %v8847_v8, 7 }
 0x180   : > { %7006 = vmatprep.mubr.f32.mxu0 %v8974_v42  ;;  %7510 = vmatpush3.bf16.msra.mxu1 %v8793_v36  ;;  %v5739_v15 = vld [vmem:[%s10288_s1 + $0x3a8] sm:$0xff]  ;;  %10377 = vst [vmem:[#allocation32_spill] sm:$0xff] %v9072_v34 }
 0x181   : > { %v8994_v14 = vsel %vm862_vm2, %v888_v12, %v890_v52  ;;  %v8997_v63 = vsel %vm862_vm2, %v890_v52, %v892_v21  ;;  %v9000_v29 = vsel %vm862_vm2, %v936_v40, %v938_v4  ;;  %v9003_v22 = vsel %vm862_vm2, %v938_v4, %v940_v23  ;;  %v6405_v36 = vpop.f32.mrb[16].mxu0  ;;  %v6441_v55 = vpop.f32.mrb[16].mxu1  ;;  %7544 = vmatprep.subr.bf16.mxu0 %v7543_v16  ;;  %v5738_v12 = vld [vmem:[%s10288_s1 + $0x3a0] sm:$0xff]  ;;  %v7954_v52 = vld [vmem:[#allocation2 + $0x30] sm:$0xff]  ;;  %v9100_v42 = vld [vmem:[#allocation2 + $0x88] sm:$0xff] }
 0x182   : > { %10366 = vst [vmem:[#allocation21_spill] sm:$0xff] %v9000_v29  ;;  %10367 = vst [vmem:[#allocation22_spill] sm:$0xff] %v9003_v22  ;;  %v896_v40 = vrot.slane %v6405_v36, 7  ;;  %v944_v25 = vrot.slane %v6441_v55, 7  ;;  %v655_v26 = vpop.f32.mrb[17].mxu0  ;;  %v775_v56 = vpop.f32.mrb[17].mxu1  ;;  %6799 = vmatmul.mubr.f32.gmra.mrb[26].mxu1 %v7954_v52  ;;  %7007 = vmatmul.mubr.f32.gmra.mrb[122].mxu0 %v8984_v38  ;;  %v7547_v36 = vpack.c.bf16 %v5755_v44, %v5754_v1 }
 0x183   : > { %v894_v4 = vrot.slane %v655_v26, 7  ;;  %v942_v53 = vrot.slane %v775_v56, 7  ;;  %6801 = vmatprep.mubr.f32.mxu1 %v7955_v18  ;;  %7009 = vmatprep.mubr.f32.mxu0 %v8988_v39  ;;  %v7515_v55 = vpack.c.bf16 %v5739_v15, %v5738_v12  ;;  %v7959_v38 = vld [vmem:[#allocation2 + $0x58] sm:$0xff]  ;;  %10380 = vst [vmem:[#allocation35_spill] sm:$0xff] %v9100_v42 }
 0x184   : > { %7546 = vmatpush3.bf16.msra.mxu0 %v7543_v16  ;;  %7512 = vmatprep.subr.bf16.mxu1 %v7511_v27  ;;  %v5756_v16 = vld [vmem:[%s10288_s1 + $0x430] sm:$0xff]  ;;  %v9070_v29 = vld [vmem:[#allocation2 + $0x78] sm:$0xff] }
 0x185   : > { %v9021_v61 = vsel %vm862_vm2, %v892_v21, %v894_v4  ;;  %v9024_v52 = vsel %vm862_vm2, %v894_v4, %v896_v40  ;;  %v9027_v26 = vsel %vm862_vm2, %v940_v23, %v942_v53  ;;  %v9030_v18 = vsel %vm862_vm2, %v942_v53, %v944_v25  ;;  %v6408_v56 = vpop.f32.mrb[18].mxu0  ;;  %v6444_v22 = vpop.f32.mrb[18].mxu1  ;;  %7514 = vmatpush3.bf16.msra.mxu1 %v7511_v27  ;;  %v5757_v21 = vld [vmem:[%s10288_s1 + $0x438] sm:$0xff]  ;;  %v7956_v23 = vld [vmem:[#allocation2 + $0x40] sm:$0xff]  ;;  %v9040_v27 = vld [vmem:[#allocation2 + $0x68] sm:$0xff] }
 0x186   : > { %10370 = vst [vmem:[#allocation25_spill] sm:$0xff] %v9027_v26  ;;  %10371 = vst [vmem:[#allocation26_spill] sm:$0xff] %v9030_v18  ;;  %v900_v1 = vrot.slane %v6408_v56, 7  ;;  %v948_v44 = vrot.slane %v6444_v22, 7  ;;  %v665_v12 = vpop.f32.mrb[19].mxu0  ;;  %v785_v15 = vpop.f32.mrb[19].mxu1  ;;  %6802 = vmatmul.mubr.f32.gmra.mrb[28].mxu1 %v7956_v23  ;;  %7010 = vmatmul.mubr.f32.gmra.mrb[124].mxu0 %v9016_v20  ;;  %v7551_v56 = vpack.c.bf16 %v5757_v21, %v5756_v16 }
 0x187   : > { %v898_v4 = vrot.slane %v665_v12, 7  ;;  %v946_v53 = vrot.slane %v785_v15, 7  ;;  %v7957_v18 = vld [vmem:[#allocation2 + $0x48] sm:$0xff]  ;;  %7012 = vmatprep.mubr.f32.mxu0 %v9018_v62  ;;  %10372 = vst [vmem:[#allocation27_spill] sm:$0xff] %v9040_v27  ;;  %v9042_v26 = vld [vmem:[#allocation2 + $0x70] sm:$0xff]  ;;  %7548 = vmatprep.subr.bf16.mxu0 %v7547_v36  ;;  %v5741_v16 = vld [vmem:[%s10288_s1 + $0x3b8] sm:$0xff] }
 0x188   : > { %6804 = vmatprep.mubr.f32.mxu1 %v7957_v18  ;;  %10373 = vst [vmem:[#allocation28_spill] sm:$0xff] %v9042_v26  ;;  %7516 = vmatprep.subr.bf16.mxu1 %v7515_v55  ;;  %v5740_v22 = vld [vmem:[%s10288_s1 + $0x3b0] sm:$0xff]  ;;  %v5759_v21 = vld [vmem:[%s10288_s1 + $0x448] sm:$0xff]  ;;  %10376 = vst [vmem:[#allocation31_spill] sm:$0xff] %v9070_v29 }
 0x189   : > { %v9048_v23 = vsel %vm862_vm2, %v896_v40, %v898_v4  ;;  %v9051_v12 = vsel %vm862_vm2, %v898_v4, %v900_v1  ;;  %v9054_v18 = vsel %vm862_vm2, %v944_v25, %v946_v53  ;;  %v9057_v15 = vsel %vm862_vm2, %v946_v53, %v948_v44  ;;  %v6411_v62 = vpop.f32.mrb[20].mxu0  ;;  %v6447_v20 = vpop.f32.mrb[20].mxu1  ;;  %7550 = vmatpush3.bf16.msra.mxu0 %v7547_v36  ;;  %v5758_v40 = vld [vmem:[%s10288_s1 + $0x440] sm:$0xff] }
 0x18a   : > { %10374 = vst [vmem:[#allocation29_spill] sm:$0xff] %v9054_v18  ;;  %10375 = vst [vmem:[#allocation30_spill] sm:$0xff] %v9057_v15  ;;  %v904_v25 = vrot.slane %v6411_v62, 7  ;;  %v952_v4 = vrot.slane %v6447_v20, 7  ;;  %v675_v18 = vpop.f32.mrb[21].mxu0  ;;  %v795_v53 = vpop.f32.mrb[21].mxu1  ;;  %7013 = vmatmul.mubr.f32.gmra.mrb[126].mxu0 %v9040_v27  ;;  %7518 = vmatpush3.bf16.msra.mxu1 %v7515_v55  ;;  %v7519_v62 = vpack.c.bf16 %v5741_v16, %v5740_v22 }
 0x18b   : > { %v7958_v15 = vld [vmem:[#allocation2 + $0x50] sm:$0xff]  ;;  %v902_v36 = vrot.slane %v675_v18, 7  ;;  %v950_v39 = vrot.slane %v795_v53, 7  ;;  %7015 = vmatprep.mubr.f32.mxu0 %v9042_v26  ;;  %7552 = vmatprep.subr.bf16.mxu0 %v7551_v56  ;;  %v7555_v20 = vpack.c.bf16 %v5759_v21, %v5758_v40  ;;  %v5743_v22 = vld [vmem:[%s10288_s1 + $0x3c8] sm:$0xff]  ;;  %v5761_v16 = vld [vmem:[%s10288_s1 + $0x458] sm:$0xff] }
 0x18c   : > { %6805 = vmatmul.mubr.f32.gmra.mrb[30].mxu1 %v7958_v15  ;;  %v5742_v15 = vld [vmem:[%s10288_s1 + $0x3c0] sm:$0xff]  ;;  %7520 = vmatprep.subr.bf16.mxu1 %v7519_v62 }
 0x18d   : > { %6807 = vmatprep.mubr.f32.mxu1 %v7959_v38  ;;  %v9078_v27 = vsel %vm862_vm2, %v900_v1, %v902_v36  ;;  %v9081_v18 = vsel %vm862_vm2, %v902_v36, %v904_v25  ;;  %v9084_v38 = vsel %vm862_vm2, %v948_v44, %v950_v39  ;;  %v9087_v53 = vsel %vm862_vm2, %v950_v39, %v952_v4  ;;  %v6414_v55 = vpop.f32.mrb[22].mxu0  ;;  %v6450_v26 = vpop.f32.mrb[22].mxu1  ;;  %v5760_v1 = vld [vmem:[%s10288_s1 + $0x450] sm:$0xff]  ;;  %v7960_v36 = vld [vmem:[#allocation2 + $0x60] sm:$0xff] }
 0x18e   : > { %10378 = vst [vmem:[#allocation33_spill] sm:$0xff] %v9084_v38  ;;  %10379 = vst [vmem:[#allocation34_spill] sm:$0xff] %v9087_v53  ;;  %7554 = vmatpush3.bf16.msra.mxu0 %v7551_v56  ;;  %v908_v44 = vrot.slane %v6414_v55, 7  ;;  %v956_v40 = vrot.slane %v6450_v26, 7  ;;  %v685_v21 = vpop.f32.mrb[23].mxu0  ;;  %v805_v39 = vpop.f32.mrb[23].mxu1  ;;  %v7523_v55 = vpack.c.bf16 %v5743_v22, %v5742_v15  ;;  %7522 = vmatpush3.bf16.msra.mxu1 %v7519_v62 }
 0x18f   : > { %7016 = vmatmul.mubr.f32.gmra.mrb[128].mxu0 %v9070_v29  ;;  %v906_v56 = vrot.slane %v685_v21, 7  ;;  %v954_v53 = vrot.slane %v805_v39, 7  ;;  %v7961_v38 = vld [vmem:[#allocation2 + $0x68] sm:$0xff]  ;;  %v9107_v26 = vld [vmem:[#allocation2 + $0x90] sm:$0xff]  ;;  %7556 = vmatprep.subr.bf16.mxu0 %v7555_v20  ;;  %v5745_v15 = vld [vmem:[%s10288_s1 + $0x3d8] sm:$0xff] }
 0x190   : > { %6808 = vmatmul.mubr.f32.gmra.mrb[32].mxu1 %v7960_v36  ;;  %7018 = vmatprep.mubr.f32.mxu0 %v9072_v34  ;;  %v9105_v49 = vsel %vm862_vm2, %v908_v44, %v10381_v33  ;;  %10382 = vst [vmem:[#allocation36_spill] sm:$0xff] %v9107_v26  ;;  %v7559_v36 = vpack.c.bf16 %v5761_v16, %v5760_v1  ;;  %v5744_v21 = vld [vmem:[%s10288_s1 + $0x3d0] sm:$0xff]  ;;  %v5762_v22 = vld [vmem:[%s10288_s1 + $0x460] sm:$0xff] }
 0x191   : > { %6810 = vmatprep.mubr.f32.mxu1 %v7961_v38  ;;  %v9113_v38 = vsel %vm862_vm2, %v904_v25, %v906_v56  ;;  %v9116_v39 = vsel %vm862_vm2, %v906_v56, %v908_v44  ;;  %v9119_v8 = vsel %vm862_vm2, %v952_v4, %v954_v53  ;;  %v6589_v33 = vpop.f32.mrb[24].mxu0  ;;  %v5763_v25 = vld [vmem:[%s10288_s1 + $0x468] sm:$0xff]  ;;  %v7962_v4 = vld [vmem:[#allocation2 + $0x70] sm:$0xff]  ;;  %v9132_v62 = vsel %vm862_vm2, %v954_v53, %v956_v40  ;;  %v7963_v44 = vld [vmem:[#allocation2 + $0x78] sm:$0xff] }
 0x192   : > { %10383 = vst [vmem:[#allocation37_spill] sm:$0xff] %v9119_v8  ;;  %7558 = vmatpush3.bf16.msra.mxu0 %v7555_v20  ;;  %v1749_v1 = vrot.slane %v6589_v33, 1  ;;  %v1460_v16 = vpop.f32.mrb[25].mxu0  ;;  %10384 = vst [vmem:[#allocation38_spill] sm:$0xff] %v9132_v62  ;;  %v9135_v56 = vld [vmem:[#allocation2 + $0x98] sm:$0xff]  ;;  %v9137_v8 = vld [vmem:[#allocation2 + $0xa0] sm:$0xff]  ;;  %7524 = vmatprep.subr.bf16.mxu1 %v7523_v55  ;;  %v7527_v33 = vpack.c.bf16 %v5745_v15, %v5744_v21  ;;  %v7563_v34 = vpack.c.bf16 %v5763_v25, %v5762_v22 }
 0x193   : > { %7019 = vmatmul.mubr.f32.gmra.mrb[130].mxu0 %v9100_v42  ;;  %v1748_v20 = vrot.slane %v1460_v16, 1  ;;  %10385 = vst [vmem:[#allocation39_spill] sm:$0xff] %v9135_v56  ;;  %7560 = vmatprep.subr.bf16.mxu0 %v7559_v36  ;;  %v10386_v53 = vrot.slane %v8843_v60, 7  ;;  %v5764_v21 = vld [vmem:[%s10288_s1 + $0x470] sm:$0xff]  ;;  %v5765_v15 = vld [vmem:[%s10288_s1 + $0x478] sm:$0xff]  ;;  %v7964_v25 = vld [vmem:[#allocation2 + $0x80] sm:$0xff] }
 0x194   : > { %6811 = vmatmul.mubr.f32.gmra.mrb[34].mxu1 %v7962_v4  ;;  %7021 = vmatprep.mubr.f32.mxu0 %v9107_v26  ;;  %v5746_v4 = vld [vmem:[%s10288_s1 + $0x3e0] sm:$0xff]  ;;  %v5747_v26 = vld [vmem:[%s10288_s1 + $0x3e8] sm:$0xff]  ;;  %v9161_v42 = vld [vmem:[#allocation2 + $0xb0] sm:$0xff] }
 0x195   : > { %6813 = vmatprep.mubr.f32.mxu1 %v7963_v44  ;;  %v1006_v40 = vsel %vm862_vm2, 0.0, %v10386_v53  ;;  %v1750_v16 = vsel %vm1747_vm3, %v1748_v20, %v1749_v1  ;;  %v6592_v44 = vpop.f32.mrb[26].mxu0  ;;  %7526 = vmatpush3.bf16.msra.mxu1 %v7523_v55  ;;  %v7965_v20 = vld [vmem:[#allocation2 + $0x88] sm:$0xff]  ;;  %v7531_v62 = vpack.c.bf16 %v5747_v26, %v5746_v4 }
 0x196   : > { %7562 = vmatpush3.bf16.msra.mxu0 %v7559_v36  ;;  %v1753_v60 = vrot.slane %v6592_v44, 1  ;;  %v1470_v22 = vpop.f32.mrb[27].mxu0  ;;  %v9156_v55 = vadd.f32 %v1750_v16, %v1006_v40  ;;  %v9159_v53 = vld [vmem:[#allocation2 + $0xa8] sm:$0xff]  ;;  %7528 = vmatprep.subr.bf16.mxu1 %v7527_v33  ;;  %v7567_v44 = vpack.c.bf16 %v5765_v15, %v5764_v21  ;;  %v5748_v40 = vld [vmem:[%s10288_s1 + $0x3f0] sm:$0xff]  ;;  %v5749_v16 = vld [vmem:[%s10288_s1 + $0x3f8] sm:$0xff] }
 0x197   : > { %7022 = vmatmul.mubr.f32.gmra.mrb[132].mxu0 %v9135_v56  ;;  %v1751_v36 = vrot.slane %v1470_v22, 1  ;;  %7564 = vmatprep.subr.bf16.mxu0 %v7563_v34  ;;  %v7966_v21 = vld [vmem:[#allocation2 + $0x90] sm:$0xff]  ;;  %v9179_v15 = vld [vmem:[#allocation2 + $0xb8] sm:$0xff] }
 0x198   : > { %6814 = vmatmul.mubr.f32.gmra.mrb[36].mxu1 %v7964_v25  ;;  %7024 = vmatprep.mubr.f32.mxu0 %v9137_v8 }
 0x199   : > { %6816 = vmatprep.mubr.f32.mxu1 %v7965_v20  ;;  %v1752_v29 = vsel %vm1747_vm3, %v1749_v1, %v1751_v36  ;;  %v1754_v25 = vsel %vm1747_vm3, %v1751_v36, %v1753_v60  ;;  %v6595_v56 = vpop.f32.mrb[28].mxu0  ;;  %7530 = vmatpush3.bf16.msra.mxu1 %v7527_v33  ;;  %v7967_v33 = vld [vmem:[#allocation2 + $0x98] sm:$0xff] }
 0x19a   : > { %7566 = vmatpush3.bf16.msra.mxu0 %v7563_v34  ;;  %v9172_v22 = vadd.f32 %v1752_v29, %v8856_v28  ;;  %v9175_v26 = vadd.f32 %v1754_v25, %v8868_v45  ;;  %v1757_v1 = vrot.slane %v6595_v56, 1  ;;  %v1480_v4 = vpop.f32.mrb[29].mxu0  ;;  %7532 = vmatprep.subr.bf16.mxu1 %v7531_v62  ;;  %v7535_v28 = vpack.c.bf16 %v5749_v16, %v5748_v40  ;;  %v7969_v16 = vld [vmem:[#allocation2 + $0xa8] sm:$0xff] }
 0x19b   : > { %7025 = vmatmul.mubr.f32.gmra.mrb[134].mxu0 %v9159_v53  ;;  %v1755_v34 = vrot.slane %v1480_v4, 1  ;;  %7568 = vmatprep.subr.bf16.mxu0 %v7567_v44 }
 0x19c   : > { %6817 = vmatmul.mubr.f32.gmra.mrb[38].mxu1 %v7966_v21  ;;  %7027 = vmatprep.mubr.f32.mxu0 %v9161_v42  ;;  %v7968_v21 = vld [vmem:[#allocation2 + $0xa0] sm:$0xff] }
 0x19d   : > { %6819 = vmatprep.mubr.f32.mxu1 %v7967_v33  ;;  %v1756_v29 = vsel %vm1747_vm3, %v1753_v60, %v1755_v34  ;;  %v1758_v45 = vsel %vm1747_vm3, %v1755_v34, %v1757_v1  ;;  %v6598_v56 = vpop.f32.mrb[30].mxu0  ;;  %7534 = vmatpush3.bf16.msra.mxu1 %v7531_v62 }
 0x19e   : > { %7570 = vmatpush3.bf16.msra.mxu0 %v7567_v44  ;;  %v9184_v36 = vadd.f32 %v1756_v29, %v8871_v59  ;;  %v9187_v20 = vadd.f32 %v1758_v45, %v8884_v54  ;;  %v1761_v25 = vrot.slane %v6598_v56, 1  ;;  %v1490_v4 = vpop.f32.mrb[31].mxu0  ;;  %7536 = vmatprep.subr.bf16.mxu1 %v7535_v28  ;;  %v7970_v29 = vld [vmem:[#allocation2 + $0xb0] sm:$0xff]  ;;  %v7971_v56 = vld [vmem:[#allocation2 + $0xb8] sm:$0xff] }
 0x19f   : > { %7028 = vmatmul.mubr.f32.gmra.mrb[136].mxu0 %v9179_v15  ;;  %v1759_v40 = vrot.slane %v1490_v4, 1 }
 0x1a0   : > { %6820 = vmatmul.mubr.f32.gmra.mrb[40].mxu1 %v7968_v21  ;;  %7030 = vmatprep.mubr.f32.mxu0 %v8809_v3 }
 0x1a1   : > { %6822 = vmatprep.mubr.f32.mxu1 %v7969_v16  ;;  %v1760_v62 = vsel %vm1747_vm3, %v1757_v1, %v1759_v40  ;;  %v1762_v59 = vsel %vm1747_vm3, %v1759_v40, %v1761_v25  ;;  %v6601_v60 = vpop.f32.mrb[32].mxu0  ;;  %7538 = vmatpush3.bf16.msra.mxu1 %v7535_v28  ;;  %v9201_v1 = vld [vmem:[#allocation2 + $0xd8] sm:$0xff]  ;;  %v9203_v28 = vld [vmem:[#allocation2 + $0xe0] sm:$0xff] }
 0x1a2   : > { %v9194_v54 = vadd.f32 %v1760_v62, %v8887_v17  ;;  %v9197_v44 = vadd.f32 %v1762_v59, %v8900_v2  ;;  %v1765_v34 = vrot.slane %v6601_v60, 1  ;;  %v1500_v33 = vpop.f32.mrb[33].mxu0  ;;  %v9219_v60 = vld [vmem:[#allocation2 + $0x120] sm:$0xff] }
 0x1a3   : > { %7031 = vmatmul.mubr.f32.gmra.mrb[138].mxu0 %v8811_v9  ;;  %v1763_v45 = vrot.slane %v1500_v33, 1 }
 0x1a4   : > { %6823 = vmatmul.mubr.f32.gmra.mrb[42].mxu1 %v7970_v29  ;;  %7033 = vmatprep.mubr.f32.mxu0 %v8817_v13 }
 0x1a5   : > { %6825 = vmatprep.mubr.f32.mxu1 %v7971_v56  ;;  %v1764_v17 = vsel %vm1747_vm3, %v1761_v25, %v1763_v45  ;;  %v1766_v2 = vsel %vm1747_vm3, %v1763_v45, %v1765_v34  ;;  %v6604_v4 = vpop.f32.mrb[34].mxu0  ;;  %v9217_v25 = vld [vmem:[#allocation2 + $0xe8] sm:$0xff] }
 0x1a6   : > { %v9208_v21 = vadd.f32 %v1764_v17, %v8903_v31  ;;  %v9211_v40 = vadd.f32 %v1766_v2, %v8920_v50  ;;  %v1769_v16 = vrot.slane %v6604_v4, 1  ;;  %v1510_v62 = vpop.f32.mrb[35].mxu0  ;;  %v7972_v17 = vld [vmem:[#allocation2 + $0x108] sm:$0xff]  ;;  %v9234_v2 = vld [vmem:[#allocation2 + $0x130] sm:$0xff] }
 0x1a7   : > { %7034 = vmatmul.mubr.f32.gmra.mrb[140].mxu0 %v9201_v1  ;;  %v1767_v59 = vrot.slane %v1510_v62, 1  ;;  %10387 = vst [vmem:[#allocation40_spill] sm:$0xff] %v9234_v2 }
 0x1a8   : > { %6826 = vmatmul.mubr.f32.gmra.mrb[44].mxu1 %v8809_v3  ;;  %7036 = vmatprep.mubr.f32.mxu0 %v9203_v28 }
 0x1a9   : > { %6828 = vmatprep.mubr.f32.mxu1 %v8811_v9  ;;  %v1768_v31 = vsel %vm1747_vm3, %v1765_v34, %v1767_v59  ;;  %v1770_v50 = vsel %vm1747_vm3, %v1767_v59, %v1769_v16  ;;  %v6607_v33 = vpop.f32.mrb[36].mxu0  ;;  %v9232_v34 = vld [vmem:[#allocation2 + $0x128] sm:$0xff] }
 0x1aa   : > { %v9224_v29 = vadd.f32 %v1768_v31, %v8923_v58  ;;  %v9227_v3 = vadd.f32 %v1770_v50, %v8940_v0  ;;  %v1773_v45 = vrot.slane %v6607_v33, 1  ;;  %v1520_v56 = vpop.f32.mrb[37].mxu0  ;;  %v7973_v50 = vld [vmem:[#allocation2 + $0x110] sm:$0xff] }
 0x1ab   : > { %7037 = vmatmul.mubr.f32.gmra.mrb[142].mxu0 %v9217_v25  ;;  %v1771_v9 = vrot.slane %v1520_v56, 1  ;;  %v7974_v56 = vld [vmem:[#allocation2 + $0x118] sm:$0xff] }
 0x1ac   : > { %6829 = vmatmul.mubr.f32.gmra.mrb[46].mxu1 %v8817_v13  ;;  %7039 = vmatprep.mubr.f32.mxu0 %v9219_v60 }
 0x1ad   : > { %6831 = vmatprep.mubr.f32.mxu1 %v7972_v17  ;;  %v1772_v58 = vsel %vm1747_vm3, %v1769_v16, %v1771_v9  ;;  %v1774_v0 = vsel %vm1747_vm3, %v1771_v9, %v1773_v45  ;;  %v6610_v4 = vpop.f32.mrb[38].mxu0  ;;  %v9246_v16 = vld [vmem:[#allocation2 + $0x138] sm:$0xff]  ;;  %v9248_v9 = vld [vmem:[#allocation2 + $0x140] sm:$0xff] }
 0x1ae   : > { %v9239_v62 = vadd.f32 %v1772_v58, %v8943_v5  ;;  %v9242_v13 = vadd.f32 %v1774_v0, %v8963_v43  ;;  %v1777_v59 = vrot.slane %v6610_v4, 1  ;;  %v1530_v31 = vpop.f32.mrb[39].mxu0  ;;  %10388 = vst [vmem:[#allocation41_spill] sm:$0xff] %v9246_v16  ;;  %10389 = vst [vmem:[#allocation42_spill] sm:$0xff] %v9248_v9 }
 0x1af   : > { %7040 = vmatmul.mubr.f32.gmra.mrb[144].mxu0 %v9232_v34  ;;  %v1775_v33 = vrot.slane %v1530_v31, 1 }
 0x1b0   : > { %6832 = vmatmul.mubr.f32.gmra.mrb[48].mxu1 %v7973_v50  ;;  %7042 = vmatprep.mubr.f32.mxu0 %v9234_v2  ;;  %v7975_v50 = vld [vmem:[#allocation2 + $0x120] sm:$0xff]  ;;  %v7976_v2 = vld [vmem:[#allocation2 + $0x128] sm:$0xff] }
 0x1b1   : > { %6834 = vmatprep.mubr.f32.mxu1 %v7974_v56  ;;  %v1776_v5 = vsel %vm1747_vm3, %v1773_v45, %v1775_v33  ;;  %v1778_v43 = vsel %vm1747_vm3, %v1775_v33, %v1777_v59  ;;  %v6613_v17 = vpop.f32.mrb[40].mxu0  ;;  %v9260_v45 = vld [vmem:[#allocation2 + $0x148] sm:$0xff]  ;;  %v9262_v33 = vld [vmem:[#allocation2 + $0x150] sm:$0xff] }
 0x1b2   : > { %v9253_v58 = vadd.f32 %v1776_v5, %v8966_v47  ;;  %v9256_v0 = vadd.f32 %v1778_v43, %v8994_v14  ;;  %v1781_v4 = vrot.slane %v6613_v17, 1  ;;  %v1540_v31 = vpop.f32.mrb[41].mxu0  ;;  %10390 = vst [vmem:[#allocation43_spill] sm:$0xff] %v9260_v45  ;;  %10391 = vst [vmem:[#allocation44_spill] sm:$0xff] %v9262_v33 }
 0x1b3   : > { %7043 = vmatmul.mubr.f32.gmra.mrb[146].mxu0 %v9246_v16  ;;  %v1779_v56 = vrot.slane %v1540_v31, 1  ;;  %v7978_v16 = vld [vmem:[#allocation2 + $0x138] sm:$0xff] }
 0x1b4   : > { %6835 = vmatmul.mubr.f32.gmra.mrb[50].mxu1 %v7975_v50  ;;  %7045 = vmatprep.mubr.f32.mxu0 %v9248_v9 }
 0x1b5   : > { %6837 = vmatprep.mubr.f32.mxu1 %v7976_v2  ;;  %v1780_v47 = vsel %vm1747_vm3, %v1777_v59, %v1779_v56  ;;  %v1782_v14 = vsel %vm1747_vm3, %v1779_v56, %v1781_v4  ;;  %v6616_v5 = vpop.f32.mrb[42].mxu0  ;;  %v7977_v2 = vld [vmem:[#allocation2 + $0x130] sm:$0xff]  ;;  %v9274_v59 = vld [vmem:[#allocation2 + $0x158] sm:$0xff]  ;;  %v9276_v56 = vld [vmem:[#allocation2 + $0x160] sm:$0xff] }
 0x1b6   : > { %v9267_v43 = vadd.f32 %v1780_v47, %v8997_v63  ;;  %v9270_v17 = vadd.f32 %v1782_v14, %v9021_v61  ;;  %v1785_v31 = vrot.slane %v6616_v5, 1  ;;  %v1550_v50 = vpop.f32.mrb[43].mxu0  ;;  %10392 = vst [vmem:[#allocation45_spill] sm:$0xff] %v9274_v59  ;;  %10393 = vst [vmem:[#allocation46_spill] sm:$0xff] %v9276_v56 }
 0x1b7   : > { %7046 = vmatmul.mubr.f32.gmra.mrb[148].mxu0 %v9260_v45  ;;  %v1783_v9 = vrot.slane %v1550_v50, 1  ;;  %v7980_v45 = vld [vmem:[#allocation2 + $0x148] sm:$0xff] }
 0x1b8   : > { %6838 = vmatmul.mubr.f32.gmra.mrb[52].mxu1 %v7977_v2  ;;  %7048 = vmatprep.mubr.f32.mxu0 %v9262_v33 }
 0x1b9   : > { %6840 = vmatprep.mubr.f32.mxu1 %v7978_v16  ;;  %v1784_v63 = vsel %vm1747_vm3, %v1781_v4, %v1783_v9  ;;  %v1786_v61 = vsel %vm1747_vm3, %v1783_v9, %v1785_v31  ;;  %v6619_v47 = vpop.f32.mrb[44].mxu0  ;;  %v7979_v16 = vld [vmem:[#allocation2 + $0x140] sm:$0xff]  ;;  %v9288_v4 = vld [vmem:[#allocation2 + $0x168] sm:$0xff]  ;;  %v9290_v9 = vld [vmem:[#allocation2 + $0x170] sm:$0xff] }
 0x1ba   : > { %v9281_v14 = vadd.f32 %v1784_v63, %v9024_v52  ;;  %v9284_v5 = vadd.f32 %v1786_v61, %v9048_v23  ;;  %v1789_v50 = vrot.slane %v6619_v47, 1  ;;  %v1560_v2 = vpop.f32.mrb[45].mxu0  ;;  %10394 = vst [vmem:[#allocation47_spill] sm:$0xff] %v9288_v4  ;;  %10395 = vst [vmem:[#allocation48_spill] sm:$0xff] %v9290_v9 }
 0x1bb   : > { %7049 = vmatmul.mubr.f32.gmra.mrb[150].mxu0 %v9274_v59  ;;  %v1787_v33 = vrot.slane %v1560_v2, 1  ;;  %v7982_v59 = vld [vmem:[#allocation2 + $0x158] sm:$0xff] }
 0x1bc   : > { %6841 = vmatmul.mubr.f32.gmra.mrb[54].mxu1 %v7979_v16  ;;  %7051 = vmatprep.mubr.f32.mxu0 %v9276_v56 }
 0x1bd   : > { %6843 = vmatprep.mubr.f32.mxu1 %v7980_v45  ;;  %v1788_v52 = vsel %vm1747_vm3, %v1785_v31, %v1787_v33  ;;  %v1790_v23 = vsel %vm1747_vm3, %v1787_v33, %v1789_v50  ;;  %v6622_v63 = vpop.f32.mrb[46].mxu0  ;;  %v7981_v45 = vld [vmem:[#allocation2 + $0x150] sm:$0xff]  ;;  %v9302_v31 = vld [vmem:[#allocation2 + $0x178] sm:$0xff]  ;;  %v9304_v33 = vld [vmem:[#allocation2 + $0x180] sm:$0xff] }
 0x1be   : > { %v9295_v61 = vadd.f32 %v1788_v52, %v9051_v12  ;;  %v9298_v47 = vadd.f32 %v1790_v23, %v9078_v27  ;;  %v1793_v2 = vrot.slane %v6622_v63, 1  ;;  %v1570_v16 = vpop.f32.mrb[47].mxu0  ;;  %10396 = vst [vmem:[#allocation49_spill] sm:$0xff] %v9302_v31  ;;  %10397 = vst [vmem:[#allocation50_spill] sm:$0xff] %v9304_v33 }
 0x1bf   : > { %7052 = vmatmul.mubr.f32.gmra.mrb[152].mxu0 %v9288_v4  ;;  %v1791_v56 = vrot.slane %v1570_v16, 1  ;;  %v7984_v4 = vld [vmem:[#allocation2 + $0x168] sm:$0xff] }
 0x1c0   : > { %6844 = vmatmul.mubr.f32.gmra.mrb[56].mxu1 %v7981_v45  ;;  %7054 = vmatprep.mubr.f32.mxu0 %v9290_v9 }
 0x1c1   : > { %6846 = vmatprep.mubr.f32.mxu1 %v7982_v59  ;;  %v1792_v12 = vsel %vm1747_vm3, %v1789_v50, %v1791_v56  ;;  %v1794_v27 = vsel %vm1747_vm3, %v1791_v56, %v1793_v2  ;;  %v6625_v52 = vpop.f32.mrb[48].mxu0  ;;  %v7983_v59 = vld [vmem:[#allocation2 + $0x160] sm:$0xff]  ;;  %v9316_v50 = vld [vmem:[#allocation2 + $0x188] sm:$0xff]  ;;  %v9318_v56 = vld [vmem:[#allocation2 + $0x190] sm:$0xff] }
 0x1c2   : > { %v9309_v23 = vadd.f32 %v1792_v12, %v9081_v18  ;;  %v9312_v63 = vadd.f32 %v1794_v27, %v9113_v38  ;;  %v1797_v16 = vrot.slane %v6625_v52, 1  ;;  %v1580_v45 = vpop.f32.mrb[49].mxu0  ;;  %10398 = vst [vmem:[#allocation51_spill] sm:$0xff] %v9316_v50  ;;  %10399 = vst [vmem:[#allocation52_spill] sm:$0xff] %v9318_v56 }
 0x1c3   : > { %7055 = vmatmul.mubr.f32.gmra.mrb[154].mxu0 %v9302_v31  ;;  %v1795_v9 = vrot.slane %v1580_v45, 1  ;;  %v7986_v31 = vld [vmem:[#allocation2 + $0x178] sm:$0xff] }
 0x1c4   : > { %6847 = vmatmul.mubr.f32.gmra.mrb[58].mxu1 %v7983_v59  ;;  %7057 = vmatprep.mubr.f32.mxu0 %v9304_v33 }
 0x1c5   : > { %6849 = vmatprep.mubr.f32.mxu1 %v7984_v4  ;;  %v1796_v18 = vsel %vm1747_vm3, %v1793_v2, %v1795_v9  ;;  %v1798_v38 = vsel %vm1747_vm3, %v1795_v9, %v1797_v16  ;;  %v6628_v12 = vpop.f32.mrb[50].mxu0  ;;  %v7985_v4 = vld [vmem:[#allocation2 + $0x170] sm:$0xff]  ;;  %v9330_v2 = vld [vmem:[#allocation2 + $0x198] sm:$0xff]  ;;  %v9332_v9 = vld [vmem:[#allocation2 + $0x1a0] sm:$0xff] }
 0x1c6   : > { %v9323_v27 = vadd.f32 %v1796_v18, %v9116_v39  ;;  %v9326_v52 = vadd.f32 %v1798_v38, %v9105_v49  ;;  %v1801_v45 = vrot.slane %v6628_v12, 1  ;;  %v1590_v59 = vpop.f32.mrb[51].mxu0  ;;  %10400 = vst [vmem:[#allocation53_spill] sm:$0xff] %v9332_v9 }
 0x1c7   : > { %7058 = vmatmul.mubr.f32.gmra.mrb[156].mxu0 %v9316_v50  ;;  %v1799_v33 = vrot.slane %v1590_v59, 1  ;;  %v7988_v50 = vld [vmem:[#allocation2 + $0x188] sm:$0xff] }
 0x1c8   : > { %6850 = vmatmul.mubr.f32.gmra.mrb[60].mxu1 %v7985_v4  ;;  %7060 = vmatprep.mubr.f32.mxu0 %v9318_v56 }
 0x1c9   : > { %6852 = vmatprep.mubr.f32.mxu1 %v7986_v31  ;;  %v1800_v39 = vsel %vm1747_vm3, %v1797_v16, %v1799_v33  ;;  %v1802_v49 = vsel %vm1747_vm3, %v1799_v33, %v1801_v45  ;;  %v6631_v18 = vpop.f32.mrb[52].mxu0  ;;  %v7987_v31 = vld [vmem:[#allocation2 + $0x180] sm:$0xff]  ;;  %v9344_v16 = vld [vmem:[#allocation2 + $0x1a8] sm:$0xff] }
 0x1ca   : > { %v9337_v38 = vadd.f32 %v1800_v39, %v8861_v30  ;;  %v9340_v12 = vadd.f32 %v1802_v49, %v8874_v46  ;;  %v1805_v59 = vrot.slane %v6631_v18, 1  ;;  %v1600_v4 = vpop.f32.mrb[53].mxu0 }
 0x1cb   : > { %7061 = vmatmul.mubr.f32.gmra.mrb[158].mxu0 %v9330_v2  ;;  %v1803_v56 = vrot.slane %v1600_v4, 1  ;;  %v7989_v4 = vld [vmem:[#allocation2 + $0x190] sm:$0xff] }
 0x1cc   : > { %6853 = vmatmul.mubr.f32.gmra.mrb[62].mxu1 %v7987_v31  ;;  %7063 = vmatprep.mubr.f32.mxu0 %v9332_v9  ;;  %v7990_v9 = vld [vmem:[#allocation2 + $0x198] sm:$0xff] }
 0x1cd   : > { %6855 = vmatprep.mubr.f32.mxu1 %v7988_v50  ;;  %v1804_v33 = vsel %vm1747_vm3, %v1801_v45, %v1803_v56  ;;  %v1806_v30 = vsel %vm1747_vm3, %v1803_v56, %v1805_v59  ;;  %v6634_v39 = vpop.f32.mrb[54].mxu0 }
 0x1ce   : > { %v9349_v46 = vadd.f32 %v1804_v33, %v8877_v51  ;;  %v9352_v49 = vadd.f32 %v1806_v30, %v8890_v11  ;;  %v1809_v18 = vrot.slane %v6634_v39, 1  ;;  %v1610_v31 = vpop.f32.mrb[55].mxu0 }
 0x1cf   : > { %7064 = vmatmul.mubr.f32.gmra.mrb[160].mxu0 %v9344_v16  ;;  %v1807_v50 = vrot.slane %v1610_v31, 1  ;;  %v7992_v31 = vld [vmem:[#allocation2 + $0x1a8] sm:$0xff] }
 0x1d0   : > { %6856 = vmatmul.mubr.f32.gmra.mrb[64].mxu1 %v7989_v4  ;;  %7066 = vmatprep.mubr.f32.mxu0 %v8915_v35  ;;  %v7991_v4 = vld [vmem:[#allocation2 + $0x1a0] sm:$0xff] }
 0x1d1   : > { %6858 = vmatprep.mubr.f32.mxu1 %v7990_v9  ;;  %v1808_v56 = vsel %vm1747_vm3, %v1805_v59, %v1807_v50  ;;  %v1810_v45 = vsel %vm1747_vm3, %v1807_v50, %v1809_v18  ;;  %v6637_v51 = vpop.f32.mrb[56].mxu0  ;;  %v9366_v59 = vld [vmem:[#allocation2 + $0x1c8] sm:$0xff]  ;;  %v9368_v50 = vld [vmem:[#allocation2 + $0x1d0] sm:$0xff] }
 0x1d2   : > { %v9359_v33 = vadd.f32 %v1808_v56, %v8893_v19  ;;  %v9362_v11 = vadd.f32 %v1810_v45, %v8906_v32  ;;  %v1813_v30 = vrot.slane %v6637_v51, 1  ;;  %v1620_v39 = vpop.f32.mrb[57].mxu0  ;;  %10401 = vst [vmem:[#allocation54_spill] sm:$0xff] %v9366_v59  ;;  %10402 = vst [vmem:[#allocation55_spill] sm:$0xff] %v9368_v50 }
 0x1d3   : > { %7067 = vmatmul.mubr.f32.gmra.mrb[162].mxu0 %v8917_v48  ;;  %v1811_v9 = vrot.slane %v1620_v39, 1 }
 0x1d4   : > { %6859 = vmatmul.mubr.f32.gmra.mrb[66].mxu1 %v7991_v4  ;;  %7069 = vmatprep.mubr.f32.mxu0 %v8935_v57 }
 0x1d5   : > { %6861 = vmatprep.mubr.f32.mxu1 %v7992_v31  ;;  %v1812_v19 = vsel %vm1747_vm3, %v1809_v18, %v1811_v9  ;;  %v1814_v32 = vsel %vm1747_vm3, %v1811_v9, %v1813_v30  ;;  %v6640_v56 = vpop.f32.mrb[58].mxu0  ;;  %v9382_v18 = vld [vmem:[#allocation2 + $0x1d8] sm:$0xff] }
 0x1d6   : > { %v9373_v45 = vadd.f32 %v1812_v19, %v8909_v41  ;;  %v9376_v51 = vadd.f32 %v1814_v32, %v8926_v6  ;;  %v1817_v39 = vrot.slane %v6640_v56, 1  ;;  %v1630_v4 = vpop.f32.mrb[59].mxu0  ;;  %10403 = vst [vmem:[#allocation56_spill] sm:$0xff] %v9382_v18 }
 0x1d7   : > { %7070 = vmatmul.mubr.f32.gmra.mrb[164].mxu0 %v9366_v59  ;;  %v1815_v31 = vrot.slane %v1630_v4, 1  ;;  %v10440_v59 = vld [vmem:[#allocation35_spill] sm:$0xff] }
 0x1d8   : > { %6862 = vmatmul.mubr.f32.gmra.mrb[68].mxu1 %v8915_v35  ;;  %7072 = vmatprep.mubr.f32.mxu0 %v9368_v50 }
 0x1d9   : > { %6864 = vmatprep.mubr.f32.mxu1 %v8917_v48  ;;  %v1816_v9 = vsel %vm1747_vm3, %v1813_v30, %v1815_v31  ;;  %v1818_v41 = vsel %vm1747_vm3, %v1815_v31, %v1817_v39  ;;  %v6643_v19 = vpop.f32.mrb[60].mxu0 }
 0x1da   : > { %v9387_v6 = vadd.f32 %v1816_v9, %v8929_v24  ;;  %v9390_v32 = vadd.f32 %v1818_v41, %v8946_v37  ;;  %v1821_v35 = vrot.slane %v6643_v19, 1  ;;  %v1640_v56 = vpop.f32.mrb[61].mxu0  ;;  %v10406_v37 = vld [vmem:[#allocation16_spill] sm:$0xff]  ;;  %v10408_v19 = vld [vmem:[#allocation15_spill] sm:$0xff] }
 0x1db   : > { %7073 = vmatmul.mubr.f32.gmra.mrb[166].mxu0 %v9382_v18  ;;  %v1819_v48 = vrot.slane %v1640_v56, 1  ;;  %v10409_v18 = vld [vmem:[#allocation18_spill] sm:$0xff] }
 0x1dc   : > { %10404 = vst [vmem:[#allocation57_spill] sm:$0xff] %v9390_v32  ;;  %6865 = vmatmul.mubr.f32.gmra.mrb[70].mxu1 %v8935_v57  ;;  %7211 = vmatprep.mubr.f32.mxu0 %v8937_v10 }
 0x1dd   : > { %7107 = vmatprep.mubr.f32.mxu1 %v8937_v10  ;;  %v1820_v30 = vsel %vm1747_vm3, %v1817_v39, %v1819_v48  ;;  %v1822_v4 = vsel %vm1747_vm3, %v1819_v48, %v1821_v35  ;;  %v6646_v24 = vpop.f32.mrb[62].mxu0  ;;  %v10410_v48 = vld [vmem:[#allocation17_spill] sm:$0xff] }
 0x1de   : > { %v9399_v31 = vadd.f32 %v1820_v30, %v8949_v7  ;;  %v9402_v9 = vadd.f32 %v1822_v4, %v10406_v37  ;;  %v1825_v41 = vrot.slane %v6646_v24, 1  ;;  %v1650_v57 = vpop.f32.mrb[63].mxu0  ;;  %v10412_v4 = vld [vmem:[#allocation21_spill] sm:$0xff] }
 0x1df   : > { %7212 = vmatmul.mubr.f32.vlgmr.msra.gmra.mrb[168].mxu0 %v10408_v19  ;;  %v1823_v56 = vrot.slane %v1650_v57, 1 }
 0x1e0   : > { %10405 = vst [vmem:[#allocation58_spill] sm:$0xff] %v9399_v31  ;;  %10407 = vst [vmem:[#allocation16_spill] sm:$0xff] %v9402_v9  ;;  %7108 = vmatmul.mubr.f32.vlgmr.msra.gmra.mrb[24].mxu1 %v10408_v19  ;;  %7214 = vmatprep.mubr.f32.mxu0 %v10409_v18  ;;  %v10414_v31 = vld [vmem:[#allocation19_spill] sm:$0xff]  ;;  %v10415_v19 = vld [vmem:[#allocation20_spill] sm:$0xff] }
 0x1e1   : > { %7110 = vmatprep.mubr.f32.mxu1 %v10409_v18  ;;  %v1824_v10 = vsel %vm1747_vm3, %v1821_v35, %v1823_v56  ;;  %v1826_v39 = vsel %vm1747_vm3, %v1823_v56, %v1825_v41  ;;  %v6649_v7 = vpop.f32.mrb[64].mxu0 }
 0x1e2   : > { %v9411_v30 = vadd.f32 %v1824_v10, %v10410_v48  ;;  %v9414_v24 = vadd.f32 %v1826_v39, %v10412_v4  ;;  %v1829_v37 = vrot.slane %v6649_v7, 1  ;;  %v1660_v9 = vpop.f32.mrb[65].mxu0  ;;  %v10416_v10 = vld [vmem:[#allocation22_spill] sm:$0xff]  ;;  %v10418_v39 = vld [vmem:[#allocation25_spill] sm:$0xff] }
 0x1e3   : > { %7215 = vmatmul.mubr.f32.gmra.mrb[170].mxu0 %v10414_v31  ;;  %v1827_v57 = vrot.slane %v1660_v9, 1  ;;  %v10421_v9 = vld [vmem:[#allocation24_spill] sm:$0xff] }
 0x1e4   : > { %10411 = vst [vmem:[#allocation15_spill] sm:$0xff] %v9411_v30  ;;  %10413 = vst [vmem:[#allocation18_spill] sm:$0xff] %v9414_v24  ;;  %7111 = vmatmul.mubr.f32.gmra.mrb[26].mxu1 %v10414_v31  ;;  %7217 = vmatprep.mubr.f32.mxu0 %v10415_v19  ;;  %v10420_v30 = vld [vmem:[#allocation23_spill] sm:$0xff] }
 0x1e5   : > { %7113 = vmatprep.mubr.f32.mxu1 %v10415_v19  ;;  %v1828_v18 = vsel %vm1747_vm3, %v1825_v41, %v1827_v57  ;;  %v1830_v35 = vsel %vm1747_vm3, %v1827_v57, %v1829_v37  ;;  %v6652_v56 = vpop.f32.mrb[66].mxu0 }
 0x1e6   : > { %v9423_v48 = vadd.f32 %v1828_v18, %v10416_v10  ;;  %v9426_v7 = vadd.f32 %v1830_v35, %v10418_v39  ;;  %v1833_v4 = vrot.slane %v6652_v56, 1  ;;  %v1670_v24 = vpop.f32.mrb[67].mxu0  ;;  %v10422_v18 = vld [vmem:[#allocation26_spill] sm:$0xff]  ;;  %v10424_v35 = vld [vmem:[#allocation29_spill] sm:$0xff] }
 0x1e7   : > { %7218 = vmatmul.mubr.f32.gmra.mrb[172].mxu0 %v10420_v30  ;;  %v1831_v31 = vrot.slane %v1670_v24, 1  ;;  %v10427_v24 = vld [vmem:[#allocation28_spill] sm:$0xff] }
 0x1e8   : > { %10417 = vst [vmem:[#allocation17_spill] sm:$0xff] %v9423_v48  ;;  %10419 = vst [vmem:[#allocation21_spill] sm:$0xff] %v9426_v7  ;;  %7114 = vmatmul.mubr.f32.gmra.mrb[28].mxu1 %v10420_v30  ;;  %7220 = vmatprep.mubr.f32.mxu0 %v10421_v9  ;;  %v10426_v48 = vld [vmem:[#allocation27_spill] sm:$0xff] }
 0x1e9   : > { %7116 = vmatprep.mubr.f32.mxu1 %v10421_v9  ;;  %v1832_v41 = vsel %vm1747_vm3, %v1829_v37, %v1831_v31  ;;  %v1834_v57 = vsel %vm1747_vm3, %v1831_v31, %v1833_v4  ;;  %v6655_v19 = vpop.f32.mrb[68].mxu0 }
 0x1ea   : > { %v9435_v10 = vadd.f32 %v1832_v41, %v10422_v18  ;;  %v9438_v56 = vadd.f32 %v1834_v57, %v10424_v35  ;;  %v1837_v39 = vrot.slane %v6655_v19, 1  ;;  %v1680_v7 = vpop.f32.mrb[69].mxu0  ;;  %v10428_v41 = vld [vmem:[#allocation30_spill] sm:$0xff]  ;;  %v10430_v57 = vld [vmem:[#allocation33_spill] sm:$0xff] }
 0x1eb   : > { %7221 = vmatmul.mubr.f32.gmra.mrb[174].mxu0 %v10426_v48  ;;  %v1835_v30 = vrot.slane %v1680_v7, 1  ;;  %v10433_v7 = vld [vmem:[#allocation32_spill] sm:$0xff] }
 0x1ec   : > { %10423 = vst [vmem:[#allocation19_spill] sm:$0xff] %v9435_v10  ;;  %10425 = vst [vmem:[#allocation20_spill] sm:$0xff] %v9438_v56  ;;  %7117 = vmatmul.mubr.f32.gmra.mrb[30].mxu1 %v10426_v48  ;;  %7223 = vmatprep.mubr.f32.mxu0 %v10427_v24  ;;  %v10432_v10 = vld [vmem:[#allocation31_spill] sm:$0xff] }
 0x1ed   : > { %7119 = vmatprep.mubr.f32.mxu1 %v10427_v24  ;;  %v1836_v37 = vsel %vm1747_vm3, %v1833_v4, %v1835_v30  ;;  %v1838_v31 = vsel %vm1747_vm3, %v1835_v30, %v1837_v39  ;;  %v6658_v9 = vpop.f32.mrb[70].mxu0  ;;  %v10434_v30 = vld [vmem:[#allocation38_spill] sm:$0xff] }
 0x1ee   : > { %v9447_v18 = vadd.f32 %v1836_v37, %v10428_v41  ;;  %v9450_v19 = vadd.f32 %v1838_v31, %v10430_v57  ;;  %v1841_v35 = vrot.slane %v6658_v9, 1  ;;  %v1690_v56 = vpop.f32.mrb[71].mxu0  ;;  %v10436_v57 = vld [vmem:[#allocation34_spill] sm:$0xff] }
 0x1ef   : > { %7224 = vmatmul.mubr.f32.gmra.mrb[176].mxu0 %v10432_v10  ;;  %v1839_v48 = vrot.slane %v1690_v56, 1 }
 0x1f0   : > { %10429 = vst [vmem:[#allocation22_spill] sm:$0xff] %v9447_v18  ;;  %10431 = vst [vmem:[#allocation25_spill] sm:$0xff] %v9450_v19  ;;  %7120 = vmatmul.mubr.f32.gmra.mrb[32].mxu1 %v10432_v10  ;;  %7226 = vmatprep.mubr.f32.mxu0 %v10433_v7  ;;  %v1891_v4 = vsel %vm1747_vm3, %v1841_v35, 0.0  ;;  %v10438_v10 = vld [vmem:[#allocation37_spill] sm:$0xff] }
 0x1f1   : > { %7122 = vmatprep.mubr.f32.mxu1 %v10433_v7  ;;  %v9458_v24 = vadd.f32 %v1891_v4, %v10434_v30  ;;  %v1840_v37 = vsel %vm1747_vm3, %v1837_v39, %v1839_v48  ;;  %v1842_v31 = vsel %vm1747_vm3, %v1839_v48, %v1841_v35  ;;  %v6693_v9 = vpop.f32.mrb[72].mxu1  ;;  %v6901_v41 = vpop.f32.mrb[72].mxu0  ;;  %v10441_v30 = vld [vmem:[#allocation36_spill] sm:$0xff] }
 0x1f2   : > { %v9463_v19 = vadd.f32 %v1840_v37, %v10436_v57  ;;  %v9466_v56 = vadd.f32 %v1842_v31, %v10438_v10  ;;  %v2360_v18 = vrot.slane %v6693_v9, 7  ;;  %v3292_v32 = vrot.slane %v6901_v41, 1  ;;  %v2072_v7 = vpop.f32.mrb[73].mxu1  ;;  %v3004_v50 = vpop.f32.mrb[73].mxu0 }
 0x1f3   : > { %10435 = vst [vmem:[#allocation23_spill] sm:$0xff] %v9458_v24  ;;  %7227 = vmatmul.mubr.f32.gmra.mrb[178].mxu0 %v10440_v59  ;;  %v2359_v4 = vrot.slane %v2072_v7, 7  ;;  %v3291_v39 = vrot.slane %v3004_v50, 1  ;;  %v10442_v24 = vld [vmem:[#allocation39_spill] sm:$0xff] }
 0x1f4   : > { %10437 = vst [vmem:[#allocation24_spill] sm:$0xff] %v9463_v19  ;;  %10439 = vst [vmem:[#allocation26_spill] sm:$0xff] %v9466_v56  ;;  %7123 = vmatmul.mubr.f32.gmra.mrb[34].mxu1 %v10440_v59  ;;  %7229 = vmatprep.mubr.f32.mxu0 %v10441_v30 }
 0x1f5   : > { %7125 = vmatprep.mubr.f32.mxu1 %v10441_v30  ;;  %v2361_v35 = vsel %vm862_vm2, %v2359_v4, %v2360_v18  ;;  %v2502_v48 = vsel %vm862_vm2, 0.0, %v2359_v4  ;;  %v3293_v37 = vsel %vm1747_vm3, %v3291_v39, %v3292_v32  ;;  %v6696_v31 = vpop.f32.mrb[74].mxu1  ;;  %v6904_v9 = vpop.f32.mrb[74].mxu0 }
 0x1f6   : > { %v7593_v41 = vadd.f32 %v9156_v55, %v2502_v48  ;;  %v7588_v57 = vadd.f32 %v9172_v22, %v2361_v35  ;;  %v2364_v10 = vrot.slane %v6696_v31, 7  ;;  %v3296_v59 = vrot.slane %v6904_v9, 1  ;;  %v2082_v7 = vpop.f32.mrb[75].mxu1  ;;  %v3014_v50 = vpop.f32.mrb[75].mxu0 }
 0x1f7   : > { %7230 = vmatmul.mubr.f32.gmra.mrb[180].mxu0 %v10442_v24  ;;  %v2362_v30 = vrot.slane %v2082_v7, 7  ;;  %v3294_v56 = vrot.slane %v3014_v50, 1 }
 0x1f8   : > { %7126 = vmatmul.mubr.f32.gmra.mrb[36].mxu1 %v10442_v24  ;;  %7232 = vmatprep.mubr.f32.mxu0 %v9137_v8  ;;  %v9481_v4 = vadd.f32 %v7593_v41, %v3293_v37 }
 0x1f9   : > { %7128 = vmatprep.mubr.f32.mxu1 %v9137_v8  ;;  %v2363_v55 = vsel %vm862_vm2, %v2360_v18, %v2362_v30  ;;  %v2365_v22 = vsel %vm862_vm2, %v2362_v30, %v2364_v10  ;;  %v3295_v39 = vsel %vm1747_vm3, %v3292_v32, %v3294_v56  ;;  %v3297_v35 = vsel %vm1747_vm3, %v3294_v56, %v3296_v59  ;;  %v6699_v48 = vpop.f32.mrb[76].mxu1  ;;  %v6907_v31 = vpop.f32.mrb[76].mxu0 }
 0x1fa   : > { %v7603_v24 = vadd.f32 %v9175_v26, %v2363_v55  ;;  %v7598_v9 = vadd.f32 %v9184_v36, %v2365_v22  ;;  %v2368_v7 = vrot.slane %v6699_v48, 7  ;;  %v3300_v50 = vrot.slane %v6907_v31, 1  ;;  %v2092_v19 = vpop.f32.mrb[77].mxu1  ;;  %v3024_v8 = vpop.f32.mrb[77].mxu0  ;;  %v7993_v31 = vld [vmem:[#allocation2 + $0xc0] sm:$0xff] }
 0x1fb   : > { %7233 = vmatmul.mubr.f32.gmra.mrb[182].mxu0 %v9159_v53  ;;  %v2366_v18 = vrot.slane %v2092_v19, 7  ;;  %v3298_v37 = vrot.slane %v3024_v8, 1  ;;  %v9493_v32 = vadd.f32 %v7588_v57, %v3295_v39 }
 0x1fc   : > { %7129 = vmatmul.mubr.f32.gmra.mrb[38].mxu1 %v9159_v53  ;;  %7235 = vmatprep.mubr.f32.mxu0 %v9161_v42  ;;  %v9495_v56 = vadd.f32 %v7603_v24, %v3297_v35 }
 0x1fd   : > { %7131 = vmatprep.mubr.f32.mxu1 %v9161_v42  ;;  %v2367_v26 = vsel %vm862_vm2, %v2364_v10, %v2366_v18  ;;  %v2369_v36 = vsel %vm862_vm2, %v2366_v18, %v2368_v7  ;;  %v3299_v41 = vsel %vm1747_vm3, %v3296_v59, %v3298_v37  ;;  %v3301_v30 = vsel %vm1747_vm3, %v3298_v37, %v3300_v50  ;;  %v6702_v55 = vpop.f32.mrb[78].mxu1  ;;  %v6910_v53 = vpop.f32.mrb[78].mxu0 }
 0x1fe   : > { %v7613_v19 = vadd.f32 %v9187_v20, %v2367_v26  ;;  %v7608_v22 = vadd.f32 %v9194_v54, %v2369_v36  ;;  %v2372_v48 = vrot.slane %v6702_v55, 7  ;;  %v3304_v42 = vrot.slane %v6910_v53, 1  ;;  %v2102_v57 = vpop.f32.mrb[79].mxu1  ;;  %v3034_v39 = vpop.f32.mrb[79].mxu0 }
 0x1ff   : > { %7236 = vmatmul.mubr.f32.gmra.mrb[184].mxu0 %v9179_v15  ;;  %v2370_v10 = vrot.slane %v2102_v57, 7  ;;  %v3302_v35 = vrot.slane %v3034_v39, 1  ;;  %v9505_v59 = vadd.f32 %v7598_v9, %v3299_v41  ;;  %v7995_v57 = vld [vmem:[#allocation2 + $0xd0] sm:$0xff] }
 0x200   : > { %7132 = vmatmul.mubr.f32.gmra.mrb[40].mxu1 %v9179_v15  ;;  %7238 = vmatprep.mubr.f32.mxu0 %v7993_v31  ;;  %v9507_v24 = vadd.f32 %v7613_v19, %v3301_v30  ;;  %v7994_v30 = vld [vmem:[#allocation2 + $0xc8] sm:$0xff] }
 0x201   : > { %7134 = vmatprep.mubr.f32.mxu1 %v7993_v31  ;;  %v2371_v20 = vsel %vm862_vm2, %v2368_v7, %v2370_v10  ;;  %v2373_v54 = vsel %vm862_vm2, %v2370_v10, %v2372_v48  ;;  %v3303_v8 = vsel %vm1747_vm3, %v3300_v50, %v3302_v35  ;;  %v3305_v18 = vsel %vm1747_vm3, %v3302_v35, %v3304_v42  ;;  %v6705_v37 = vpop.f32.mrb[80].mxu1  ;;  %v6913_v26 = vpop.f32.mrb[80].mxu0 }
 0x202   : > { %v7623_v15 = vadd.f32 %v9197_v44, %v2371_v20  ;;  %v7618_v36 = vadd.f32 %v9208_v21, %v2373_v54  ;;  %v2376_v55 = vrot.slane %v6705_v37, 7  ;;  %v3308_v53 = vrot.slane %v6913_v26, 1  ;;  %v2112_v9 = vpop.f32.mrb[81].mxu1  ;;  %v3044_v41 = vpop.f32.mrb[81].mxu0 }
 0x203   : > { %7239 = vmatmul.mubr.f32.gmra.mrb[186].mxu0 %v7994_v30  ;;  %v2374_v7 = vrot.slane %v2112_v9, 7  ;;  %v3306_v19 = vrot.slane %v3044_v41, 1  ;;  %v9515_v50 = vadd.f32 %v7608_v22, %v3303_v8 }
 0x204   : > { %7135 = vmatmul.mubr.f32.gmra.mrb[42].mxu1 %v7994_v30  ;;  %7241 = vmatprep.mubr.f32.mxu0 %v7995_v57  ;;  %v9517_v39 = vadd.f32 %v7623_v15, %v3305_v18 }
 0x205   : > { %7137 = vmatprep.mubr.f32.mxu1 %v7995_v57  ;;  %v2375_v44 = vsel %vm862_vm2, %v2372_v48, %v2374_v7  ;;  %v2377_v21 = vsel %vm862_vm2, %v2374_v7, %v2376_v55  ;;  %v3307_v10 = vsel %vm1747_vm3, %v3304_v42, %v3306_v19  ;;  %v3309_v35 = vsel %vm1747_vm3, %v3306_v19, %v3308_v53  ;;  %v6708_v31 = vpop.f32.mrb[82].mxu1  ;;  %v6916_v20 = vpop.f32.mrb[82].mxu0 }
 0x206   : > { %v7633_v54 = vadd.f32 %v9211_v40, %v2375_v44  ;;  %v7628_v37 = vadd.f32 %v9224_v29, %v2377_v21  ;;  %v2380_v26 = vrot.slane %v6708_v31, 7  ;;  %v3312_v9 = vrot.slane %v6916_v20, 1  ;;  %v2122_v22 = vpop.f32.mrb[83].mxu1  ;;  %v3054_v8 = vpop.f32.mrb[83].mxu0 }
 0x207   : > { %7242 = vmatmul.mubr.f32.gmra.mrb[188].mxu0 %v9201_v1  ;;  %v2378_v48 = vrot.slane %v2122_v22, 7  ;;  %v3310_v18 = vrot.slane %v3054_v8, 1  ;;  %v9529_v42 = vadd.f32 %v7618_v36, %v3307_v10 }
 0x208   : > { %7138 = vmatmul.mubr.f32.gmra.mrb[44].mxu1 %v9201_v1  ;;  %7244 = vmatprep.mubr.f32.mxu0 %v9203_v28  ;;  %v9531_v15 = vadd.f32 %v7633_v54, %v3309_v35 }
 0x209   : > { %7140 = vmatprep.mubr.f32.mxu1 %v9203_v28  ;;  %v2379_v40 = vsel %vm862_vm2, %v2376_v55, %v2378_v48  ;;  %v2381_v29 = vsel %vm862_vm2, %v2378_v48, %v2380_v26  ;;  %v3311_v41 = vsel %vm1747_vm3, %v3308_v53, %v3310_v18  ;;  %v3313_v30 = vsel %vm1747_vm3, %v3310_v18, %v3312_v9  ;;  %v6711_v7 = vpop.f32.mrb[84].mxu1  ;;  %v6919_v1 = vpop.f32.mrb[84].mxu0 }
 0x20a   : > { %v7643_v19 = vadd.f32 %v9227_v3, %v2379_v40  ;;  %v7638_v57 = vadd.f32 %v9239_v62, %v2381_v29  ;;  %v2384_v44 = vrot.slane %v6711_v7, 7  ;;  %v3316_v28 = vrot.slane %v6919_v1, 1  ;;  %v2132_v36 = vpop.f32.mrb[85].mxu1  ;;  %v3064_v21 = vpop.f32.mrb[85].mxu0  ;;  %v10443_v29 = vld [vmem:[#allocation40_spill] sm:$0xff] }
 0x20b   : > { %7245 = vmatmul.mubr.f32.gmra.mrb[190].mxu0 %v9217_v25  ;;  %v2382_v55 = vrot.slane %v2132_v36, 7  ;;  %v3314_v10 = vrot.slane %v3064_v21, 1  ;;  %v9543_v53 = vadd.f32 %v7628_v37, %v3311_v41 }
 0x20c   : > { %7141 = vmatmul.mubr.f32.gmra.mrb[46].mxu1 %v9217_v25  ;;  %7247 = vmatprep.mubr.f32.mxu0 %v9219_v60  ;;  %v9545_v35 = vadd.f32 %v7643_v19, %v3313_v30 }
 0x20d   : > { %7143 = vmatprep.mubr.f32.mxu1 %v9219_v60  ;;  %v2383_v3 = vsel %vm862_vm2, %v2380_v26, %v2382_v55  ;;  %v2385_v62 = vsel %vm862_vm2, %v2382_v55, %v2384_v44  ;;  %v3315_v31 = vsel %vm1747_vm3, %v3312_v9, %v3314_v10  ;;  %v3317_v20 = vsel %vm1747_vm3, %v3314_v10, %v3316_v28  ;;  %v6714_v54 = vpop.f32.mrb[86].mxu1  ;;  %v6922_v25 = vpop.f32.mrb[86].mxu0 }
 0x20e   : > { %v7653_v22 = vadd.f32 %v9242_v13, %v2383_v3  ;;  %v7648_v8 = vadd.f32 %v9253_v58, %v2385_v62  ;;  %v2388_v48 = vrot.slane %v6714_v54, 7  ;;  %v3320_v60 = vrot.slane %v6922_v25, 1  ;;  %v2142_v37 = vpop.f32.mrb[87].mxu1  ;;  %v3074_v18 = vpop.f32.mrb[87].mxu0  ;;  %v10444_v3 = vld [vmem:[#allocation41_spill] sm:$0xff] }
 0x20f   : > { %7248 = vmatmul.mubr.f32.gmra.mrb[192].mxu0 %v9232_v34  ;;  %v2386_v26 = vrot.slane %v2142_v37, 7  ;;  %v3318_v40 = vrot.slane %v3074_v18, 1  ;;  %v9557_v9 = vadd.f32 %v7638_v57, %v3315_v31  ;;  %v10445_v31 = vld [vmem:[#allocation42_spill] sm:$0xff] }
 0x210   : > { %7144 = vmatmul.mubr.f32.gmra.mrb[48].mxu1 %v9232_v34  ;;  %7250 = vmatprep.mubr.f32.mxu0 %v10443_v29  ;;  %v9559_v41 = vadd.f32 %v7653_v22, %v3317_v20 }
 0x211   : > { %7146 = vmatprep.mubr.f32.mxu1 %v10443_v29  ;;  %v2387_v13 = vsel %vm862_vm2, %v2384_v44, %v2386_v26  ;;  %v2389_v58 = vsel %vm862_vm2, %v2386_v26, %v2388_v48  ;;  %v3319_v30 = vsel %vm1747_vm3, %v3316_v28, %v3318_v40  ;;  %v3321_v7 = vsel %vm1747_vm3, %v3318_v40, %v3320_v60  ;;  %v6717_v1 = vpop.f32.mrb[88].mxu1  ;;  %v6925_v34 = vpop.f32.mrb[88].mxu0 }
 0x212   : > { %v7663_v19 = vadd.f32 %v9256_v0, %v2387_v13  ;;  %v7658_v36 = vadd.f32 %v9267_v43, %v2389_v58  ;;  %v2392_v21 = vrot.slane %v6717_v1, 7  ;;  %v3324_v55 = vrot.slane %v6925_v34, 1  ;;  %v2152_v57 = vpop.f32.mrb[89].mxu1  ;;  %v3084_v10 = vpop.f32.mrb[89].mxu0  ;;  %v10446_v58 = vld [vmem:[#allocation43_spill] sm:$0xff] }
 0x213   : > { %7251 = vmatmul.mubr.f32.gmra.mrb[194].mxu0 %v10444_v3  ;;  %v2390_v44 = vrot.slane %v2152_v57, 7  ;;  %v3322_v62 = vrot.slane %v3084_v10, 1  ;;  %v9571_v28 = vadd.f32 %v7648_v8, %v3319_v30 }
 0x214   : > { %7147 = vmatmul.mubr.f32.gmra.mrb[50].mxu1 %v10444_v3  ;;  %7253 = vmatprep.mubr.f32.mxu0 %v10445_v31  ;;  %v9573_v20 = vadd.f32 %v7663_v19, %v3321_v7  ;;  %v10447_v7 = vld [vmem:[#allocation44_spill] sm:$0xff] }
 0x215   : > { %7149 = vmatprep.mubr.f32.mxu1 %v10445_v31  ;;  %v2391_v0 = vsel %vm862_vm2, %v2388_v48, %v2390_v44  ;;  %v2393_v43 = vsel %vm862_vm2, %v2390_v44, %v2392_v21  ;;  %v3323_v54 = vsel %vm1747_vm3, %v3320_v60, %v3322_v62  ;;  %v3325_v25 = vsel %vm1747_vm3, %v3322_v62, %v3324_v55  ;;  %v6720_v22 = vpop.f32.mrb[90].mxu1  ;;  %v6928_v37 = vpop.f32.mrb[90].mxu0 }
 0x216   : > { %v7673_v18 = vadd.f32 %v9270_v17, %v2391_v0  ;;  %v7668_v26 = vadd.f32 %v9281_v14, %v2393_v43  ;;  %v2396_v40 = vrot.slane %v6720_v22, 7  ;;  %v3328_v29 = vrot.slane %v6928_v37, 1  ;;  %v2162_v8 = vpop.f32.mrb[91].mxu1  ;;  %v3094_v13 = vpop.f32.mrb[91].mxu0  ;;  %v10448_v43 = vld [vmem:[#allocation45_spill] sm:$0xff] }
 0x217   : > { %7254 = vmatmul.mubr.f32.gmra.mrb[196].mxu0 %v10446_v58  ;;  %v2394_v48 = vrot.slane %v2162_v8, 7  ;;  %v3326_v30 = vrot.slane %v3094_v13, 1  ;;  %v9585_v60 = vadd.f32 %v7658_v36, %v3323_v54 }
 0x218   : > { %7150 = vmatmul.mubr.f32.gmra.mrb[52].mxu1 %v10446_v58  ;;  %7256 = vmatprep.mubr.f32.mxu0 %v10447_v7  ;;  %v9587_v1 = vadd.f32 %v7673_v18, %v3325_v25  ;;  %v10449_v25 = vld [vmem:[#allocation46_spill] sm:$0xff] }
 0x219   : > { %7152 = vmatprep.mubr.f32.mxu1 %v10447_v7  ;;  %v2395_v17 = vsel %vm862_vm2, %v2392_v21, %v2394_v48  ;;  %v2397_v14 = vsel %vm862_vm2, %v2394_v48, %v2396_v40  ;;  %v3327_v34 = vsel %vm1747_vm3, %v3324_v55, %v3326_v30  ;;  %v3329_v19 = vsel %vm1747_vm3, %v3326_v30, %v3328_v29  ;;  %v6723_v57 = vpop.f32.mrb[92].mxu1  ;;  %v6931_v10 = vpop.f32.mrb[92].mxu0 }
 0x21a   : > { %v7683_v3 = vadd.f32 %v9284_v5, %v2395_v17  ;;  %v7678_v44 = vadd.f32 %v9295_v61, %v2397_v14  ;;  %v2400_v62 = vrot.slane %v6723_v57, 7  ;;  %v3332_v31 = vrot.slane %v6931_v10, 1  ;;  %v2172_v36 = vpop.f32.mrb[93].mxu1  ;;  %v3104_v0 = vpop.f32.mrb[93].mxu0  ;;  %v10450_v14 = vld [vmem:[#allocation47_spill] sm:$0xff] }
 0x21b   : > { %7257 = vmatmul.mubr.f32.gmra.mrb[198].mxu0 %v10448_v43  ;;  %v2398_v21 = vrot.slane %v2172_v36, 7  ;;  %v3330_v54 = vrot.slane %v3104_v0, 1  ;;  %v9599_v55 = vadd.f32 %v7668_v26, %v3327_v34 }
 0x21c   : > { %7153 = vmatmul.mubr.f32.gmra.mrb[54].mxu1 %v10448_v43  ;;  %7259 = vmatprep.mubr.f32.mxu0 %v10449_v25  ;;  %v9601_v22 = vadd.f32 %v7683_v3, %v3329_v19  ;;  %v10451_v19 = vld [vmem:[#allocation48_spill] sm:$0xff] }
 0x21d   : > { %7155 = vmatprep.mubr.f32.mxu1 %v10449_v25  ;;  %v2399_v5 = vsel %vm862_vm2, %v2396_v40, %v2398_v21  ;;  %v2401_v61 = vsel %vm862_vm2, %v2398_v21, %v2400_v62  ;;  %v3331_v37 = vsel %vm1747_vm3, %v3328_v29, %v3330_v54  ;;  %v3333_v18 = vsel %vm1747_vm3, %v3330_v54, %v3332_v31  ;;  %v6726_v8 = vpop.f32.mrb[94].mxu1  ;;  %v6934_v13 = vpop.f32.mrb[94].mxu0 }
 0x21e   : > { %v7693_v58 = vadd.f32 %v9298_v47, %v2399_v5  ;;  %v7688_v48 = vadd.f32 %v9309_v23, %v2401_v61  ;;  %v2404_v30 = vrot.slane %v6726_v8, 7  ;;  %v3336_v7 = vrot.slane %v6934_v13, 1  ;;  %v2182_v26 = vpop.f32.mrb[95].mxu1  ;;  %v3114_v17 = vpop.f32.mrb[95].mxu0  ;;  %v10452_v61 = vld [vmem:[#allocation49_spill] sm:$0xff] }
 0x21f   : > { %7260 = vmatmul.mubr.f32.gmra.mrb[200].mxu0 %v10450_v14  ;;  %v2402_v40 = vrot.slane %v2182_v26, 7  ;;  %v3334_v34 = vrot.slane %v3114_v17, 1  ;;  %v9613_v29 = vadd.f32 %v7678_v44, %v3331_v37 }
 0x220   : > { %7156 = vmatmul.mubr.f32.gmra.mrb[56].mxu1 %v10450_v14  ;;  %7262 = vmatprep.mubr.f32.mxu0 %v10451_v19  ;;  %v9615_v57 = vadd.f32 %v7693_v58, %v3333_v18  ;;  %v10453_v18 = vld [vmem:[#allocation50_spill] sm:$0xff] }
 0x221   : > { %7158 = vmatprep.mubr.f32.mxu1 %v10451_v19  ;;  %v2403_v47 = vsel %vm862_vm2, %v2400_v62, %v2402_v40  ;;  %v2405_v23 = vsel %vm862_vm2, %v2402_v40, %v2404_v30  ;;  %v3335_v10 = vsel %vm1747_vm3, %v3332_v31, %v3334_v34  ;;  %v3337_v3 = vsel %vm1747_vm3, %v3334_v34, %v3336_v7  ;;  %v6729_v36 = vpop.f32.mrb[96].mxu1  ;;  %v6937_v0 = vpop.f32.mrb[96].mxu0 }
 0x222   : > { %v7703_v43 = vadd.f32 %v9312_v63, %v2403_v47  ;;  %v7698_v21 = vadd.f32 %v9323_v27, %v2405_v23  ;;  %v2408_v54 = vrot.slane %v6729_v36, 7  ;;  %v3340_v25 = vrot.slane %v6937_v0, 1  ;;  %v2192_v44 = vpop.f32.mrb[97].mxu1  ;;  %v3124_v5 = vpop.f32.mrb[97].mxu0  ;;  %v10454_v23 = vld [vmem:[#allocation51_spill] sm:$0xff] }
 0x223   : > { %7263 = vmatmul.mubr.f32.gmra.mrb[202].mxu0 %v10452_v61  ;;  %v2406_v62 = vrot.slane %v2192_v44, 7  ;;  %v3338_v37 = vrot.slane %v3124_v5, 1  ;;  %v9627_v31 = vadd.f32 %v7688_v48, %v3335_v10 }
 0x224   : > { %7159 = vmatmul.mubr.f32.gmra.mrb[58].mxu1 %v10452_v61  ;;  %7265 = vmatprep.mubr.f32.mxu0 %v10453_v18  ;;  %v9629_v8 = vadd.f32 %v7703_v43, %v3337_v3  ;;  %v10455_v3 = vld [vmem:[#allocation52_spill] sm:$0xff] }
 0x225   : > { %7161 = vmatprep.mubr.f32.mxu1 %v10453_v18  ;;  %v2407_v63 = vsel %vm862_vm2, %v2404_v30, %v2406_v62  ;;  %v2409_v27 = vsel %vm862_vm2, %v2406_v62, %v2408_v54  ;;  %v3339_v13 = vsel %vm1747_vm3, %v3336_v7, %v3338_v37  ;;  %v3341_v58 = vsel %vm1747_vm3, %v3338_v37, %v3340_v25  ;;  %v6732_v26 = vpop.f32.mrb[98].mxu1  ;;  %v6940_v17 = vpop.f32.mrb[98].mxu0 }
 0x226   : > { %v7713_v14 = vadd.f32 %v9326_v52, %v2407_v63  ;;  %v7708_v40 = vadd.f32 %v9337_v38, %v2409_v27  ;;  %v2412_v34 = vrot.slane %v6732_v26, 7  ;;  %v3344_v19 = vrot.slane %v6940_v17, 1  ;;  %v2202_v48 = vpop.f32.mrb[99].mxu1  ;;  %v3134_v47 = vpop.f32.mrb[99].mxu0 }
 0x227   : > { %7266 = vmatmul.mubr.f32.gmra.mrb[204].mxu0 %v10454_v23  ;;  %v2410_v30 = vrot.slane %v2202_v48, 7  ;;  %v3342_v10 = vrot.slane %v3134_v47, 1  ;;  %v9641_v7 = vadd.f32 %v7698_v21, %v3339_v13  ;;  %v10456_v13 = vld [vmem:[#allocation53_spill] sm:$0xff] }
 0x228   : > { %7162 = vmatmul.mubr.f32.gmra.mrb[60].mxu1 %v10454_v23  ;;  %7268 = vmatprep.mubr.f32.mxu0 %v10455_v3  ;;  %v9643_v36 = vadd.f32 %v7713_v14, %v3341_v58 }
 0x229   : > { %7164 = vmatprep.mubr.f32.mxu1 %v10455_v3  ;;  %v2411_v52 = vsel %vm862_vm2, %v2408_v54, %v2410_v30  ;;  %v2413_v38 = vsel %vm862_vm2, %v2410_v30, %v2412_v34  ;;  %v3343_v0 = vsel %vm1747_vm3, %v3340_v25, %v3342_v10  ;;  %v3345_v43 = vsel %vm1747_vm3, %v3342_v10, %v3344_v19  ;;  %v6735_v44 = vpop.f32.mrb[100].mxu1  ;;  %v6943_v5 = vpop.f32.mrb[100].mxu0 }
 0x22a   : > { %v7723_v61 = vadd.f32 %v9340_v12, %v2411_v52  ;;  %v7718_v62 = vadd.f32 %v9349_v46, %v2413_v38  ;;  %v2416_v37 = vrot.slane %v6735_v44, 7  ;;  %v3348_v18 = vrot.slane %v6943_v5, 1  ;;  %v2212_v21 = vpop.f32.mrb[101].mxu1  ;;  %v3144_v63 = vpop.f32.mrb[101].mxu0  ;;  %v7996_v52 = vld [vmem:[#allocation2 + $0x1b0] sm:$0xff] }
 0x22b   : > { %7269 = vmatmul.mubr.f32.gmra.mrb[206].mxu0 %v9330_v2  ;;  %v2414_v54 = vrot.slane %v2212_v21, 7  ;;  %v3346_v27 = vrot.slane %v3144_v63, 1  ;;  %v9655_v25 = vadd.f32 %v7708_v40, %v3343_v0 }
 0x22c   : > { %7165 = vmatmul.mubr.f32.gmra.mrb[62].mxu1 %v9330_v2  ;;  %7271 = vmatprep.mubr.f32.mxu0 %v10456_v13  ;;  %v9657_v58 = vadd.f32 %v7723_v61, %v3345_v43 }
 0x22d   : > { %7167 = vmatprep.mubr.f32.mxu1 %v10456_v13  ;;  %v2415_v12 = vsel %vm862_vm2, %v2412_v34, %v2414_v54  ;;  %v2417_v46 = vsel %vm862_vm2, %v2414_v54, %v2416_v37  ;;  %v3347_v26 = vsel %vm1747_vm3, %v3344_v19, %v3346_v27  ;;  %v3349_v17 = vsel %vm1747_vm3, %v3346_v27, %v3348_v18  ;;  %v6738_v14 = vpop.f32.mrb[102].mxu1  ;;  %v6946_v2 = vpop.f32.mrb[102].mxu0  ;;  %v7997_v27 = vld [vmem:[#allocation2 + $0x1b8] sm:$0xff] }
 0x22e   : > { %v7733_v48 = vadd.f32 %v9352_v49, %v2415_v12  ;;  %v7728_v47 = vadd.f32 %v9359_v33, %v2417_v46  ;;  %v2420_v23 = vrot.slane %v6738_v14, 7  ;;  %v3352_v30 = vrot.slane %v6946_v2, 1  ;;  %v2222_v40 = vpop.f32.mrb[103].mxu1  ;;  %v3154_v10 = vpop.f32.mrb[103].mxu0  ;;  %v7998_v12 = vld [vmem:[#allocation2 + $0x1c0] sm:$0xff] }
 0x22f   : > { %7272 = vmatmul.mubr.f32.gmra.mrb[208].mxu0 %v9344_v16  ;;  %v2418_v34 = vrot.slane %v2222_v40, 7  ;;  %v3350_v3 = vrot.slane %v3154_v10, 1  ;;  %v9667_v19 = vadd.f32 %v7718_v62, %v3347_v26 }
 0x230   : > { %7168 = vmatmul.mubr.f32.gmra.mrb[64].mxu1 %v9344_v16  ;;  %7274 = vmatprep.mubr.f32.mxu0 %v7996_v52  ;;  %v9669_v38 = vadd.f32 %v7733_v48, %v3349_v17 }
 0x231   : > { %7170 = vmatprep.mubr.f32.mxu1 %v7996_v52  ;;  %v2419_v49 = vsel %vm862_vm2, %v2416_v37, %v2418_v34  ;;  %v2421_v33 = vsel %vm862_vm2, %v2418_v34, %v2420_v23  ;;  %v3351_v0 = vsel %vm1747_vm3, %v3348_v18, %v3350_v3  ;;  %v3353_v43 = vsel %vm1747_vm3, %v3350_v3, %v3352_v30  ;;  %v6741_v44 = vpop.f32.mrb[104].mxu1  ;;  %v6949_v5 = vpop.f32.mrb[104].mxu0  ;;  %v10457_v52 = vld [vmem:[#allocation54_spill] sm:$0xff] }
 0x232   : > { %v7743_v16 = vadd.f32 %v9362_v11, %v2419_v49  ;;  %v7738_v61 = vadd.f32 %v9373_v45, %v2421_v33  ;;  %v2424_v21 = vrot.slane %v6741_v44, 7  ;;  %v3356_v63 = vrot.slane %v6949_v5, 1  ;;  %v2232_v62 = vpop.f32.mrb[105].mxu1  ;;  %v3164_v54 = vpop.f32.mrb[105].mxu0  ;;  %v10458_v33 = vld [vmem:[#allocation55_spill] sm:$0xff] }
 0x233   : > { %7275 = vmatmul.mubr.f32.gmra.mrb[210].mxu0 %v7997_v27  ;;  %v2422_v37 = vrot.slane %v2232_v62, 7  ;;  %v3354_v13 = vrot.slane %v3164_v54, 1  ;;  %v9677_v18 = vadd.f32 %v7728_v47, %v3351_v0  ;;  %v10459_v62 = vld [vmem:[#allocation57_spill] sm:$0xff] }
 0x234   : > { %7171 = vmatmul.mubr.f32.gmra.mrb[66].mxu1 %v7997_v27  ;;  %7277 = vmatprep.mubr.f32.mxu0 %v7998_v12  ;;  %v9679_v46 = vadd.f32 %v7743_v16, %v3353_v43  ;;  %v10460_v27 = vld [vmem:[#allocation58_spill] sm:$0xff] }
 0x235   : > { %7173 = vmatprep.mubr.f32.mxu1 %v7998_v12  ;;  %v2423_v11 = vsel %vm862_vm2, %v2420_v23, %v2422_v37  ;;  %v2425_v45 = vsel %vm862_vm2, %v2422_v37, %v2424_v21  ;;  %v3355_v26 = vsel %vm1747_vm3, %v3352_v30, %v3354_v13  ;;  %v3357_v17 = vsel %vm1747_vm3, %v3354_v13, %v3356_v63  ;;  %v6744_v14 = vpop.f32.mrb[106].mxu1  ;;  %v6952_v2 = vpop.f32.mrb[106].mxu0 }
 0x236   : > { %v7753_v48 = vadd.f32 %v9376_v51, %v2423_v11  ;;  %v7748_v40 = vadd.f32 %v9387_v6, %v2425_v45  ;;  %v2428_v10 = vrot.slane %v6744_v14, 7  ;;  %v3360_v34 = vrot.slane %v6952_v2, 1  ;;  %v2242_v47 = vpop.f32.mrb[107].mxu1  ;;  %v3174_v3 = vpop.f32.mrb[107].mxu0  ;;  %v10461_v45 = vld [vmem:[#allocation56_spill] sm:$0xff] }
 0x237   : > { %7278 = vmatmul.mubr.f32.gmra.mrb[212].mxu0 %v10457_v52  ;;  %v2426_v23 = vrot.slane %v2242_v47, 7  ;;  %v3358_v49 = vrot.slane %v3174_v3, 1  ;;  %v9691_v30 = vadd.f32 %v7738_v61, %v3355_v26 }
 0x238   : > { %7174 = vmatmul.mubr.f32.gmra.mrb[68].mxu1 %v10457_v52  ;;  %7280 = vmatprep.mubr.f32.mxu0 %v10458_v33  ;;  %v9693_v0 = vadd.f32 %v7753_v48, %v3357_v17 }
 0x239   : > { %7176 = vmatprep.mubr.f32.mxu1 %v10458_v33  ;;  %v2427_v51 = vsel %vm862_vm2, %v2424_v21, %v2426_v23  ;;  %v2429_v6 = vsel %vm862_vm2, %v2426_v23, %v2428_v10  ;;  %v3359_v43 = vsel %vm1747_vm3, %v3356_v63, %v3358_v49  ;;  %v3361_v44 = vsel %vm1747_vm3, %v3358_v49, %v3360_v34  ;;  %v6747_v5 = vpop.f32.mrb[108].mxu1  ;;  %v6955_v16 = vpop.f32.mrb[108].mxu0  ;;  %v10462_v23 = vld [vmem:[#allocation16_spill] sm:$0xff]  ;;  %v10463_v33 = vld [vmem:[#allocation15_spill] sm:$0xff] }
 0x23a   : > { %v7763_v54 = vadd.f32 %v10459_v62, %v2427_v51  ;;  %v7758_v37 = vadd.f32 %v10460_v27, %v2429_v6  ;;  %v2432_v13 = vrot.slane %v6747_v5, 7  ;;  %v3364_v12 = vrot.slane %v6955_v16, 1  ;;  %v2252_v61 = vpop.f32.mrb[109].mxu1  ;;  %v3184_v11 = vpop.f32.mrb[109].mxu0 }
 0x23b   : > { %7281 = vmatmul.mubr.f32.gmra.mrb[214].mxu0 %v10461_v45  ;;  %v2430_v21 = vrot.slane %v2252_v61, 7  ;;  %v3362_v26 = vrot.slane %v3184_v11, 1  ;;  %v9703_v17 = vadd.f32 %v7748_v40, %v3359_v43 }
 0x23c   : > { %7177 = vmatmul.mubr.f32.gmra.mrb[70].mxu1 %v10461_v45  ;;  %v9705_v63 = vadd.f32 %v7763_v54, %v3361_v44 }
 0x23d   : > { %v2431_v14 = vsel %vm862_vm2, %v2428_v10, %v2430_v21  ;;  %v2433_v2 = vsel %vm862_vm2, %v2430_v21, %v2432_v13  ;;  %v3363_v48 = vsel %vm1747_vm3, %v3360_v34, %v3362_v26  ;;  %v3365_v47 = vsel %vm1747_vm3, %v3362_v26, %v3364_v12  ;;  %v6750_v3 = vpop.f32.mrb[110].mxu1  ;;  %v6958_v52 = vpop.f32.mrb[110].mxu0  ;;  %v10464_v21 = vld [vmem:[#allocation18_spill] sm:$0xff] }
 0x23e   : > { %v7773_v49 = vadd.f32 %v10462_v23, %v2431_v14  ;;  %v7768_v51 = vadd.f32 %v10463_v33, %v2433_v2  ;;  %v2436_v6 = vrot.slane %v6750_v3, 7  ;;  %v3368_v5 = vrot.slane %v6958_v52, 1  ;;  %v2262_v40 = vpop.f32.mrb[111].mxu1  ;;  %v3194_v43 = vpop.f32.mrb[111].mxu0  ;;  %v10465_v14 = vld [vmem:[#allocation17_spill] sm:$0xff] }
 0x23f   : > { %v2434_v44 = vrot.slane %v2262_v40, 7  ;;  %v3366_v16 = vrot.slane %v3194_v43, 1  ;;  %v9713_v62 = vadd.f32 %v7758_v37, %v3363_v48 }
 0x240   : > { %v9715_v10 = vadd.f32 %v7773_v49, %v3365_v47 }
 0x241   : > { %v2435_v34 = vsel %vm862_vm2, %v2432_v13, %v2434_v44  ;;  %v2437_v54 = vsel %vm862_vm2, %v2434_v44, %v2436_v6  ;;  %v3367_v27 = vsel %vm1747_vm3, %v3364_v12, %v3366_v16  ;;  %v3369_v61 = vsel %vm1747_vm3, %v3366_v16, %v3368_v5  ;;  %v6753_v11 = vpop.f32.mrb[112].mxu1  ;;  %v6961_v45 = vpop.f32.mrb[112].mxu0 }
 0x242   : > { %v7783_v26 = vadd.f32 %v10464_v21, %v2435_v34  ;;  %v7778_v2 = vadd.f32 %v10465_v14, %v2437_v54  ;;  %v2440_v3 = vrot.slane %v6753_v11, 7  ;;  %v3372_v52 = vrot.slane %v6961_v45, 1  ;;  %v2272_v37 = vpop.f32.mrb[113].mxu1  ;;  %v3204_v48 = vpop.f32.mrb[113].mxu0  ;;  %v10467_v34 = vld [vmem:[#allocation21_spill] sm:$0xff]  ;;  %v10468_v11 = vld [vmem:[#allocation19_spill] sm:$0xff] }
 0x243   : > { %v2438_v47 = vrot.slane %v2272_v37, 7  ;;  %v3370_v23 = vrot.slane %v3204_v48, 1  ;;  %v9723_v49 = vadd.f32 %v7768_v51, %v3367_v27 }
 0x244   : > { %v9725_v13 = vadd.f32 %v7783_v26, %v3369_v61 }
 0x245   : > { %v2439_v12 = vsel %vm862_vm2, %v2436_v6, %v2438_v47  ;;  %v2441_v33 = vsel %vm862_vm2, %v2438_v47, %v2440_v3  ;;  %v3371_v40 = vsel %vm1747_vm3, %v3368_v5, %v3370_v23  ;;  %v3373_v43 = vsel %vm1747_vm3, %v3370_v23, %v3372_v52  ;;  %v6756_v44 = vpop.f32.mrb[114].mxu1  ;;  %v6964_v16 = vpop.f32.mrb[114].mxu0 }
 0x246   : > { %10466 = vst [vmem:[#allocation29_spill] sm:$0xff] %v9725_v13  ;;  %v7793_v54 = vadd.f32 %v10467_v34, %v2439_v12  ;;  %v7788_v45 = vadd.f32 %v10468_v11, %v2441_v33  ;;  %v2444_v21 = vrot.slane %v6756_v44, 7  ;;  %v3376_v14 = vrot.slane %v6964_v16, 1  ;;  %v2282_v51 = vpop.f32.mrb[115].mxu1  ;;  %v3214_v27 = vpop.f32.mrb[115].mxu0  ;;  %v10470_v44 = vld [vmem:[#allocation20_spill] sm:$0xff] }
 0x247   : > { %v2442_v61 = vrot.slane %v2282_v51, 7  ;;  %v3374_v26 = vrot.slane %v3214_v27, 1  ;;  %v9733_v37 = vadd.f32 %v7778_v2, %v3371_v40  ;;  %v10471_v34 = vld [vmem:[#allocation22_spill] sm:$0xff] }
 0x248   : > { %v9735_v6 = vadd.f32 %v7793_v54, %v3373_v43 }
 0x249   : > { %v2443_v5 = vsel %vm862_vm2, %v2440_v3, %v2442_v61  ;;  %v2445_v48 = vsel %vm862_vm2, %v2442_v61, %v2444_v21  ;;  %v3375_v47 = vsel %vm1747_vm3, %v3372_v52, %v3374_v26  ;;  %v3377_v23 = vsel %vm1747_vm3, %v3374_v26, %v3376_v14  ;;  %v6759_v12 = vpop.f32.mrb[116].mxu1  ;;  %v6967_v33 = vpop.f32.mrb[116].mxu0 }
 0x24a   : > { %10469 = vst [vmem:[#allocation27_spill] sm:$0xff] %v9735_v6  ;;  %v7803_v16 = vadd.f32 %v10470_v44, %v2443_v5  ;;  %v7798_v11 = vadd.f32 %v10471_v34, %v2445_v48  ;;  %v2448_v51 = vrot.slane %v6759_v12, 7  ;;  %v3380_v27 = vrot.slane %v6967_v33, 1  ;;  %v2292_v2 = vpop.f32.mrb[117].mxu1  ;;  %v3224_v40 = vpop.f32.mrb[117].mxu0  ;;  %v10474_v12 = vld [vmem:[#allocation25_spill] sm:$0xff] }
 0x24b   : > { %v2446_v43 = vrot.slane %v2292_v2, 7  ;;  %v3378_v54 = vrot.slane %v3224_v40, 1  ;;  %v9743_v6 = vadd.f32 %v7788_v45, %v3375_v47  ;;  %v10475_v34 = vld [vmem:[#allocation24_spill] sm:$0xff] }
 0x24c   : > { %v9745_v3 = vadd.f32 %v7803_v16, %v3377_v23 }
 0x24d   : > { %10472 = vst [vmem:[#allocation28_spill] sm:$0xff] %v9743_v6  ;;  %v2447_v52 = vsel %vm862_vm2, %v2444_v21, %v2446_v43  ;;  %v2449_v61 = vsel %vm862_vm2, %v2446_v43, %v2448_v51  ;;  %v3379_v26 = vsel %vm1747_vm3, %v3376_v14, %v3378_v54  ;;  %v3381_v5 = vsel %vm1747_vm3, %v3378_v54, %v3380_v27  ;;  %v6762_v44 = vpop.f32.mrb[118].mxu1  ;;  %v6970_v48 = vpop.f32.mrb[118].mxu0 }
 0x24e   : > { %10473 = vst [vmem:[#allocation30_spill] sm:$0xff] %v9745_v3  ;;  %v7813_v33 = vadd.f32 %v10474_v12, %v2447_v52  ;;  %v7808_v13 = vadd.f32 %v10475_v34, %v2449_v61  ;;  %v2452_v2 = vrot.slane %v6762_v44, 7  ;;  %v3384_v40 = vrot.slane %v6970_v48, 1  ;;  %v2302_v45 = vpop.f32.mrb[119].mxu1  ;;  %v3234_v47 = vpop.f32.mrb[119].mxu0  ;;  %v10476_v61 = vld [vmem:[#allocation26_spill] sm:$0xff] }
 0x24f   : > { %v2450_v23 = vrot.slane %v2302_v45, 7  ;;  %v3382_v16 = vrot.slane %v3234_v47, 1  ;;  %v9753_v3 = vadd.f32 %v7798_v11, %v3379_v26  ;;  %v10477_v48 = vld [vmem:[#allocation23_spill] sm:$0xff] }
 0x250   : > { %v9755_v21 = vadd.f32 %v7813_v33, %v3381_v5  ;;  %v3434_v11 = vsel %vm1747_vm3, %v3384_v40, 0.0 }
 0x251   : > { %v2451_v14 = vsel %vm862_vm2, %v2448_v51, %v2450_v23  ;;  %v2453_v43 = vsel %vm862_vm2, %v2450_v23, %v2452_v2  ;;  %v3383_v54 = vsel %vm1747_vm3, %v3380_v27, %v3382_v16  ;;  %v3385_v52 = vsel %vm1747_vm3, %v3382_v16, %v3384_v40  ;;  %v7005_v12 = vpop.f32.mrb[120].mxu0 }
 0x252   : > { %v7823_v44 = vadd.f32 %v10476_v61, %v2451_v14  ;;  %v7818_v34 = vadd.f32 %v10477_v48, %v2453_v43  ;;  %v3903_v6 = vrot.slane %v7005_v12, 7  ;;  %v3615_v45 = vpop.f32.mrb[121].mxu0  ;;  %v9763_v47 = vadd.f32 %v7808_v13, %v3383_v54 }
 0x253   : > { %v3902_v26 = vrot.slane %v3615_v45, 7 }
 0x254   : > { %v9766_v5 = vadd.f32 %v7818_v34, %v3434_v11  ;;  %v9768_v51 = vadd.f32 %v7823_v44, %v3385_v52 }
 0x255   : > { %v4045_v27 = vsel %vm862_vm2, 0.0, %v3902_v26  ;;  %v7008_v33 = vpop.f32.mrb[122].mxu0  ;;  %v3904_v2 = vsel %vm862_vm2, %v3902_v26, %v3903_v6 }
 0x256   : > { %v3907_v23 = vrot.slane %v7008_v33, 7  ;;  %v3625_v16 = vpop.f32.mrb[123].mxu0  ;;  %v9773_v14 = vadd.f32 %v9493_v32, %v3904_v2  ;;  %v9776_v13 = vadd.f32 %v9481_v4, %v4045_v27 }
 0x257   : > { %v3905_v43 = vrot.slane %v3625_v16, 7 }
 0x259   : > { %v7011_v40 = vpop.f32.mrb[124].mxu0  ;;  %v3908_v54 = vsel %vm862_vm2, %v3905_v43, %v3907_v23  ;;  %v3906_v52 = vsel %vm862_vm2, %v3903_v6, %v3905_v43 }
 0x25a   : > { %v3911_v12 = vrot.slane %v7011_v40, 7  ;;  %v3635_v61 = vpop.f32.mrb[125].mxu0  ;;  %v9781_v44 = vadd.f32 %v9505_v59, %v3908_v54  ;;  %v9784_v48 = vadd.f32 %v9495_v56, %v3906_v52 }
 0x25b   : > { %v3909_v34 = vrot.slane %v3635_v61, 7 }
 0x25d   : > { %v7014_v32 = vpop.f32.mrb[126].mxu0  ;;  %v3912_v45 = vsel %vm862_vm2, %v3909_v34, %v3911_v12  ;;  %v3910_v4 = vsel %vm862_vm2, %v3907_v23, %v3909_v34 }
 0x25e   : > { %v3915_v11 = vrot.slane %v7014_v32, 7  ;;  %v3645_v26 = vpop.f32.mrb[127].mxu0  ;;  %v9789_v27 = vadd.f32 %v9515_v50, %v3912_v45  ;;  %v9792_v6 = vadd.f32 %v9507_v24, %v3910_v4 }
 0x25f   : > { %v3913_v33 = vrot.slane %v3645_v26, 7 }
 0x261   : > { %v3916_v2 = vsel %vm862_vm2, %v3913_v33, %v3915_v11  ;;  %v3914_v56 = vsel %vm862_vm2, %v3911_v12, %v3913_v33 }
 0x262   : > { %v7017_v59 = vpop.f32.mrb[128].mxu0  ;;  %v9797_v40 = vadd.f32 %v9529_v42, %v3916_v2  ;;  %v9800_v23 = vadd.f32 %v9517_v39, %v3914_v56 }
 0x263   : > { %v3919_v16 = vrot.slane %v7017_v59, 7  ;;  %v3655_v43 = vpop.f32.mrb[129].mxu0 }
 0x264   : > { %v3917_v54 = vrot.slane %v3655_v43, 7 }
 0x266   : > { %v7020_v50 = vpop.f32.mrb[130].mxu0  ;;  %v3920_v52 = vsel %vm862_vm2, %v3917_v54, %v3919_v16  ;;  %v3918_v24 = vsel %vm862_vm2, %v3915_v11, %v3917_v54 }
 0x267   : > { %v3923_v61 = vrot.slane %v7020_v50, 7  ;;  %v3665_v34 = vpop.f32.mrb[131].mxu0  ;;  %v9805_v32 = vadd.f32 %v9543_v53, %v3920_v52  ;;  %v9808_v12 = vadd.f32 %v9531_v15, %v3918_v24 }
 0x268   : > { %v3921_v45 = vrot.slane %v3665_v34, 7 }
 0x26a   : > { %v7023_v42 = vpop.f32.mrb[132].mxu0  ;;  %v3924_v4 = vsel %vm862_vm2, %v3921_v45, %v3923_v61  ;;  %v3922_v39 = vsel %vm862_vm2, %v3919_v16, %v3921_v45 }
 0x26b   : > { %v3927_v26 = vrot.slane %v7023_v42, 7  ;;  %v3675_v33 = vpop.f32.mrb[133].mxu0  ;;  %v9813_v59 = vadd.f32 %v9557_v9, %v3924_v4  ;;  %v9816_v11 = vadd.f32 %v9545_v35, %v3922_v39 }
 0x26c   : > { %v3925_v2 = vrot.slane %v3675_v33, 7 }
 0x26e   : > { %v7026_v53 = vpop.f32.mrb[134].mxu0  ;;  %v3928_v56 = vsel %vm862_vm2, %v3925_v2, %v3927_v26  ;;  %v3926_v15 = vsel %vm862_vm2, %v3923_v61, %v3925_v2 }
 0x26f   : > { %v3931_v43 = vrot.slane %v7026_v53, 7  ;;  %v3685_v54 = vpop.f32.mrb[135].mxu0  ;;  %v9821_v50 = vadd.f32 %v9571_v28, %v3928_v56  ;;  %v9824_v16 = vadd.f32 %v9559_v41, %v3926_v15 }
 0x270   : > { %v3929_v52 = vrot.slane %v3685_v54, 7 }
 0x272   : > { %v7029_v9 = vpop.f32.mrb[136].mxu0  ;;  %v3932_v24 = vsel %vm862_vm2, %v3929_v52, %v3931_v43  ;;  %v3930_v35 = vsel %vm862_vm2, %v3927_v26, %v3929_v52 }
 0x273   : > { %v3935_v34 = vrot.slane %v7029_v9, 7  ;;  %v3695_v45 = vpop.f32.mrb[137].mxu0  ;;  %v9829_v42 = vadd.f32 %v9585_v60, %v3932_v24  ;;  %v9832_v61 = vadd.f32 %v9573_v20, %v3930_v35 }
 0x274   : > { %v3933_v4 = vrot.slane %v3695_v45, 7 }
 0x276   : > { %v7032_v28 = vpop.f32.mrb[138].mxu0  ;;  %v3936_v39 = vsel %vm862_vm2, %v3933_v4, %v3935_v34  ;;  %v3934_v41 = vsel %vm862_vm2, %v3931_v43, %v3933_v4 }
 0x277   : > { %v3939_v33 = vrot.slane %v7032_v28, 7  ;;  %v3705_v2 = vpop.f32.mrb[139].mxu0  ;;  %v9837_v53 = vadd.f32 %v9599_v55, %v3936_v39  ;;  %v9840_v26 = vadd.f32 %v9587_v1, %v3934_v41 }
 0x278   : > { %v3937_v56 = vrot.slane %v3705_v2, 7 }
 0x27a   : > { %v7035_v60 = vpop.f32.mrb[140].mxu0  ;;  %v3940_v15 = vsel %vm862_vm2, %v3937_v56, %v3939_v33  ;;  %v3938_v20 = vsel %vm862_vm2, %v3935_v34, %v3937_v56 }
 0x27b   : > { %v3943_v54 = vrot.slane %v7035_v60, 7  ;;  %v3715_v52 = vpop.f32.mrb[141].mxu0  ;;  %v9845_v9 = vadd.f32 %v9613_v29, %v3940_v15  ;;  %v9848_v43 = vadd.f32 %v9601_v22, %v3938_v20 }
 0x27c   : > { %v3941_v24 = vrot.slane %v3715_v52, 7 }
 0x27e   : > { %v7038_v55 = vpop.f32.mrb[142].mxu0  ;;  %v3944_v35 = vsel %vm862_vm2, %v3941_v24, %v3943_v54  ;;  %v3942_v1 = vsel %vm862_vm2, %v3939_v33, %v3941_v24 }
 0x27f   : > { %v3947_v45 = vrot.slane %v7038_v55, 7  ;;  %v3725_v4 = vpop.f32.mrb[143].mxu0  ;;  %v9853_v28 = vadd.f32 %v9627_v31, %v3944_v35  ;;  %v9856_v34 = vadd.f32 %v9615_v57, %v3942_v1 }
 0x280   : > { %v3945_v39 = vrot.slane %v3725_v4, 7 }
 0x282   : > { %v7041_v29 = vpop.f32.mrb[144].mxu0  ;;  %v3948_v41 = vsel %vm862_vm2, %v3945_v39, %v3947_v45  ;;  %v3946_v22 = vsel %vm862_vm2, %v3943_v54, %v3945_v39 }
 0x283   : > { %v3951_v2 = vrot.slane %v7041_v29, 7  ;;  %v3735_v56 = vpop.f32.mrb[145].mxu0  ;;  %v9861_v60 = vadd.f32 %v9641_v7, %v3948_v41  ;;  %v9864_v33 = vadd.f32 %v9629_v8, %v3946_v22 }
 0x284   : > { %v3949_v15 = vrot.slane %v3735_v56, 7 }
 0x286   : > { %v7044_v31 = vpop.f32.mrb[146].mxu0  ;;  %v3952_v20 = vsel %vm862_vm2, %v3949_v15, %v3951_v2  ;;  %v3950_v57 = vsel %vm862_vm2, %v3947_v45, %v3949_v15 }
 0x287   : > { %v3955_v52 = vrot.slane %v7044_v31, 7  ;;  %v3745_v24 = vpop.f32.mrb[147].mxu0  ;;  %v9869_v55 = vadd.f32 %v9655_v25, %v3952_v20  ;;  %v9872_v54 = vadd.f32 %v9643_v36, %v3950_v57 }
 0x288   : > { %v3953_v35 = vrot.slane %v3745_v24, 7 }
 0x28a   : > { %v7047_v7 = vpop.f32.mrb[148].mxu0  ;;  %v3956_v1 = vsel %vm862_vm2, %v3953_v35, %v3955_v52  ;;  %v3954_v8 = vsel %vm862_vm2, %v3951_v2, %v3953_v35 }
 0x28b   : > { %v3959_v4 = vrot.slane %v7047_v7, 7  ;;  %v3755_v39 = vpop.f32.mrb[149].mxu0  ;;  %v9877_v29 = vadd.f32 %v9667_v19, %v3956_v1  ;;  %v9880_v45 = vadd.f32 %v9657_v58, %v3954_v8 }
 0x28c   : > { %v3957_v41 = vrot.slane %v3755_v39, 7 }
 0x28e   : > { %v7050_v25 = vpop.f32.mrb[150].mxu0  ;;  %v3960_v22 = vsel %vm862_vm2, %v3957_v41, %v3959_v4  ;;  %v3958_v36 = vsel %vm862_vm2, %v3955_v52, %v3957_v41 }
 0x28f   : > { %v3963_v56 = vrot.slane %v7050_v25, 7  ;;  %v3765_v15 = vpop.f32.mrb[151].mxu0  ;;  %v9885_v31 = vadd.f32 %v9677_v18, %v3960_v22  ;;  %v9888_v2 = vadd.f32 %v9669_v38, %v3958_v36 }
 0x290   : > { %v3961_v20 = vrot.slane %v3765_v15, 7 }
 0x292   : > { %v7053_v19 = vpop.f32.mrb[152].mxu0  ;;  %v3964_v57 = vsel %vm862_vm2, %v3961_v20, %v3963_v56  ;;  %v3962_v58 = vsel %vm862_vm2, %v3959_v4, %v3961_v20 }
 0x293   : > { %v3967_v24 = vrot.slane %v7053_v19, 7  ;;  %v3775_v35 = vpop.f32.mrb[153].mxu0  ;;  %v9893_v7 = vadd.f32 %v9691_v30, %v3964_v57  ;;  %v9896_v52 = vadd.f32 %v9679_v46, %v3962_v58 }
 0x294   : > { %v3965_v1 = vrot.slane %v3775_v35, 7 }
 0x296   : > { %v7056_v18 = vpop.f32.mrb[154].mxu0  ;;  %v3968_v8 = vsel %vm862_vm2, %v3965_v1, %v3967_v24  ;;  %v3966_v38 = vsel %vm862_vm2, %v3963_v56, %v3965_v1 }
 0x297   : > { %v3971_v39 = vrot.slane %v7056_v18, 7  ;;  %v3785_v41 = vpop.f32.mrb[155].mxu0  ;;  %v9901_v25 = vadd.f32 %v9703_v17, %v3968_v8  ;;  %v9904_v4 = vadd.f32 %v9693_v0, %v3966_v38 }
 0x298   : > { %v3969_v22 = vrot.slane %v3785_v41, 7 }
 0x29a   : > { %v7059_v30 = vpop.f32.mrb[156].mxu0  ;;  %v3972_v36 = vsel %vm862_vm2, %v3969_v22, %v3971_v39  ;;  %v3970_v46 = vsel %vm862_vm2, %v3967_v24, %v3969_v22 }
 0x29b   : > { %v3975_v15 = vrot.slane %v7059_v30, 7  ;;  %v3795_v20 = vpop.f32.mrb[157].mxu0  ;;  %v9909_v19 = vadd.f32 %v9713_v62, %v3972_v36  ;;  %v9912_v56 = vadd.f32 %v9705_v63, %v3970_v46 }
 0x29c   : > { %v3973_v57 = vrot.slane %v3795_v20, 7 }
 0x29e   : > { %v7062_v17 = vpop.f32.mrb[158].mxu0  ;;  %v3976_v58 = vsel %vm862_vm2, %v3973_v57, %v3975_v15  ;;  %v3974_v0 = vsel %vm862_vm2, %v3971_v39, %v3973_v57  ;;  %v10478_v39 = vld [vmem:[#allocation29_spill] sm:$0xff] }
 0x29f   : > { %v3979_v35 = vrot.slane %v7062_v17, 7  ;;  %v3805_v1 = vpop.f32.mrb[159].mxu0  ;;  %v9917_v18 = vadd.f32 %v9723_v49, %v3976_v58  ;;  %v9920_v24 = vadd.f32 %v9715_v10, %v3974_v0  ;;  %v10479_v58 = vld [vmem:[#allocation28_spill] sm:$0xff] }
 0x2a0   : > { %v3977_v8 = vrot.slane %v3805_v1, 7 }
 0x2a2   : > { %v7065_v62 = vpop.f32.mrb[160].mxu0  ;;  %v3980_v38 = vsel %vm862_vm2, %v3977_v8, %v3979_v35  ;;  %v3978_v63 = vsel %vm862_vm2, %v3975_v15, %v3977_v8  ;;  %v10480_v15 = vld [vmem:[#allocation27_spill] sm:$0xff] }
 0x2a3   : > { %v3983_v41 = vrot.slane %v7065_v62, 7  ;;  %v3815_v22 = vpop.f32.mrb[161].mxu0  ;;  %v9925_v30 = vadd.f32 %v9733_v37, %v3980_v38  ;;  %v9928_v36 = vadd.f32 %v10478_v39, %v3978_v63 }
 0x2a4   : > { %v3981_v46 = vrot.slane %v3815_v22, 7 }
 0x2a6   : > { %v7068_v49 = vpop.f32.mrb[162].mxu0  ;;  %v3984_v20 = vsel %vm862_vm2, %v3981_v46, %v3983_v41  ;;  %v3982_v10 = vsel %vm862_vm2, %v3979_v35, %v3981_v46  ;;  %v10483_v35 = vld [vmem:[#allocation30_spill] sm:$0xff] }
 0x2a7   : > { %v3987_v57 = vrot.slane %v7068_v49, 7  ;;  %v3825_v17 = vpop.f32.mrb[163].mxu0  ;;  %v9933_v0 = vadd.f32 %v10479_v58, %v3984_v20  ;;  %v9936_v1 = vadd.f32 %v10480_v15, %v3982_v10 }
 0x2a8   : > { %v3985_v8 = vrot.slane %v3825_v17, 7 }
 0x2a9   : > { %10481 = vst [vmem:[#allocation33_spill] sm:$0xff] %v9936_v1 }
 0x2aa   : > { %v7071_v37 = vpop.f32.mrb[164].mxu0  ;;  %v3988_v62 = vsel %vm862_vm2, %v3985_v8, %v3987_v57  ;;  %v3986_v38 = vsel %vm862_vm2, %v3983_v41, %v3985_v8 }
 0x2ab   : > { %v3991_v63 = vrot.slane %v7071_v37, 7  ;;  %v3835_v22 = vpop.f32.mrb[165].mxu0  ;;  %v9941_v39 = vadd.f32 %v9753_v3, %v3988_v62  ;;  %v9944_v46 = vadd.f32 %v10483_v35, %v3986_v38 }
 0x2ac   : > { %v3989_v49 = vrot.slane %v3835_v22, 7 }
 0x2ad   : > { %10482 = vst [vmem:[#allocation31_spill] sm:$0xff] %v9941_v39  ;;  %10484 = vst [vmem:[#allocation32_spill] sm:$0xff] %v9944_v46 }
 0x2ae   : > { %v7074_v20 = vpop.f32.mrb[166].mxu0  ;;  %v3992_v58 = vsel %vm862_vm2, %v3989_v49, %v3991_v63  ;;  %v3990_v10 = vsel %vm862_vm2, %v3987_v57, %v3989_v49 }
 0x2af   : > { %v3995_v17 = vrot.slane %v7074_v20, 7  ;;  %v3845_v15 = vpop.f32.mrb[167].mxu0  ;;  %v9949_v1 = vadd.f32 %v9763_v47, %v3992_v58  ;;  %v9952_v41 = vadd.f32 %v9755_v21, %v3990_v10 }
 0x2b0   : > { %v3993_v8 = vrot.slane %v3845_v15, 7 }
 0x2b1   : > { %10485 = vst [vmem:[#allocation38_spill] sm:$0xff] %v9949_v1  ;;  %10486 = vst [vmem:[#allocation34_spill] sm:$0xff] %v9952_v41 }
 0x2b2   : > { %v7213_v37 = vpop.f32.mrb[168].mxu0  ;;  %v3996_v62 = vsel %vm862_vm2, %v3993_v8, %v3995_v17  ;;  %v3994_v38 = vsel %vm862_vm2, %v3991_v63, %v3993_v8 }
 0x2b3   : > { %v7109_v3 = vpop.f32.mrb[24].mxu1  ;;  %v4835_v35 = vrot.slane %v7213_v37, 1  ;;  %v4547_v57 = vpop.f32.mrb[169].mxu0  ;;  %v9958_v49 = vadd.f32 %v9766_v5, %v3996_v62  ;;  %v9961_v47 = vadd.f32 %v9768_v51, %v3994_v38 }
 0x2b4   : > { %v7591_v22 = vadd.f32 %v9773_v14, %v7109_v3  ;;  %v4177_v46 = vpop.f32.mrb[25].mxu1  ;;  %v4834_v20 = vrot.slane %v4547_v57, 1 }
 0x2b5   : > { %10487 = vst [vmem:[#allocation37_spill] sm:$0xff] %v9958_v49  ;;  %10488 = vst [vmem:[#allocation35_spill] sm:$0xff] %v9961_v47  ;;  %v7596_v21 = vadd.f32 %v9776_v13, %v4177_v46 }
 0x2b6   : > { %v4836_v58 = vsel %vm1747_vm3, %v4834_v20, %v4835_v35  ;;  %v7216_v17 = vpop.f32.mrb[170].mxu0 }
 0x2b7   : > { %v7112_v10 = vpop.f32.mrb[26].mxu1  ;;  %v4978_v63 = vadd.f32 %v7596_v21, %v4836_v58  ;;  %v4839_v15 = vrot.slane %v7216_v17, 1  ;;  %v4557_v3 = vpop.f32.mrb[171].mxu0 }
 0x2b8   : > { %v7601_v14 = vadd.f32 %v9781_v44, %v7112_v10  ;;  %v4187_v8 = vpop.f32.mrb[27].mxu1  ;;  %v4837_v5 = vrot.slane %v4557_v3, 1 }
 0x2b9   : > { %v7606_v37 = vadd.f32 %v9784_v48, %v4187_v8  ;;  %v5032_v51 = vsel %vm415_vm0, %v4978_v63, 0.0 }
 0x2ba   : > { %5080 = vst [vmem:[%s8085_s29] sm:$0xff] %v5032_v51  ;;  %v4838_v13 = vsel %vm1747_vm3, %v4835_v35, %v4837_v5  ;;  %v4840_v46 = vsel %vm1747_vm3, %v4837_v5, %v4839_v15  ;;  %v7219_v57 = vpop.f32.mrb[172].mxu0  ;;  %v5181_v63 = vmul.f32 %v5032_v51, %v5032_v51 }
 0x2bb   : > { %v7115_v38 = vpop.f32.mrb[28].mxu1  ;;  %v4979_v21 = vadd.f32 %v7591_v22, %v4838_v13  ;;  %v4980_v44 = vadd.f32 %v7606_v37, %v4840_v46  ;;  %v4843_v58 = vrot.slane %v7219_v57, 1  ;;  %v4567_v48 = vpop.f32.mrb[173].mxu0 }
 0x2bc   : > { %v7611_v20 = vadd.f32 %v9789_v27, %v7115_v38  ;;  %v4197_v10 = vpop.f32.mrb[29].mxu1  ;;  %v4841_v8 = vrot.slane %v4567_v48, 1 }
 0x2bd   : > { %v7616_v17 = vadd.f32 %v9792_v6, %v4197_v10  ;;  %v5034_v47 = vsel %vm420_vm1, %v4980_v44, 0.0  ;;  %5081 = vst [vmem:[%s8085_s29 + $0x8] sm:$0xff] %v4979_v21  ;;  %v5128_v35 = vadd.f32 %v5032_v51, %v4979_v21  ;;  %v5182_v5 = vmul.f32 %v4979_v21, %v4979_v21 }
 0x2be   : > { %5082 = vst [vmem:[%s8085_s29 + $0x10] sm:$0xff] %v5034_v47  ;;  %v5183_v49 = vmul.f32 %v5034_v47, %v5034_v47  ;;  %v4842_v22 = vsel %vm1747_vm3, %v4839_v15, %v4841_v8  ;;  %v4844_v27 = vsel %vm1747_vm3, %v4841_v8, %v4843_v58  ;;  %v7222_v13 = vpop.f32.mrb[174].mxu0 }
 0x2bf   : > { %v7118_v37 = vpop.f32.mrb[30].mxu1  ;;  %v5129_v46 = vadd.f32 %v5128_v35, %v5034_v47  ;;  %v5229_v6 = vadd.f32 %v5182_v5, %v5181_v63  ;;  %v4981_v38 = vadd.f32 %v7601_v14, %v4842_v22  ;;  %v4982_v57 = vadd.f32 %v7616_v17, %v4844_v27  ;;  %v4577_v48 = vpop.f32.mrb[175].mxu0 }
 0x2c0   : > { %v4207_v10 = vpop.f32.mrb[31].mxu1  ;;  %v7621_v44 = vadd.f32 %v9797_v40, %v7118_v37  ;;  %v4847_v51 = vrot.slane %v7222_v13, 1  ;;  %v4845_v41 = vrot.slane %v4577_v48, 1 }
 0x2c1   : > { %v7626_v21 = vadd.f32 %v9800_v23, %v4207_v10  ;;  %v5230_v1 = vadd.f32 %v5229_v6, %v5183_v49  ;;  %v5035_v15 = vsel %vm415_vm0, %v4981_v38, 0.0  ;;  %5084 = vst [vmem:[%s8085_s29 + $0x20] sm:$0xff] %v4982_v57  ;;  %v5185_v8 = vmul.f32 %v4982_v57, %v4982_v57 }
 0x2c2   : > { %5083 = vst [vmem:[%s8085_s29 + $0x18] sm:$0xff] %v5035_v15  ;;  %v5130_v39 = vadd.f32 %v5129_v46, %v5035_v15  ;;  %v5184_v47 = vmul.f32 %v5035_v15, %v5035_v15  ;;  %v4846_v14 = vsel %vm1747_vm3, %v4843_v58, %v4845_v41  ;;  %v4848_v17 = vsel %vm1747_vm3, %v4845_v41, %v4847_v51  ;;  %v7225_v40 = vpop.f32.mrb[176].mxu0 }
 0x2c3   : > { %v7121_v63 = vpop.f32.mrb[32].mxu1  ;;  %v4983_v35 = vadd.f32 %v7611_v20, %v4846_v14  ;;  %v4984_v23 = vadd.f32 %v7626_v21, %v4848_v17  ;;  %v4851_v5 = vrot.slane %v7225_v40, 1  ;;  %v4587_v27 = vpop.f32.mrb[177].mxu0 }
 0x2c4   : > { %v7631_v49 = vadd.f32 %v9805_v32, %v7121_v63  ;;  %v4217_v22 = vpop.f32.mrb[33].mxu1  ;;  %v5131_v37 = vadd.f32 %v5130_v39, %v4982_v57  ;;  %v5231_v13 = vadd.f32 %v5230_v1, %v5184_v47  ;;  %v4849_v6 = vrot.slane %v4587_v27, 1 }
 0x2c5   : > { %v7636_v46 = vadd.f32 %v9808_v12, %v4217_v22  ;;  %v5037_v58 = vsel %vm420_vm1, %v4983_v35, 0.0  ;;  %v5038_v41 = vsel %vm415_vm0, %v4984_v23, 0.0 }
 0x2c6   : > { %v5232_v38 = vadd.f32 %v5231_v13, %v5185_v8  ;;  %5085 = vst [vmem:[%s8085_s29 + $0x28] sm:$0xff] %v5037_v58  ;;  %5086 = vst [vmem:[%s8085_s29 + $0x30] sm:$0xff] %v5038_v41  ;;  %v5132_v20 = vadd.f32 %v5131_v37, %v5037_v58  ;;  %v5186_v10 = vmul.f32 %v5037_v58, %v5037_v58  ;;  %v7228_v21 = vpop.f32.mrb[178].mxu0 }
 0x2c7   : > { %v5187_v32 = vmul.f32 %v5038_v41, %v5038_v41  ;;  %v7124_v48 = vpop.f32.mrb[34].mxu1  ;;  %v4850_v1 = vsel %vm1747_vm3, %v4847_v51, %v4849_v6  ;;  %v4852_v12 = vsel %vm1747_vm3, %v4849_v6, %v4851_v5  ;;  %v4855_v57 = vrot.slane %v7228_v21, 1  ;;  %v4597_v47 = vpop.f32.mrb[179].mxu0 }
 0x2c8   : > { %v7641_v39 = vadd.f32 %v9813_v59, %v7124_v48  ;;  %v4227_v15 = vpop.f32.mrb[35].mxu1  ;;  %v5133_v14 = vadd.f32 %v5132_v20, %v5038_v41  ;;  %v5233_v8 = vadd.f32 %v5232_v38, %v5186_v10  ;;  %v4985_v17 = vadd.f32 %v7621_v44, %v4850_v1 }
 0x2c9   : > { %v4986_v63 = vadd.f32 %v7636_v46, %v4852_v12  ;;  %v7646_v40 = vadd.f32 %v9816_v11, %v4227_v15  ;;  %v4853_v35 = vrot.slane %v4597_v47, 1 }
 0x2ca   : > { %v5234_v23 = vadd.f32 %v5233_v8, %v5187_v32  ;;  %5087 = vst [vmem:[%s8085_s29 + $0x38] sm:$0xff] %v4985_v17  ;;  %v5134_v51 = vadd.f32 %v5133_v14, %v4985_v17  ;;  %v5188_v27 = vmul.f32 %v4985_v17, %v4985_v17  ;;  %v7231_v59 = vpop.f32.mrb[180].mxu0 }
 0x2cb   : > { %v5040_v22 = vsel %vm420_vm1, %v4986_v63, 0.0  ;;  %v7127_v37 = vpop.f32.mrb[36].mxu1  ;;  %v4854_v6 = vsel %vm1747_vm3, %v4851_v5, %v4853_v35  ;;  %v4856_v44 = vsel %vm1747_vm3, %v4853_v35, %v4855_v57  ;;  %v4607_v58 = vpop.f32.mrb[181].mxu0  ;;  %v4859_v32 = vrot.slane %v7231_v59, 1 }
 0x2cc   : > { %5088 = vst [vmem:[%s8085_s29 + $0x40] sm:$0xff] %v5040_v22  ;;  %v5189_v13 = vmul.f32 %v5040_v22, %v5040_v22  ;;  %v7651_v46 = vadd.f32 %v9821_v50, %v7127_v37  ;;  %v4237_v11 = vpop.f32.mrb[37].mxu1  ;;  %v5135_v41 = vadd.f32 %v5134_v51, %v5040_v22  ;;  %v5235_v38 = vadd.f32 %v5234_v23, %v5188_v27 }
 0x2cd   : > { %v4987_v20 = vadd.f32 %v7631_v49, %v4854_v6  ;;  %v4988_v10 = vadd.f32 %v7646_v40, %v4856_v44  ;;  %v7656_v48 = vadd.f32 %v9824_v16, %v4237_v11  ;;  %v4857_v21 = vrot.slane %v4607_v58, 1 }
 0x2ce   : > { %v5236_v1 = vadd.f32 %v5235_v38, %v5189_v13  ;;  %v7234_v47 = vpop.f32.mrb[182].mxu0 }
 0x2cf   : > { %v5041_v12 = vsel %vm415_vm0, %v4987_v20, 0.0  ;;  %5090 = vst [vmem:[%s8085_s29 + $0x50] sm:$0xff] %v4988_v10  ;;  %v5191_v5 = vmul.f32 %v4988_v10, %v4988_v10  ;;  %v7130_v15 = vpop.f32.mrb[38].mxu1  ;;  %v4858_v8 = vsel %vm1747_vm3, %v4855_v57, %v4857_v21  ;;  %v4860_v49 = vsel %vm1747_vm3, %v4857_v21, %v4859_v32  ;;  %v4617_v16 = vpop.f32.mrb[183].mxu0 }
 0x2d0   : > { %5089 = vst [vmem:[%s8085_s29 + $0x48] sm:$0xff] %v5041_v12  ;;  %v5136_v50 = vadd.f32 %v5135_v41, %v5041_v12  ;;  %v5190_v14 = vmul.f32 %v5041_v12, %v5041_v12  ;;  %v4247_v17 = vpop.f32.mrb[39].mxu1  ;;  %v4989_v63 = vadd.f32 %v7641_v39, %v4858_v8  ;;  %v4990_v40 = vadd.f32 %v7656_v48, %v4860_v49 }
 0x2d1   : > { %v7661_v35 = vadd.f32 %v9829_v42, %v7130_v15  ;;  %v4863_v23 = vrot.slane %v7234_v47, 1  ;;  %v7666_v27 = vadd.f32 %v9832_v61, %v4247_v17  ;;  %v4861_v37 = vrot.slane %v4617_v16, 1 }
 0x2d2   : > { %v5137_v22 = vadd.f32 %v5136_v50, %v4988_v10  ;;  %v5237_v51 = vadd.f32 %v5236_v1, %v5190_v14  ;;  %v5043_v59 = vsel %vm420_vm1, %v4989_v63, 0.0  ;;  %v5044_v57 = vsel %vm415_vm0, %v4990_v40, 0.0  ;;  %v7237_v6 = vpop.f32.mrb[184].mxu0 }
 0x2d3   : > { %v7133_v13 = vpop.f32.mrb[40].mxu1  ;;  %5091 = vst [vmem:[%s8085_s29 + $0x58] sm:$0xff] %v5043_v59  ;;  %5092 = vst [vmem:[%s8085_s29 + $0x60] sm:$0xff] %v5044_v57  ;;  %v5192_v11 = vmul.f32 %v5043_v59, %v5043_v59  ;;  %v5193_v42 = vmul.f32 %v5044_v57, %v5044_v57  ;;  %v4627_v41 = vpop.f32.mrb[185].mxu0  ;;  %v4862_v61 = vsel %vm1747_vm3, %v4859_v32, %v4861_v37  ;;  %v4867_v10 = vrot.slane %v7237_v6, 1 }
 0x2d4   : > { %v5238_v44 = vadd.f32 %v5237_v51, %v5191_v5  ;;  %v5138_v39 = vadd.f32 %v5137_v22, %v5043_v59  ;;  %v4257_v58 = vpop.f32.mrb[41].mxu1  ;;  %v4864_v38 = vsel %vm1747_vm3, %v4861_v37, %v4863_v23  ;;  %v7671_v20 = vadd.f32 %v9837_v53, %v7133_v13 }
 0x2d5   : > { %v4991_v1 = vadd.f32 %v7651_v46, %v4862_v61  ;;  %v4992_v12 = vadd.f32 %v7666_v27, %v4864_v38  ;;  %v7676_v5 = vadd.f32 %v9840_v26, %v4257_v58  ;;  %v4865_v15 = vrot.slane %v4627_v41, 1 }
 0x2d6   : > { %v5139_v48 = vadd.f32 %v5138_v39, %v5044_v57  ;;  %v5239_v21 = vadd.f32 %v5238_v44, %v5192_v11  ;;  %v7240_v50 = vpop.f32.mrb[186].mxu0 }
 0x2d7   : > { %v7136_v47 = vpop.f32.mrb[42].mxu1  ;;  %v5046_v8 = vsel %vm420_vm1, %v4992_v12, 0.0  ;;  %5093 = vst [vmem:[%s8085_s29 + $0x68] sm:$0xff] %v4991_v1  ;;  %v5194_v49 = vmul.f32 %v4991_v1, %v4991_v1  ;;  %v4637_v53 = vpop.f32.mrb[187].mxu0  ;;  %v4866_v46 = vsel %vm1747_vm3, %v4863_v23, %v4865_v15  ;;  %v4868_v63 = vsel %vm1747_vm3, %v4865_v15, %v4867_v10 }
 0x2d8   : > { %v5240_v14 = vadd.f32 %v5239_v21, %v5193_v42  ;;  %v5140_v32 = vadd.f32 %v5139_v48, %v4991_v1  ;;  %v4267_v17 = vpop.f32.mrb[43].mxu1  ;;  %5094 = vst [vmem:[%s8085_s29 + $0x70] sm:$0xff] %v5046_v8  ;;  %v5195_v16 = vmul.f32 %v5046_v8, %v5046_v8  ;;  %v7681_v26 = vadd.f32 %v9845_v9, %v7136_v47 }
 0x2d9   : > { %v4993_v51 = vadd.f32 %v7661_v35, %v4866_v46  ;;  %v4994_v27 = vadd.f32 %v7676_v5, %v4868_v63  ;;  %v4871_v37 = vrot.slane %v7240_v50, 1  ;;  %v7686_v59 = vadd.f32 %v9848_v43, %v4267_v17 }
 0x2da   : > { %v5141_v40 = vadd.f32 %v5140_v32, %v5046_v8  ;;  %v5241_v22 = vadd.f32 %v5240_v14, %v5194_v49  ;;  %v4869_v57 = vrot.slane %v4637_v53, 1  ;;  %v7243_v6 = vpop.f32.mrb[188].mxu0 }
 0x2db   : > { %v7139_v13 = vpop.f32.mrb[44].mxu1  ;;  %v5047_v39 = vsel %vm415_vm0, %v4993_v51, 0.0  ;;  %5096 = vst [vmem:[%s8085_s29 + $0x80] sm:$0xff] %v4994_v27  ;;  %v4647_v9 = vpop.f32.mrb[189].mxu0  ;;  %v4875_v38 = vrot.slane %v7243_v6, 1  ;;  %v5197_v1 = vmul.f32 %v4994_v27, %v4994_v27 }
 0x2dc   : > { %v5242_v44 = vadd.f32 %v5241_v22, %v5195_v16  ;;  %v7691_v23 = vadd.f32 %v9853_v28, %v7139_v13  ;;  %v4277_v11 = vpop.f32.mrb[45].mxu1  ;;  %5095 = vst [vmem:[%s8085_s29 + $0x78] sm:$0xff] %v5047_v39  ;;  %v5142_v42 = vadd.f32 %v5141_v40, %v5047_v39  ;;  %v5196_v58 = vmul.f32 %v5047_v39, %v5047_v39 }
 0x2dd   : > { %v4870_v35 = vsel %vm1747_vm3, %v4867_v10, %v4869_v57  ;;  %v4872_v41 = vsel %vm1747_vm3, %v4869_v57, %v4871_v37  ;;  %v7696_v48 = vadd.f32 %v9856_v34, %v4277_v11  ;;  %v4873_v28 = vrot.slane %v4647_v9, 1 }
 0x2de   : > { %v4995_v43 = vadd.f32 %v7671_v20, %v4870_v35  ;;  %v4996_v61 = vadd.f32 %v7686_v59, %v4872_v41  ;;  %v5143_v21 = vadd.f32 %v5142_v42, %v4994_v27  ;;  %v5243_v12 = vadd.f32 %v5242_v44, %v5196_v58  ;;  %v7246_v15 = vpop.f32.mrb[190].mxu0 }
 0x2df   : > { %v7142_v5 = vpop.f32.mrb[46].mxu1  ;;  %v4879_v50 = vrot.slane %v7246_v15, 1  ;;  %v4657_v8 = vpop.f32.mrb[191].mxu0  ;;  %v4874_v53 = vsel %vm1747_vm3, %v4871_v37, %v4873_v28  ;;  %v4876_v16 = vsel %vm1747_vm3, %v4873_v28, %v4875_v38 }
 0x2e0   : > { %v5049_v47 = vsel %vm420_vm1, %v4995_v43, 0.0  ;;  %v5050_v10 = vsel %vm415_vm0, %v4996_v61, 0.0  ;;  %v7701_v20 = vadd.f32 %v9861_v60, %v7142_v5  ;;  %v4287_v14 = vpop.f32.mrb[47].mxu1  ;;  %v5244_v32 = vadd.f32 %v5243_v12, %v5197_v1 }
 0x2e1   : > { %5097 = vst [vmem:[%s8085_s29 + $0x88] sm:$0xff] %v5049_v47  ;;  %5098 = vst [vmem:[%s8085_s29 + $0x90] sm:$0xff] %v5050_v10  ;;  %v5144_v34 = vadd.f32 %v5143_v21, %v5049_v47  ;;  %v5198_v49 = vmul.f32 %v5049_v47, %v5049_v47  ;;  %v5199_v17 = vmul.f32 %v5050_v10, %v5050_v10  ;;  %v4877_v63 = vrot.slane %v4657_v8, 1 }
 0x2e2   : > { %v7706_v46 = vadd.f32 %v9864_v33, %v4287_v14  ;;  %v4997_v22 = vadd.f32 %v7681_v26, %v4874_v53  ;;  %v4998_v51 = vadd.f32 %v7696_v48, %v4876_v16  ;;  %v7249_v59 = vpop.f32.mrb[192].mxu0 }
 0x2e3   : > { %v5145_v40 = vadd.f32 %v5144_v34, %v5050_v10  ;;  %v5245_v60 = vadd.f32 %v5244_v32, %v5198_v49  ;;  %v7145_v27 = vpop.f32.mrb[48].mxu1  ;;  %v4878_v57 = vsel %vm1747_vm3, %v4875_v38, %v4877_v63  ;;  %v4880_v13 = vsel %vm1747_vm3, %v4877_v63, %v4879_v50  ;;  %v4667_v44 = vpop.f32.mrb[193].mxu0 }
 0x2e4   : > { %v7711_v6 = vadd.f32 %v9869_v55, %v7145_v27  ;;  %v4297_v37 = vpop.f32.mrb[49].mxu1  ;;  %v5052_v33 = vsel %vm420_vm1, %v4998_v51, 0.0  ;;  %5099 = vst [vmem:[%s8085_s29 + $0x98] sm:$0xff] %v4997_v22  ;;  %v5200_v9 = vmul.f32 %v4997_v22, %v4997_v22  ;;  %v4999_v26 = vadd.f32 %v7691_v23, %v4878_v57 }
 0x2e5   : > { %v5246_v39 = vadd.f32 %v5245_v60, %v5199_v17  ;;  %v5146_v11 = vadd.f32 %v5145_v40, %v4997_v22  ;;  %5100 = vst [vmem:[%s8085_s29 + $0xa0] sm:$0xff] %v5052_v33  ;;  %v5000_v42 = vadd.f32 %v7706_v46, %v4880_v13  ;;  %v4883_v58 = vrot.slane %v7249_v59, 1 }
 0x2e6   : > { %v7716_v35 = vadd.f32 %v9872_v54, %v4297_v37  ;;  %v5201_v43 = vmul.f32 %v5052_v33, %v5052_v33  ;;  %v4881_v61 = vrot.slane %v4667_v44, 1  ;;  %v7252_v48 = vpop.f32.mrb[194].mxu0  ;;  %v5053_v21 = vsel %vm415_vm0, %v4999_v26, 0.0 }
 0x2e7   : > { %v5147_v41 = vadd.f32 %v5146_v11, %v5052_v33  ;;  %v5247_v55 = vadd.f32 %v5246_v39, %v5200_v9  ;;  %v7148_v38 = vpop.f32.mrb[50].mxu1  ;;  %5102 = vst [vmem:[%s8085_s29 + $0xb0] sm:$0xff] %v5000_v42  ;;  %v4887_v12 = vrot.slane %v7252_v48, 1  ;;  %v4677_v23 = vpop.f32.mrb[195].mxu0  ;;  %5101 = vst [vmem:[%s8085_s29 + $0xa8] sm:$0xff] %v5053_v21  ;;  %v5202_v47 = vmul.f32 %v5053_v21, %v5053_v21 }
 0x2e8   : > { %v7721_v1 = vadd.f32 %v9877_v29, %v7148_v38  ;;  %v4307_v28 = vpop.f32.mrb[51].mxu1  ;;  %v4882_v54 = vsel %vm1747_vm3, %v4879_v50, %v4881_v61  ;;  %v4884_v10 = vsel %vm1747_vm3, %v4881_v61, %v4883_v58  ;;  %v4885_v32 = vrot.slane %v4677_v23, 1 }
 0x2e9   : > { %v5248_v5 = vadd.f32 %v5247_v55, %v5201_v43  ;;  %v5148_v15 = vadd.f32 %v5147_v41, %v5053_v21  ;;  %v5001_v14 = vadd.f32 %v7701_v20, %v4882_v54  ;;  %v7726_v8 = vadd.f32 %v9880_v45, %v4307_v28 }
 0x2ea   : > { %v5203_v49 = vmul.f32 %v5000_v42, %v5000_v42  ;;  %v5002_v17 = vadd.f32 %v7716_v35, %v4884_v10  ;;  %v7255_v16 = vpop.f32.mrb[196].mxu0  ;;  %v4886_v63 = vsel %vm1747_vm3, %v4883_v58, %v4885_v32  ;;  %v4888_v50 = vsel %vm1747_vm3, %v4885_v32, %v4887_v12 }
 0x2eb   : > { %v5149_v34 = vadd.f32 %v5148_v15, %v5000_v42  ;;  %v5249_v29 = vadd.f32 %v5248_v5, %v5202_v47  ;;  %v7151_v53 = vpop.f32.mrb[52].mxu1  ;;  %v5055_v46 = vsel %vm420_vm1, %v5001_v14, 0.0  ;;  %v4687_v45 = vpop.f32.mrb[197].mxu0  ;;  %v5003_v57 = vadd.f32 %v7711_v6, %v4886_v63 }
 0x2ec   : > { %v7731_v20 = vadd.f32 %v9885_v31, %v7151_v53  ;;  %v4317_v40 = vpop.f32.mrb[53].mxu1  ;;  %v5056_v22 = vsel %vm415_vm0, %v5002_v17, 0.0  ;;  %5103 = vst [vmem:[%s8085_s29 + $0xb8] sm:$0xff] %v5055_v46  ;;  %v5204_v27 = vmul.f32 %v5055_v46, %v5055_v46  ;;  %v5004_v13 = vadd.f32 %v7726_v8, %v4888_v50 }
 0x2ed   : > { %v5250_v60 = vadd.f32 %v5249_v29, %v5203_v49  ;;  %v5150_v51 = vadd.f32 %v5149_v34, %v5055_v46  ;;  %5104 = vst [vmem:[%s8085_s29 + $0xc0] sm:$0xff] %v5056_v22  ;;  %v5205_v59 = vmul.f32 %v5056_v22, %v5056_v22  ;;  %v4891_v37 = vrot.slane %v7255_v16, 1  ;;  %5105 = vst [vmem:[%s8085_s29 + $0xc8] sm:$0xff] %v5003_v57 }
 0x2ee   : > { %v7736_v31 = vadd.f32 %v9888_v2, %v4317_v40  ;;  %v4889_v33 = vrot.slane %v4687_v45, 1  ;;  %v7258_v9 = vpop.f32.mrb[198].mxu0  ;;  %v5058_v26 = vsel %vm420_vm1, %v5004_v13, 0.0  ;;  %v5206_v42 = vmul.f32 %v5003_v57, %v5003_v57 }
 0x2ef   : > { %v5151_v44 = vadd.f32 %v5150_v51, %v5056_v22  ;;  %v5251_v39 = vadd.f32 %v5250_v60, %v5204_v27  ;;  %v7154_v11 = vpop.f32.mrb[54].mxu1  ;;  %v4895_v35 = vrot.slane %v7258_v9, 1  ;;  %v4697_v6 = vpop.f32.mrb[199].mxu0  ;;  %5106 = vst [vmem:[%s8085_s29 + $0xd0] sm:$0xff] %v5058_v26  ;;  %v5207_v23 = vmul.f32 %v5058_v26, %v5058_v26 }
 0x2f0   : > { %v7741_v58 = vadd.f32 %v9893_v7, %v7154_v11  ;;  %v4327_v41 = vpop.f32.mrb[55].mxu1  ;;  %v4890_v61 = vsel %vm1747_vm3, %v4887_v12, %v4889_v33  ;;  %v4892_v2 = vsel %vm1747_vm3, %v4889_v33, %v4891_v37  ;;  %v4893_v21 = vrot.slane %v4697_v6, 1 }
 0x2f1   : > { %v5252_v43 = vadd.f32 %v5251_v39, %v5205_v59  ;;  %v5152_v55 = vadd.f32 %v5151_v44, %v5003_v57  ;;  %v5005_v38 = vadd.f32 %v7721_v1, %v4890_v61  ;;  %v7746_v48 = vadd.f32 %v9896_v52, %v4327_v41 }
 0x2f2   : > { %v5006_v7 = vadd.f32 %v7736_v31, %v4892_v2  ;;  %v7261_v47 = vpop.f32.mrb[200].mxu0  ;;  %v4894_v10 = vsel %vm1747_vm3, %v4891_v37, %v4893_v21  ;;  %v4896_v12 = vsel %vm1747_vm3, %v4893_v21, %v4895_v35 }
 0x2f3   : > { %v5153_v28 = vadd.f32 %v5152_v55, %v5058_v26  ;;  %v5253_v5 = vadd.f32 %v5252_v43, %v5206_v42  ;;  %v7157_v15 = vpop.f32.mrb[56].mxu1  ;;  %v5059_v54 = vsel %vm415_vm0, %v5005_v38, 0.0  ;;  %v4707_v8 = vpop.f32.mrb[201].mxu0  ;;  %v5007_v49 = vadd.f32 %v7731_v20, %v4894_v10 }
 0x2f4   : > { %v7751_v1 = vadd.f32 %v9901_v25, %v7157_v15  ;;  %v4337_v14 = vpop.f32.mrb[57].mxu1  ;;  %5107 = vst [vmem:[%s8085_s29 + $0xd8] sm:$0xff] %v5059_v54  ;;  %5108 = vst [vmem:[%s8085_s29 + $0xe0] sm:$0xff] %v5006_v7  ;;  %v5208_v34 = vmul.f32 %v5059_v54, %v5059_v54  ;;  %v5008_v29 = vadd.f32 %v7746_v48, %v4896_v12  ;;  %v4899_v17 = vrot.slane %v7261_v47, 1 }
 0x2f5   : > { %v5254_v52 = vadd.f32 %v5253_v5, %v5207_v23  ;;  %v5154_v32 = vadd.f32 %v5153_v28, %v5059_v54  ;;  %v7756_v53 = vadd.f32 %v9904_v4, %v4337_v14  ;;  %v5209_v46 = vmul.f32 %v5006_v7, %v5006_v7 }
 0x2f6   : > { %v4897_v50 = vrot.slane %v4707_v8, 1  ;;  %v7264_v25 = vpop.f32.mrb[202].mxu0  ;;  %v5061_v45 = vsel %vm420_vm1, %v5007_v49, 0.0  ;;  %v5062_v60 = vsel %vm415_vm0, %v5008_v29, 0.0 }
 0x2f7   : > { %v5155_v16 = vadd.f32 %v5154_v32, %v5006_v7  ;;  %v5255_v63 = vadd.f32 %v5254_v52, %v5208_v34  ;;  %v7160_v40 = vpop.f32.mrb[58].mxu1  ;;  %v4903_v22 = vrot.slane %v7264_v25, 1  ;;  %v4717_v27 = vpop.f32.mrb[203].mxu0  ;;  %5109 = vst [vmem:[%s8085_s29 + $0xe8] sm:$0xff] %v5061_v45  ;;  %5110 = vst [vmem:[%s8085_s29 + $0xf0] sm:$0xff] %v5062_v60  ;;  %v5210_v57 = vmul.f32 %v5061_v45, %v5061_v45 }
 0x2f8   : > { %v7761_v20 = vadd.f32 %v9909_v19, %v7160_v40  ;;  %v4347_v51 = vpop.f32.mrb[59].mxu1  ;;  %v5211_v13 = vmul.f32 %v5062_v60, %v5062_v60  ;;  %v4898_v37 = vsel %vm1747_vm3, %v4895_v35, %v4897_v50  ;;  %v4900_v44 = vsel %vm1747_vm3, %v4897_v50, %v4899_v17 }
 0x2f9   : > { %v5256_v59 = vadd.f32 %v5255_v63, %v5209_v46  ;;  %v5156_v4 = vadd.f32 %v5155_v16, %v5061_v45  ;;  %v7766_v39 = vadd.f32 %v9912_v56, %v4347_v51  ;;  %v4901_v31 = vrot.slane %v4717_v27, 1 }
 0x2fa   : > { %v5009_v11 = vadd.f32 %v7741_v58, %v4898_v37  ;;  %v5010_v9 = vadd.f32 %v7756_v53, %v4900_v44  ;;  %v7267_v42 = vpop.f32.mrb[204].mxu0 }
 0x2fb   : > { %v5157_v33 = vadd.f32 %v5156_v4, %v5062_v60  ;;  %v5257_v19 = vadd.f32 %v5256_v59, %v5210_v57  ;;  %v7163_v26 = vpop.f32.mrb[60].mxu1  ;;  %v4902_v41 = vsel %vm1747_vm3, %v4899_v17, %v4901_v31  ;;  %v4904_v6 = vsel %vm1747_vm3, %v4901_v31, %v4903_v22  ;;  %v4727_v55 = vpop.f32.mrb[205].mxu0  ;;  %v10491_v31 = vld [vmem:[#allocation33_spill] sm:$0xff] }
 0x2fc   : > { %v7771_v43 = vadd.f32 %v9917_v18, %v7163_v26  ;;  %v4357_v35 = vpop.f32.mrb[61].mxu1  ;;  %v5064_v56 = vsel %vm420_vm1, %v5010_v9, 0.0  ;;  %5111 = vst [vmem:[%s8085_s29 + $0xf8] sm:$0xff] %v5009_v11  ;;  %v5212_v38 = vmul.f32 %v5009_v11, %v5009_v11  ;;  %v5011_v58 = vadd.f32 %v7751_v1, %v4902_v41 }
 0x2fd   : > { %v5258_v61 = vadd.f32 %v5257_v19, %v5211_v13  ;;  %v5158_v2 = vadd.f32 %v5157_v33, %v5009_v11  ;;  %5112 = vst [vmem:[%s8085_s29 + $0x100] sm:$0xff] %v5064_v56  ;;  %v5012_v48 = vadd.f32 %v7766_v39, %v4904_v6  ;;  %v4907_v21 = vrot.slane %v7267_v42, 1  ;;  %v10492_v42 = vld [vmem:[#allocation31_spill] sm:$0xff] }
 0x2fe   : > { %v7776_v28 = vadd.f32 %v9920_v24, %v4357_v35  ;;  %v5213_v5 = vmul.f32 %v5064_v56, %v5064_v56  ;;  %v4905_v7 = vrot.slane %v4727_v55, 1  ;;  %v7270_v47 = vpop.f32.mrb[206].mxu0  ;;  %v5065_v54 = vsel %vm415_vm0, %v5011_v58, 0.0  ;;  %v10493_v58 = vld [vmem:[#allocation32_spill] sm:$0xff] }
 0x2ff   : > { %v5159_v23 = vadd.f32 %v5158_v2, %v5064_v56  ;;  %v5259_v18 = vadd.f32 %v5258_v61, %v5212_v38  ;;  %v7166_v15 = vpop.f32.mrb[62].mxu1  ;;  %5114 = vst [vmem:[%s8085_s29 + $0x110] sm:$0xff] %v5012_v48  ;;  %v4911_v12 = vrot.slane %v7270_v47, 1  ;;  %v4737_v1 = vpop.f32.mrb[207].mxu0  ;;  %5113 = vst [vmem:[%s8085_s29 + $0x108] sm:$0xff] %v5065_v54  ;;  %v5214_v32 = vmul.f32 %v5065_v54, %v5065_v54 }
 0x300   : > { %v7781_v10 = vadd.f32 %v9925_v30, %v7166_v15  ;;  %v4367_v14 = vpop.f32.mrb[63].mxu1  ;;  %v4906_v24 = vsel %vm1747_vm3, %v4903_v22, %v4905_v7  ;;  %v4908_v34 = vsel %vm1747_vm3, %v4905_v7, %v4907_v21  ;;  %v4909_v17 = vrot.slane %v4737_v1, 1 }
 0x301   : > { %v5260_v8 = vadd.f32 %v5259_v18, %v5213_v5  ;;  %v5160_v52 = vadd.f32 %v5159_v23, %v5065_v54  ;;  %v5013_v49 = vadd.f32 %v7761_v20, %v4906_v24  ;;  %v7786_v29 = vadd.f32 %v9928_v36, %v4367_v14  ;;  %v10494_v14 = vld [vmem:[#allocation38_spill] sm:$0xff] }
 0x302   : > { %v5215_v16 = vmul.f32 %v5012_v48, %v5012_v48  ;;  %v5014_v46 = vadd.f32 %v7776_v28, %v4908_v34  ;;  %v7273_v50 = vpop.f32.mrb[208].mxu0  ;;  %v4910_v25 = vsel %vm1747_vm3, %v4907_v21, %v4909_v17  ;;  %v4912_v45 = vsel %vm1747_vm3, %v4909_v17, %v4911_v12  ;;  %v10495_v17 = vld [vmem:[#allocation34_spill] sm:$0xff] }
 0x303   : > { %v5161_v53 = vadd.f32 %v5160_v52, %v5012_v48  ;;  %v5261_v30 = vadd.f32 %v5260_v8, %v5214_v32  ;;  %v7169_v63 = vpop.f32.mrb[64].mxu1  ;;  %v5067_v40 = vsel %vm420_vm1, %v5013_v49, 0.0  ;;  %v4747_v36 = vpop.f32.mrb[209].mxu0  ;;  %v5015_v57 = vadd.f32 %v7771_v43, %v4910_v25 }
 0x304   : > { %v7791_v60 = vadd.f32 %v9933_v0, %v7169_v63  ;;  %v4377_v20 = vpop.f32.mrb[65].mxu1  ;;  %v5068_v51 = vsel %vm415_vm0, %v5014_v46, 0.0  ;;  %5115 = vst [vmem:[%s8085_s29 + $0x118] sm:$0xff] %v5067_v40  ;;  %v5216_v59 = vmul.f32 %v5067_v40, %v5067_v40  ;;  %v5016_v13 = vadd.f32 %v7786_v29, %v4912_v45 }
 0x305   : > { %v5262_v22 = vadd.f32 %v5261_v30, %v5215_v16  ;;  %v5162_v27 = vadd.f32 %v5161_v53, %v5067_v40  ;;  %5116 = vst [vmem:[%s8085_s29 + $0x120] sm:$0xff] %v5068_v51  ;;  %v5217_v4 = vmul.f32 %v5068_v51, %v5068_v51  ;;  %v4915_v37 = vrot.slane %v7273_v50, 1  ;;  %5117 = vst [vmem:[%s8085_s29 + $0x128] sm:$0xff] %v5015_v57 }
 0x306   : > { %v7796_v0 = vadd.f32 %v10491_v31, %v4377_v20  ;;  %v4913_v33 = vrot.slane %v4747_v36, 1  ;;  %v7276_v11 = vpop.f32.mrb[210].mxu0  ;;  %v5070_v9 = vsel %vm420_vm1, %v5016_v13, 0.0  ;;  %v5218_v26 = vmul.f32 %v5015_v57, %v5015_v57  ;;  %v10496_v20 = vld [vmem:[#allocation37_spill] sm:$0xff] }
 0x307   : > { %v5163_v44 = vadd.f32 %v5162_v27, %v5068_v51  ;;  %v5263_v39 = vadd.f32 %v5262_v22, %v5216_v59  ;;  %v7172_v19 = vpop.f32.mrb[66].mxu1  ;;  %v4919_v6 = vrot.slane %v7276_v11, 1  ;;  %v4757_v43 = vpop.f32.mrb[211].mxu0  ;;  %5118 = vst [vmem:[%s8085_s29 + $0x130] sm:$0xff] %v5070_v9  ;;  %v5219_v23 = vmul.f32 %v5070_v9, %v5070_v9 }
 0x308   : > { %v7801_v41 = vadd.f32 %v10492_v42, %v7172_v19  ;;  %v4387_v35 = vpop.f32.mrb[67].mxu1  ;;  %v4914_v56 = vsel %vm1747_vm3, %v4911_v12, %v4913_v33  ;;  %v4916_v2 = vsel %vm1747_vm3, %v4913_v33, %v4915_v37  ;;  %v4917_v21 = vrot.slane %v4757_v43, 1 }
 0x309   : > { %v5264_v55 = vadd.f32 %v5263_v39, %v5217_v4  ;;  %v5164_v61 = vadd.f32 %v5163_v44, %v5015_v57  ;;  %v5017_v38 = vadd.f32 %v7781_v10, %v4914_v56  ;;  %v7806_v48 = vadd.f32 %v10493_v58, %v4387_v35  ;;  %v10497_v39 = vld [vmem:[#allocation35_spill] sm:$0xff] }
 0x30a   : > { %v5018_v18 = vadd.f32 %v7796_v0, %v4916_v2  ;;  %v7279_v15 = vpop.f32.mrb[212].mxu0  ;;  %v4918_v54 = vsel %vm1747_vm3, %v4915_v37, %v4917_v21  ;;  %v4920_v12 = vsel %vm1747_vm3, %v4917_v21, %v4919_v6 }
 0x30b   : > { %v5165_v28 = vadd.f32 %v5164_v61, %v5070_v9  ;;  %v5265_v5 = vadd.f32 %v5264_v55, %v5218_v26  ;;  %v7175_v7 = vpop.f32.mrb[68].mxu1  ;;  %v5071_v47 = vsel %vm415_vm0, %v5017_v38, 0.0  ;;  %v4767_v8 = vpop.f32.mrb[213].mxu0  ;;  %v5019_v34 = vadd.f32 %v7791_v60, %v4918_v54 }
 0x30c   : > { %v7811_v10 = vadd.f32 %v10494_v14, %v7175_v7  ;;  %v4397_v1 = vpop.f32.mrb[69].mxu1  ;;  %5119 = vst [vmem:[%s8085_s29 + $0x138] sm:$0xff] %v5071_v47  ;;  %5120 = vst [vmem:[%s8085_s29 + $0x140] sm:$0xff] %v5018_v18  ;;  %v5220_v24 = vmul.f32 %v5071_v47, %v5071_v47  ;;  %v5020_v49 = vadd.f32 %v7806_v48, %v4920_v12  ;;  %v4923_v29 = vrot.slane %v7279_v15, 1 }
 0x30d   : > { %v5266_v52 = vadd.f32 %v5265_v5, %v5219_v23  ;;  %v5166_v32 = vadd.f32 %v5165_v28, %v5071_v47  ;;  %v7816_v53 = vadd.f32 %v10495_v17, %v4397_v1  ;;  %v5221_v30 = vmul.f32 %v5018_v18, %v5018_v18 }
 0x30e   : > { %v4921_v63 = vrot.slane %v4767_v8, 1  ;;  %v7282_v40 = vpop.f32.mrb[214].mxu0  ;;  %v5073_v25 = vsel %vm420_vm1, %v5019_v34, 0.0  ;;  %v5074_v45 = vsel %vm415_vm0, %v5020_v49, 0.0 }
 0x30f   : > { %v5167_v16 = vadd.f32 %v5166_v32, %v5018_v18  ;;  %v5267_v46 = vadd.f32 %v5266_v52, %v5220_v24  ;;  %v7178_v50 = vpop.f32.mrb[70].mxu1  ;;  %v4927_v36 = vrot.slane %v7282_v40, 1  ;;  %v4777_v51 = vpop.f32.mrb[215].mxu0  ;;  %5121 = vst [vmem:[%s8085_s29 + $0x148] sm:$0xff] %v5073_v25  ;;  %5122 = vst [vmem:[%s8085_s29 + $0x150] sm:$0xff] %v5074_v45  ;;  %v5222_v4 = vmul.f32 %v5073_v25, %v5073_v25  ;;  %v5430_v40 = vld [vmem:[%s8085_s29 + $0x28] sm:$0xff] (%p8073_p4) }
 0x310   : > { %v7821_v60 = vadd.f32 %v10496_v20, %v7178_v50  ;;  %v4407_v22 = vpop.f32.mrb[71].mxu1  ;;  %v5223_v57 = vmul.f32 %v5074_v45, %v5074_v45  ;;  %v4922_v13 = vsel %vm1747_vm3, %v4919_v6, %v4921_v63  ;;  %v4924_v37 = vsel %vm1747_vm3, %v4921_v63, %v4923_v29  ;;  %v5426_v63 = vld [vmem:[%s8085_s29 + $0x18] sm:$0xff] (%p8073_p4)  ;;  %v5428_v50 = vld [vmem:[%s8085_s29 + $0x20] sm:$0xff] (%p8073_p4)  ;;  %5431 = vst [vmem:[%s10179_s22 + $0x28] sm:$0xff] (%p8073_p4), %v5430_v40 }
 0x311   : > { %v5268_v27 = vadd.f32 %v5267_v46, %v5221_v30  ;;  %v5168_v59 = vadd.f32 %v5167_v16, %v5073_v25  ;;  %v4977_v44 = vsel %vm1747_vm3, %v4927_v36, 0.0  ;;  %v7826_v31 = vadd.f32 %v10497_v39, %v4407_v22  ;;  %v5420_v16 = vld [vmem:[%s8085_s29] sm:$0xff] (%p8073_p4)  ;;  %v5422_v30 = vld [vmem:[%s8085_s29 + $0x8] sm:$0xff] (%p8073_p4)  ;;  %v5424_v46 = vld [vmem:[%s8085_s29 + $0x10] sm:$0xff] (%p8073_p4)  ;;  %5427 = vst [vmem:[%s10179_s22 + $0x18] sm:$0xff] (%p8073_p4), %v5426_v63 }
 0x312   : > { %v5021_v19 = vadd.f32 %v7801_v41, %v4922_v13  ;;  %v5022_v11 = vadd.f32 %v7816_v53, %v4924_v37  ;;  %v5025_v9 = vadd.f32 %v7821_v60, %v4977_v44  ;;  %v4925_v26 = vrot.slane %v4777_v51, 1  ;;  %5421 = vst [vmem:[%s10179_s22] sm:$0xff] (%p8073_p4), %v5420_v16  ;;  %5423 = vst [vmem:[%s10179_s22 + $0x8] sm:$0xff] (%p8073_p4), %v5422_v30  ;;  %v5432_v25 = vld [vmem:[%s8085_s29 + $0x30] sm:$0xff] (%p8073_p4)  ;;  %v5436_v20 = vld [vmem:[%s8085_s29 + $0x40] sm:$0xff] (%p8073_p4) }
 0x313   : > { %v5169_v0 = vadd.f32 %v5168_v59, %v5074_v45  ;;  %v5269_v33 = vadd.f32 %v5268_v27, %v5222_v4  ;;  %5425 = vst [vmem:[%s10179_s22 + $0x10] sm:$0xff] (%p8073_p4), %v5424_v46  ;;  %5429 = vst [vmem:[%s10179_s22 + $0x20] sm:$0xff] (%p8073_p4), %v5428_v50  ;;  %v5434_v45 = vld [vmem:[%s8085_s29 + $0x38] sm:$0xff] (%p8073_p4)  ;;  %v5438_v60 = vld [vmem:[%s8085_s29 + $0x48] sm:$0xff] (%p8073_p4) }
 0x314   : > { %v5076_v35 = vsel %vm420_vm1, %v5022_v11, 0.0  ;;  %5123 = vst [vmem:[%s8085_s29 + $0x158] sm:$0xff] %v5021_v19  ;;  %v5224_v43 = vmul.f32 %v5021_v19, %v5021_v19  ;;  %v5079_v55 = vsel %vm420_vm1, %v5025_v9, 0.0  ;;  %v4926_v61 = vsel %vm1747_vm3, %v4923_v29, %v4925_v26  ;;  %5433 = vst [vmem:[%s10179_s22 + $0x30] sm:$0xff] (%p8073_p4), %v5432_v25  ;;  %v5442_v22 = vld [vmem:[%s8085_s29 + $0x58] sm:$0xff] (%p8073_p4)  ;;  %v5444_v51 = vld [vmem:[%s8085_s29 + $0x60] sm:$0xff] (%p8073_p4) }
 0x315   : > { %v5270_v42 = vadd.f32 %v5269_v33, %v5223_v57  ;;  %v5170_v6 = vadd.f32 %v5169_v0, %v5021_v19  ;;  %5124 = vst [vmem:[%s8085_s29 + $0x160] sm:$0xff] %v5076_v35  ;;  %v4928_v41 = vsel %vm1747_vm3, %v4925_v26, %v4927_v36  ;;  %v5225_v2 = vmul.f32 %v5076_v35, %v5076_v35  ;;  %v5440_v36 = vld [vmem:[%s8085_s29 + $0x50] sm:$0xff] (%p8073_p4)  ;;  %v5446_v27 = vld [vmem:[%s8085_s29 + $0x68] sm:$0xff] (%p8073_p4)  ;;  %v5450_v4 = vld [vmem:[%s8085_s29 + $0x78] sm:$0xff] (%p8073_p4) }
 0x316   : > { %5127 = vst [vmem:[%s8085_s29 + $0x178] sm:$0xff] %v5079_v55  ;;  %v5023_v58 = vadd.f32 %v7811_v10, %v4926_v61  ;;  %v5024_v48 = vadd.f32 %v7826_v31, %v4928_v41  ;;  %v5228_v15 = vmul.f32 %v5079_v55, %v5079_v55  ;;  %5435 = vst [vmem:[%s10179_s22 + $0x38] sm:$0xff] (%p8073_p4), %v5434_v45  ;;  %v5448_v59 = vld [vmem:[%s8085_s29 + $0x70] sm:$0xff] (%p8073_p4)  ;;  %v5452_v57 = vld [vmem:[%s8085_s29 + $0x80] sm:$0xff] (%p8073_p4) }
 0x317   : > { %v5171_v56 = vadd.f32 %v5170_v6, %v5076_v35  ;;  %v5271_v38 = vadd.f32 %v5270_v42, %v5224_v43  ;;  %5437 = vst [vmem:[%s10179_s22 + $0x40] sm:$0xff] (%p8073_p4), %v5436_v20  ;;  %5439 = vst [vmem:[%s10179_s22 + $0x48] sm:$0xff] (%p8073_p4), %v5438_v60  ;;  %v5454_v13 = vld [vmem:[%s8085_s29 + $0x88] sm:$0xff] (%p8073_p4)  ;;  %v5456_v37 = vld [vmem:[%s8085_s29 + $0x90] sm:$0xff] (%p8073_p4) }
 0x318   : > { %v5077_v28 = vsel %vm415_vm0, %v5023_v58, 0.0  ;;  %5126 = vst [vmem:[%s8085_s29 + $0x170] sm:$0xff] %v5024_v48  ;;  %v5227_v18 = vmul.f32 %v5024_v48, %v5024_v48  ;;  %5441 = vst [vmem:[%s10179_s22 + $0x50] sm:$0xff] (%p8073_p4), %v5440_v36  ;;  %v5458_v44 = vld [vmem:[%s8085_s29 + $0x98] sm:$0xff] (%p8073_p4)  ;;  %v5460_v39 = vld [vmem:[%s8085_s29 + $0xa0] sm:$0xff] (%p8073_p4) }
 0x319   : > { %v5272_v21 = vadd.f32 %v5271_v38, %v5225_v2  ;;  %5125 = vst [vmem:[%s8085_s29 + $0x168] sm:$0xff] %v5077_v28  ;;  %v5172_v23 = vadd.f32 %v5171_v56, %v5077_v28  ;;  %v5226_v5 = vmul.f32 %v5077_v28, %v5077_v28  ;;  %5443 = vst [vmem:[%s10179_s22 + $0x58] sm:$0xff] (%p8073_p4), %v5442_v22  ;;  %v5462_v31 = vld [vmem:[%s8085_s29 + $0xa8] sm:$0xff] (%p8073_p4)  ;;  %v5464_v0 = vld [vmem:[%s8085_s29 + $0xb0] sm:$0xff] (%p8073_p4) }
 0x31a   : > { %5445 = vst [vmem:[%s10179_s22 + $0x60] sm:$0xff] (%p8073_p4), %v5444_v51  ;;  %5447 = vst [vmem:[%s10179_s22 + $0x68] sm:$0xff] (%p8073_p4), %v5446_v27  ;;  %v5466_v33 = vld [vmem:[%s8085_s29 + $0xb8] sm:$0xff] (%p8073_p4)  ;;  %v5468_v19 = vld [vmem:[%s8085_s29 + $0xc0] sm:$0xff] (%p8073_p4) }
 0x31b   : > { %v5173_v3 = vadd.f32 %v5172_v23, %v5024_v48  ;;  %v5273_v7 = vadd.f32 %v5272_v21, %v5226_v5  ;;  %5449 = vst [vmem:[%s10179_s22 + $0x70] sm:$0xff] (%p8073_p4), %v5448_v59  ;;  %5451 = vst [vmem:[%s10179_s22 + $0x78] sm:$0xff] (%p8073_p4), %v5450_v4  ;;  %v5470_v11 = vld [vmem:[%s8085_s29 + $0xc8] sm:$0xff] (%p8073_p4)  ;;  %v5472_v9 = vld [vmem:[%s8085_s29 + $0xd0] sm:$0xff] (%p8073_p4) }
 0x31c   : > { %5453 = vst [vmem:[%s10179_s22 + $0x80] sm:$0xff] (%p8073_p4), %v5452_v57  ;;  %5455 = vst [vmem:[%s10179_s22 + $0x88] sm:$0xff] (%p8073_p4), %v5454_v13  ;;  %v5474_v26 = vld [vmem:[%s8085_s29 + $0xd8] sm:$0xff] (%p8073_p4)  ;;  %v5476_v42 = vld [vmem:[%s8085_s29 + $0xe0] sm:$0xff] (%p8073_p4) }
 0x31d   : > { %v5174_v47 = vadd.f32 %v5173_v3, %v5079_v55  ;;  %v5274_v54 = vadd.f32 %v5273_v7, %v5227_v18  ;;  %5457 = vst [vmem:[%s10179_s22 + $0x90] sm:$0xff] (%p8073_p4), %v5456_v37  ;;  %5459 = vst [vmem:[%s10179_s22 + $0x98] sm:$0xff] (%p8073_p4), %v5458_v44  ;;  %v5478_v35 = vld [vmem:[%s8085_s29 + $0xe8] sm:$0xff] (%p8073_p4)  ;;  %v5480_v6 = vld [vmem:[%s8085_s29 + $0xf0] sm:$0xff] (%p8073_p4) }
 0x31e   : > { %5461 = vst [vmem:[%s10179_s22 + $0xa0] sm:$0xff] (%p8073_p4), %v5460_v39  ;;  %5463 = vst [vmem:[%s10179_s22 + $0xa8] sm:$0xff] (%p8073_p4), %v5462_v31  ;;  %v5482_v43 = vld [vmem:[%s8085_s29 + $0xf8] sm:$0xff] (%p8073_p4)  ;;  %v5484_v55 = vld [vmem:[%s8085_s29 + $0x100] sm:$0xff] (%p8073_p4) }
 0x31f   : > { %v5175_v12 = vrot.slane %v5174_v47, 4  ;;  %v5275_v14 = vadd.f32 %v5274_v54, %v5228_v15  ;;  %5465 = vst [vmem:[%s10179_s22 + $0xb0] sm:$0xff] (%p8073_p4), %v5464_v0  ;;  %5467 = vst [vmem:[%s10179_s22 + $0xb8] sm:$0xff] (%p8073_p4), %v5466_v33  ;;  %v5486_v61 = vld [vmem:[%s8085_s29 + $0x108] sm:$0xff] (%p8073_p4)  ;;  %v5488_v41 = vld [vmem:[%s8085_s29 + $0x110] sm:$0xff] (%p8073_p4) }
 0x320   : > { %5469 = vst [vmem:[%s10179_s22 + $0x180] sm:$0xff] (%p8073_p4), %v5468_v19  ;;  %5471 = vst [vmem:[%s10179_s22 + $0x188] sm:$0xff] (%p8073_p4), %v5470_v11  ;;  %v5490_v56 = vld [vmem:[%s8085_s29 + $0x118] sm:$0xff] (%p8073_p4)  ;;  %v5492_v2 = vld [vmem:[%s8085_s29 + $0x120] sm:$0xff] (%p8073_p4) }
 0x321   : > { %v5176_v1 = vadd.f32 %v5175_v12, %v5174_v47  ;;  %v5276_v10 = vrot.slane %v5275_v14, 4  ;;  %5473 = vst [vmem:[%s10179_s22 + $0x190] sm:$0xff] (%p8073_p4), %v5472_v9  ;;  %5475 = vst [vmem:[%s10179_s22 + $0x198] sm:$0xff] (%p8073_p4), %v5474_v26  ;;  %v5494_v38 = vld [vmem:[%s8085_s29 + $0x128] sm:$0xff] (%p8073_p4)  ;;  %v5496_v58 = vld [vmem:[%s8085_s29 + $0x130] sm:$0xff] (%p8073_p4) }
 0x322   : > { %5477 = vst [vmem:[%s10179_s22 + $0x1a0] sm:$0xff] (%p8073_p4), %v5476_v42  ;;  %5479 = vst [vmem:[%s10179_s22 + $0x1a8] sm:$0xff] (%p8073_p4), %v5478_v35  ;;  %v5498_v48 = vld [vmem:[%s8085_s29 + $0x138] sm:$0xff] (%p8073_p4)  ;;  %v5500_v21 = vld [vmem:[%s8085_s29 + $0x140] sm:$0xff] (%p8073_p4) }
 0x323   : > { %v5177_v8 = vrot.slane %v5176_v1, 2  ;;  %v5277_v52 = vadd.f32 %v5276_v10, %v5275_v14  ;;  %5481 = vst [vmem:[%s10179_s22 + $0x1b0] sm:$0xff] (%p8073_p4), %v5480_v6  ;;  %5483 = vst [vmem:[%s10179_s22 + $0x1b8] sm:$0xff] (%p8073_p4), %v5482_v43  ;;  %v5502_v28 = vld [vmem:[%s8085_s29 + $0x148] sm:$0xff] (%p8073_p4)  ;;  %v5504_v23 = vld [vmem:[%s8085_s29 + $0x150] sm:$0xff] (%p8073_p4) }
 0x324   : > { %5485 = vst [vmem:[%s10179_s22 + $0x1c0] sm:$0xff] (%p8073_p4), %v5484_v55  ;;  %5487 = vst [vmem:[%s10179_s22 + $0x1c8] sm:$0xff] (%p8073_p4), %v5486_v61  ;;  %v5506_v5 = vld [vmem:[%s8085_s29 + $0x158] sm:$0xff] (%p8073_p4)  ;;  %v5508_v3 = vld [vmem:[%s8085_s29 + $0x160] sm:$0xff] (%p8073_p4) }
 0x325   : > { %v5178_v32 = vadd.f32 %v5177_v8, %v5176_v1  ;;  %v5278_v62 = vrot.slane %v5277_v52, 2  ;;  %5489 = vst [vmem:[%s10179_s22 + $0x1d0] sm:$0xff] (%p8073_p4), %v5488_v41  ;;  %5491 = vst [vmem:[%s10179_s22 + $0x1d8] sm:$0xff] (%p8073_p4), %v5490_v56  ;;  %v5510_v18 = vld [vmem:[%s8085_s29 + $0x168] sm:$0xff] (%p8073_p4)  ;;  %v5512_v7 = vld [vmem:[%s8085_s29 + $0x170] sm:$0xff] (%p8073_p4) }
 0x326   : > { %5493 = vst [vmem:[%s10179_s22 + $0x1e0] sm:$0xff] (%p8073_p4), %v5492_v2  ;;  %5495 = vst [vmem:[%s10179_s22 + $0x1e8] sm:$0xff] (%p8073_p4), %v5494_v38  ;;  %v5514_v15 = vld [vmem:[%s8085_s29 + $0x178] sm:$0xff] (%p8073_p4) }
 0x327   : > { %v5179_v24 = vrot.slane %v5178_v32, 1  ;;  %v5279_v34 = vadd.f32 %v5278_v62, %v5277_v52  ;;  %5497 = vst [vmem:[%s10179_s22 + $0x1f0] sm:$0xff] (%p8073_p4), %v5496_v58  ;;  %5499 = vst [vmem:[%s10179_s22 + $0x1f8] sm:$0xff] (%p8073_p4), %v5498_v48 }
 0x328   : > { %5294 = sbr.rel (!%p8073_p4) target bundleno = 815 (0x32f), region = 149  ;;  %5501 = vst [vmem:[%s10179_s22 + $0x200] sm:$0xff] (%p8073_p4), %v5500_v21  ;;  %5503 = vst [vmem:[%s10179_s22 + $0x208] sm:$0xff] (%p8073_p4), %v5502_v28 }
 0x329   : > { %v5280_v49 = vrot.slane %v5279_v34, 1  ;;  %v5180_v29 = vadd.f32 %v5179_v24, %v5178_v32  ;;  %5505 = vst [vmem:[%s10179_s22 + $0x210] sm:$0xff] (%p8073_p4), %v5504_v23  ;;  %5507 = vst [vmem:[%s10179_s22 + $0x218] sm:$0xff] (%p8073_p4), %v5506_v5 }
 0x32a   : > { %5509 = vst [vmem:[%s10179_s22 + $0x220] sm:$0xff] (%p8073_p4), %v5508_v3  ;;  %5511 = vst [vmem:[%s10179_s22 + $0x228] sm:$0xff] (%p8073_p4), %v5510_v18 }
 0x32b   : > { %v5281_v17 = vadd.f32 %v5280_v49, %v5279_v34  ;;  %5513 = vst [vmem:[%s10179_s22 + $0x230] sm:$0xff] (%p8073_p4), %v5512_v7  ;;  %5515 = vst [vmem:[%s10179_s22 + $0x238] sm:$0xff] (%p8073_p4), %v5514_v15 }
 0x32d   : > { %v5282_v53 = vsel %vm862_vm2, %v5180_v29, %v5281_v17 }
 0x32e   : > { %5283 = vst [vmem:[%s8083_s28] sm:$0x3] %v5282_v53 }
 0x32f PF: > { %p11_p12 = scmp.ge.s32.totalorder %s8064_s16, 4   ;;  %s10498_s12 = smov %s8023_s13 }
 0x330   : > { %s10499_s13 = smov %s8071_s19  ;;  %s10500_s14 = smov %s8064_s16 }
 0x331   :  { %13 = sbr.rel (!%p11_p12) target bundleno = 2 (0x2), region = 262 }

// kernel: double_conv.4
= control target key start
LH: loop header
LB: loop body
LE: loop exit
PB: predicated region body
PF: predicated region fallthrough
CT: control target
= control target key end

     0   :  { %s8491_s18 = smov 0   ;;  %s8493_s19 = smov 0   ;;  %s10937_s0 = inlined_call_operand.vmem [shape: f32[2,16,24,128], index: 0, kind: input, shape index: {}]   ;;  %s10938_s1 = inlined_call_operand.vmem [shape: f32[9,128,128], index: 1, kind: input, shape index: {}]   ;;  %s10939_s2 = inlined_call_operand.vmem [shape: f32[1,1,1,128], index: 2, kind: input, shape index: {}]   ;;  %s10940_s3 = inlined_call_operand.vmem [shape: f32[1,1,1,128], index: 3, kind: input, shape index: {}]   ;;  %s10941_s4 = inlined_call_operand.vmem [shape: f32[2,16,24,128], index: 4, kind: output, shape index: {0}]   ;;  %s10942_s5 = inlined_call_operand.vmem [shape: f32[2,2,128], index: 5, kind: output, shape index: {1}]  }
   0x1   :  { %s8495_s20 = smov 0  }
   0x2 LB: > { %s8502_s21 = sadd.s32 4294967295, %s8457_s20   ;;  %s8504_s22 = sadd.s32 1, %s8457_s20   ;;  %s8457_s20 = sphi %s8495_s20, %s11152_s20   ;;  %s8453_s19 = sphi %s8493_s19, %s11151_s19   ;;  %s8449_s18 = sphi %s8491_s18, %s11150_s18  }
   0x3   : > { %s83_s23 = ssub.s32 %s8457_s20, %s8504_s22  ;;  %s86_s24 = sadd.s32 1, %s8453_s19 }
   0x4   : > { %p84_p0 = scmp.eq.s32.totalorder %s83_s23, 0  ;;  %p96_p1 = scmp.ne.s32.totalorder %s8453_s19, %s8449_s18 }
   0x5   : > { %p97_p2 = scmp.eq.s32.totalorder %s8502_s21, 1  ;;  %p6047_p3 = scmp.ge.s32.totalorder %s8457_s20, 1 }
   0x6   : > { %s8511_s25 = scalar_select %p84_p0, %s8453_s19, %s86_s24  }
   0x7   : > { %p8513_p4 = por %p97_p2, %p96_p1  ;;  %p156_p5 = scmp.lt.s32.totalorder %s8457_s20, 3 }
   0x9   : > { %p157_p6 = pnand %p6047_p3, %p156_p5 }
   0xb   : > { %160 = sbr.rel (%p157_p6) target bundleno = 870 (0x366), region = 32 }
  0x12   : > { %s171_s27 = sand.u32 1, %s8449_s18   ;;  %p181_p7 = scmp.lt.s32.totalorder %s8502_s21, 1 }
  0x13   : > { %s8353_s28 = smul.u32 384, %s171_s27  ;;  %s6049_s29 = sshll.u32 %s8502_s21, 3 }
  0x14   : > { %s182_s30 = scalar_select %p181_p7, %s8502_s21, 1 }
  0x15   : > { %s8525_s10 = scalar_lea.vmem [#allocation3], %s8353_s28 }
  0x16   : > { %s6048_s6 = sshll.u32 %s182_s30, 1 }
  0x17   : > { %s8523_s9 = scalar_lea.vmem %s10942_s5, %s6048_s6 }
  0x18   : > { %s6050_s11 = smul.u32 192, %s8502_s21 }
  0x1a   : > { %s8533_s14 = scalar_lea.vmem %s10937_s0, %s6050_s11 }
  0x1b   : > { %v223_v0 = vld [vmem:[%s8533_s14] sm:$0xff]  ;;  %v225_v1 = vld [vmem:[%s8533_s14 + $0x8] sm:$0xff]  ;;  %v227_v2 = vld [vmem:[%s8533_s14 + $0x10] sm:$0xff] }
  0x1c   : > { %224 = vst [vmem:[#allocation2 + $0x18] sm:$0xff] %v223_v0  ;;  %226 = vst [vmem:[#allocation2 + $0x20] sm:$0xff] %v225_v1  ;;  %v229_v3 = vld [vmem:[%s8533_s14 + $0x18] sm:$0xff]  ;;  %v231_v4 = vld [vmem:[%s8533_s14 + $0x20] sm:$0xff] }
  0x1d   : > { %228 = vst [vmem:[#allocation2 + $0x28] sm:$0xff] %v227_v2  ;;  %v233_v5 = vld [vmem:[%s8533_s14 + $0x28] sm:$0xff]  ;;  %230 = vst [vmem:[#allocation2 + $0x30] sm:$0xff] %v229_v3  ;;  %v235_v6 = vld [vmem:[%s8533_s14 + $0x30] sm:$0xff] }
  0x1e   : > { %232 = vst [vmem:[#allocation2 + $0x38] sm:$0xff] %v231_v4  ;;  %234 = vst [vmem:[#allocation2 + $0x40] sm:$0xff] %v233_v5  ;;  %v237_v7 = vld [vmem:[%s8533_s14 + $0x38] sm:$0xff]  ;;  %v239_v8 = vld [vmem:[%s8533_s14 + $0x40] sm:$0xff] }
  0x1f   : > { %236 = vst [vmem:[#allocation2 + $0x48] sm:$0xff] %v235_v6  ;;  %238 = vst [vmem:[#allocation2 + $0x50] sm:$0xff] %v237_v7  ;;  %v241_v9 = vld [vmem:[%s8533_s14 + $0x48] sm:$0xff]  ;;  %v243_v10 = vld [vmem:[%s8533_s14 + $0x50] sm:$0xff] }
  0x20   : > { %240 = vst [vmem:[#allocation2 + $0x58] sm:$0xff] %v239_v8  ;;  %v245_v11 = vld [vmem:[%s8533_s14 + $0x58] sm:$0xff]  ;;  %242 = vst [vmem:[#allocation2 + $0x60] sm:$0xff] %v241_v9  ;;  %v247_v12 = vld [vmem:[%s8533_s14 + $0x60] sm:$0xff] }
  0x21   : > { %244 = vst [vmem:[#allocation2 + $0x68] sm:$0xff] %v243_v10  ;;  %246 = vst [vmem:[#allocation2 + $0x70] sm:$0xff] %v245_v11  ;;  %v249_v13 = vld [vmem:[%s8533_s14 + $0x68] sm:$0xff]  ;;  %v251_v14 = vld [vmem:[%s8533_s14 + $0x70] sm:$0xff] }
  0x22   : > { %248 = vst [vmem:[#allocation2 + $0x78] sm:$0xff] %v247_v12  ;;  %250 = vst [vmem:[#allocation2 + $0x80] sm:$0xff] %v249_v13  ;;  %v253_v15 = vld [vmem:[%s8533_s14 + $0x78] sm:$0xff]  ;;  %v255_v16 = vld [vmem:[%s8533_s14 + $0x80] sm:$0xff] }
  0x23   : > { %252 = vst [vmem:[#allocation2 + $0x88] sm:$0xff] %v251_v14  ;;  %v257_v17 = vld [vmem:[%s8533_s14 + $0x88] sm:$0xff]  ;;  %254 = vst [vmem:[#allocation2 + $0x90] sm:$0xff] %v253_v15  ;;  %v259_v18 = vld [vmem:[%s8533_s14 + $0x90] sm:$0xff] }
  0x24   : > { %256 = vst [vmem:[#allocation2 + $0x98] sm:$0xff] %v255_v16  ;;  %258 = vst [vmem:[#allocation2 + $0xa0] sm:$0xff] %v257_v17  ;;  %v261_v19 = vld [vmem:[%s8533_s14 + $0x98] sm:$0xff]  ;;  %v263_v20 = vld [vmem:[%s8533_s14 + $0xa0] sm:$0xff] }
  0x25   : > { %260 = vst [vmem:[#allocation2 + $0xa8] sm:$0xff] %v259_v18  ;;  %262 = vst [vmem:[#allocation2 + $0xb0] sm:$0xff] %v261_v19  ;;  %v265_v21 = vld [vmem:[%s8533_s14 + $0xa8] sm:$0xff]  ;;  %v267_v22 = vld [vmem:[%s8533_s14 + $0xb0] sm:$0xff] }
  0x26   : > { %264 = vst [vmem:[#allocation2 + $0xb8] sm:$0xff] %v263_v20  ;;  %v269_v23 = vld [vmem:[%s8533_s14 + $0xb8] sm:$0xff]  ;;  %266 = vst [vmem:[#allocation2 + $0xc0] sm:$0xff] %v265_v21  ;;  %v271_v24 = vld [vmem:[%s8533_s14 + $0x180] sm:$0xff] }
  0x27   : > { %268 = vst [vmem:[#allocation2 + $0xc8] sm:$0xff] %v267_v22  ;;  %270 = vst [vmem:[#allocation2 + $0xd0] sm:$0xff] %v269_v23  ;;  %v273_v25 = vld [vmem:[%s8533_s14 + $0x188] sm:$0xff]  ;;  %v275_v26 = vld [vmem:[%s8533_s14 + $0x190] sm:$0xff] }
  0x28   : > { %272 = vst [vmem:[#allocation2 + $0x108] sm:$0xff] %v271_v24  ;;  %274 = vst [vmem:[#allocation2 + $0x110] sm:$0xff] %v273_v25  ;;  %v277_v27 = vld [vmem:[%s8533_s14 + $0x198] sm:$0xff]  ;;  %v279_v28 = vld [vmem:[%s8533_s14 + $0x1a0] sm:$0xff] }
  0x29   : > { %276 = vst [vmem:[#allocation2 + $0x118] sm:$0xff] %v275_v26  ;;  %v281_v29 = vld [vmem:[%s8533_s14 + $0x1a8] sm:$0xff]  ;;  %278 = vst [vmem:[#allocation2 + $0x120] sm:$0xff] %v277_v27  ;;  %v283_v30 = vld [vmem:[%s8533_s14 + $0x1b0] sm:$0xff] }
  0x2a   : > { %280 = vst [vmem:[#allocation2 + $0x128] sm:$0xff] %v279_v28  ;;  %282 = vst [vmem:[#allocation2 + $0x130] sm:$0xff] %v281_v29  ;;  %v285_v31 = vld [vmem:[%s8533_s14 + $0x1b8] sm:$0xff]  ;;  %v287_v32 = vld [vmem:[%s8533_s14 + $0x1c0] sm:$0xff] }
  0x2b   : > { %284 = vst [vmem:[#allocation2 + $0x138] sm:$0xff] %v283_v30  ;;  %286 = vst [vmem:[#allocation2 + $0x140] sm:$0xff] %v285_v31  ;;  %v289_v33 = vld [vmem:[%s8533_s14 + $0x1c8] sm:$0xff]  ;;  %v291_v34 = vld [vmem:[%s8533_s14 + $0x1d0] sm:$0xff] }
  0x2c   : > { %288 = vst [vmem:[#allocation2 + $0x148] sm:$0xff] %v287_v32  ;;  %v293_v35 = vld [vmem:[%s8533_s14 + $0x1d8] sm:$0xff]  ;;  %290 = vst [vmem:[#allocation2 + $0x150] sm:$0xff] %v289_v33  ;;  %v295_v36 = vld [vmem:[%s8533_s14 + $0x1e0] sm:$0xff] }
  0x2d   : > { %292 = vst [vmem:[#allocation2 + $0x158] sm:$0xff] %v291_v34  ;;  %294 = vst [vmem:[#allocation2 + $0x160] sm:$0xff] %v293_v35  ;;  %v297_v37 = vld [vmem:[%s8533_s14 + $0x1e8] sm:$0xff]  ;;  %v299_v38 = vld [vmem:[%s8533_s14 + $0x1f0] sm:$0xff] }
  0x2e   : > { %296 = vst [vmem:[#allocation2 + $0x168] sm:$0xff] %v295_v36  ;;  %298 = vst [vmem:[#allocation2 + $0x170] sm:$0xff] %v297_v37  ;;  %v301_v39 = vld [vmem:[%s8533_s14 + $0x1f8] sm:$0xff]  ;;  %v303_v40 = vld [vmem:[%s8533_s14 + $0x200] sm:$0xff] }
  0x2f   : > { %300 = vst [vmem:[#allocation2 + $0x178] sm:$0xff] %v299_v38  ;;  %v305_v41 = vld [vmem:[%s8533_s14 + $0x208] sm:$0xff]  ;;  %302 = vst [vmem:[#allocation2 + $0x180] sm:$0xff] %v301_v39  ;;  %v307_v42 = vld [vmem:[%s8533_s14 + $0x210] sm:$0xff] }
  0x30   : > { %304 = vst [vmem:[#allocation2 + $0x188] sm:$0xff] %v303_v40  ;;  %306 = vst [vmem:[#allocation2 + $0x190] sm:$0xff] %v305_v41  ;;  %v309_v43 = vld [vmem:[%s8533_s14 + $0x218] sm:$0xff]  ;;  %v311_v44 = vld [vmem:[%s8533_s14 + $0x220] sm:$0xff] }
  0x31   : > { %308 = vst [vmem:[#allocation2 + $0x198] sm:$0xff] %v307_v42  ;;  %310 = vst [vmem:[#allocation2 + $0x1a0] sm:$0xff] %v309_v43  ;;  %v313_v45 = vld [vmem:[%s8533_s14 + $0x228] sm:$0xff]  ;;  %v315_v46 = vld [vmem:[%s8533_s14 + $0x230] sm:$0xff] }
  0x32   : > { %312 = vst [vmem:[#allocation2 + $0x1a8] sm:$0xff] %v311_v44  ;;  %v317_v47 = vld [vmem:[%s8533_s14 + $0x238] sm:$0xff]  ;;  %314 = vst [vmem:[#allocation2 + $0x1b0] sm:$0xff] %v313_v45 }
  0x33   : > { %316 = vst [vmem:[#allocation2 + $0x1b8] sm:$0xff] %v315_v46  ;;  %318 = vst [vmem:[#allocation2 + $0x1c0] sm:$0xff] %v317_v47 }
  0x34   : > { %326 = vsyncadd [#allocation4], 6144 }
  0x35   : > { %8441 = dma.done.wait [#allocation4], 6144 }
  0x36   : > { %8442 = vsyncadd [#allocation4], 4294961152  ;;  %p6051_p8 = scmp.le.s32.totalorder %s8502_s21, 0 }
  0x37   : > { %s6052_s15 = sadd.s32 (!%p6051_p8), 4294967295, %s6049_s29 }
  0x38   : > { %335 = sbr.rel (%p6051_p8) target bundleno = 73 (0x49), region = 71 }
  0x3f   : > { %s337_s16 = smul.u32 24, %s6052_s15 }
  0x41   : > { %s338_s20 = scalar_lea.vmem %s10937_s0, %s337_s16 }
  0x42   : > { %v373_v48 = vld [vmem:[%s338_s20] sm:$0xff]  ;;  %v375_v49 = vld [vmem:[%s338_s20 + $0x8] sm:$0xff]  ;;  %v377_v50 = vld [vmem:[%s338_s20 + $0x10] sm:$0xff] }
  0x43   : > { %374 = vst [vmem:[#allocation2] sm:$0xff] %v373_v48  ;;  %376 = vst [vmem:[#allocation2 + $0x8] sm:$0xff] %v375_v49  ;;  %v379_v51 = vld [vmem:[%s338_s20 + $0x180] sm:$0xff]  ;;  %v381_v52 = vld [vmem:[%s338_s20 + $0x188] sm:$0xff] }
  0x44   : > { %378 = vst [vmem:[#allocation2 + $0x10] sm:$0xff] %v377_v50  ;;  %v383_v53 = vld [vmem:[%s338_s20 + $0x190] sm:$0xff]  ;;  %380 = vst [vmem:[#allocation2 + $0xf0] sm:$0xff] %v379_v51 }
  0x45   : > { %382 = vst [vmem:[#allocation2 + $0xf8] sm:$0xff] %v381_v52  ;;  %384 = vst [vmem:[#allocation2 + $0x100] sm:$0xff] %v383_v53 }
  0x46   : > { %392 = vsyncadd [#allocation6], 768 }
  0x47   : > { %8443 = dma.done.wait [#allocation6], 768 }
  0x48   : > { %8444 = vsyncadd [#allocation6], 4294966528 }
  0x49 PF: > { %p6053_p9 = scmp.ge.s32.totalorder %s8502_s21, 1 }
  0x4b   : > { %401 = sbr.rel (%p6053_p9) target bundleno = 89 (0x59), region = 110 }
  0x52   : > { %v6056_v54 = vld [vmem:[%s8533_s14 + $0xc0] sm:$0xff]  ;;  %v6057_v55 = vld [vmem:[%s8533_s14 + $0xc8] sm:$0xff]  ;;  %v6058_v56 = vld [vmem:[%s8533_s14 + $0xd0] sm:$0xff] }
  0x53   : > { %441 = vst [vmem:[#allocation2 + $0xd8] sm:$0xff] %v6056_v54  ;;  %443 = vst [vmem:[#allocation2 + $0xe0] sm:$0xff] %v6057_v55  ;;  %v6059_v57 = vld [vmem:[%s8533_s14 + $0x240] sm:$0xff]  ;;  %v6060_v58 = vld [vmem:[%s8533_s14 + $0x248] sm:$0xff] }
  0x54   : > { %445 = vst [vmem:[#allocation2 + $0xe8] sm:$0xff] %v6058_v56  ;;  %v6061_v59 = vld [vmem:[%s8533_s14 + $0x250] sm:$0xff]  ;;  %447 = vst [vmem:[#allocation2 + $0x1c8] sm:$0xff] %v6059_v57 }
  0x55   : > { %449 = vst [vmem:[#allocation2 + $0x1d0] sm:$0xff] %v6060_v58  ;;  %451 = vst [vmem:[#allocation2 + $0x1d8] sm:$0xff] %v6061_v59 }
  0x56   : > { %459 = vsyncadd [#allocation8], 768 }
  0x57   : > { %8445 = dma.done.wait [#allocation8], 768 }
  0x58   : > { %8446 = vsyncadd [#allocation8], 4294966528 }
  0x59 PF: > { %v465_v60 = vlaneseq  ;;  %v478_v61 = vld [vmem:[#allocation2] sm:$0xff]  ;;  %v479_v1 = vld [vmem:[#allocation2 + $0x8] sm:$0xff]  ;;  %v480_v2 = vld [vmem:[#allocation2 + $0x10] sm:$0xff]  ;;  %p6066_p10 = scmp.ne.s32.totalorder %s8502_s21, 0 }
  0x5a   : > { %v8599_v62 = vld [vmem:[%s10939_s2] ss:$0 sm:$0xff]  ;;  %v481_v3 = vld [vmem:[#allocation2 + $0x18] sm:$0xff]  ;;  %v483_v9 = vld [vmem:[#allocation2 + $0x28] sm:$0xff] }
  0x5b   : > { %v8604_v63 = vld [vmem:[%s10940_s3] ss:$0 sm:$0xff]  ;;  %v545_v0 = vmul.f32 %v8599_v62, %v478_v61  ;;  %v8607_v4 = vshrl.u32 %v465_v60, 7  ;;  %v546_v5 = vmul.f32 %v8599_v62, %v479_v1  ;;  %v547_v6 = vmul.f32 %v8599_v62, %v480_v2  ;;  %v484_v10 = vld [vmem:[#allocation2 + $0x30] sm:$0xff]  ;;  %v485_v22 = vld [vmem:[#allocation2 + $0x38] sm:$0xff] }
  0x5c   : > { %v548_v7 = vmul.f32 %v8599_v62, %v481_v3  ;;  %v482_v8 = vld [vmem:[#allocation2 + $0x20] sm:$0xff]  ;;  %v550_v13 = vmul.f32 %v8599_v62, %v483_v9  ;;  %v551_v14 = vmul.f32 %v8599_v62, %v484_v10  ;;  %v487_v27 = vld [vmem:[#allocation2 + $0x48] sm:$0xff]  ;;  %v488_v28 = vld [vmem:[#allocation2 + $0x50] sm:$0xff]  ;;  %v552_v36 = vmul.f32 %v8599_v62, %v485_v22 }
  0x5d   : > { %11010 = vst [vmem:[#allocation13_spill] sm:$0xff] %v8607_v4  ;;  %v612_v11 = vadd.f32 %v8604_v63, %v545_v0  ;;  %v549_v12 = vmul.f32 %v8599_v62, %v482_v8  ;;  %vm469_vm0 = vcmp.ge.s32.totalorder %v8607_v4, 1  ;;  %v613_v15 = vadd.f32 %v8604_v63, %v546_v5  ;;  %v486_v23 = vld [vmem:[#allocation2 + $0x40] sm:$0xff]  ;;  %v489_v33 = vld [vmem:[#allocation2 + $0x58] sm:$0xff]  ;;  %v491_v39 = vld [vmem:[#allocation2 + $0x68] sm:$0xff] }
  0x5e   : > { %v8619_v16 = vadd.s32 16, %v8607_v4  ;;  %v614_v17 = vadd.f32 %v8604_v63, %v547_v6  ;;  %v615_v19 = vadd.f32 %v8604_v63, %v548_v7  ;;  %v617_v21 = vadd.f32 %v8604_v63, %v550_v13  ;;  %v490_v38 = vld [vmem:[#allocation2 + $0x60] sm:$0xff]  ;;  %v492_v44 = vld [vmem:[#allocation2 + $0x70] sm:$0xff]  ;;  %v493_v53 = vld [vmem:[#allocation2 + $0x78] sm:$0xff] }
  0x5f   : > { %v672_v18 = vmax.f32 %v612_v11, 0.0  ;;  %v616_v20 = vadd.f32 %v8604_v63, %v549_v12  ;;  %v673_v24 = vmax.f32 %v613_v15, 0.0  ;;  %v618_v26 = vadd.f32 %v8604_v63, %v551_v14  ;;  %v494_v58 = vld [vmem:[#allocation2 + $0x80] sm:$0xff]  ;;  %v495_v1 = vld [vmem:[#allocation2 + $0x88] sm:$0xff]  ;;  %v496_v7 = vld [vmem:[#allocation2 + $0x90] sm:$0xff] }
  0x60   : > { %11011 = vst [vmem:[#allocation14_spill] sm:$0xff] %v8619_v16  ;;  %vm474_vm1 = vcmp.le.s32.totalorder %v8619_v16, 16  ;;  %v674_v25 = vmax.f32 %v614_v17, 0.0  ;;  %v675_v30 = vmax.f32 %v615_v19, 0.0  ;;  %v677_v32 = vmax.f32 %v617_v21, 0.0  ;;  %v497_v8 = vld [vmem:[#allocation2 + $0x98] sm:$0xff] }
  0x61   : > { %v738_v29 = vsel %vm469_vm0, %v672_v18, 0.0  ;;  %v676_v31 = vmax.f32 %v616_v20, 0.0  ;;  %799 = vst [vmem:[#allocation2 + $0x8] sm:$0xff] %v673_v24  ;;  %v678_v35 = vmax.f32 %v618_v26, 0.0  ;;  %v553_v37 = vmul.f32 %v8599_v62, %v486_v23  ;;  %v498_v13 = vld [vmem:[#allocation2 + $0xa0] sm:$0xff]  ;;  %v499_v19 = vld [vmem:[#allocation2 + $0xa8] sm:$0xff] }
  0x62   : > { %798 = vst [vmem:[#allocation2] sm:$0xff] %v738_v29  ;;  %v740_v34 = vsel %vm474_vm1, %v674_v25, 0.0  ;;  %v741_v40 = vsel %vm469_vm0, %v675_v30, 0.0  ;;  %v743_v41 = vsel %vm474_vm1, %v677_v32, 0.0  ;;  %v554_v42 = vmul.f32 %v8599_v62, %v487_v27  ;;  %v500_v24 = vld [vmem:[#allocation2 + $0xb0] sm:$0xff]  ;;  %v501_v29 = vld [vmem:[#allocation2 + $0xb8] sm:$0xff] }
  0x63   : > { %800 = vst [vmem:[#allocation2 + $0x10] sm:$0xff] %v740_v34  ;;  %802 = vst [vmem:[#allocation2 + $0x20] sm:$0xff] %v676_v31  ;;  %v555_v43 = vmul.f32 %v8599_v62, %v488_v28  ;;  %v744_v45 = vsel %vm469_vm0, %v678_v35, 0.0  ;;  %v619_v46 = vadd.f32 %v8604_v63, %v552_v36  ;;  %v620_v47 = vadd.f32 %v8604_v63, %v553_v37  ;;  %v502_v34 = vld [vmem:[#allocation2 + $0xc0] sm:$0xff] }
  0x64   : > { %801 = vst [vmem:[#allocation2 + $0x18] sm:$0xff] %v741_v40  ;;  %803 = vst [vmem:[#allocation2 + $0x28] sm:$0xff] %v743_v41  ;;  %v556_v48 = vmul.f32 %v8599_v62, %v489_v33  ;;  %v621_v49 = vadd.f32 %v8604_v63, %v554_v42  ;;  %v557_v51 = vmul.f32 %v8599_v62, %v490_v38 }
  0x65   : > { %804 = vst [vmem:[#allocation2 + $0x30] sm:$0xff] %v744_v45  ;;  %v622_v50 = vadd.f32 %v8604_v63, %v555_v43  ;;  %v558_v52 = vmul.f32 %v8599_v62, %v491_v39  ;;  %v679_v54 = vmax.f32 %v619_v46, 0.0  ;;  %v680_v55 = vmax.f32 %v620_v47, 0.0  ;;  %v503_v39 = vld [vmem:[#allocation2 + $0xc8] sm:$0xff] }
  0x66   : > { %v623_v56 = vadd.f32 %v8604_v63, %v556_v48  ;;  %v559_v57 = vmul.f32 %v8599_v62, %v492_v44  ;;  %v681_v59 = vmax.f32 %v621_v49, 0.0  ;;  %v624_v61 = vadd.f32 %v8604_v63, %v557_v51  ;;  %v504_v44 = vld [vmem:[#allocation2 + $0xd0] sm:$0xff]  ;;  %v505_v49 = vld [vmem:[#allocation2 + $0xd8] sm:$0xff] }
  0x67   : > { %v682_v60 = vmax.f32 %v622_v50, 0.0  ;;  %v625_v0 = vadd.f32 %v8604_v63, %v558_v52  ;;  %805 = vst [vmem:[#allocation2 + $0x38] sm:$0xff] %v679_v54  ;;  %v746_v2 = vsel %vm474_vm1, %v680_v55, 0.0  ;;  %v560_v6 = vmul.f32 %v8599_v62, %v493_v53  ;;  %v506_v54 = vld [vmem:[#allocation2 + $0xe0] sm:$0xff]  ;;  %v507_v55 = vld [vmem:[#allocation2 + $0xe8] sm:$0xff] }
  0x68   : > { %v683_v3 = vmax.f32 %v623_v56, 0.0  ;;  %v626_v5 = vadd.f32 %v8604_v63, %v559_v57  ;;  %806 = vst [vmem:[#allocation2 + $0x40] sm:$0xff] %v746_v2  ;;  %v747_v9 = vsel %vm469_vm0, %v681_v59, 0.0  ;;  %v684_v10 = vmax.f32 %v624_v61, 0.0 }
  0x69   : > { %808 = vst [vmem:[#allocation2 + $0x50] sm:$0xff] %v682_v60  ;;  %v685_v11 = vmax.f32 %v625_v0, 0.0  ;;  %v561_v12 = vmul.f32 %v8599_v62, %v494_v58  ;;  %807 = vst [vmem:[#allocation2 + $0x48] sm:$0xff] %v747_v9  ;;  %v627_v17 = vadd.f32 %v8604_v63, %v560_v6  ;;  %v562_v18 = vmul.f32 %v8599_v62, %v495_v1  ;;  %v508_v60 = vld [vmem:[#allocation2 + $0xf0] sm:$0xff]  ;;  %v510_v9 = vld [vmem:[#allocation2 + $0x100] sm:$0xff] }
  0x6a   : > { %v749_v14 = vsel %vm474_vm1, %v683_v3, 0.0  ;;  %v686_v15 = vmax.f32 %v626_v5, 0.0  ;;  %v750_v20 = vsel %vm469_vm0, %v684_v10, 0.0  ;;  %v563_v22 = vmul.f32 %v8599_v62, %v496_v7 }
  0x6b   : > { %809 = vst [vmem:[#allocation2 + $0x58] sm:$0xff] %v749_v14  ;;  %811 = vst [vmem:[#allocation2 + $0x68] sm:$0xff] %v685_v11  ;;  %v628_v21 = vadd.f32 %v8604_v63, %v561_v12  ;;  %v564_v23 = vmul.f32 %v8599_v62, %v497_v8  ;;  %v687_v26 = vmax.f32 %v627_v17, 0.0  ;;  %v629_v27 = vadd.f32 %v8604_v63, %v562_v18  ;;  %v509_v8 = vld [vmem:[#allocation2 + $0xf8] sm:$0xff]  ;;  %v511_v14 = vld [vmem:[#allocation2 + $0x108] sm:$0xff] }
  0x6c   : > { %810 = vst [vmem:[#allocation2 + $0x60] sm:$0xff] %v750_v20  ;;  %v752_v25 = vsel %vm474_vm1, %v686_v15, 0.0  ;;  %v565_v28 = vmul.f32 %v8599_v62, %v498_v13  ;;  %v630_v31 = vadd.f32 %v8604_v63, %v563_v22  ;;  %v566_v33 = vmul.f32 %v8599_v62, %v499_v19 }
  0x6d   : > { %812 = vst [vmem:[#allocation2 + $0x70] sm:$0xff] %v752_v25  ;;  %v688_v30 = vmax.f32 %v628_v21, 0.0  ;;  %v631_v32 = vadd.f32 %v8604_v63, %v564_v23  ;;  %v753_v35 = vsel %vm469_vm0, %v687_v26, 0.0  ;;  %v689_v36 = vmax.f32 %v629_v27, 0.0  ;;  %v513_v25 = vld [vmem:[#allocation2 + $0x118] sm:$0xff] }
  0x6e   : > { %v632_v37 = vadd.f32 %v8604_v63, %v565_v28  ;;  %v567_v38 = vmul.f32 %v8599_v62, %v500_v24  ;;  %813 = vst [vmem:[#allocation2 + $0x78] sm:$0xff] %v753_v35  ;;  %v690_v40 = vmax.f32 %v630_v31, 0.0  ;;  %v633_v42 = vadd.f32 %v8604_v63, %v566_v33  ;;  %v512_v24 = vld [vmem:[#allocation2 + $0x110] sm:$0xff]  ;;  %v515_v35 = vld [vmem:[#allocation2 + $0x128] sm:$0xff] }
  0x6f   : > { %814 = vst [vmem:[#allocation2 + $0x80] sm:$0xff] %v688_v30  ;;  %v691_v41 = vmax.f32 %v631_v32, 0.0  ;;  %v568_v43 = vmul.f32 %v8599_v62, %v501_v29  ;;  %v755_v45 = vsel %vm474_vm1, %v689_v36, 0.0  ;;  %v569_v48 = vmul.f32 %v8599_v62, %v502_v34  ;;  %v514_v30 = vld [vmem:[#allocation2 + $0x120] sm:$0xff] }
  0x70   : > { %v692_v46 = vmax.f32 %v632_v37, 0.0  ;;  %v634_v47 = vadd.f32 %v8604_v63, %v567_v38  ;;  %815 = vst [vmem:[#allocation2 + $0x88] sm:$0xff] %v755_v45  ;;  %v756_v50 = vsel %vm469_vm0, %v690_v40, 0.0  ;;  %v693_v51 = vmax.f32 %v633_v42, 0.0  ;;  %v516_v40 = vld [vmem:[#allocation2 + $0x130] sm:$0xff] }
  0x71   : > { %817 = vst [vmem:[#allocation2 + $0x98] sm:$0xff] %v691_v41  ;;  %v635_v52 = vadd.f32 %v8604_v63, %v568_v43  ;;  %v570_v53 = vmul.f32 %v8599_v62, %v503_v39  ;;  %816 = vst [vmem:[#allocation2 + $0x90] sm:$0xff] %v756_v50  ;;  %v636_v58 = vadd.f32 %v8604_v63, %v569_v48  ;;  %v517_v41 = vld [vmem:[#allocation2 + $0x138] sm:$0xff]  ;;  %v518_v50 = vld [vmem:[#allocation2 + $0x140] sm:$0xff] }
  0x72   : > { %v758_v56 = vsel %vm474_vm1, %v692_v46, 0.0  ;;  %v694_v57 = vmax.f32 %v634_v47, 0.0  ;;  %v571_v59 = vmul.f32 %v8599_v62, %v504_v44  ;;  %v759_v61 = vsel %vm469_vm0, %v693_v51, 0.0 }
  0x73   : > { %818 = vst [vmem:[#allocation2 + $0xa0] sm:$0xff] %v758_v56  ;;  %v695_v0 = vmax.f32 %v635_v52, 0.0  ;;  %v637_v1 = vadd.f32 %v8604_v63, %v570_v53  ;;  %v572_v2 = vmul.f32 %v8599_v62, %v505_v49  ;;  %819 = vst [vmem:[#allocation2 + $0xa8] sm:$0xff] %v759_v61  ;;  %v696_v3 = vmax.f32 %v636_v58, 0.0  ;;  %v520_v56 = vld [vmem:[#allocation2 + $0x150] sm:$0xff] }
  0x74   : > { %820 = vst [vmem:[#allocation2 + $0xb0] sm:$0xff] %v694_v57  ;;  %v638_v5 = vadd.f32 %v8604_v63, %v571_v59  ;;  %v573_v6 = vmul.f32 %v8599_v62, %v506_v54  ;;  %v574_v7 = vmul.f32 %v8599_v62, %v507_v55  ;;  %v575_v13 = vmul.f32 %v8599_v62, %v508_v60  ;;  %v519_v55 = vld [vmem:[#allocation2 + $0x148] sm:$0xff] }
  0x75   : > { %v761_v10 = vsel %vm474_vm1, %v695_v0, 0.0  ;;  %v697_v11 = vmax.f32 %v637_v1, 0.0  ;;  %v639_v12 = vadd.f32 %v8604_v63, %v572_v2  ;;  %v762_v15 = vsel %vm469_vm0, %v696_v3, 0.0  ;;  %v521_v3 = vld [vmem:[#allocation2 + $0x158] sm:$0xff] }
  0x76   : > { %821 = vst [vmem:[#allocation2 + $0xb8] sm:$0xff] %v761_v10  ;;  %v698_v17 = vmax.f32 %v638_v5, 0.0  ;;  %v640_v18 = vadd.f32 %v8604_v63, %v573_v6  ;;  %v641_v19 = vadd.f32 %v8604_v63, %v574_v7  ;;  %822 = vst [vmem:[#allocation2 + $0xc0] sm:$0xff] %v762_v15  ;;  %v642_v21 = vadd.f32 %v8604_v63, %v575_v13  ;;  %v522_v5 = vld [vmem:[#allocation2 + $0x160] sm:$0xff]  ;;  %v523_v10 = vld [vmem:[#allocation2 + $0x168] sm:$0xff] }
  0x77   : > { %823 = vst [vmem:[#allocation2 + $0xc8] sm:$0xff] %v697_v11  ;;  %v699_v20 = vmax.f32 %v639_v12, 0.0  ;;  %v576_v22 = vmul.f32 %v8599_v62, %v509_v8  ;;  %v577_v23 = vmul.f32 %v8599_v62, %v510_v9  ;;  %v578_v29 = vmul.f32 %v8599_v62, %v511_v14 }
  0x78   : > { %v764_v26 = vsel %vm474_vm1, %v698_v17, 0.0  ;;  %v700_v27 = vmax.f32 %v640_v18, 0.0  ;;  %v701_v28 = vmax.f32 %v641_v19, 0.0  ;;  %v702_v32 = vmax.f32 %v642_v21, 0.0  ;;  %v525_v21 = vld [vmem:[#allocation2 + $0x178] sm:$0xff] }
  0x79   : > { %824 = vst [vmem:[#allocation2 + $0xd0] sm:$0xff] %v764_v26  ;;  %v765_v31 = vsel %vm469_vm0, %v699_v20, 0.0  ;;  %v643_v33 = vadd.f32 %v8604_v63, %v576_v22  ;;  %v644_v34 = vadd.f32 %v8604_v63, %v577_v23  ;;  %v645_v37 = vadd.f32 %v8604_v63, %v578_v29  ;;  %v524_v20 = vld [vmem:[#allocation2 + $0x170] sm:$0xff]  ;;  %v526_v22 = vld [vmem:[#allocation2 + $0x180] sm:$0xff] }
  0x7a   : > { %825 = vst [vmem:[#allocation2 + $0xd8] sm:$0xff] %v765_v31  ;;  %826 = vst [vmem:[#allocation2 + $0xe0] sm:$0xff] %v700_v27  ;;  %v767_v36 = vsel %vm474_vm1, %v701_v28, 0.0  ;;  %v579_v38 = vmul.f32 %v8599_v62, %v512_v24  ;;  %v580_v39 = vmul.f32 %v8599_v62, %v513_v25  ;;  %v768_v42 = vsel %vm469_vm0, %v702_v32, 0.0 }
  0x7b   : > { %827 = vst [vmem:[#allocation2 + $0xe8] sm:$0xff] %v767_v36  ;;  %v703_v43 = vmax.f32 %v643_v33, 0.0  ;;  %v704_v44 = vmax.f32 %v644_v34, 0.0  ;;  %v581_v45 = vmul.f32 %v8599_v62, %v514_v30  ;;  %828 = vst [vmem:[#allocation2 + $0xf0] sm:$0xff] %v768_v42  ;;  %v705_v46 = vmax.f32 %v645_v37, 0.0  ;;  %v528_v36 = vld [vmem:[#allocation2 + $0x190] sm:$0xff] }
  0x7c   : > { %v646_v47 = vadd.f32 %v8604_v63, %v579_v38  ;;  %v647_v48 = vadd.f32 %v8604_v63, %v580_v39  ;;  %v582_v49 = vmul.f32 %v8599_v62, %v515_v35  ;;  %v583_v53 = vmul.f32 %v8599_v62, %v516_v40  ;;  %v527_v35 = vld [vmem:[#allocation2 + $0x188] sm:$0xff]  ;;  %v529_v37 = vld [vmem:[#allocation2 + $0x198] sm:$0xff] }
  0x7d   : > { %829 = vst [vmem:[#allocation2 + $0xf8] sm:$0xff] %v703_v43  ;;  %v770_v51 = vsel %vm474_vm1, %v704_v44, 0.0  ;;  %v648_v52 = vadd.f32 %v8604_v63, %v581_v45  ;;  %v584_v54 = vmul.f32 %v8599_v62, %v517_v41  ;;  %v771_v57 = vsel %vm469_vm0, %v705_v46, 0.0  ;;  %v530_v46 = vld [vmem:[#allocation2 + $0x1a0] sm:$0xff] }
  0x7e   : > { %830 = vst [vmem:[#allocation2 + $0x100] sm:$0xff] %v770_v51  ;;  %v706_v58 = vmax.f32 %v646_v47, 0.0  ;;  %v707_v59 = vmax.f32 %v647_v48, 0.0  ;;  %v649_v60 = vadd.f32 %v8604_v63, %v582_v49  ;;  %831 = vst [vmem:[#allocation2 + $0x108] sm:$0xff] %v771_v57  ;;  %v650_v0 = vadd.f32 %v8604_v63, %v583_v53  ;;  %v531_v51 = vld [vmem:[#allocation2 + $0x1a8] sm:$0xff] }
  0x7f   : > { %v708_v61 = vmax.f32 %v648_v52, 0.0  ;;  %v651_v1 = vadd.f32 %v8604_v63, %v584_v54  ;;  %v585_v2 = vmul.f32 %v8599_v62, %v518_v50  ;;  %v586_v8 = vmul.f32 %v8599_v62, %v519_v55  ;;  %v532_v52 = vld [vmem:[#allocation2 + $0x1b0] sm:$0xff] }
  0x80   : > { %832 = vst [vmem:[#allocation2 + $0x110] sm:$0xff] %v706_v58  ;;  %v773_v6 = vsel %vm474_vm1, %v707_v59, 0.0  ;;  %v709_v7 = vmax.f32 %v649_v60, 0.0  ;;  %v587_v9 = vmul.f32 %v8599_v62, %v520_v56  ;;  %v710_v12 = vmax.f32 %v650_v0, 0.0  ;;  %v534_v0 = vld [vmem:[#allocation2 + $0x1c0] sm:$0xff] }
  0x81   : > { %833 = vst [vmem:[#allocation2 + $0x118] sm:$0xff] %v773_v6  ;;  %v774_v11 = vsel %vm469_vm0, %v708_v61, 0.0  ;;  %v711_v13 = vmax.f32 %v651_v1, 0.0  ;;  %v652_v14 = vadd.f32 %v8604_v63, %v585_v2  ;;  %v653_v15 = vadd.f32 %v8604_v63, %v586_v8  ;;  %v533_v61 = vld [vmem:[#allocation2 + $0x1b8] sm:$0xff]  ;;  %v535_v6 = vld [vmem:[#allocation2 + $0x1c8] sm:$0xff] }
  0x82   : > { %834 = vst [vmem:[#allocation2 + $0x120] sm:$0xff] %v774_v11  ;;  %835 = vst [vmem:[#allocation2 + $0x128] sm:$0xff] %v709_v7  ;;  %v654_v17 = vadd.f32 %v8604_v63, %v587_v9  ;;  %v588_v18 = vmul.f32 %v8599_v62, %v521_v3  ;;  %v589_v19 = vmul.f32 %v8599_v62, %v522_v5  ;;  %v776_v23 = vsel %vm474_vm1, %v710_v12, 0.0 }
  0x83   : > { %v777_v24 = vsel %vm469_vm0, %v711_v13, 0.0  ;;  %v712_v25 = vmax.f32 %v652_v14, 0.0  ;;  %v590_v26 = vmul.f32 %v8599_v62, %v523_v10  ;;  %836 = vst [vmem:[#allocation2 + $0x130] sm:$0xff] %v776_v23  ;;  %v713_v27 = vmax.f32 %v653_v15, 0.0  ;;  %v536_v15 = vld [vmem:[#allocation2 + $0x1d0] sm:$0xff] }
  0x84   : > { %837 = vst [vmem:[#allocation2 + $0x138] sm:$0xff] %v777_v24  ;;  %v714_v28 = vmax.f32 %v654_v17, 0.0  ;;  %v655_v29 = vadd.f32 %v8604_v63, %v588_v18  ;;  %v656_v30 = vadd.f32 %v8604_v63, %v589_v19  ;;  %v591_v32 = vmul.f32 %v8599_v62, %v524_v20  ;;  %v537_v17 = vld [vmem:[#allocation2 + $0x1d8] sm:$0xff] }
  0x85   : > { %838 = vst [vmem:[#allocation2 + $0x140] sm:$0xff] %v712_v25  ;;  %v657_v31 = vadd.f32 %v8604_v63, %v590_v26  ;;  %v592_v33 = vmul.f32 %v8599_v62, %v525_v21  ;;  %v593_v34 = vmul.f32 %v8599_v62, %v526_v22  ;;  %v779_v38 = vsel %vm474_vm1, %v713_v27, 0.0 }
  0x86   : > { %v780_v39 = vsel %vm469_vm0, %v714_v28, 0.0  ;;  %v715_v40 = vmax.f32 %v655_v29, 0.0  ;;  %v716_v41 = vmax.f32 %v656_v30, 0.0  ;;  %839 = vst [vmem:[#allocation2 + $0x148] sm:$0xff] %v779_v38  ;;  %v658_v43 = vadd.f32 %v8604_v63, %v591_v32 }
  0x87   : > { %840 = vst [vmem:[#allocation2 + $0x150] sm:$0xff] %v780_v39  ;;  %v717_v42 = vmax.f32 %v657_v31, 0.0  ;;  %v659_v44 = vadd.f32 %v8604_v63, %v592_v33  ;;  %v660_v45 = vadd.f32 %v8604_v63, %v593_v34  ;;  %v594_v48 = vmul.f32 %v8599_v62, %v527_v35 }
  0x88   : > { %841 = vst [vmem:[#allocation2 + $0x158] sm:$0xff] %v715_v40  ;;  %v782_v47 = vsel %vm474_vm1, %v716_v41, 0.0  ;;  %v595_v49 = vmul.f32 %v8599_v62, %v528_v36  ;;  %v596_v50 = vmul.f32 %v8599_v62, %v529_v37  ;;  %v718_v54 = vmax.f32 %v658_v43, 0.0 }
  0x89   : > { %842 = vst [vmem:[#allocation2 + $0x160] sm:$0xff] %v782_v47  ;;  %v783_v53 = vsel %vm469_vm0, %v717_v42, 0.0  ;;  %v719_v55 = vmax.f32 %v659_v44, 0.0  ;;  %v720_v56 = vmax.f32 %v660_v45, 0.0  ;;  %v661_v57 = vadd.f32 %v8604_v63, %v594_v48 }
  0x8a   : > { %843 = vst [vmem:[#allocation2 + $0x168] sm:$0xff] %v783_v53  ;;  %v662_v58 = vadd.f32 %v8604_v63, %v595_v49  ;;  %v663_v59 = vadd.f32 %v8604_v63, %v596_v50  ;;  %v597_v60 = vmul.f32 %v8599_v62, %v530_v46  ;;  %844 = vst [vmem:[#allocation2 + $0x170] sm:$0xff] %v718_v54 }
  0x8b   : > { %v785_v1 = vsel %vm474_vm1, %v719_v55, 0.0  ;;  %v786_v2 = vsel %vm469_vm0, %v720_v56, 0.0  ;;  %v598_v3 = vmul.f32 %v8599_v62, %v531_v51  ;;  %v599_v5 = vmul.f32 %v8599_v62, %v532_v52 }
  0x8c   : > { %845 = vst [vmem:[#allocation2 + $0x178] sm:$0xff] %v785_v1  ;;  %846 = vst [vmem:[#allocation2 + $0x180] sm:$0xff] %v786_v2  ;;  %v721_v7 = vmax.f32 %v661_v57, 0.0  ;;  %v722_v8 = vmax.f32 %v662_v58, 0.0  ;;  %v723_v9 = vmax.f32 %v663_v59, 0.0  ;;  %v664_v10 = vadd.f32 %v8604_v63, %v597_v60 }
  0x8d   : > { %v665_v11 = vadd.f32 %v8604_v63, %v598_v3  ;;  %v666_v12 = vadd.f32 %v8604_v63, %v599_v5  ;;  %v600_v13 = vmul.f32 %v8599_v62, %v533_v61  ;;  %v601_v14 = vmul.f32 %v8599_v62, %v534_v0 }
  0x8e   : > { %847 = vst [vmem:[#allocation2 + $0x188] sm:$0xff] %v721_v7  ;;  %v788_v18 = vsel %vm474_vm1, %v722_v8, 0.0  ;;  %v789_v19 = vsel %vm469_vm0, %v723_v9, 0.0  ;;  %v724_v20 = vmax.f32 %v664_v10, 0.0  ;;  %v602_v21 = vmul.f32 %v8599_v62, %v535_v6 }
  0x8f   : > { %848 = vst [vmem:[#allocation2 + $0x190] sm:$0xff] %v788_v18  ;;  %849 = vst [vmem:[#allocation2 + $0x198] sm:$0xff] %v789_v19  ;;  %v725_v22 = vmax.f32 %v665_v11, 0.0  ;;  %v726_v23 = vmax.f32 %v666_v12, 0.0  ;;  %v667_v24 = vadd.f32 %v8604_v63, %v600_v13  ;;  %v668_v25 = vadd.f32 %v8604_v63, %v601_v14 }
  0x90   : > { %850 = vst [vmem:[#allocation2 + $0x1a0] sm:$0xff] %v724_v20  ;;  %v669_v26 = vadd.f32 %v8604_v63, %v602_v21  ;;  %v603_v27 = vmul.f32 %v8599_v62, %v536_v15  ;;  %v604_v28 = vmul.f32 %v8599_v62, %v537_v17 }
  0x91   : > { %v791_v29 = vsel %vm474_vm1, %v725_v22, 0.0  ;;  %v792_v30 = vsel %vm469_vm0, %v726_v23, 0.0  ;;  %v727_v31 = vmax.f32 %v667_v24, 0.0  ;;  %v728_v32 = vmax.f32 %v668_v25, 0.0  ;;  %861 = sbr.rel (%p6066_p10) target bundleno = 153 (0x99), region = 149 }
  0x92   : > { %851 = vst [vmem:[#allocation2 + $0x1a8] sm:$0xff] %v791_v29  ;;  %852 = vst [vmem:[#allocation2 + $0x1b0] sm:$0xff] %v792_v30  ;;  %v729_v33 = vmax.f32 %v669_v26, 0.0  ;;  %v670_v34 = vadd.f32 %v8604_v63, %v603_v27  ;;  %v671_v35 = vadd.f32 %v8604_v63, %v604_v28  ;;  %v8459_v63 = vmov (!%p6066_p10), 0.0  }
  0x93   : > { %853 = vst [vmem:[#allocation2 + $0x1b8] sm:$0xff] %v727_v31  ;;  %v794_v36 = vsel %vm474_vm1, %v728_v32, 0.0  ;;  %862 = vst [vmem:[#allocation2] sm:$0xff] (!%p6066_p10), %v8459_v63 }
  0x94   : > { %854 = vst [vmem:[#allocation2 + $0x1c0] sm:$0xff] %v794_v36  ;;  %v795_v62 = vsel %vm469_vm0, %v729_v33, 0.0  ;;  %v730_v37 = vmax.f32 %v670_v34, 0.0  ;;  %v731_v38 = vmax.f32 %v671_v35, 0.0  ;;  %863 = vst [vmem:[#allocation2 + $0x8] sm:$0xff] (!%p6066_p10), %v8459_v63 }
  0x95   : > { %855 = vst [vmem:[#allocation2 + $0x1c8] sm:$0xff] %v795_v62  ;;  %864 = vst [vmem:[#allocation2 + $0x10] sm:$0xff] (!%p6066_p10), %v8459_v63 }
  0x96   : > { %856 = vst [vmem:[#allocation2 + $0x1d0] sm:$0xff] %v730_v37  ;;  %v797_v39 = vsel %vm474_vm1, %v731_v38, 0.0  ;;  %865 = vst [vmem:[#allocation2 + $0xf0] sm:$0xff] (!%p6066_p10), %v8459_v63 }
  0x97   : > { %857 = vst [vmem:[#allocation2 + $0x1d8] sm:$0xff] %v797_v39  ;;  %866 = vst [vmem:[#allocation2 + $0xf8] sm:$0xff] (!%p6066_p10), %v8459_v63 }
  0x98   : > { %867 = vst [vmem:[#allocation2 + $0x100] sm:$0xff] %v8459_v63 }
  0x99 PF: > { %p6067_p11 = scmp.ne.s32.totalorder %s8502_s21, 1 }
  0x9a   : > { %v8460_v40 = vmov (!%p6067_p11), 0.0  }
  0x9b   : > { %871 = sbr.rel (%p6067_p11) target bundleno = 162 (0xa2), region = 153  ;;  %873 = vst [vmem:[#allocation2 + $0xd8] sm:$0xff] (!%p6067_p11), %v8460_v40  ;;  %874 = vst [vmem:[#allocation2 + $0xe0] sm:$0xff] (!%p6067_p11), %v8460_v40 }
  0x9c   : > { %875 = vst [vmem:[#allocation2 + $0xe8] sm:$0xff] (!%p6067_p11), %v8460_v40  ;;  %876 = vst [vmem:[#allocation2 + $0x1c8] sm:$0xff] (!%p6067_p11), %v8460_v40 }
  0x9d   : > { %877 = vst [vmem:[#allocation2 + $0x1d0] sm:$0xff] (!%p6067_p11), %v8460_v40  ;;  %878 = vst [vmem:[#allocation2 + $0x1d8] sm:$0xff] (!%p6067_p11), %v8460_v40 }
  0xa2 PF: > { %v927_v41 = vld [vmem:[%s10938_s1] sm:$0xff]  ;;  %v928_v42 = vld [vmem:[%s10938_s1 + $0x8] sm:$0xff]  ;;  %v929_v43 = vld [vmem:[%s10938_s1 + $0x10] sm:$0xff]  ;;  %vm1296_vm2 = vcmask 1040384   ;;  %vm2181_vm3 = vcmask 1046528   ;;  %s10829_s30 = scalar_lea.vmem (%p8513_p4), %s10941_s4, %s6050_s11 }
  0xa3   : > { %v7713_v44 = vpack.c.bf16 %v928_v42, %v927_v41  ;;  %v930_v45 = vld [vmem:[%s10938_s1 + $0x18] sm:$0xff]  ;;  %v931_v47 = vld [vmem:[%s10938_s1 + $0x20] sm:$0xff]  ;;  %v932_v48 = vld [vmem:[%s10938_s1 + $0x28] sm:$0xff] }
  0xa4   : > { %v7717_v46 = vpack.c.bf16 %v930_v45, %v929_v43  ;;  %v7721_v49 = vpack.c.bf16 %v932_v48, %v931_v47  ;;  %v8833_v50 = vld [vmem:[#allocation2] sm:$0xff]  ;;  %v8835_v51 = vld [vmem:[#allocation2 + $0xf0] sm:$0xff]  ;;  %v934_v53 = vld [vmem:[%s10938_s1 + $0x38] sm:$0xff] }
  0xa5   : > { %7714 = vmatprep.subr.bf16.mxu0 %v7713_v44  ;;  %8001 = vmatprep.subr.bf16.mxu1 %v7713_v44  ;;  %v933_v52 = vld [vmem:[%s10938_s1 + $0x30] sm:$0xff]  ;;  %v935_v55 = vld [vmem:[%s10938_s1 + $0x40] sm:$0xff]  ;;  %v936_v56 = vld [vmem:[%s10938_s1 + $0x48] sm:$0xff] }
  0xa6   : > { %7716 = vmatpush3.bf16.msra.mxu0 %v7713_v44  ;;  %8009 = vmatpush3.bf16.msra.mxu1 %v7713_v44  ;;  %v7725_v54 = vpack.c.bf16 %v934_v53, %v933_v52  ;;  %v7729_v57 = vpack.c.bf16 %v936_v56, %v935_v55  ;;  %v937_v58 = vld [vmem:[%s10938_s1 + $0x50] sm:$0xff]  ;;  %v938_v59 = vld [vmem:[%s10938_s1 + $0x58] sm:$0xff]  ;;  %v939_v61 = vld [vmem:[%s10938_s1 + $0x60] sm:$0xff] }
  0xa7   : > { %7718 = vmatprep.subr.bf16.mxu0 %v7717_v46  ;;  %8002 = vmatprep.subr.bf16.mxu1 %v7717_v46  ;;  %v7733_v60 = vpack.c.bf16 %v938_v59, %v937_v58  ;;  %v940_v0 = vld [vmem:[%s10938_s1 + $0x68] sm:$0xff]  ;;  %v941_v2 = vld [vmem:[%s10938_s1 + $0x70] sm:$0xff]  ;;  %v942_v3 = vld [vmem:[%s10938_s1 + $0x78] sm:$0xff] }
  0xa8   : > { %6809 = vmatprep.mubr.f32.mxu0 %v8833_v50  ;;  %6845 = vmatprep.mubr.f32.mxu1 %v8835_v51  ;;  %v7737_v1 = vpack.c.bf16 %v940_v0, %v939_v61  ;;  %v7741_v5 = vpack.c.bf16 %v942_v3, %v941_v2  ;;  %v6084_v6 = vld [vmem:[%s10938_s1 + $0x100] sm:$0xff]  ;;  %v6085_v7 = vld [vmem:[%s10938_s1 + $0x108] sm:$0xff]  ;;  %v6086_v12 = vld [vmem:[%s10938_s1 + $0x110] sm:$0xff] }
  0xa9   : > { %v6068_v8 = vld [vmem:[%s10938_s1 + $0x80] sm:$0xff]  ;;  %v6069_v9 = vld [vmem:[%s10938_s1 + $0x88] sm:$0xff]  ;;  %v7777_v10 = vpack.c.bf16 %v6085_v7, %v6084_v6  ;;  %v6087_v13 = vld [vmem:[%s10938_s1 + $0x118] sm:$0xff] }
  0xaa   : > { %7720 = vmatpush3.bf16.msra.mxu0 %v7717_v46  ;;  %8010 = vmatpush3.bf16.msra.mxu1 %v7717_v46  ;;  %v7745_v11 = vpack.c.bf16 %v6069_v9, %v6068_v8  ;;  %v6070_v14 = vld [vmem:[%s10938_s1 + $0x90] sm:$0xff]  ;;  %v6071_v15 = vld [vmem:[%s10938_s1 + $0x98] sm:$0xff]  ;;  %v8893_v17 = vld [vmem:[#allocation2 + $0x8] sm:$0xff]  ;;  %v7781_v21 = vpack.c.bf16 %v6087_v13, %v6086_v12 }
  0xab   : > { %7722 = vmatprep.subr.bf16.mxu0 %v7721_v49  ;;  %8003 = vmatprep.subr.bf16.mxu1 %v7721_v49  ;;  %v8895_v18 = vld [vmem:[#allocation2 + $0xf8] sm:$0xff]  ;;  %v8897_v19 = vld [vmem:[#allocation2 + $0x10] sm:$0xff]  ;;  %v8899_v20 = vld [vmem:[#allocation2 + $0x100] sm:$0xff]  ;;  %v7749_v22 = vpack.c.bf16 %v6071_v15, %v6070_v14 }
  0xac   : > { %v6088_v23 = vld [vmem:[%s10938_s1 + $0x120] sm:$0xff]  ;;  %v6089_v24 = vld [vmem:[%s10938_s1 + $0x128] sm:$0xff]  ;;  %v8916_v27 = vld [vmem:[#allocation2 + $0x18] sm:$0xff] }
  0xad   : > { %v6072_v25 = vld [vmem:[%s10938_s1 + $0xa0] sm:$0xff]  ;;  %v6073_v26 = vld [vmem:[%s10938_s1 + $0xa8] sm:$0xff]  ;;  %v8923_v30 = vld [vmem:[#allocation2 + $0x110] sm:$0xff]  ;;  %v7785_v31 = vpack.c.bf16 %v6089_v24, %v6088_v23 }
  0xae   : > { %7724 = vmatpush3.bf16.msra.mxu0 %v7721_v49  ;;  %8011 = vmatpush3.bf16.msra.mxu1 %v7721_v49  ;;  %v8918_v28 = vld [vmem:[#allocation2 + $0x108] sm:$0xff]  ;;  %v8921_v29 = vld [vmem:[#allocation2 + $0x20] sm:$0xff]  ;;  %v7753_v32 = vpack.c.bf16 %v6073_v26, %v6072_v25  ;;  %v6090_v33 = vld [vmem:[%s10938_s1 + $0x130] sm:$0xff] }
  0xaf   : > { %7726 = vmatprep.subr.bf16.mxu0 %v7725_v54  ;;  %8004 = vmatprep.subr.bf16.mxu1 %v7725_v54  ;;  %v6091_v34 = vld [vmem:[%s10938_s1 + $0x138] sm:$0xff]  ;;  %v6074_v35 = vld [vmem:[%s10938_s1 + $0xb0] sm:$0xff]  ;;  %v8941_v62 = vld [vmem:[#allocation2 + $0x28] sm:$0xff] }
  0xb0   : > { %v6075_v36 = vld [vmem:[%s10938_s1 + $0xb8] sm:$0xff]  ;;  %v8945_v38 = vld [vmem:[#allocation2 + $0x30] sm:$0xff]  ;;  %v8947_v39 = vld [vmem:[#allocation2 + $0x120] sm:$0xff]  ;;  %v7789_v63 = vpack.c.bf16 %v6091_v34, %v6090_v33 }
  0xb1   : > { %v8943_v37 = vld [vmem:[#allocation2 + $0x118] sm:$0xff]  ;;  %v7757_v40 = vpack.c.bf16 %v6075_v36, %v6074_v35  ;;  %v6092_v41 = vld [vmem:[%s10938_s1 + $0x140] sm:$0xff]  ;;  %v6093_v42 = vld [vmem:[%s10938_s1 + $0x148] sm:$0xff] }
  0xb2   : > { %7728 = vmatpush3.bf16.msra.mxu0 %v7725_v54  ;;  %8012 = vmatpush3.bf16.msra.mxu1 %v7725_v54  ;;  %v6076_v43 = vld [vmem:[%s10938_s1 + $0xc0] sm:$0xff]  ;;  %v6077_v44 = vld [vmem:[%s10938_s1 + $0xc8] sm:$0xff]  ;;  %v8965_v45 = vld [vmem:[#allocation2 + $0x38] sm:$0xff]  ;;  %v7793_v49 = vpack.c.bf16 %v6093_v42, %v6092_v41 }
  0xb3   : > { %7730 = vmatprep.subr.bf16.mxu0 %v7729_v57  ;;  %8005 = vmatprep.subr.bf16.mxu1 %v7729_v57  ;;  %v8967_v46 = vld [vmem:[#allocation2 + $0x128] sm:$0xff]  ;;  %v8969_v47 = vld [vmem:[#allocation2 + $0x40] sm:$0xff]  ;;  %v8971_v48 = vld [vmem:[#allocation2 + $0x130] sm:$0xff]  ;;  %v7761_v52 = vpack.c.bf16 %v6077_v44, %v6076_v43 }
  0xb4   : > { %v6094_v53 = vld [vmem:[%s10938_s1 + $0x150] sm:$0xff]  ;;  %v6095_v54 = vld [vmem:[%s10938_s1 + $0x158] sm:$0xff]  ;;  %v6097_v2 = vld [vmem:[%s10938_s1 + $0x168] sm:$0xff] }
  0xb5   : > { %v6078_v55 = vld [vmem:[%s10938_s1 + $0xd0] sm:$0xff]  ;;  %v6079_v56 = vld [vmem:[%s10938_s1 + $0xd8] sm:$0xff]  ;;  %v7797_v61 = vpack.c.bf16 %v6095_v54, %v6094_v53  ;;  %v6080_v3 = vld [vmem:[%s10938_s1 + $0xe0] sm:$0xff] }
  0xb6   : > { %7732 = vmatpush3.bf16.msra.mxu0 %v7729_v57  ;;  %8013 = vmatpush3.bf16.msra.mxu1 %v7729_v57  ;;  %v8989_v57 = vld [vmem:[#allocation2 + $0x48] sm:$0xff]  ;;  %v8991_v58 = vld [vmem:[#allocation2 + $0x138] sm:$0xff]  ;;  %v8993_v59 = vld [vmem:[#allocation2 + $0x50] sm:$0xff]  ;;  %v7765_v0 = vpack.c.bf16 %v6079_v56, %v6078_v55 }
  0xb7   : > { %7734 = vmatprep.subr.bf16.mxu0 %v7733_v60  ;;  %8006 = vmatprep.subr.bf16.mxu1 %v7733_v60  ;;  %v9013_v6 = vld [vmem:[#allocation2 + $0x58] sm:$0xff]  ;;  %v9015_v7 = vld [vmem:[#allocation2 + $0x148] sm:$0xff]  ;;  %v9017_v8 = vld [vmem:[#allocation2 + $0x60] sm:$0xff] }
  0xb8   : > { %v9019_v9 = vld [vmem:[#allocation2 + $0x150] sm:$0xff]  ;;  %v6099_v13 = vld [vmem:[%s10938_s1 + $0x178] sm:$0xff]  ;;  %v9043_v24 = vld [vmem:[#allocation2 + $0x160] sm:$0xff] }
  0xb9   : > { %v6098_v12 = vld [vmem:[%s10938_s1 + $0x170] sm:$0xff]  ;;  %v6083_v15 = vld [vmem:[%s10938_s1 + $0xf8] sm:$0xff]  ;;  %v6100_v33 = vld [vmem:[%s10938_s1 + $0x180] sm:$0xff] }
  0xba   : > { %7736 = vmatpush3.bf16.msra.mxu0 %v7733_v60  ;;  %8014 = vmatpush3.bf16.msra.mxu1 %v7733_v60  ;;  %v8995_v60 = vld [vmem:[#allocation2 + $0x140] sm:$0xff]  ;;  %v6082_v14 = vld [vmem:[%s10938_s1 + $0xf0] sm:$0xff]  ;;  %v7805_v25 = vpack.c.bf16 %v6099_v13, %v6098_v12  ;;  %v6101_v34 = vld [vmem:[%s10938_s1 + $0x188] sm:$0xff] }
  0xbb   : > { %7738 = vmatprep.subr.bf16.mxu0 %v7737_v1  ;;  %8007 = vmatprep.subr.bf16.mxu1 %v7737_v1  ;;  %v9041_v23 = vld [vmem:[#allocation2 + $0x70] sm:$0xff]  ;;  %v7773_v26 = vpack.c.bf16 %v6083_v15, %v6082_v14  ;;  %v9061_v35 = vld [vmem:[#allocation2 + $0x78] sm:$0xff]  ;;  %v9063_v36 = vld [vmem:[#allocation2 + $0x168] sm:$0xff]  ;;  %v7809_v42 = vpack.c.bf16 %v6101_v34, %v6100_v33 }
  0xbc   : > { %v9073_v43 = vld [vmem:[#allocation2 + $0x88] sm:$0xff]  ;;  %v9075_v44 = vld [vmem:[#allocation2 + $0x178] sm:$0xff]  ;;  %v9089_v55 = vld [vmem:[#allocation2 + $0xa0] sm:$0xff] }
  0xbd   : > { %v9085_v53 = vld [vmem:[#allocation2 + $0x98] sm:$0xff]  ;;  %v9087_v54 = vld [vmem:[#allocation2 + $0x188] sm:$0xff]  ;;  %v9091_v56 = vld [vmem:[#allocation2 + $0x190] sm:$0xff] }
  0xbe   : > { %7740 = vmatpush3.bf16.msra.mxu0 %v7737_v1  ;;  %8015 = vmatpush3.bf16.msra.mxu1 %v7737_v1  ;;  %v6096_v1 = vld [vmem:[%s10938_s1 + $0x160] sm:$0xff]  ;;  %v6102_v12 = vld [vmem:[%s10938_s1 + $0x190] sm:$0xff]  ;;  %v6103_v13 = vld [vmem:[%s10938_s1 + $0x198] sm:$0xff] }
  0xbf   : > { %7742 = vmatprep.subr.bf16.mxu0 %v7741_v5  ;;  %8008 = vmatprep.subr.bf16.mxu1 %v7741_v5  ;;  %v7813_v15 = vpack.c.bf16 %v6103_v13, %v6102_v12  ;;  %v6138_v33 = vld [vmem:[%s10938_s1 + $0x2b0] sm:$0xff]  ;;  %v6139_v34 = vld [vmem:[%s10938_s1 + $0x2b8] sm:$0xff]  ;;  %v6141_v12 = vld [vmem:[%s10938_s1 + $0x2c8] sm:$0xff] }
  0xc0   : > { %v6108_v13 = vld [vmem:[%s10938_s1 + $0x1c0] sm:$0xff] }
  0xc1   : > { %v9668_v16 = vld [vmem:[#allocation2 + $0x60] sm:$0xff] }
  0xc2   : > { %7744 = vmatpush3.bf16.msra.mxu0 %v7741_v5  ;;  %8016 = vmatpush3.bf16.msra.mxu1 %v7741_v5  ;;  %v6081_v5 = vld [vmem:[%s10938_s1 + $0xe8] sm:$0xff]  ;;  %11021 = vst [vmem:[#allocation24_spill] sm:$0xff] %v9668_v16 }
  0xc3   : > { %7778 = vmatprep.subr.bf16.mxu0 %v7777_v10  ;;  %7746 = vmatprep.subr.bf16.mxu1 %v7745_v11 }
  0xc5   : > { %6810 = vmatmul.mubr.f32.vlgmr.msra.gmra.mrb[0].mxu0 %v8893_v17  ;;  %6846 = vmatmul.mubr.f32.vlgmr.msra.gmra.mrb[0].mxu1 %v8895_v18 }
  0xc6   : > { %7780 = vmatpush3.bf16.msra.mxu0 %v7777_v10  ;;  %6812 = vmatprep.mubr.f32.mxu0 %v8897_v19  ;;  %v7801_v10 = vpack.c.bf16 %v6097_v2, %v6096_v1  ;;  %v9101_v1 = vld [vmem:[#allocation2 + $0xb0] sm:$0xff]  ;;  %v9103_v2 = vld [vmem:[#allocation2 + $0x1a0] sm:$0xff] }
  0xc7   : > { %6848 = vmatprep.mubr.f32.mxu1 %v8899_v20  ;;  %7748 = vmatpush3.bf16.msra.mxu1 %v7745_v11  ;;  %v7769_v11 = vpack.c.bf16 %v6081_v5, %v6080_v3  ;;  %v9109_v3 = vld [vmem:[#allocation2 + $0xb8] sm:$0xff]  ;;  %v9111_v5 = vld [vmem:[#allocation2 + $0x1a8] sm:$0xff] }
  0xc8   : > { %7782 = vmatprep.subr.bf16.mxu0 %v7781_v21  ;;  %7750 = vmatprep.subr.bf16.mxu1 %v7749_v22 }
  0xc9   : > { %6813 = vmatmul.mubr.f32.gmra.mrb[2].mxu0 %v8916_v27  ;;  %6849 = vmatmul.mubr.f32.gmra.mrb[2].mxu1 %v8918_v28 }
  0xca   : > { %6815 = vmatprep.mubr.f32.mxu0 %v8921_v29  ;;  %6851 = vmatprep.mubr.f32.mxu1 %v8923_v30 }
  0xcb   : > { %7784 = vmatpush3.bf16.msra.mxu0 %v7781_v21  ;;  %7752 = vmatpush3.bf16.msra.mxu1 %v7749_v22  ;;  %v9037_v21 = vld [vmem:[#allocation2 + $0x68] sm:$0xff]  ;;  %v9039_v22 = vld [vmem:[#allocation2 + $0x158] sm:$0xff] }
  0xcc   : > { %7786 = vmatprep.subr.bf16.mxu0 %v7785_v31  ;;  %7754 = vmatprep.subr.bf16.mxu1 %v7753_v32 }
  0xcd   : > { %6816 = vmatmul.mubr.f32.gmra.mrb[4].mxu0 %v8941_v62  ;;  %6852 = vmatmul.mubr.f32.gmra.mrb[4].mxu1 %v8943_v37 }
  0xce   : > { %6818 = vmatprep.mubr.f32.mxu0 %v8945_v38  ;;  %6854 = vmatprep.mubr.f32.mxu1 %v8947_v39 }
  0xcf   : > { %7788 = vmatpush3.bf16.msra.mxu0 %v7785_v31  ;;  %7756 = vmatpush3.bf16.msra.mxu1 %v7753_v32  ;;  %v6132_v31 = vld [vmem:[%s10938_s1 + $0x280] sm:$0xff]  ;;  %v6133_v32 = vld [vmem:[%s10938_s1 + $0x288] sm:$0xff] }
  0xd0   : > { %7790 = vmatprep.subr.bf16.mxu0 %v7789_v63  ;;  %7758 = vmatprep.subr.bf16.mxu1 %v7757_v40  ;;  %v7873_v41 = vpack.c.bf16 %v6133_v32, %v6132_v31  ;;  %v6104_v31 = vld [vmem:[%s10938_s1 + $0x1a0] sm:$0xff] }
  0xd1   : > { %6819 = vmatmul.mubr.f32.gmra.mrb[6].mxu0 %v8965_v45  ;;  %6855 = vmatmul.mubr.f32.gmra.mrb[6].mxu1 %v8967_v46 }
  0xd2   : > { %6821 = vmatprep.mubr.f32.mxu0 %v8969_v47  ;;  %6857 = vmatprep.mubr.f32.mxu1 %v8971_v48 }
  0xd3   : > { %7792 = vmatpush3.bf16.msra.mxu0 %v7789_v63  ;;  %7760 = vmatpush3.bf16.msra.mxu1 %v7757_v40  ;;  %v9065_v63 = vld [vmem:[#allocation2 + $0x80] sm:$0xff]  ;;  %v9067_v40 = vld [vmem:[#allocation2 + $0x170] sm:$0xff] }
  0xd4   : > { %7794 = vmatprep.subr.bf16.mxu0 %v7793_v49  ;;  %7762 = vmatprep.subr.bf16.mxu1 %v7761_v52 }
  0xd5   : > { %6822 = vmatmul.mubr.f32.gmra.mrb[8].mxu0 %v8989_v57  ;;  %6858 = vmatmul.mubr.f32.gmra.mrb[8].mxu1 %v8991_v58 }
  0xd6   : > { %6824 = vmatprep.mubr.f32.mxu0 %v8993_v59  ;;  %6860 = vmatprep.mubr.f32.mxu1 %v8995_v60 }
  0xd7   : > { %7796 = vmatpush3.bf16.msra.mxu0 %v7793_v49  ;;  %7764 = vmatpush3.bf16.msra.mxu1 %v7761_v52  ;;  %v9077_v49 = vld [vmem:[#allocation2 + $0x90] sm:$0xff]  ;;  %v9079_v52 = vld [vmem:[#allocation2 + $0x180] sm:$0xff] }
  0xd8   : > { %7798 = vmatprep.subr.bf16.mxu0 %v7797_v61  ;;  %7766 = vmatprep.subr.bf16.mxu1 %v7765_v0 }
  0xd9   : > { %6825 = vmatmul.mubr.f32.gmra.mrb[10].mxu0 %v9013_v6  ;;  %6861 = vmatmul.mubr.f32.gmra.mrb[10].mxu1 %v9015_v7 }
  0xda   : > { %6827 = vmatprep.mubr.f32.mxu0 %v9017_v8  ;;  %6863 = vmatprep.mubr.f32.mxu1 %v9019_v9 }
  0xdb   : > { %7800 = vmatpush3.bf16.msra.mxu0 %v7797_v61  ;;  %7768 = vmatpush3.bf16.msra.mxu1 %v7765_v0  ;;  %v9097_v61 = vld [vmem:[#allocation2 + $0xa8] sm:$0xff]  ;;  %v9099_v0 = vld [vmem:[#allocation2 + $0x198] sm:$0xff] }
  0xdc   : > { %7802 = vmatprep.subr.bf16.mxu0 %v7801_v10  ;;  %7770 = vmatprep.subr.bf16.mxu1 %v7769_v11 }
  0xdd   : > { %6828 = vmatmul.mubr.f32.gmra.mrb[12].mxu0 %v9037_v21  ;;  %6864 = vmatmul.mubr.f32.gmra.mrb[12].mxu1 %v9039_v22 }
  0xde   : > { %6830 = vmatprep.mubr.f32.mxu0 %v9041_v23  ;;  %6866 = vmatprep.mubr.f32.mxu1 %v9043_v24 }
  0xdf   : > { %7804 = vmatpush3.bf16.msra.mxu0 %v7801_v10  ;;  %7772 = vmatpush3.bf16.msra.mxu1 %v7769_v11  ;;  %v6134_v10 = vld [vmem:[%s10938_s1 + $0x290] sm:$0xff]  ;;  %v6135_v11 = vld [vmem:[%s10938_s1 + $0x298] sm:$0xff] }
  0xe0   : > { %7806 = vmatprep.subr.bf16.mxu0 %v7805_v25  ;;  %7774 = vmatprep.subr.bf16.mxu1 %v7773_v26  ;;  %v7877_v14 = vpack.c.bf16 %v6135_v11, %v6134_v10  ;;  %v6140_v11 = vld [vmem:[%s10938_s1 + $0x2c0] sm:$0xff] }
  0xe1   : > { %6831 = vmatmul.mubr.f32.gmra.mrb[14].mxu0 %v9061_v35  ;;  %6867 = vmatmul.mubr.f32.gmra.mrb[14].mxu1 %v9063_v36 }
  0xe2   : > { %6833 = vmatprep.mubr.f32.mxu0 %v9065_v63  ;;  %6869 = vmatprep.mubr.f32.mxu1 %v9067_v40 }
  0xe3   : > { %7808 = vmatpush3.bf16.msra.mxu0 %v7805_v25  ;;  %7776 = vmatpush3.bf16.msra.mxu1 %v7773_v26  ;;  %v6136_v25 = vld [vmem:[%s10938_s1 + $0x2a0] sm:$0xff]  ;;  %v6137_v26 = vld [vmem:[%s10938_s1 + $0x2a8] sm:$0xff] }
  0xe4   : > { %7874 = vmatprep.subr.bf16.mxu0 %v7873_v41  ;;  %7810 = vmatprep.subr.bf16.mxu1 %v7809_v42 }
  0xe5   : > { %6834 = vmatmul.mubr.f32.gmra.mrb[16].mxu0 %v9073_v43  ;;  %6870 = vmatmul.mubr.f32.gmra.mrb[16].mxu1 %v9075_v44 }
  0xe6   : > { %6836 = vmatprep.mubr.f32.mxu0 %v9077_v49  ;;  %6872 = vmatprep.mubr.f32.mxu1 %v9079_v52 }
  0xe9   : > { %6837 = vmatmul.mubr.f32.gmra.mrb[18].mxu0 %v9085_v53  ;;  %6873 = vmatmul.mubr.f32.gmra.mrb[18].mxu1 %v9087_v54 }
  0xea   : > { %6839 = vmatprep.mubr.f32.mxu0 %v9089_v55  ;;  %6875 = vmatprep.mubr.f32.mxu1 %v9091_v56 }
  0xed   : > { %6840 = vmatmul.mubr.f32.gmra.mrb[20].mxu0 %v9097_v61  ;;  %6876 = vmatmul.mubr.f32.gmra.mrb[20].mxu1 %v9099_v0 }
  0xee   : > { %6842 = vmatprep.mubr.f32.mxu0 %v9101_v1  ;;  %6878 = vmatprep.mubr.f32.mxu1 %v9103_v2 }
  0xf1   : > { %6843 = vmatmul.mubr.f32.gmra.mrb[22].mxu0 %v9109_v3  ;;  %6879 = vmatmul.mubr.f32.gmra.mrb[22].mxu1 %v9111_v5 }
  0xf2   : > { %6913 = vmatprep.mubr.f32.mxu1 %v8833_v50  ;;  %7017 = vmatprep.mubr.f32.mxu0 %v8833_v50  ;;  %v6105_v50 = vld [vmem:[%s10938_s1 + $0x1a8] sm:$0xff] }
  0xf3   : > { %v7817_v32 = vpack.c.bf16 %v6105_v50, %v6104_v31  ;;  %v6143_v31 = vld [vmem:[%s10938_s1 + $0x2d8] sm:$0xff]  ;;  %v6110_v50 = vld [vmem:[%s10938_s1 + $0x1d0] sm:$0xff] }
  0xf5   : > { %6914 = vmatmul.mubr.f32.vlgmr.msra.gmra.mrb[24].mxu1 %v8893_v17  ;;  %7018 = vmatmul.mubr.f32.vlgmr.msra.gmra.mrb[24].mxu0 %v8893_v17  ;;  %v7881_v17 = vpack.c.bf16 %v6137_v26, %v6136_v25  ;;  %v6142_v26 = vld [vmem:[%s10938_s1 + $0x2d0] sm:$0xff] }
  0xf6   : > { %7876 = vmatpush3.bf16.msra.mxu0 %v7873_v41  ;;  %6916 = vmatprep.mubr.f32.mxu1 %v8897_v19  ;;  %v6107_v41 = vld [vmem:[%s10938_s1 + $0x1b8] sm:$0xff] }
  0xf7   : > { %7020 = vmatprep.mubr.f32.mxu0 %v8897_v19  ;;  %7812 = vmatpush3.bf16.msra.mxu1 %v7809_v42  ;;  %v6106_v19 = vld [vmem:[%s10938_s1 + $0x1b0] sm:$0xff]  ;;  %v7885_v42 = vpack.c.bf16 %v6139_v34, %v6138_v33  ;;  %v6144_v34 = vld [vmem:[%s10938_s1 + $0x2e0] sm:$0xff] }
  0xf8   : > { %7878 = vmatprep.subr.bf16.mxu0 %v7877_v14  ;;  %7814 = vmatprep.subr.bf16.mxu1 %v7813_v15  ;;  %v7821_v10 = vpack.c.bf16 %v6107_v41, %v6106_v19  ;;  %v6145_v19 = vld [vmem:[%s10938_s1 + $0x2e8] sm:$0xff]  ;;  %v6112_v41 = vld [vmem:[%s10938_s1 + $0x1e0] sm:$0xff] }
  0xf9   : > { %6917 = vmatmul.mubr.f32.gmra.mrb[26].mxu1 %v8916_v27  ;;  %7021 = vmatmul.mubr.f32.gmra.mrb[26].mxu0 %v8916_v27 }
  0xfa   : > { %6919 = vmatprep.mubr.f32.mxu1 %v8921_v29  ;;  %7023 = vmatprep.mubr.f32.mxu0 %v8921_v29 }
  0xfb   : > { %7880 = vmatpush3.bf16.msra.mxu0 %v7877_v14  ;;  %7816 = vmatpush3.bf16.msra.mxu1 %v7813_v15  ;;  %v6109_v14 = vld [vmem:[%s10938_s1 + $0x1c8] sm:$0xff]  ;;  %v7889_v15 = vpack.c.bf16 %v6141_v12, %v6140_v11  ;;  %v6146_v12 = vld [vmem:[%s10938_s1 + $0x2f0] sm:$0xff] }
  0xfc   : > { %7882 = vmatprep.subr.bf16.mxu0 %v7881_v17  ;;  %7818 = vmatprep.subr.bf16.mxu1 %v7817_v32  ;;  %v7825_v25 = vpack.c.bf16 %v6109_v14, %v6108_v13  ;;  %v6147_v13 = vld [vmem:[%s10938_s1 + $0x2f8] sm:$0xff]  ;;  %v6114_v14 = vld [vmem:[%s10938_s1 + $0x1f0] sm:$0xff] }
  0xfd   : > { %6920 = vmatmul.mubr.f32.gmra.mrb[28].mxu1 %v8941_v62  ;;  %7024 = vmatmul.mubr.f32.gmra.mrb[28].mxu0 %v8941_v62 }
  0xfe   : > { %6922 = vmatprep.mubr.f32.mxu1 %v8945_v38  ;;  %7026 = vmatprep.mubr.f32.mxu0 %v8945_v38 }
  0xff   : > { %7884 = vmatpush3.bf16.msra.mxu0 %v7881_v17  ;;  %7820 = vmatpush3.bf16.msra.mxu1 %v7817_v32  ;;  %v6111_v17 = vld [vmem:[%s10938_s1 + $0x1d8] sm:$0xff]  ;;  %v7893_v32 = vpack.c.bf16 %v6143_v31, %v6142_v26  ;;  %v6148_v31 = vld [vmem:[%s10938_s1 + $0x300] sm:$0xff] }
 0x100   : > { %7886 = vmatprep.subr.bf16.mxu0 %v7885_v42  ;;  %7822 = vmatprep.subr.bf16.mxu1 %v7821_v10  ;;  %v7829_v33 = vpack.c.bf16 %v6111_v17, %v6110_v50  ;;  %v6149_v50 = vld [vmem:[%s10938_s1 + $0x308] sm:$0xff]  ;;  %v6116_v17 = vld [vmem:[%s10938_s1 + $0x200] sm:$0xff] }
 0x101   : > { %6923 = vmatmul.mubr.f32.gmra.mrb[30].mxu1 %v8965_v45  ;;  %7027 = vmatmul.mubr.f32.gmra.mrb[30].mxu0 %v8965_v45 }
 0x102   : > { %6925 = vmatprep.mubr.f32.mxu1 %v8969_v47  ;;  %7029 = vmatprep.mubr.f32.mxu0 %v8969_v47 }
 0x103   : > { %7888 = vmatpush3.bf16.msra.mxu0 %v7885_v42  ;;  %7824 = vmatpush3.bf16.msra.mxu1 %v7821_v10  ;;  %v6113_v42 = vld [vmem:[%s10938_s1 + $0x1e8] sm:$0xff]  ;;  %v7897_v10 = vpack.c.bf16 %v6145_v19, %v6144_v34  ;;  %v6119_v19 = vld [vmem:[%s10938_s1 + $0x218] sm:$0xff] }
 0x104   : > { %7890 = vmatprep.subr.bf16.mxu0 %v7889_v15  ;;  %7826 = vmatprep.subr.bf16.mxu1 %v7825_v25  ;;  %v7833_v11 = vpack.c.bf16 %v6113_v42, %v6112_v41 }
 0x105   : > { %6926 = vmatmul.mubr.f32.gmra.mrb[32].mxu1 %v8989_v57  ;;  %7030 = vmatmul.mubr.f32.gmra.mrb[32].mxu0 %v8989_v57 }
 0x106   : > { %6928 = vmatprep.mubr.f32.mxu1 %v8993_v59  ;;  %7032 = vmatprep.mubr.f32.mxu0 %v8993_v59 }
 0x107   : > { %7892 = vmatpush3.bf16.msra.mxu0 %v7889_v15  ;;  %7828 = vmatpush3.bf16.msra.mxu1 %v7825_v25  ;;  %v6115_v15 = vld [vmem:[%s10938_s1 + $0x1f8] sm:$0xff]  ;;  %v7901_v25 = vpack.c.bf16 %v6147_v13, %v6146_v12  ;;  %v6120_v12 = vld [vmem:[%s10938_s1 + $0x220] sm:$0xff] }
 0x108   : > { %7894 = vmatprep.subr.bf16.mxu0 %v7893_v32  ;;  %7830 = vmatprep.subr.bf16.mxu1 %v7829_v33  ;;  %v7837_v26 = vpack.c.bf16 %v6115_v15, %v6114_v14  ;;  %v6154_v14 = vld [vmem:[%s10938_s1 + $0x330] sm:$0xff]  ;;  %v6155_v15 = vld [vmem:[%s10938_s1 + $0x338] sm:$0xff] }
 0x109   : > { %6929 = vmatmul.mubr.f32.gmra.mrb[34].mxu1 %v9013_v6  ;;  %7033 = vmatmul.mubr.f32.gmra.mrb[34].mxu0 %v9013_v6 }
 0x10a   : > { %6931 = vmatprep.mubr.f32.mxu1 %v9017_v8  ;;  %7035 = vmatprep.mubr.f32.mxu0 %v9017_v8 }
 0x10b   : > { %7896 = vmatpush3.bf16.msra.mxu0 %v7893_v32  ;;  %7832 = vmatpush3.bf16.msra.mxu1 %v7829_v33  ;;  %v6117_v32 = vld [vmem:[%s10938_s1 + $0x208] sm:$0xff]  ;;  %v9241_v33 = vpack.c.bf16 %v6149_v50, %v6148_v31  ;;  %v6156_v31 = vld [vmem:[%s10938_s1 + $0x340] sm:$0xff] }
 0x10c   : > { %7898 = vmatprep.subr.bf16.mxu0 %v7897_v10  ;;  %7834 = vmatprep.subr.bf16.mxu1 %v7833_v11  ;;  %v9243_v34 = vpack.c.bf16 %v6117_v32, %v6116_v17  ;;  %v6157_v50 = vld [vmem:[%s10938_s1 + $0x348] sm:$0xff] }
 0x10d   : > { %6932 = vmatmul.mubr.f32.gmra.mrb[36].mxu1 %v9037_v21  ;;  %7036 = vmatmul.mubr.f32.gmra.mrb[36].mxu0 %v9037_v21  ;;  %v6125_v17 = vld [vmem:[%s10938_s1 + $0x248] sm:$0xff] }
 0x10e   : > { %6934 = vmatprep.mubr.f32.mxu1 %v9041_v23  ;;  %7038 = vmatprep.mubr.f32.mxu0 %v9041_v23 }
 0x10f   : > { %7900 = vmatpush3.bf16.msra.mxu0 %v7897_v10  ;;  %7836 = vmatpush3.bf16.msra.mxu1 %v7833_v11  ;;  %v6152_v10 = vld [vmem:[%s10938_s1 + $0x320] sm:$0xff]  ;;  %v6153_v11 = vld [vmem:[%s10938_s1 + $0x328] sm:$0xff] }
 0x110   : > { %7902 = vmatprep.subr.bf16.mxu0 %v7901_v25  ;;  %7838 = vmatprep.subr.bf16.mxu1 %v7837_v26 }
 0x111   : > { %6935 = vmatmul.mubr.f32.gmra.mrb[38].mxu1 %v9061_v35  ;;  %7039 = vmatmul.mubr.f32.gmra.mrb[38].mxu0 %v9061_v35 }
 0x112   : > { %6937 = vmatprep.mubr.f32.mxu1 %v9065_v63  ;;  %7041 = vmatprep.mubr.f32.mxu0 %v9065_v63 }
 0x113   : > { %7904 = vmatpush3.bf16.msra.mxu0 %v7901_v25  ;;  %7840 = vmatpush3.bf16.msra.mxu1 %v7837_v26  ;;  %v6123_v25 = vld [vmem:[%s10938_s1 + $0x238] sm:$0xff] }
 0x114   : > { %7906 = vmatprep.subr.bf16.mxu0 %v9241_v33  ;;  %7842 = vmatprep.subr.bf16.mxu1 %v9243_v34 }
 0x115   : > { %6938 = vmatmul.mubr.f32.gmra.mrb[40].mxu1 %v9073_v43  ;;  %7042 = vmatmul.mubr.f32.gmra.mrb[40].mxu0 %v9073_v43 }
 0x116   : > { %6940 = vmatprep.mubr.f32.mxu1 %v9077_v49  ;;  %7044 = vmatprep.mubr.f32.mxu0 %v9077_v49 }
 0x119   : > { %6941 = vmatmul.mubr.f32.gmra.mrb[42].mxu1 %v9085_v53  ;;  %7045 = vmatmul.mubr.f32.gmra.mrb[42].mxu0 %v9085_v53 }
 0x11a   : > { %6943 = vmatprep.mubr.f32.mxu1 %v9089_v55  ;;  %7047 = vmatprep.mubr.f32.mxu0 %v9089_v55 }
 0x11d   : > { %6944 = vmatmul.mubr.f32.gmra.mrb[44].mxu1 %v9097_v61  ;;  %7048 = vmatmul.mubr.f32.gmra.mrb[44].mxu0 %v9097_v61 }
 0x11e   : > { %6946 = vmatprep.mubr.f32.mxu1 %v9101_v1  ;;  %7050 = vmatprep.mubr.f32.mxu0 %v9101_v1 }
 0x121   : > { %6947 = vmatmul.mubr.f32.gmra.mrb[46].mxu1 %v9109_v3  ;;  %7051 = vmatmul.mubr.f32.gmra.mrb[46].mxu0 %v9109_v3 }
 0x122   : > { %6949 = vmatprep.mubr.f32.mxu1 %v8835_v51  ;;  %7053 = vmatprep.mubr.f32.mxu0 %v8835_v51  ;;  %v6150_v51 = vld [vmem:[%s10938_s1 + $0x310] sm:$0xff] }
 0x125   : > { %6950 = vmatmul.mubr.f32.gmra.mrb[48].mxu1 %v8895_v18  ;;  %7054 = vmatmul.mubr.f32.gmra.mrb[48].mxu0 %v8895_v18  ;;  %v6151_v18 = vld [vmem:[%s10938_s1 + $0x318] sm:$0xff] }
 0x126   : > { %6952 = vmatprep.mubr.f32.mxu1 %v8899_v20  ;;  %7056 = vmatprep.mubr.f32.mxu0 %v8899_v20  ;;  %v6118_v20 = vld [vmem:[%s10938_s1 + $0x210] sm:$0xff]  ;;  %v7909_v41 = vpack.c.bf16 %v6151_v18, %v6150_v51  ;;  %v6127_v51 = vld [vmem:[%s10938_s1 + $0x258] sm:$0xff] }
 0x127   : > { %v7845_v42 = vpack.c.bf16 %v6119_v19, %v6118_v20  ;;  %v6160_v20 = vld [vmem:[%s10938_s1 + $0x360] sm:$0xff]  ;;  %v6161_v19 = vld [vmem:[%s10938_s1 + $0x368] sm:$0xff] }
 0x129   : > { %6953 = vmatmul.mubr.f32.gmra.mrb[50].mxu1 %v8918_v28  ;;  %7057 = vmatmul.mubr.f32.gmra.mrb[50].mxu0 %v8918_v28 }
 0x12a   : > { %6955 = vmatprep.mubr.f32.mxu1 %v8923_v30  ;;  %7059 = vmatprep.mubr.f32.mxu0 %v8923_v30 }
 0x12d   : > { %6956 = vmatmul.mubr.f32.gmra.mrb[52].mxu1 %v8943_v37  ;;  %7060 = vmatmul.mubr.f32.gmra.mrb[52].mxu0 %v8943_v37 }
 0x12e   : > { %6958 = vmatprep.mubr.f32.mxu1 %v8947_v39  ;;  %7062 = vmatprep.mubr.f32.mxu0 %v8947_v39 }
 0x131   : > { %6959 = vmatmul.mubr.f32.gmra.mrb[54].mxu1 %v8967_v46  ;;  %7063 = vmatmul.mubr.f32.gmra.mrb[54].mxu0 %v8967_v46 }
 0x132   : > { %6961 = vmatprep.mubr.f32.mxu1 %v8971_v48  ;;  %7065 = vmatprep.mubr.f32.mxu0 %v8971_v48 }
 0x135   : > { %6962 = vmatmul.mubr.f32.gmra.mrb[56].mxu1 %v8991_v58  ;;  %7066 = vmatmul.mubr.f32.gmra.mrb[56].mxu0 %v8991_v58 }
 0x136   : > { %6964 = vmatprep.mubr.f32.mxu1 %v8995_v60  ;;  %7068 = vmatprep.mubr.f32.mxu0 %v8995_v60 }
 0x139   : > { %6965 = vmatmul.mubr.f32.gmra.mrb[58].mxu1 %v9015_v7  ;;  %7069 = vmatmul.mubr.f32.gmra.mrb[58].mxu0 %v9015_v7 }
 0x13a   : > { %6967 = vmatprep.mubr.f32.mxu1 %v9019_v9  ;;  %7071 = vmatprep.mubr.f32.mxu0 %v9019_v9 }
 0x13d   : > { %6968 = vmatmul.mubr.f32.gmra.mrb[60].mxu1 %v9039_v22  ;;  %7072 = vmatmul.mubr.f32.gmra.mrb[60].mxu0 %v9039_v22 }
 0x13e   : > { %6970 = vmatprep.mubr.f32.mxu1 %v9043_v24  ;;  %7074 = vmatprep.mubr.f32.mxu0 %v9043_v24 }
 0x141   : > { %6971 = vmatmul.mubr.f32.gmra.mrb[62].mxu1 %v9063_v36  ;;  %7075 = vmatmul.mubr.f32.gmra.mrb[62].mxu0 %v9063_v36 }
 0x142   : > { %6973 = vmatprep.mubr.f32.mxu1 %v9067_v40  ;;  %7077 = vmatprep.mubr.f32.mxu0 %v9067_v40 }
 0x145   : > { %6974 = vmatmul.mubr.f32.gmra.mrb[64].mxu1 %v9075_v44  ;;  %7078 = vmatmul.mubr.f32.gmra.mrb[64].mxu0 %v9075_v44 }
 0x146   : > { %6976 = vmatprep.mubr.f32.mxu1 %v9079_v52  ;;  %7080 = vmatprep.mubr.f32.mxu0 %v9079_v52 }
 0x149   : > { %6977 = vmatmul.mubr.f32.gmra.mrb[66].mxu1 %v9087_v54  ;;  %7081 = vmatmul.mubr.f32.gmra.mrb[66].mxu0 %v9087_v54 }
 0x14a   : > { %6979 = vmatprep.mubr.f32.mxu1 %v9091_v56  ;;  %7083 = vmatprep.mubr.f32.mxu0 %v9091_v56 }
 0x14d   : > { %6980 = vmatmul.mubr.f32.gmra.mrb[68].mxu1 %v9099_v0  ;;  %7084 = vmatmul.mubr.f32.gmra.mrb[68].mxu0 %v9099_v0 }
 0x14e   : > { %6982 = vmatprep.mubr.f32.mxu1 %v9103_v2  ;;  %7086 = vmatprep.mubr.f32.mxu0 %v9103_v2 }
 0x151   : > { %6983 = vmatmul.mubr.f32.gmra.mrb[70].mxu1 %v9111_v5  ;;  %7087 = vmatmul.mubr.f32.gmra.mrb[70].mxu0 %v9111_v5 }
 0x152   : > { %7121 = vmatprep.mubr.f32.mxu1 %v8916_v27  ;;  %7329 = vmatprep.mubr.f32.mxu0 %v8916_v27  ;;  %v6121_v27 = vld [vmem:[%s10938_s1 + $0x228] sm:$0xff] }
 0x153   : > { %v7849_v13 = vpack.c.bf16 %v6121_v27, %v6120_v12  ;;  %v6131_v12 = vld [vmem:[%s10938_s1 + $0x278] sm:$0xff] }
 0x155   : > { %7122 = vmatmul.mubr.f32.vlgmr.msra.gmra.mrb[72].mxu1 %v8921_v29  ;;  %7330 = vmatmul.mubr.f32.vlgmr.msra.gmra.mrb[72].mxu0 %v8921_v29  ;;  %v7913_v29 = vpack.c.bf16 %v6153_v11, %v6152_v10  ;;  %v6162_v10 = vld [vmem:[%s10938_s1 + $0x370] sm:$0xff]  ;;  %v6163_v11 = vld [vmem:[%s10938_s1 + $0x378] sm:$0xff] }
 0x156   : > { %7908 = vmatpush3.bf16.msra.mxu0 %v9241_v33  ;;  %7124 = vmatprep.mubr.f32.mxu1 %v8941_v62  ;;  %v6158_v33 = vld [vmem:[%s10938_s1 + $0x350] sm:$0xff] }
 0x157   : > { %7332 = vmatprep.mubr.f32.mxu0 %v8941_v62  ;;  %7844 = vmatpush3.bf16.msra.mxu1 %v9243_v34  ;;  %v6122_v62 = vld [vmem:[%s10938_s1 + $0x230] sm:$0xff]  ;;  %v6159_v34 = vld [vmem:[%s10938_s1 + $0x358] sm:$0xff] }
 0x158   : > { %7910 = vmatprep.subr.bf16.mxu0 %v7909_v41  ;;  %7846 = vmatprep.subr.bf16.mxu1 %v7845_v42  ;;  %v7853_v26 = vpack.c.bf16 %v6123_v25, %v6122_v62 }
 0x159   : > { %7125 = vmatmul.mubr.f32.gmra.mrb[74].mxu1 %v8945_v38  ;;  %7333 = vmatmul.mubr.f32.gmra.mrb[74].mxu0 %v8945_v38  ;;  %v7917_v38 = vpack.c.bf16 %v6155_v15, %v6154_v14  ;;  %v6165_v14 = vld [vmem:[%s10938_s1 + $0x388] sm:$0xff] }
 0x15a   : > { %7127 = vmatprep.mubr.f32.mxu1 %v8965_v45  ;;  %7335 = vmatprep.mubr.f32.mxu0 %v8965_v45  ;;  %v6124_v45 = vld [vmem:[%s10938_s1 + $0x240] sm:$0xff] }
 0x15b   : > { %7912 = vmatpush3.bf16.msra.mxu0 %v7909_v41  ;;  %7848 = vmatpush3.bf16.msra.mxu1 %v7845_v42  ;;  %v7857_v32 = vpack.c.bf16 %v6125_v17, %v6124_v45  ;;  %v6129_v41 = vld [vmem:[%s10938_s1 + $0x268] sm:$0xff] }
 0x15c   : > { %7914 = vmatprep.subr.bf16.mxu0 %v7913_v29  ;;  %7850 = vmatprep.subr.bf16.mxu1 %v7849_v13 }
 0x15d   : > { %7128 = vmatmul.mubr.f32.gmra.mrb[76].mxu1 %v8969_v47  ;;  %7336 = vmatmul.mubr.f32.gmra.mrb[76].mxu0 %v8969_v47  ;;  %v7921_v47 = vpack.c.bf16 %v6157_v50, %v6156_v31 }
 0x15e   : > { %7130 = vmatprep.mubr.f32.mxu1 %v8989_v57  ;;  %7338 = vmatprep.mubr.f32.mxu0 %v8989_v57  ;;  %v6126_v57 = vld [vmem:[%s10938_s1 + $0x250] sm:$0xff] }
 0x15f   : > { %7916 = vmatpush3.bf16.msra.mxu0 %v7913_v29  ;;  %7852 = vmatpush3.bf16.msra.mxu1 %v7849_v13  ;;  %v7861_v18 = vpack.c.bf16 %v6127_v51, %v6126_v57  ;;  %v6180_v29 = vld [vmem:[%s10938_s1 + $0x400] sm:$0xff]  ;;  %v6181_v13 = vld [vmem:[%s10938_s1 + $0x408] sm:$0xff] }
 0x160   : > { %7918 = vmatprep.subr.bf16.mxu0 %v7917_v38  ;;  %7854 = vmatprep.subr.bf16.mxu1 %v7853_v26 }
 0x161   : > { %7131 = vmatmul.mubr.f32.gmra.mrb[78].mxu1 %v8993_v59  ;;  %7339 = vmatmul.mubr.f32.gmra.mrb[78].mxu0 %v8993_v59  ;;  %v7925_v59 = vpack.c.bf16 %v6159_v34, %v6158_v33 }
 0x162   : > { %7133 = vmatprep.mubr.f32.mxu1 %v9013_v6  ;;  %7341 = vmatprep.mubr.f32.mxu0 %v9013_v6  ;;  %v6128_v6 = vld [vmem:[%s10938_s1 + $0x260] sm:$0xff] }
 0x163   : > { %7920 = vmatpush3.bf16.msra.mxu0 %v7917_v38  ;;  %7856 = vmatpush3.bf16.msra.mxu1 %v7853_v26  ;;  %v7865_v42 = vpack.c.bf16 %v6129_v41, %v6128_v6 }
 0x164   : > { %7922 = vmatprep.subr.bf16.mxu0 %v7921_v47  ;;  %7858 = vmatprep.subr.bf16.mxu1 %v7857_v32 }
 0x165   : > { %7134 = vmatmul.mubr.f32.gmra.mrb[80].mxu1 %v9017_v8  ;;  %7342 = vmatmul.mubr.f32.gmra.mrb[80].mxu0 %v9017_v8  ;;  %v7929_v8 = vpack.c.bf16 %v6161_v19, %v6160_v20 }
 0x166   : > { %7136 = vmatprep.mubr.f32.mxu1 %v9037_v21  ;;  %7344 = vmatprep.mubr.f32.mxu0 %v9037_v21  ;;  %v6130_v21 = vld [vmem:[%s10938_s1 + $0x270] sm:$0xff] }
 0x167   : > { %7924 = vmatpush3.bf16.msra.mxu0 %v7921_v47  ;;  %7860 = vmatpush3.bf16.msra.mxu1 %v7857_v32  ;;  %v7869_v27 = vpack.c.bf16 %v6131_v12, %v6130_v21 }
 0x168   : > { %7926 = vmatprep.subr.bf16.mxu0 %v7925_v59  ;;  %7862 = vmatprep.subr.bf16.mxu1 %v7861_v18 }
 0x169   : > { %7137 = vmatmul.mubr.f32.gmra.mrb[82].mxu1 %v9041_v23  ;;  %7345 = vmatmul.mubr.f32.gmra.mrb[82].mxu0 %v9041_v23  ;;  %v7933_v23 = vpack.c.bf16 %v6163_v11, %v6162_v10 }
 0x16a   : > { %7139 = vmatprep.mubr.f32.mxu1 %v9061_v35  ;;  %7347 = vmatprep.mubr.f32.mxu0 %v9061_v35  ;;  %v6164_v35 = vld [vmem:[%s10938_s1 + $0x380] sm:$0xff] }
 0x16b   : > { %7928 = vmatpush3.bf16.msra.mxu0 %v7925_v59  ;;  %7864 = vmatpush3.bf16.msra.mxu1 %v7861_v18  ;;  %v9443_v15 = vpack.c.bf16 %v6165_v14, %v6164_v35  ;;  %v9565_v14 = vld [vmem:[#allocation2 + $0x1b0] sm:$0xff] }
 0x16c   : > { %7930 = vmatprep.subr.bf16.mxu0 %v7929_v8  ;;  %7866 = vmatprep.subr.bf16.mxu1 %v7865_v42 }
 0x16d   : > { %7140 = vmatmul.mubr.f32.gmra.mrb[84].mxu1 %v9065_v63  ;;  %7348 = vmatmul.mubr.f32.gmra.mrb[84].mxu0 %v9065_v63  ;;  %v9441_v63 = vpack.c.bf16 %v6181_v13, %v6180_v29 }
 0x16e   : > { %7142 = vmatprep.mubr.f32.mxu1 %v9073_v43  ;;  %7350 = vmatprep.mubr.f32.mxu0 %v9073_v43  ;;  %v9459_v43 = vld [vmem:[#allocation2 + $0xc0] sm:$0xff] }
 0x16f   : > { %7932 = vmatpush3.bf16.msra.mxu0 %v7929_v8  ;;  %7868 = vmatpush3.bf16.msra.mxu1 %v7865_v42 }
 0x170   : > { %7934 = vmatprep.subr.bf16.mxu0 %v7933_v23  ;;  %7870 = vmatprep.subr.bf16.mxu1 %v7869_v27 }
 0x171   : > { %7143 = vmatmul.mubr.f32.gmra.mrb[86].mxu1 %v9077_v49  ;;  %7351 = vmatmul.mubr.f32.gmra.mrb[86].mxu0 %v9077_v49  ;;  %v9461_v49 = vld [vmem:[#allocation2 + $0xc8] sm:$0xff] }
 0x172   : > { %7145 = vmatprep.mubr.f32.mxu1 %v9085_v53  ;;  %7353 = vmatprep.mubr.f32.mxu0 %v9085_v53  ;;  %v9467_v53 = vld [vmem:[#allocation2 + $0xd0] sm:$0xff] }
 0x173   : > { %7936 = vmatpush3.bf16.msra.mxu0 %v7933_v23  ;;  %7872 = vmatpush3.bf16.msra.mxu1 %v7869_v27 }
 0x174   : > { %7970 = vmatprep.subr.bf16.mxu0 %v9441_v63  ;;  %7938 = vmatprep.subr.bf16.mxu1 %v9443_v15 }
 0x175   : > { %7146 = vmatmul.mubr.f32.gmra.mrb[88].mxu1 %v9089_v55  ;;  %7354 = vmatmul.mubr.f32.gmra.mrb[88].mxu0 %v9089_v55 }
 0x176   : > { %7148 = vmatprep.mubr.f32.mxu1 %v9097_v61  ;;  %7356 = vmatprep.mubr.f32.mxu0 %v9097_v61 }
 0x179   : > { %7149 = vmatmul.mubr.f32.gmra.mrb[90].mxu1 %v9101_v1  ;;  %7357 = vmatmul.mubr.f32.gmra.mrb[90].mxu0 %v9101_v1 }
 0x17a   : > { %7151 = vmatprep.mubr.f32.mxu1 %v9109_v3  ;;  %7359 = vmatprep.mubr.f32.mxu0 %v9109_v3 }
 0x17d   : > { %7152 = vmatmul.mubr.f32.gmra.mrb[92].mxu1 %v9459_v43  ;;  %7360 = vmatmul.mubr.f32.gmra.mrb[92].mxu0 %v9459_v43 }
 0x17e   : > { %7154 = vmatprep.mubr.f32.mxu1 %v9461_v49  ;;  %7362 = vmatprep.mubr.f32.mxu0 %v9461_v49 }
 0x181   : > { %7155 = vmatmul.mubr.f32.gmra.mrb[94].mxu1 %v9467_v53  ;;  %7363 = vmatmul.mubr.f32.gmra.mrb[94].mxu0 %v9467_v53 }
 0x182   : > { %7157 = vmatprep.mubr.f32.mxu1 %v8918_v28  ;;  %7365 = vmatprep.mubr.f32.mxu0 %v8918_v28 }
 0x185   : > { %7158 = vmatmul.mubr.f32.gmra.mrb[96].mxu1 %v8923_v30  ;;  %7366 = vmatmul.mubr.f32.gmra.mrb[96].mxu0 %v8923_v30 }
 0x186   : > { %7160 = vmatprep.mubr.f32.mxu1 %v8943_v37  ;;  %7368 = vmatprep.mubr.f32.mxu0 %v8943_v37 }
 0x189   : > { %7161 = vmatmul.mubr.f32.gmra.mrb[98].mxu1 %v8947_v39  ;;  %7369 = vmatmul.mubr.f32.gmra.mrb[98].mxu0 %v8947_v39 }
 0x18a   : > { %7163 = vmatprep.mubr.f32.mxu1 %v8967_v46  ;;  %7371 = vmatprep.mubr.f32.mxu0 %v8967_v46 }
 0x18d   : > { %7164 = vmatmul.mubr.f32.gmra.mrb[100].mxu1 %v8971_v48  ;;  %7372 = vmatmul.mubr.f32.gmra.mrb[100].mxu0 %v8971_v48 }
 0x18e   : > { %7166 = vmatprep.mubr.f32.mxu1 %v8991_v58  ;;  %7374 = vmatprep.mubr.f32.mxu0 %v8991_v58 }
 0x191   : > { %7167 = vmatmul.mubr.f32.gmra.mrb[102].mxu1 %v8995_v60  ;;  %7375 = vmatmul.mubr.f32.gmra.mrb[102].mxu0 %v8995_v60 }
 0x192   : > { %7169 = vmatprep.mubr.f32.mxu1 %v9015_v7  ;;  %7377 = vmatprep.mubr.f32.mxu0 %v9015_v7 }
 0x195   : > { %7170 = vmatmul.mubr.f32.gmra.mrb[104].mxu1 %v9019_v9  ;;  %7378 = vmatmul.mubr.f32.gmra.mrb[104].mxu0 %v9019_v9 }
 0x196   : > { %7172 = vmatprep.mubr.f32.mxu1 %v9039_v22  ;;  %7380 = vmatprep.mubr.f32.mxu0 %v9039_v22 }
 0x198   : > { %v6811_v28 = vpop.f32.mrb[0].mxu0  ;;  %v6847_v30 = vpop.f32.mrb[0].mxu1 }
 0x199   : > { %v1298_v37 = vrot.slane %v6811_v28, 7  ;;  %v9493_v39 = vpop.f32.mrb[1].mxu0  ;;  %7173 = vmatmul.mubr.f32.gmra.mrb[106].mxu1 %v9043_v24  ;;  %7381 = vmatmul.mubr.f32.gmra.mrb[106].mxu0 %v9043_v24  ;;  %v1346_v46 = vrot.slane %v6847_v30, 7  ;;  %v9497_v48 = vpop.f32.mrb[1].mxu1  ;;  %v9567_v28 = vld [vmem:[#allocation2 + $0x1b8] sm:$0xff] }
 0x19a   : > { %v10943_v58 = vrot.slane %v9493_v39, 7  ;;  %v10944_v60 = vrot.slane %v9497_v48, 7  ;;  %7175 = vmatprep.mubr.f32.mxu1 %v9063_v36  ;;  %7383 = vmatprep.mubr.f32.mxu0 %v9063_v36 }
 0x19c   : > { %v9506_v7 = vsel %vm1296_vm2, %v10943_v58, %v1298_v37  ;;  %v9511_v9 = vsel %vm1296_vm2, %v10944_v60, %v1346_v46  ;;  %v6814_v22 = vpop.f32.mrb[2].mxu0  ;;  %v6850_v24 = vpop.f32.mrb[2].mxu1  ;;  %v8385_v58 = vld [vmem:[#allocation2 + $0x38] sm:$0xff] }
 0x19d   : > { %v1302_v55 = vrot.slane %v6814_v22, 7  ;;  %v1350_v61 = vrot.slane %v6850_v24, 7  ;;  %v1019_v1 = vpop.f32.mrb[3].mxu0  ;;  %v1139_v3 = vpop.f32.mrb[3].mxu1  ;;  %7176 = vmatmul.mubr.f32.gmra.mrb[108].mxu1 %v9067_v40  ;;  %7384 = vmatmul.mubr.f32.gmra.mrb[108].mxu0 %v9067_v40  ;;  %v9666_v60 = vld [vmem:[#allocation2 + $0x58] sm:$0xff] }
 0x19e   : > { %v1300_v36 = vrot.slane %v1019_v1, 7  ;;  %v1348_v62 = vrot.slane %v1139_v3, 7  ;;  %7178 = vmatprep.mubr.f32.mxu1 %v9075_v44  ;;  %7386 = vmatprep.mubr.f32.mxu0 %v9075_v44  ;;  %11020 = vst [vmem:[#allocation23_spill] sm:$0xff] %v9666_v60 }
 0x1a0   : > { %v9518_v25 = vsel %vm1296_vm2, %v1298_v37, %v1300_v36  ;;  %v9521_v38 = vsel %vm1296_vm2, %v1300_v36, %v1302_v55  ;;  %v9524_v26 = vsel %vm1296_vm2, %v1346_v46, %v1348_v62  ;;  %v9527_v31 = vsel %vm1296_vm2, %v1348_v62, %v1350_v61  ;;  %v6817_v50 = vpop.f32.mrb[4].mxu0  ;;  %v6853_v40 = vpop.f32.mrb[4].mxu1  ;;  %v9585_v62 = vld [vmem:[#allocation2 + $0x1c0] sm:$0xff] }
 0x1a1   : > { %v1306_v45 = vrot.slane %v6817_v50, 7  ;;  %v1354_v17 = vrot.slane %v6853_v40, 7  ;;  %v1029_v47 = vpop.f32.mrb[5].mxu0  ;;  %v1149_v32 = vpop.f32.mrb[5].mxu1  ;;  %7179 = vmatmul.mubr.f32.gmra.mrb[110].mxu1 %v9079_v52  ;;  %7387 = vmatmul.mubr.f32.gmra.mrb[110].mxu0 %v9079_v52  ;;  %v9587_v50 = vld [vmem:[#allocation2 + $0x30] sm:$0xff] }
 0x1a2   : > { %v1304_v44 = vrot.slane %v1029_v47, 7  ;;  %v1352_v33 = vrot.slane %v1149_v32, 7  ;;  %7181 = vmatprep.mubr.f32.mxu1 %v9087_v54  ;;  %7389 = vmatprep.mubr.f32.mxu0 %v9087_v54 }
 0x1a4   : > { %v9534_v34 = vsel %vm1296_vm2, %v1302_v55, %v1304_v44  ;;  %v9537_v57 = vsel %vm1296_vm2, %v1304_v44, %v1306_v45  ;;  %v9540_v51 = vsel %vm1296_vm2, %v1350_v61, %v1352_v33  ;;  %v9543_v59 = vsel %vm1296_vm2, %v1352_v33, %v1354_v17  ;;  %v6820_v18 = vpop.f32.mrb[6].mxu0  ;;  %v6856_v52 = vpop.f32.mrb[6].mxu1  ;;  %v6182_v33 = vld [vmem:[%s10938_s1 + $0x410] sm:$0xff] }
 0x1a5   : > { %v1310_v20 = vrot.slane %v6820_v18, 7  ;;  %v1358_v19 = vrot.slane %v6856_v52, 7  ;;  %v1039_v6 = vpop.f32.mrb[7].mxu0  ;;  %v1159_v41 = vpop.f32.mrb[7].mxu1  ;;  %7182 = vmatmul.mubr.f32.gmra.mrb[112].mxu1 %v9091_v56  ;;  %7390 = vmatmul.mubr.f32.gmra.mrb[112].mxu0 %v9091_v56  ;;  %v6183_v18 = vld [vmem:[%s10938_s1 + $0x418] sm:$0xff] }
 0x1a6   : > { %v1308_v54 = vrot.slane %v1039_v6, 7  ;;  %v1356_v8 = vrot.slane %v1159_v41, 7  ;;  %7184 = vmatprep.mubr.f32.mxu1 %v9099_v0  ;;  %7392 = vmatprep.mubr.f32.mxu0 %v9099_v0 }
 0x1a8   : > { %v9550_v42 = vsel %vm1296_vm2, %v1306_v45, %v1308_v54  ;;  %v9553_v10 = vsel %vm1296_vm2, %v1308_v54, %v1310_v20  ;;  %v9556_v11 = vsel %vm1296_vm2, %v1354_v17, %v1356_v8  ;;  %v9559_v21 = vsel %vm1296_vm2, %v1356_v8, %v1358_v19  ;;  %v6823_v12 = vpop.f32.mrb[8].mxu0  ;;  %v6859_v56 = vpop.f32.mrb[8].mxu1  ;;  %v8381_v8 = vld [vmem:[#allocation2 + $0x18] sm:$0xff] }
 0x1a9   : > { %v1314_v23 = vrot.slane %v6823_v12, 7  ;;  %v1362_v27 = vrot.slane %v6859_v56, 7  ;;  %v1049_v29 = vpop.f32.mrb[9].mxu0  ;;  %v1169_v13 = vpop.f32.mrb[9].mxu1  ;;  %7185 = vmatmul.mubr.f32.gmra.mrb[114].mxu1 %v9103_v2  ;;  %7393 = vmatmul.mubr.f32.gmra.mrb[114].mxu0 %v9103_v2  ;;  %v9610_v12 = vld [vmem:[#allocation2 + $0x38] sm:$0xff]  ;;  %v7973_v56 = vpack.c.bf16 %v6183_v18, %v6182_v33  ;;  %v8383_v33 = vld [vmem:[#allocation2 + $0x28] sm:$0xff] }
 0x1aa   : > { %v1312_v0 = vrot.slane %v1049_v29, 7  ;;  %v1360_v35 = vrot.slane %v1169_v13, 7  ;;  %7187 = vmatprep.mubr.f32.mxu1 %v9111_v5  ;;  %7395 = vmatprep.mubr.f32.mxu0 %v9111_v5  ;;  %11012 = vst [vmem:[#allocation15_spill] sm:$0xff] %v9610_v12  ;;  %v9634_v18 = vld [vmem:[#allocation2 + $0x48] sm:$0xff] }
 0x1ab   : > { %11016 = vst [vmem:[#allocation19_spill] sm:$0xff] %v9634_v18 }
 0x1ac   : > { %v9570_v30 = vsel %vm1296_vm2, %v1310_v20, %v1312_v0  ;;  %v9573_v37 = vsel %vm1296_vm2, %v1312_v0, %v1314_v23  ;;  %v9576_v46 = vsel %vm1296_vm2, %v1358_v19, %v1360_v35  ;;  %v9579_v2 = vsel %vm1296_vm2, %v1360_v35, %v1362_v27  ;;  %v6826_v22 = vpop.f32.mrb[10].mxu0  ;;  %v6862_v24 = vpop.f32.mrb[10].mxu1 }
 0x1ad   : > { %v1318_v55 = vrot.slane %v6826_v22, 7  ;;  %v1366_v5 = vrot.slane %v6862_v24, 7  ;;  %v1059_v61 = vpop.f32.mrb[11].mxu0  ;;  %v1179_v1 = vpop.f32.mrb[11].mxu1  ;;  %7188 = vmatmul.mubr.f32.gmra.mrb[116].mxu1 %v9565_v14  ;;  %7396 = vmatmul.mubr.f32.gmra.mrb[116].mxu0 %v9565_v14  ;;  %v9624_v22 = vld [vmem:[#allocation2 + $0x40] sm:$0xff]  ;;  %v6166_v24 = vld [vmem:[%s10938_s1 + $0x390] sm:$0xff] }
 0x1ae   : > { %v1316_v3 = vrot.slane %v1059_v61, 7  ;;  %v1364_v36 = vrot.slane %v1179_v1, 7  ;;  %7190 = vmatprep.mubr.f32.mxu1 %v9567_v28  ;;  %7398 = vmatprep.mubr.f32.mxu0 %v9567_v28  ;;  %11015 = vst [vmem:[#allocation18_spill] sm:$0xff] %v9624_v22 }
 0x1b0   : > { %v9590_v40 = vsel %vm1296_vm2, %v1314_v23, %v1316_v3  ;;  %v9593_v45 = vsel %vm1296_vm2, %v1316_v3, %v1318_v55  ;;  %v9596_v17 = vsel %vm1296_vm2, %v1362_v27, %v1364_v36  ;;  %v9599_v47 = vsel %vm1296_vm2, %v1364_v36, %v1366_v5  ;;  %v6829_v32 = vpop.f32.mrb[12].mxu0  ;;  %v6865_v44 = vpop.f32.mrb[12].mxu1  ;;  %v8382_v36 = vld [vmem:[#allocation2 + $0x20] sm:$0xff] }
 0x1b1   : > { %v1322_v52 = vrot.slane %v6829_v32, 7  ;;  %v1370_v20 = vrot.slane %v6865_v44, 7  ;;  %v1069_v19 = vpop.f32.mrb[13].mxu0  ;;  %v1189_v6 = vpop.f32.mrb[13].mxu1  ;;  %7191 = vmatmul.mubr.f32.gmra.mrb[118].mxu1 %v9585_v62  ;;  %7399 = vmatmul.mubr.f32.gmra.mrb[118].mxu0 %v9585_v62 }
 0x1b2   : > { %v1320_v41 = vrot.slane %v1069_v19, 7  ;;  %v1368_v54 = vrot.slane %v1189_v6, 7  ;;  %7225 = vmatprep.mubr.f32.mxu1 %v8381_v8  ;;  %7433 = vmatprep.mubr.f32.mxu0 %v9587_v50  ;;  %v9638_v19 = vld [vmem:[#allocation2 + $0x50] sm:$0xff] }
 0x1b3   : > { %11017 = vst [vmem:[#allocation20_spill] sm:$0xff] %v9638_v19 }
 0x1b4   : > { %v9613_v23 = vsel %vm1296_vm2, %v1318_v55, %v1320_v41  ;;  %v9616_v27 = vsel %vm1296_vm2, %v1320_v41, %v1322_v52  ;;  %v9619_v29 = vsel %vm1296_vm2, %v1366_v5, %v1368_v54  ;;  %v9622_v13 = vsel %vm1296_vm2, %v1368_v54, %v1370_v20  ;;  %v6832_v0 = vpop.f32.mrb[14].mxu0  ;;  %v6868_v35 = vpop.f32.mrb[14].mxu1  ;;  %v6167_v55 = vld [vmem:[%s10938_s1 + $0x398] sm:$0xff]  ;;  %v6184_v41 = vld [vmem:[%s10938_s1 + $0x420] sm:$0xff] }
 0x1b5   : > { %11013 = vst [vmem:[#allocation16_spill] sm:$0xff] %v9619_v29  ;;  %11014 = vst [vmem:[#allocation17_spill] sm:$0xff] %v9622_v13  ;;  %v1326_v61 = vrot.slane %v6832_v0, 7  ;;  %v1374_v1 = vrot.slane %v6868_v35, 7  ;;  %v1079_v3 = vpop.f32.mrb[15].mxu0  ;;  %v1199_v5 = vpop.f32.mrb[15].mxu1  ;;  %7226 = vmatmul.mubr.f32.vlgmr.msra.gmra.mrb[24].mxu1 %v8382_v36  ;;  %7434 = vmatmul.mubr.f32.vlgmr.msra.gmra.mrb[120].mxu0 %v9610_v12  ;;  %v7941_v6 = vpack.c.bf16 %v6167_v55, %v6166_v24 }
 0x1b6   : > { %v1324_v32 = vrot.slane %v1079_v3, 7  ;;  %v1372_v44 = vrot.slane %v1199_v5, 7  ;;  %7972 = vmatpush3.bf16.msra.mxu0 %v9441_v63  ;;  %7228 = vmatprep.mubr.f32.mxu1 %v8383_v33  ;;  %v6185_v24 = vld [vmem:[%s10938_s1 + $0x428] sm:$0xff]  ;;  %v9722_v13 = vld [vmem:[#allocation2 + $0x80] sm:$0xff]  ;;  %v11033_v12 = vrot.slane %v9497_v48, 7 }
 0x1b7   : > { %7436 = vmatprep.mubr.f32.mxu0 %v9624_v22  ;;  %7940 = vmatpush3.bf16.msra.mxu1 %v9443_v15  ;;  %v6169_v55 = vld [vmem:[%s10938_s1 + $0x3a8] sm:$0xff]  ;;  %11029 = vst [vmem:[#allocation32_spill] sm:$0xff] %v9722_v13 }
 0x1b8   : > { %v9644_v54 = vsel %vm1296_vm2, %v1322_v52, %v1324_v32  ;;  %v9647_v63 = vsel %vm1296_vm2, %v1324_v32, %v1326_v61  ;;  %v9650_v8 = vsel %vm1296_vm2, %v1370_v20, %v1372_v44  ;;  %v9653_v0 = vsel %vm1296_vm2, %v1372_v44, %v1374_v1  ;;  %v6835_v15 = vpop.f32.mrb[16].mxu0  ;;  %v6871_v35 = vpop.f32.mrb[16].mxu1  ;;  %7974 = vmatprep.subr.bf16.mxu0 %v7973_v56  ;;  %v6168_v52 = vld [vmem:[%s10938_s1 + $0x3a0] sm:$0xff]  ;;  %v8384_v32 = vld [vmem:[#allocation2 + $0x30] sm:$0xff]  ;;  %v9750_v22 = vld [vmem:[#allocation2 + $0x88] sm:$0xff] }
 0x1b9   : > { %11018 = vst [vmem:[#allocation21_spill] sm:$0xff] %v9650_v8  ;;  %11019 = vst [vmem:[#allocation22_spill] sm:$0xff] %v9653_v0  ;;  %v1330_v20 = vrot.slane %v6835_v15, 7  ;;  %v1378_v3 = vrot.slane %v6871_v35, 7  ;;  %v1089_v5 = vpop.f32.mrb[17].mxu0  ;;  %v1209_v36 = vpop.f32.mrb[17].mxu1  ;;  %7229 = vmatmul.mubr.f32.gmra.mrb[26].mxu1 %v8384_v32  ;;  %7437 = vmatmul.mubr.f32.gmra.mrb[122].mxu0 %v9634_v18  ;;  %v7977_v15 = vpack.c.bf16 %v6185_v24, %v6184_v41 }
 0x1ba   : > { %v1328_v44 = vrot.slane %v1089_v5, 7  ;;  %v1376_v33 = vrot.slane %v1209_v36, 7  ;;  %7231 = vmatprep.mubr.f32.mxu1 %v8385_v58  ;;  %7439 = vmatprep.mubr.f32.mxu0 %v9638_v19  ;;  %v7945_v35 = vpack.c.bf16 %v6169_v55, %v6168_v52  ;;  %v8389_v18 = vld [vmem:[#allocation2 + $0x58] sm:$0xff]  ;;  %11032 = vst [vmem:[#allocation35_spill] sm:$0xff] %v9750_v22 }
 0x1bb   : > { %7976 = vmatpush3.bf16.msra.mxu0 %v7973_v56  ;;  %7942 = vmatprep.subr.bf16.mxu1 %v7941_v6  ;;  %v6186_v56 = vld [vmem:[%s10938_s1 + $0x430] sm:$0xff]  ;;  %v9720_v8 = vld [vmem:[#allocation2 + $0x78] sm:$0xff] }
 0x1bc   : > { %v9671_v4 = vsel %vm1296_vm2, %v1326_v61, %v1328_v44  ;;  %v9674_v32 = vsel %vm1296_vm2, %v1328_v44, %v1330_v20  ;;  %v9677_v5 = vsel %vm1296_vm2, %v1374_v1, %v1376_v33  ;;  %v9680_v58 = vsel %vm1296_vm2, %v1376_v33, %v1378_v3  ;;  %v6838_v36 = vpop.f32.mrb[18].mxu0  ;;  %v6874_v0 = vpop.f32.mrb[18].mxu1  ;;  %7944 = vmatpush3.bf16.msra.mxu1 %v7941_v6  ;;  %v6187_v61 = vld [vmem:[%s10938_s1 + $0x438] sm:$0xff]  ;;  %v8386_v1 = vld [vmem:[#allocation2 + $0x40] sm:$0xff]  ;;  %v9690_v6 = vld [vmem:[#allocation2 + $0x68] sm:$0xff] }
 0x1bd   : > { %11022 = vst [vmem:[#allocation25_spill] sm:$0xff] %v9677_v5  ;;  %11023 = vst [vmem:[#allocation26_spill] sm:$0xff] %v9680_v58  ;;  %v1334_v41 = vrot.slane %v6838_v36, 7  ;;  %v1382_v24 = vrot.slane %v6874_v0, 7  ;;  %v1099_v52 = vpop.f32.mrb[19].mxu0  ;;  %v1219_v55 = vpop.f32.mrb[19].mxu1  ;;  %7232 = vmatmul.mubr.f32.gmra.mrb[28].mxu1 %v8386_v1  ;;  %7440 = vmatmul.mubr.f32.gmra.mrb[124].mxu0 %v9666_v60  ;;  %v7981_v36 = vpack.c.bf16 %v6187_v61, %v6186_v56 }
 0x1be   : > { %v1332_v44 = vrot.slane %v1099_v52, 7  ;;  %v1380_v33 = vrot.slane %v1219_v55, 7  ;;  %v8387_v58 = vld [vmem:[#allocation2 + $0x48] sm:$0xff]  ;;  %7442 = vmatprep.mubr.f32.mxu0 %v9668_v16  ;;  %11024 = vst [vmem:[#allocation27_spill] sm:$0xff] %v9690_v6  ;;  %v9692_v5 = vld [vmem:[#allocation2 + $0x70] sm:$0xff]  ;;  %7978 = vmatprep.subr.bf16.mxu0 %v7977_v15  ;;  %v6171_v56 = vld [vmem:[%s10938_s1 + $0x3b8] sm:$0xff] }
 0x1bf   : > { %7234 = vmatprep.mubr.f32.mxu1 %v8387_v58  ;;  %11025 = vst [vmem:[#allocation28_spill] sm:$0xff] %v9692_v5  ;;  %7946 = vmatprep.subr.bf16.mxu1 %v7945_v35  ;;  %v6170_v0 = vld [vmem:[%s10938_s1 + $0x3b0] sm:$0xff]  ;;  %v6189_v61 = vld [vmem:[%s10938_s1 + $0x448] sm:$0xff]  ;;  %11028 = vst [vmem:[#allocation31_spill] sm:$0xff] %v9720_v8 }
 0x1c0   : > { %v9698_v1 = vsel %vm1296_vm2, %v1330_v20, %v1332_v44  ;;  %v9701_v52 = vsel %vm1296_vm2, %v1332_v44, %v1334_v41  ;;  %v9704_v58 = vsel %vm1296_vm2, %v1378_v3, %v1380_v33  ;;  %v9707_v55 = vsel %vm1296_vm2, %v1380_v33, %v1382_v24  ;;  %v6841_v16 = vpop.f32.mrb[20].mxu0  ;;  %v6877_v60 = vpop.f32.mrb[20].mxu1  ;;  %7980 = vmatpush3.bf16.msra.mxu0 %v7977_v15  ;;  %v6188_v20 = vld [vmem:[%s10938_s1 + $0x440] sm:$0xff] }
 0x1c1   : > { %11026 = vst [vmem:[#allocation29_spill] sm:$0xff] %v9704_v58  ;;  %11027 = vst [vmem:[#allocation30_spill] sm:$0xff] %v9707_v55  ;;  %v1338_v3 = vrot.slane %v6841_v16, 7  ;;  %v1386_v44 = vrot.slane %v6877_v60, 7  ;;  %v1109_v58 = vpop.f32.mrb[21].mxu0  ;;  %v1229_v33 = vpop.f32.mrb[21].mxu1  ;;  %7443 = vmatmul.mubr.f32.gmra.mrb[126].mxu0 %v9690_v6  ;;  %7948 = vmatpush3.bf16.msra.mxu1 %v7945_v35  ;;  %v7949_v16 = vpack.c.bf16 %v6171_v56, %v6170_v0 }
 0x1c2   : > { %v8388_v55 = vld [vmem:[#allocation2 + $0x50] sm:$0xff]  ;;  %v1336_v15 = vrot.slane %v1109_v58, 7  ;;  %v1384_v19 = vrot.slane %v1229_v33, 7  ;;  %7445 = vmatprep.mubr.f32.mxu0 %v9692_v5  ;;  %7982 = vmatprep.subr.bf16.mxu0 %v7981_v36  ;;  %v7985_v60 = vpack.c.bf16 %v6189_v61, %v6188_v20  ;;  %v6173_v0 = vld [vmem:[%s10938_s1 + $0x3c8] sm:$0xff]  ;;  %v6191_v56 = vld [vmem:[%s10938_s1 + $0x458] sm:$0xff] }
 0x1c3   : > { %7235 = vmatmul.mubr.f32.gmra.mrb[30].mxu1 %v8388_v55  ;;  %v6172_v55 = vld [vmem:[%s10938_s1 + $0x3c0] sm:$0xff]  ;;  %7950 = vmatprep.subr.bf16.mxu1 %v7949_v16 }
 0x1c4   : > { %7237 = vmatprep.mubr.f32.mxu1 %v8389_v18  ;;  %v9728_v6 = vsel %vm1296_vm2, %v1334_v41, %v1336_v15  ;;  %v9731_v58 = vsel %vm1296_vm2, %v1336_v15, %v1338_v3  ;;  %v9734_v18 = vsel %vm1296_vm2, %v1382_v24, %v1384_v19  ;;  %v9737_v33 = vsel %vm1296_vm2, %v1384_v19, %v1386_v44  ;;  %v6844_v35 = vpop.f32.mrb[22].mxu0  ;;  %v6880_v5 = vpop.f32.mrb[22].mxu1  ;;  %v6190_v41 = vld [vmem:[%s10938_s1 + $0x450] sm:$0xff]  ;;  %v8390_v15 = vld [vmem:[#allocation2 + $0x60] sm:$0xff] }
 0x1c5   : > { %11030 = vst [vmem:[#allocation33_spill] sm:$0xff] %v9734_v18  ;;  %11031 = vst [vmem:[#allocation34_spill] sm:$0xff] %v9737_v33  ;;  %7984 = vmatpush3.bf16.msra.mxu0 %v7981_v36  ;;  %v1342_v24 = vrot.slane %v6844_v35, 7  ;;  %v1390_v20 = vrot.slane %v6880_v5, 7  ;;  %v1119_v61 = vpop.f32.mrb[23].mxu0  ;;  %v1239_v19 = vpop.f32.mrb[23].mxu1  ;;  %v7953_v35 = vpack.c.bf16 %v6173_v0, %v6172_v55  ;;  %7952 = vmatpush3.bf16.msra.mxu1 %v7949_v16 }
 0x1c6   : > { %7446 = vmatmul.mubr.f32.gmra.mrb[128].mxu0 %v9720_v8  ;;  %v1340_v36 = vrot.slane %v1119_v61, 7  ;;  %v1388_v33 = vrot.slane %v1239_v19, 7  ;;  %v8391_v18 = vld [vmem:[#allocation2 + $0x68] sm:$0xff]  ;;  %v9757_v5 = vld [vmem:[#allocation2 + $0x90] sm:$0xff]  ;;  %7986 = vmatprep.subr.bf16.mxu0 %v7985_v60  ;;  %v6175_v55 = vld [vmem:[%s10938_s1 + $0x3d8] sm:$0xff] }
 0x1c7   : > { %7238 = vmatmul.mubr.f32.gmra.mrb[32].mxu1 %v8390_v15  ;;  %7448 = vmatprep.mubr.f32.mxu0 %v9722_v13  ;;  %v9755_v29 = vsel %vm1296_vm2, %v1342_v24, %v11033_v12  ;;  %11034 = vst [vmem:[#allocation36_spill] sm:$0xff] %v9757_v5  ;;  %v7989_v15 = vpack.c.bf16 %v6191_v56, %v6190_v41  ;;  %v6174_v61 = vld [vmem:[%s10938_s1 + $0x3d0] sm:$0xff]  ;;  %v6192_v0 = vld [vmem:[%s10938_s1 + $0x460] sm:$0xff] }
 0x1c8   : > { %7240 = vmatprep.mubr.f32.mxu1 %v8391_v18  ;;  %v9763_v18 = vsel %vm1296_vm2, %v1338_v3, %v1340_v36  ;;  %v9766_v19 = vsel %vm1296_vm2, %v1340_v36, %v1342_v24  ;;  %v9769_v48 = vsel %vm1296_vm2, %v1386_v44, %v1388_v33  ;;  %v7019_v12 = vpop.f32.mrb[24].mxu0  ;;  %v6193_v3 = vld [vmem:[%s10938_s1 + $0x468] sm:$0xff]  ;;  %v8392_v44 = vld [vmem:[#allocation2 + $0x70] sm:$0xff]  ;;  %v9782_v16 = vsel %vm1296_vm2, %v1388_v33, %v1390_v20  ;;  %v8393_v24 = vld [vmem:[#allocation2 + $0x78] sm:$0xff] }
 0x1c9   : > { %11035 = vst [vmem:[#allocation37_spill] sm:$0xff] %v9769_v48  ;;  %7988 = vmatpush3.bf16.msra.mxu0 %v7985_v60  ;;  %v2183_v41 = vrot.slane %v7019_v12, 1  ;;  %v1894_v56 = vpop.f32.mrb[25].mxu0  ;;  %11036 = vst [vmem:[#allocation38_spill] sm:$0xff] %v9782_v16  ;;  %v9785_v36 = vld [vmem:[#allocation2 + $0x98] sm:$0xff]  ;;  %v9787_v48 = vld [vmem:[#allocation2 + $0xa0] sm:$0xff]  ;;  %7954 = vmatprep.subr.bf16.mxu1 %v7953_v35  ;;  %v7957_v12 = vpack.c.bf16 %v6175_v55, %v6174_v61  ;;  %v7993_v13 = vpack.c.bf16 %v6193_v3, %v6192_v0 }
 0x1ca   : > { %7449 = vmatmul.mubr.f32.gmra.mrb[130].mxu0 %v9750_v22  ;;  %v2182_v60 = vrot.slane %v1894_v56, 1  ;;  %11037 = vst [vmem:[#allocation39_spill] sm:$0xff] %v9785_v36  ;;  %7990 = vmatprep.subr.bf16.mxu0 %v7989_v15  ;;  %v11038_v33 = vrot.slane %v9493_v39, 7  ;;  %v6194_v61 = vld [vmem:[%s10938_s1 + $0x470] sm:$0xff]  ;;  %v6195_v55 = vld [vmem:[%s10938_s1 + $0x478] sm:$0xff]  ;;  %v8394_v3 = vld [vmem:[#allocation2 + $0x80] sm:$0xff] }
 0x1cb   : > { %7241 = vmatmul.mubr.f32.gmra.mrb[34].mxu1 %v8392_v44  ;;  %7451 = vmatprep.mubr.f32.mxu0 %v9757_v5  ;;  %v6176_v44 = vld [vmem:[%s10938_s1 + $0x3e0] sm:$0xff]  ;;  %v6177_v5 = vld [vmem:[%s10938_s1 + $0x3e8] sm:$0xff]  ;;  %v9811_v22 = vld [vmem:[#allocation2 + $0xb0] sm:$0xff] }
 0x1cc   : > { %7243 = vmatprep.mubr.f32.mxu1 %v8393_v24  ;;  %v1440_v20 = vsel %vm1296_vm2, 0.0, %v11038_v33  ;;  %v2184_v56 = vsel %vm2181_vm3, %v2182_v60, %v2183_v41  ;;  %v7022_v24 = vpop.f32.mrb[26].mxu0  ;;  %7956 = vmatpush3.bf16.msra.mxu1 %v7953_v35  ;;  %v8395_v60 = vld [vmem:[#allocation2 + $0x88] sm:$0xff]  ;;  %v7961_v16 = vpack.c.bf16 %v6177_v5, %v6176_v44 }
 0x1cd   : > { %7992 = vmatpush3.bf16.msra.mxu0 %v7989_v15  ;;  %v2187_v39 = vrot.slane %v7022_v24, 1  ;;  %v1904_v0 = vpop.f32.mrb[27].mxu0  ;;  %v9806_v35 = vadd.f32 %v2184_v56, %v1440_v20  ;;  %v9809_v33 = vld [vmem:[#allocation2 + $0xa8] sm:$0xff]  ;;  %7958 = vmatprep.subr.bf16.mxu1 %v7957_v12  ;;  %v7997_v24 = vpack.c.bf16 %v6195_v55, %v6194_v61  ;;  %v6178_v20 = vld [vmem:[%s10938_s1 + $0x3f0] sm:$0xff]  ;;  %v6179_v56 = vld [vmem:[%s10938_s1 + $0x3f8] sm:$0xff] }
 0x1ce   : > { %7452 = vmatmul.mubr.f32.gmra.mrb[132].mxu0 %v9785_v36  ;;  %v2185_v15 = vrot.slane %v1904_v0, 1  ;;  %7994 = vmatprep.subr.bf16.mxu0 %v7993_v13  ;;  %v8396_v61 = vld [vmem:[#allocation2 + $0x90] sm:$0xff]  ;;  %v9829_v55 = vld [vmem:[#allocation2 + $0xb8] sm:$0xff] }
 0x1cf   : > { %7244 = vmatmul.mubr.f32.gmra.mrb[36].mxu1 %v8394_v3  ;;  %7454 = vmatprep.mubr.f32.mxu0 %v9787_v48 }
 0x1d0   : > { %7246 = vmatprep.mubr.f32.mxu1 %v8395_v60  ;;  %v2186_v8 = vsel %vm2181_vm3, %v2183_v41, %v2185_v15  ;;  %v2188_v3 = vsel %vm2181_vm3, %v2185_v15, %v2187_v39  ;;  %v7025_v36 = vpop.f32.mrb[28].mxu0  ;;  %7960 = vmatpush3.bf16.msra.mxu1 %v7957_v12  ;;  %v8397_v12 = vld [vmem:[#allocation2 + $0x98] sm:$0xff] }
 0x1d1   : > { %7996 = vmatpush3.bf16.msra.mxu0 %v7993_v13  ;;  %v9822_v0 = vadd.f32 %v2186_v8, %v9506_v7  ;;  %v9825_v5 = vadd.f32 %v2188_v3, %v9518_v25  ;;  %v2191_v41 = vrot.slane %v7025_v36, 1  ;;  %v1914_v44 = vpop.f32.mrb[29].mxu0  ;;  %7962 = vmatprep.subr.bf16.mxu1 %v7961_v16  ;;  %v7965_v7 = vpack.c.bf16 %v6179_v56, %v6178_v20  ;;  %v8399_v56 = vld [vmem:[#allocation2 + $0xa8] sm:$0xff] }
 0x1d2   : > { %7455 = vmatmul.mubr.f32.gmra.mrb[134].mxu0 %v9809_v33  ;;  %v2189_v13 = vrot.slane %v1914_v44, 1  ;;  %7998 = vmatprep.subr.bf16.mxu0 %v7997_v24 }
 0x1d3   : > { %7247 = vmatmul.mubr.f32.gmra.mrb[38].mxu1 %v8396_v61  ;;  %7457 = vmatprep.mubr.f32.mxu0 %v9811_v22  ;;  %v8398_v61 = vld [vmem:[#allocation2 + $0xa0] sm:$0xff] }
 0x1d4   : > { %7249 = vmatprep.mubr.f32.mxu1 %v8397_v12  ;;  %v2190_v8 = vsel %vm2181_vm3, %v2187_v39, %v2189_v13  ;;  %v2192_v25 = vsel %vm2181_vm3, %v2189_v13, %v2191_v41  ;;  %v7028_v36 = vpop.f32.mrb[30].mxu0  ;;  %7964 = vmatpush3.bf16.msra.mxu1 %v7961_v16 }
 0x1d5   : > { %8000 = vmatpush3.bf16.msra.mxu0 %v7997_v24  ;;  %v9834_v15 = vadd.f32 %v2190_v8, %v9521_v38  ;;  %v9837_v60 = vadd.f32 %v2192_v25, %v9534_v34  ;;  %v2195_v3 = vrot.slane %v7028_v36, 1  ;;  %v1924_v44 = vpop.f32.mrb[31].mxu0  ;;  %7966 = vmatprep.subr.bf16.mxu1 %v7965_v7  ;;  %v8400_v8 = vld [vmem:[#allocation2 + $0xb0] sm:$0xff]  ;;  %v8401_v36 = vld [vmem:[#allocation2 + $0xb8] sm:$0xff] }
 0x1d6   : > { %7458 = vmatmul.mubr.f32.gmra.mrb[136].mxu0 %v9829_v55  ;;  %v2193_v20 = vrot.slane %v1924_v44, 1 }
 0x1d7   : > { %7250 = vmatmul.mubr.f32.gmra.mrb[40].mxu1 %v8398_v61  ;;  %7460 = vmatprep.mubr.f32.mxu0 %v9459_v43 }
 0x1d8   : > { %7252 = vmatprep.mubr.f32.mxu1 %v8399_v56  ;;  %v2194_v16 = vsel %vm2181_vm3, %v2191_v41, %v2193_v20  ;;  %v2196_v38 = vsel %vm2181_vm3, %v2193_v20, %v2195_v3  ;;  %v7031_v39 = vpop.f32.mrb[32].mxu0  ;;  %7968 = vmatpush3.bf16.msra.mxu1 %v7965_v7  ;;  %v9851_v41 = vld [vmem:[#allocation2 + $0xd8] sm:$0xff]  ;;  %v9853_v7 = vld [vmem:[#allocation2 + $0xe0] sm:$0xff] }
 0x1d9   : > { %v9844_v34 = vadd.f32 %v2194_v16, %v9537_v57  ;;  %v9847_v24 = vadd.f32 %v2196_v38, %v9550_v42  ;;  %v2199_v13 = vrot.slane %v7031_v39, 1  ;;  %v1934_v12 = vpop.f32.mrb[33].mxu0  ;;  %v9869_v39 = vld [vmem:[#allocation2 + $0x120] sm:$0xff] }
 0x1da   : > { %7461 = vmatmul.mubr.f32.gmra.mrb[138].mxu0 %v9461_v49  ;;  %v2197_v25 = vrot.slane %v1934_v12, 1 }
 0x1db   : > { %7253 = vmatmul.mubr.f32.gmra.mrb[42].mxu1 %v8400_v8  ;;  %7463 = vmatprep.mubr.f32.mxu0 %v9467_v53 }
 0x1dc   : > { %7255 = vmatprep.mubr.f32.mxu1 %v8401_v36  ;;  %v2198_v57 = vsel %vm2181_vm3, %v2195_v3, %v2197_v25  ;;  %v2200_v42 = vsel %vm2181_vm3, %v2197_v25, %v2199_v13  ;;  %v7034_v44 = vpop.f32.mrb[34].mxu0  ;;  %v9867_v3 = vld [vmem:[#allocation2 + $0xe8] sm:$0xff] }
 0x1dd   : > { %v9858_v61 = vadd.f32 %v2198_v57, %v9553_v10  ;;  %v9861_v20 = vadd.f32 %v2200_v42, %v9570_v30  ;;  %v2203_v56 = vrot.slane %v7034_v44, 1  ;;  %v1944_v16 = vpop.f32.mrb[35].mxu0  ;;  %v8402_v57 = vld [vmem:[#allocation2 + $0x108] sm:$0xff]  ;;  %v9884_v42 = vld [vmem:[#allocation2 + $0x130] sm:$0xff] }
 0x1de   : > { %7464 = vmatmul.mubr.f32.gmra.mrb[140].mxu0 %v9851_v41  ;;  %v2201_v38 = vrot.slane %v1944_v16, 1  ;;  %11039 = vst [vmem:[#allocation40_spill] sm:$0xff] %v9884_v42 }
 0x1df   : > { %7256 = vmatmul.mubr.f32.gmra.mrb[44].mxu1 %v9459_v43  ;;  %7466 = vmatprep.mubr.f32.mxu0 %v9853_v7 }
 0x1e0   : > { %7258 = vmatprep.mubr.f32.mxu1 %v9461_v49  ;;  %v2202_v10 = vsel %vm2181_vm3, %v2199_v13, %v2201_v38  ;;  %v2204_v30 = vsel %vm2181_vm3, %v2201_v38, %v2203_v56  ;;  %v7037_v12 = vpop.f32.mrb[36].mxu0  ;;  %v9882_v13 = vld [vmem:[#allocation2 + $0x128] sm:$0xff] }
 0x1e1   : > { %v9874_v8 = vadd.f32 %v2202_v10, %v9573_v37  ;;  %v9877_v43 = vadd.f32 %v2204_v30, %v9590_v40  ;;  %v2207_v25 = vrot.slane %v7037_v12, 1  ;;  %v1954_v36 = vpop.f32.mrb[37].mxu0  ;;  %v8403_v30 = vld [vmem:[#allocation2 + $0x110] sm:$0xff] }
 0x1e2   : > { %7467 = vmatmul.mubr.f32.gmra.mrb[142].mxu0 %v9867_v3  ;;  %v2205_v49 = vrot.slane %v1954_v36, 1  ;;  %v8404_v36 = vld [vmem:[#allocation2 + $0x118] sm:$0xff] }
 0x1e3   : > { %7259 = vmatmul.mubr.f32.gmra.mrb[46].mxu1 %v9467_v53  ;;  %7469 = vmatprep.mubr.f32.mxu0 %v9869_v39 }
 0x1e4   : > { %7261 = vmatprep.mubr.f32.mxu1 %v8402_v57  ;;  %v2206_v37 = vsel %vm2181_vm3, %v2203_v56, %v2205_v49  ;;  %v2208_v40 = vsel %vm2181_vm3, %v2205_v49, %v2207_v25  ;;  %v7040_v44 = vpop.f32.mrb[38].mxu0  ;;  %v9896_v56 = vld [vmem:[#allocation2 + $0x138] sm:$0xff]  ;;  %v9898_v49 = vld [vmem:[#allocation2 + $0x140] sm:$0xff] }
 0x1e5   : > { %v9889_v16 = vadd.f32 %v2206_v37, %v9593_v45  ;;  %v9892_v53 = vadd.f32 %v2208_v40, %v9613_v23  ;;  %v2211_v38 = vrot.slane %v7040_v44, 1  ;;  %v1964_v10 = vpop.f32.mrb[39].mxu0  ;;  %11040 = vst [vmem:[#allocation41_spill] sm:$0xff] %v9896_v56  ;;  %11041 = vst [vmem:[#allocation42_spill] sm:$0xff] %v9898_v49 }
 0x1e6   : > { %7470 = vmatmul.mubr.f32.gmra.mrb[144].mxu0 %v9882_v13  ;;  %v2209_v12 = vrot.slane %v1964_v10, 1 }
 0x1e7   : > { %7262 = vmatmul.mubr.f32.gmra.mrb[48].mxu1 %v8403_v30  ;;  %7472 = vmatprep.mubr.f32.mxu0 %v9884_v42  ;;  %v8405_v30 = vld [vmem:[#allocation2 + $0x120] sm:$0xff]  ;;  %v8406_v42 = vld [vmem:[#allocation2 + $0x128] sm:$0xff] }
 0x1e8   : > { %7264 = vmatprep.mubr.f32.mxu1 %v8404_v36  ;;  %v2210_v45 = vsel %vm2181_vm3, %v2207_v25, %v2209_v12  ;;  %v2212_v23 = vsel %vm2181_vm3, %v2209_v12, %v2211_v38  ;;  %v7043_v57 = vpop.f32.mrb[40].mxu0  ;;  %v9910_v25 = vld [vmem:[#allocation2 + $0x148] sm:$0xff]  ;;  %v9912_v12 = vld [vmem:[#allocation2 + $0x150] sm:$0xff] }
 0x1e9   : > { %v9903_v37 = vadd.f32 %v2210_v45, %v9616_v27  ;;  %v9906_v40 = vadd.f32 %v2212_v23, %v9644_v54  ;;  %v2215_v44 = vrot.slane %v7043_v57, 1  ;;  %v1974_v10 = vpop.f32.mrb[41].mxu0  ;;  %11042 = vst [vmem:[#allocation43_spill] sm:$0xff] %v9910_v25  ;;  %11043 = vst [vmem:[#allocation44_spill] sm:$0xff] %v9912_v12 }
 0x1ea   : > { %7473 = vmatmul.mubr.f32.gmra.mrb[146].mxu0 %v9896_v56  ;;  %v2213_v36 = vrot.slane %v1974_v10, 1  ;;  %v8408_v56 = vld [vmem:[#allocation2 + $0x138] sm:$0xff] }
 0x1eb   : > { %7265 = vmatmul.mubr.f32.gmra.mrb[50].mxu1 %v8405_v30  ;;  %7475 = vmatprep.mubr.f32.mxu0 %v9898_v49 }
 0x1ec   : > { %7267 = vmatprep.mubr.f32.mxu1 %v8406_v42  ;;  %v2214_v27 = vsel %vm2181_vm3, %v2211_v38, %v2213_v36  ;;  %v2216_v54 = vsel %vm2181_vm3, %v2213_v36, %v2215_v44  ;;  %v7046_v45 = vpop.f32.mrb[42].mxu0  ;;  %v8407_v42 = vld [vmem:[#allocation2 + $0x130] sm:$0xff]  ;;  %v9924_v38 = vld [vmem:[#allocation2 + $0x158] sm:$0xff]  ;;  %v9926_v36 = vld [vmem:[#allocation2 + $0x160] sm:$0xff] }
 0x1ed   : > { %v9917_v23 = vadd.f32 %v2214_v27, %v9647_v63  ;;  %v9920_v57 = vadd.f32 %v2216_v54, %v9671_v4  ;;  %v2219_v10 = vrot.slane %v7046_v45, 1  ;;  %v1984_v30 = vpop.f32.mrb[43].mxu0  ;;  %11044 = vst [vmem:[#allocation45_spill] sm:$0xff] %v9924_v38  ;;  %11045 = vst [vmem:[#allocation46_spill] sm:$0xff] %v9926_v36 }
 0x1ee   : > { %7476 = vmatmul.mubr.f32.gmra.mrb[148].mxu0 %v9910_v25  ;;  %v2217_v49 = vrot.slane %v1984_v30, 1  ;;  %v8410_v25 = vld [vmem:[#allocation2 + $0x148] sm:$0xff] }
 0x1ef   : > { %7268 = vmatmul.mubr.f32.gmra.mrb[52].mxu1 %v8407_v42  ;;  %7478 = vmatprep.mubr.f32.mxu0 %v9912_v12 }
 0x1f0   : > { %7270 = vmatprep.mubr.f32.mxu1 %v8408_v56  ;;  %v2218_v63 = vsel %vm2181_vm3, %v2215_v44, %v2217_v49  ;;  %v2220_v4 = vsel %vm2181_vm3, %v2217_v49, %v2219_v10  ;;  %v7049_v27 = vpop.f32.mrb[44].mxu0  ;;  %v8409_v56 = vld [vmem:[#allocation2 + $0x140] sm:$0xff]  ;;  %v9938_v44 = vld [vmem:[#allocation2 + $0x168] sm:$0xff]  ;;  %v9940_v49 = vld [vmem:[#allocation2 + $0x170] sm:$0xff] }
 0x1f1   : > { %v9931_v54 = vadd.f32 %v2218_v63, %v9674_v32  ;;  %v9934_v45 = vadd.f32 %v2220_v4, %v9698_v1  ;;  %v2223_v30 = vrot.slane %v7049_v27, 1  ;;  %v1994_v42 = vpop.f32.mrb[45].mxu0  ;;  %11046 = vst [vmem:[#allocation47_spill] sm:$0xff] %v9938_v44  ;;  %11047 = vst [vmem:[#allocation48_spill] sm:$0xff] %v9940_v49 }
 0x1f2   : > { %7479 = vmatmul.mubr.f32.gmra.mrb[150].mxu0 %v9924_v38  ;;  %v2221_v12 = vrot.slane %v1994_v42, 1  ;;  %v8412_v38 = vld [vmem:[#allocation2 + $0x158] sm:$0xff] }
 0x1f3   : > { %7271 = vmatmul.mubr.f32.gmra.mrb[54].mxu1 %v8409_v56  ;;  %7481 = vmatprep.mubr.f32.mxu0 %v9926_v36 }
 0x1f4   : > { %7273 = vmatprep.mubr.f32.mxu1 %v8410_v25  ;;  %v2222_v32 = vsel %vm2181_vm3, %v2219_v10, %v2221_v12  ;;  %v2224_v1 = vsel %vm2181_vm3, %v2221_v12, %v2223_v30  ;;  %v7052_v63 = vpop.f32.mrb[46].mxu0  ;;  %v8411_v25 = vld [vmem:[#allocation2 + $0x150] sm:$0xff]  ;;  %v9952_v10 = vld [vmem:[#allocation2 + $0x178] sm:$0xff]  ;;  %v9954_v12 = vld [vmem:[#allocation2 + $0x180] sm:$0xff] }
 0x1f5   : > { %v9945_v4 = vadd.f32 %v2222_v32, %v9701_v52  ;;  %v9948_v27 = vadd.f32 %v2224_v1, %v9728_v6  ;;  %v2227_v42 = vrot.slane %v7052_v63, 1  ;;  %v2004_v56 = vpop.f32.mrb[47].mxu0  ;;  %11048 = vst [vmem:[#allocation49_spill] sm:$0xff] %v9952_v10  ;;  %11049 = vst [vmem:[#allocation50_spill] sm:$0xff] %v9954_v12 }
 0x1f6   : > { %7482 = vmatmul.mubr.f32.gmra.mrb[152].mxu0 %v9938_v44  ;;  %v2225_v36 = vrot.slane %v2004_v56, 1  ;;  %v8414_v44 = vld [vmem:[#allocation2 + $0x168] sm:$0xff] }
 0x1f7   : > { %7274 = vmatmul.mubr.f32.gmra.mrb[56].mxu1 %v8411_v25  ;;  %7484 = vmatprep.mubr.f32.mxu0 %v9940_v49 }
 0x1f8   : > { %7276 = vmatprep.mubr.f32.mxu1 %v8412_v38  ;;  %v2226_v52 = vsel %vm2181_vm3, %v2223_v30, %v2225_v36  ;;  %v2228_v6 = vsel %vm2181_vm3, %v2225_v36, %v2227_v42  ;;  %v7055_v32 = vpop.f32.mrb[48].mxu0  ;;  %v8413_v38 = vld [vmem:[#allocation2 + $0x160] sm:$0xff]  ;;  %v9966_v30 = vld [vmem:[#allocation2 + $0x188] sm:$0xff]  ;;  %v9968_v36 = vld [vmem:[#allocation2 + $0x190] sm:$0xff] }
 0x1f9   : > { %v9959_v1 = vadd.f32 %v2226_v52, %v9731_v58  ;;  %v9962_v63 = vadd.f32 %v2228_v6, %v9763_v18  ;;  %v2231_v56 = vrot.slane %v7055_v32, 1  ;;  %v2014_v25 = vpop.f32.mrb[49].mxu0  ;;  %11050 = vst [vmem:[#allocation51_spill] sm:$0xff] %v9966_v30  ;;  %11051 = vst [vmem:[#allocation52_spill] sm:$0xff] %v9968_v36 }
 0x1fa   : > { %7485 = vmatmul.mubr.f32.gmra.mrb[154].mxu0 %v9952_v10  ;;  %v2229_v49 = vrot.slane %v2014_v25, 1  ;;  %v8416_v10 = vld [vmem:[#allocation2 + $0x178] sm:$0xff] }
 0x1fb   : > { %7277 = vmatmul.mubr.f32.gmra.mrb[58].mxu1 %v8413_v38  ;;  %7487 = vmatprep.mubr.f32.mxu0 %v9954_v12 }
 0x1fc   : > { %7279 = vmatprep.mubr.f32.mxu1 %v8414_v44  ;;  %v2230_v58 = vsel %vm2181_vm3, %v2227_v42, %v2229_v49  ;;  %v2232_v18 = vsel %vm2181_vm3, %v2229_v49, %v2231_v56  ;;  %v7058_v52 = vpop.f32.mrb[50].mxu0  ;;  %v8415_v44 = vld [vmem:[#allocation2 + $0x170] sm:$0xff]  ;;  %v9980_v42 = vld [vmem:[#allocation2 + $0x198] sm:$0xff]  ;;  %v9982_v49 = vld [vmem:[#allocation2 + $0x1a0] sm:$0xff] }
 0x1fd   : > { %v9973_v6 = vadd.f32 %v2230_v58, %v9766_v19  ;;  %v9976_v32 = vadd.f32 %v2232_v18, %v9755_v29  ;;  %v2235_v25 = vrot.slane %v7058_v52, 1  ;;  %v2024_v38 = vpop.f32.mrb[51].mxu0  ;;  %11052 = vst [vmem:[#allocation53_spill] sm:$0xff] %v9982_v49 }
 0x1fe   : > { %7488 = vmatmul.mubr.f32.gmra.mrb[156].mxu0 %v9966_v30  ;;  %v2233_v12 = vrot.slane %v2024_v38, 1  ;;  %v8418_v30 = vld [vmem:[#allocation2 + $0x188] sm:$0xff] }
 0x1ff   : > { %7280 = vmatmul.mubr.f32.gmra.mrb[60].mxu1 %v8415_v44  ;;  %7490 = vmatprep.mubr.f32.mxu0 %v9968_v36 }
 0x200   : > { %7282 = vmatprep.mubr.f32.mxu1 %v8416_v10  ;;  %v2234_v19 = vsel %vm2181_vm3, %v2231_v56, %v2233_v12  ;;  %v2236_v29 = vsel %vm2181_vm3, %v2233_v12, %v2235_v25  ;;  %v7061_v58 = vpop.f32.mrb[52].mxu0  ;;  %v8417_v10 = vld [vmem:[#allocation2 + $0x180] sm:$0xff]  ;;  %v9994_v56 = vld [vmem:[#allocation2 + $0x1a8] sm:$0xff] }
 0x201   : > { %v9987_v18 = vadd.f32 %v2234_v19, %v9511_v9  ;;  %v9990_v52 = vadd.f32 %v2236_v29, %v9524_v26  ;;  %v2239_v38 = vrot.slane %v7061_v58, 1  ;;  %v2034_v44 = vpop.f32.mrb[53].mxu0 }
 0x202   : > { %7491 = vmatmul.mubr.f32.gmra.mrb[158].mxu0 %v9980_v42  ;;  %v2237_v36 = vrot.slane %v2034_v44, 1  ;;  %v8419_v44 = vld [vmem:[#allocation2 + $0x190] sm:$0xff] }
 0x203   : > { %7283 = vmatmul.mubr.f32.gmra.mrb[62].mxu1 %v8417_v10  ;;  %7493 = vmatprep.mubr.f32.mxu0 %v9982_v49  ;;  %v8420_v49 = vld [vmem:[#allocation2 + $0x198] sm:$0xff] }
 0x204   : > { %7285 = vmatprep.mubr.f32.mxu1 %v8418_v30  ;;  %v2238_v12 = vsel %vm2181_vm3, %v2235_v25, %v2237_v36  ;;  %v2240_v9 = vsel %vm2181_vm3, %v2237_v36, %v2239_v38  ;;  %v7064_v19 = vpop.f32.mrb[54].mxu0 }
 0x205   : > { %v9999_v26 = vadd.f32 %v2238_v12, %v9527_v31  ;;  %v10002_v29 = vadd.f32 %v2240_v9, %v9540_v51  ;;  %v2243_v58 = vrot.slane %v7064_v19, 1  ;;  %v2044_v10 = vpop.f32.mrb[55].mxu0 }
 0x206   : > { %7494 = vmatmul.mubr.f32.gmra.mrb[160].mxu0 %v9994_v56  ;;  %v2241_v30 = vrot.slane %v2044_v10, 1  ;;  %v8422_v10 = vld [vmem:[#allocation2 + $0x1a8] sm:$0xff] }
 0x207   : > { %7286 = vmatmul.mubr.f32.gmra.mrb[64].mxu1 %v8419_v44  ;;  %7496 = vmatprep.mubr.f32.mxu0 %v9565_v14  ;;  %v8421_v44 = vld [vmem:[#allocation2 + $0x1a0] sm:$0xff] }
 0x208   : > { %7288 = vmatprep.mubr.f32.mxu1 %v8420_v49  ;;  %v2242_v36 = vsel %vm2181_vm3, %v2239_v38, %v2241_v30  ;;  %v2244_v25 = vsel %vm2181_vm3, %v2241_v30, %v2243_v58  ;;  %v7067_v31 = vpop.f32.mrb[56].mxu0  ;;  %v10016_v38 = vld [vmem:[#allocation2 + $0x1c8] sm:$0xff]  ;;  %v10018_v30 = vld [vmem:[#allocation2 + $0x1d0] sm:$0xff] }
 0x209   : > { %v10009_v12 = vadd.f32 %v2242_v36, %v9543_v59  ;;  %v10012_v51 = vadd.f32 %v2244_v25, %v9556_v11  ;;  %v2247_v9 = vrot.slane %v7067_v31, 1  ;;  %v2054_v19 = vpop.f32.mrb[57].mxu0  ;;  %11053 = vst [vmem:[#allocation54_spill] sm:$0xff] %v10016_v38  ;;  %11054 = vst [vmem:[#allocation55_spill] sm:$0xff] %v10018_v30 }
 0x20a   : > { %7497 = vmatmul.mubr.f32.gmra.mrb[162].mxu0 %v9567_v28  ;;  %v2245_v49 = vrot.slane %v2054_v19, 1 }
 0x20b   : > { %7289 = vmatmul.mubr.f32.gmra.mrb[66].mxu1 %v8421_v44  ;;  %7499 = vmatprep.mubr.f32.mxu0 %v9585_v62 }
 0x20c   : > { %7291 = vmatprep.mubr.f32.mxu1 %v8422_v10  ;;  %v2246_v59 = vsel %vm2181_vm3, %v2243_v58, %v2245_v49  ;;  %v2248_v11 = vsel %vm2181_vm3, %v2245_v49, %v2247_v9  ;;  %v7070_v36 = vpop.f32.mrb[58].mxu0  ;;  %v10032_v58 = vld [vmem:[#allocation2 + $0x1d8] sm:$0xff] }
 0x20d   : > { %v10023_v25 = vadd.f32 %v2246_v59, %v9559_v21  ;;  %v10026_v31 = vadd.f32 %v2248_v11, %v9576_v46  ;;  %v2251_v19 = vrot.slane %v7070_v36, 1  ;;  %v2064_v44 = vpop.f32.mrb[59].mxu0  ;;  %11055 = vst [vmem:[#allocation56_spill] sm:$0xff] %v10032_v58 }
 0x20e   : > { %7500 = vmatmul.mubr.f32.gmra.mrb[164].mxu0 %v10016_v38  ;;  %v2249_v10 = vrot.slane %v2064_v44, 1  ;;  %v11092_v38 = vld [vmem:[#allocation35_spill] sm:$0xff] }
 0x20f   : > { %7292 = vmatmul.mubr.f32.gmra.mrb[68].mxu1 %v9565_v14  ;;  %7502 = vmatprep.mubr.f32.mxu0 %v10018_v30 }
 0x210   : > { %7294 = vmatprep.mubr.f32.mxu1 %v9567_v28  ;;  %v2250_v49 = vsel %vm2181_vm3, %v2247_v9, %v2249_v10  ;;  %v2252_v21 = vsel %vm2181_vm3, %v2249_v10, %v2251_v19  ;;  %v7073_v59 = vpop.f32.mrb[60].mxu0 }
 0x211   : > { %v10037_v46 = vadd.f32 %v2250_v49, %v9579_v2  ;;  %v10040_v11 = vadd.f32 %v2252_v21, %v9596_v17  ;;  %v2255_v14 = vrot.slane %v7073_v59, 1  ;;  %v2074_v36 = vpop.f32.mrb[61].mxu0  ;;  %v11058_v17 = vld [vmem:[#allocation16_spill] sm:$0xff]  ;;  %v11060_v59 = vld [vmem:[#allocation15_spill] sm:$0xff] }
 0x212   : > { %7503 = vmatmul.mubr.f32.gmra.mrb[166].mxu0 %v10032_v58  ;;  %v2253_v28 = vrot.slane %v2074_v36, 1  ;;  %v11061_v58 = vld [vmem:[#allocation18_spill] sm:$0xff] }
 0x213   : > { %11056 = vst [vmem:[#allocation57_spill] sm:$0xff] %v10040_v11  ;;  %7295 = vmatmul.mubr.f32.gmra.mrb[70].mxu1 %v9585_v62  ;;  %7641 = vmatprep.mubr.f32.mxu0 %v9587_v50 }
 0x214   : > { %7537 = vmatprep.mubr.f32.mxu1 %v9587_v50  ;;  %v2254_v9 = vsel %vm2181_vm3, %v2251_v19, %v2253_v28  ;;  %v2256_v44 = vsel %vm2181_vm3, %v2253_v28, %v2255_v14  ;;  %v7076_v2 = vpop.f32.mrb[62].mxu0  ;;  %v11062_v28 = vld [vmem:[#allocation17_spill] sm:$0xff] }
 0x215   : > { %v10049_v10 = vadd.f32 %v2254_v9, %v9599_v47  ;;  %v10052_v49 = vadd.f32 %v2256_v44, %v11058_v17  ;;  %v2259_v21 = vrot.slane %v7076_v2, 1  ;;  %v2084_v62 = vpop.f32.mrb[63].mxu0  ;;  %v11064_v44 = vld [vmem:[#allocation21_spill] sm:$0xff] }
 0x216   : > { %7642 = vmatmul.mubr.f32.vlgmr.msra.gmra.mrb[168].mxu0 %v11060_v59  ;;  %v2257_v36 = vrot.slane %v2084_v62, 1 }
 0x217   : > { %11057 = vst [vmem:[#allocation58_spill] sm:$0xff] %v10049_v10  ;;  %11059 = vst [vmem:[#allocation16_spill] sm:$0xff] %v10052_v49  ;;  %7538 = vmatmul.mubr.f32.vlgmr.msra.gmra.mrb[24].mxu1 %v11060_v59  ;;  %7644 = vmatprep.mubr.f32.mxu0 %v11061_v58  ;;  %v11066_v10 = vld [vmem:[#allocation19_spill] sm:$0xff]  ;;  %v11067_v59 = vld [vmem:[#allocation20_spill] sm:$0xff] }
 0x218   : > { %7540 = vmatprep.mubr.f32.mxu1 %v11061_v58  ;;  %v2258_v50 = vsel %vm2181_vm3, %v2255_v14, %v2257_v36  ;;  %v2260_v19 = vsel %vm2181_vm3, %v2257_v36, %v2259_v21  ;;  %v7079_v47 = vpop.f32.mrb[64].mxu0 }
 0x219   : > { %v10061_v9 = vadd.f32 %v2258_v50, %v11062_v28  ;;  %v10064_v2 = vadd.f32 %v2260_v19, %v11064_v44  ;;  %v2263_v17 = vrot.slane %v7079_v47, 1  ;;  %v2094_v49 = vpop.f32.mrb[65].mxu0  ;;  %v11068_v50 = vld [vmem:[#allocation22_spill] sm:$0xff]  ;;  %v11070_v19 = vld [vmem:[#allocation25_spill] sm:$0xff] }
 0x21a   : > { %7645 = vmatmul.mubr.f32.gmra.mrb[170].mxu0 %v11066_v10  ;;  %v2261_v62 = vrot.slane %v2094_v49, 1  ;;  %v11073_v49 = vld [vmem:[#allocation24_spill] sm:$0xff] }
 0x21b   : > { %11063 = vst [vmem:[#allocation15_spill] sm:$0xff] %v10061_v9  ;;  %11065 = vst [vmem:[#allocation18_spill] sm:$0xff] %v10064_v2  ;;  %7541 = vmatmul.mubr.f32.gmra.mrb[26].mxu1 %v11066_v10  ;;  %7647 = vmatprep.mubr.f32.mxu0 %v11067_v59  ;;  %v11072_v9 = vld [vmem:[#allocation23_spill] sm:$0xff] }
 0x21c   : > { %7543 = vmatprep.mubr.f32.mxu1 %v11067_v59  ;;  %v2262_v58 = vsel %vm2181_vm3, %v2259_v21, %v2261_v62  ;;  %v2264_v14 = vsel %vm2181_vm3, %v2261_v62, %v2263_v17  ;;  %v7082_v36 = vpop.f32.mrb[66].mxu0 }
 0x21d   : > { %v10073_v28 = vadd.f32 %v2262_v58, %v11068_v50  ;;  %v10076_v47 = vadd.f32 %v2264_v14, %v11070_v19  ;;  %v2267_v44 = vrot.slane %v7082_v36, 1  ;;  %v2104_v2 = vpop.f32.mrb[67].mxu0  ;;  %v11074_v58 = vld [vmem:[#allocation26_spill] sm:$0xff]  ;;  %v11076_v14 = vld [vmem:[#allocation29_spill] sm:$0xff] }
 0x21e   : > { %7648 = vmatmul.mubr.f32.gmra.mrb[172].mxu0 %v11072_v9  ;;  %v2265_v10 = vrot.slane %v2104_v2, 1  ;;  %v11079_v2 = vld [vmem:[#allocation28_spill] sm:$0xff] }
 0x21f   : > { %11069 = vst [vmem:[#allocation17_spill] sm:$0xff] %v10073_v28  ;;  %11071 = vst [vmem:[#allocation21_spill] sm:$0xff] %v10076_v47  ;;  %7544 = vmatmul.mubr.f32.gmra.mrb[28].mxu1 %v11072_v9  ;;  %7650 = vmatprep.mubr.f32.mxu0 %v11073_v49  ;;  %v11078_v28 = vld [vmem:[#allocation27_spill] sm:$0xff] }
 0x220   : > { %7546 = vmatprep.mubr.f32.mxu1 %v11073_v49  ;;  %v2266_v21 = vsel %vm2181_vm3, %v2263_v17, %v2265_v10  ;;  %v2268_v62 = vsel %vm2181_vm3, %v2265_v10, %v2267_v44  ;;  %v7085_v59 = vpop.f32.mrb[68].mxu0 }
 0x221   : > { %v10085_v50 = vadd.f32 %v2266_v21, %v11074_v58  ;;  %v10088_v36 = vadd.f32 %v2268_v62, %v11076_v14  ;;  %v2271_v19 = vrot.slane %v7085_v59, 1  ;;  %v2114_v47 = vpop.f32.mrb[69].mxu0  ;;  %v11080_v21 = vld [vmem:[#allocation30_spill] sm:$0xff]  ;;  %v11082_v62 = vld [vmem:[#allocation33_spill] sm:$0xff] }
 0x222   : > { %7651 = vmatmul.mubr.f32.gmra.mrb[174].mxu0 %v11078_v28  ;;  %v2269_v9 = vrot.slane %v2114_v47, 1  ;;  %v11085_v47 = vld [vmem:[#allocation32_spill] sm:$0xff] }
 0x223   : > { %11075 = vst [vmem:[#allocation19_spill] sm:$0xff] %v10085_v50  ;;  %11077 = vst [vmem:[#allocation20_spill] sm:$0xff] %v10088_v36  ;;  %7547 = vmatmul.mubr.f32.gmra.mrb[30].mxu1 %v11078_v28  ;;  %7653 = vmatprep.mubr.f32.mxu0 %v11079_v2  ;;  %v11084_v50 = vld [vmem:[#allocation31_spill] sm:$0xff] }
 0x224   : > { %7549 = vmatprep.mubr.f32.mxu1 %v11079_v2  ;;  %v2270_v17 = vsel %vm2181_vm3, %v2267_v44, %v2269_v9  ;;  %v2272_v10 = vsel %vm2181_vm3, %v2269_v9, %v2271_v19  ;;  %v7088_v49 = vpop.f32.mrb[70].mxu0  ;;  %v11086_v9 = vld [vmem:[#allocation38_spill] sm:$0xff] }
 0x225   : > { %v10097_v58 = vadd.f32 %v2270_v17, %v11080_v21  ;;  %v10100_v59 = vadd.f32 %v2272_v10, %v11082_v62  ;;  %v2275_v14 = vrot.slane %v7088_v49, 1  ;;  %v2124_v36 = vpop.f32.mrb[71].mxu0  ;;  %v11088_v62 = vld [vmem:[#allocation34_spill] sm:$0xff] }
 0x226   : > { %7654 = vmatmul.mubr.f32.gmra.mrb[176].mxu0 %v11084_v50  ;;  %v2273_v28 = vrot.slane %v2124_v36, 1 }
 0x227   : > { %11081 = vst [vmem:[#allocation22_spill] sm:$0xff] %v10097_v58  ;;  %11083 = vst [vmem:[#allocation25_spill] sm:$0xff] %v10100_v59  ;;  %7550 = vmatmul.mubr.f32.gmra.mrb[32].mxu1 %v11084_v50  ;;  %7656 = vmatprep.mubr.f32.mxu0 %v11085_v47  ;;  %v2325_v44 = vsel %vm2181_vm3, %v2275_v14, 0.0  ;;  %v11090_v50 = vld [vmem:[#allocation37_spill] sm:$0xff] }
 0x228   : > { %7552 = vmatprep.mubr.f32.mxu1 %v11085_v47  ;;  %v10108_v2 = vadd.f32 %v2325_v44, %v11086_v9  ;;  %v2274_v17 = vsel %vm2181_vm3, %v2271_v19, %v2273_v28  ;;  %v2276_v10 = vsel %vm2181_vm3, %v2273_v28, %v2275_v14  ;;  %v7123_v49 = vpop.f32.mrb[72].mxu1  ;;  %v7331_v21 = vpop.f32.mrb[72].mxu0  ;;  %v11093_v9 = vld [vmem:[#allocation36_spill] sm:$0xff] }
 0x229   : > { %v10113_v59 = vadd.f32 %v2274_v17, %v11088_v62  ;;  %v10116_v36 = vadd.f32 %v2276_v10, %v11090_v50  ;;  %v2794_v58 = vrot.slane %v7123_v49, 7  ;;  %v3726_v11 = vrot.slane %v7331_v21, 1  ;;  %v2506_v47 = vpop.f32.mrb[73].mxu1  ;;  %v3438_v30 = vpop.f32.mrb[73].mxu0 }
 0x22a   : > { %11087 = vst [vmem:[#allocation23_spill] sm:$0xff] %v10108_v2  ;;  %7657 = vmatmul.mubr.f32.gmra.mrb[178].mxu0 %v11092_v38  ;;  %v2793_v44 = vrot.slane %v2506_v47, 7  ;;  %v3725_v19 = vrot.slane %v3438_v30, 1  ;;  %v11094_v2 = vld [vmem:[#allocation39_spill] sm:$0xff] }
 0x22b   : > { %11089 = vst [vmem:[#allocation24_spill] sm:$0xff] %v10113_v59  ;;  %11091 = vst [vmem:[#allocation26_spill] sm:$0xff] %v10116_v36  ;;  %7553 = vmatmul.mubr.f32.gmra.mrb[34].mxu1 %v11092_v38  ;;  %7659 = vmatprep.mubr.f32.mxu0 %v11093_v9 }
 0x22c   : > { %7555 = vmatprep.mubr.f32.mxu1 %v11093_v9  ;;  %v2795_v14 = vsel %vm1296_vm2, %v2793_v44, %v2794_v58  ;;  %v2936_v28 = vsel %vm1296_vm2, 0.0, %v2793_v44  ;;  %v3727_v17 = vsel %vm2181_vm3, %v3725_v19, %v3726_v11  ;;  %v7126_v10 = vpop.f32.mrb[74].mxu1  ;;  %v7334_v49 = vpop.f32.mrb[74].mxu0 }
 0x22d   : > { %v8023_v21 = vadd.f32 %v9806_v35, %v2936_v28  ;;  %v8018_v62 = vadd.f32 %v9822_v0, %v2795_v14  ;;  %v2798_v50 = vrot.slane %v7126_v10, 7  ;;  %v3730_v38 = vrot.slane %v7334_v49, 1  ;;  %v2516_v47 = vpop.f32.mrb[75].mxu1  ;;  %v3448_v30 = vpop.f32.mrb[75].mxu0 }
 0x22e   : > { %7660 = vmatmul.mubr.f32.gmra.mrb[180].mxu0 %v11094_v2  ;;  %v2796_v9 = vrot.slane %v2516_v47, 7  ;;  %v3728_v36 = vrot.slane %v3448_v30, 1 }
 0x22f   : > { %7556 = vmatmul.mubr.f32.gmra.mrb[36].mxu1 %v11094_v2  ;;  %7662 = vmatprep.mubr.f32.mxu0 %v9787_v48  ;;  %v10131_v44 = vadd.f32 %v8023_v21, %v3727_v17 }
 0x230   : > { %7558 = vmatprep.mubr.f32.mxu1 %v9787_v48  ;;  %v2797_v35 = vsel %vm1296_vm2, %v2794_v58, %v2796_v9  ;;  %v2799_v0 = vsel %vm1296_vm2, %v2796_v9, %v2798_v50  ;;  %v3729_v19 = vsel %vm2181_vm3, %v3726_v11, %v3728_v36  ;;  %v3731_v14 = vsel %vm2181_vm3, %v3728_v36, %v3730_v38  ;;  %v7129_v28 = vpop.f32.mrb[76].mxu1  ;;  %v7337_v10 = vpop.f32.mrb[76].mxu0 }
 0x231   : > { %v8033_v2 = vadd.f32 %v9825_v5, %v2797_v35  ;;  %v8028_v49 = vadd.f32 %v9834_v15, %v2799_v0  ;;  %v2802_v47 = vrot.slane %v7129_v28, 7  ;;  %v3734_v30 = vrot.slane %v7337_v10, 1  ;;  %v2526_v59 = vpop.f32.mrb[77].mxu1  ;;  %v3458_v48 = vpop.f32.mrb[77].mxu0  ;;  %v8423_v10 = vld [vmem:[#allocation2 + $0xc0] sm:$0xff] }
 0x232   : > { %7663 = vmatmul.mubr.f32.gmra.mrb[182].mxu0 %v9809_v33  ;;  %v2800_v58 = vrot.slane %v2526_v59, 7  ;;  %v3732_v17 = vrot.slane %v3458_v48, 1  ;;  %v10143_v11 = vadd.f32 %v8018_v62, %v3729_v19 }
 0x233   : > { %7559 = vmatmul.mubr.f32.gmra.mrb[38].mxu1 %v9809_v33  ;;  %7665 = vmatprep.mubr.f32.mxu0 %v9811_v22  ;;  %v10145_v36 = vadd.f32 %v8033_v2, %v3731_v14 }
 0x234   : > { %7561 = vmatprep.mubr.f32.mxu1 %v9811_v22  ;;  %v2801_v5 = vsel %vm1296_vm2, %v2798_v50, %v2800_v58  ;;  %v2803_v15 = vsel %vm1296_vm2, %v2800_v58, %v2802_v47  ;;  %v3733_v21 = vsel %vm2181_vm3, %v3730_v38, %v3732_v17  ;;  %v3735_v9 = vsel %vm2181_vm3, %v3732_v17, %v3734_v30  ;;  %v7132_v35 = vpop.f32.mrb[78].mxu1  ;;  %v7340_v33 = vpop.f32.mrb[78].mxu0 }
 0x235   : > { %v8043_v59 = vadd.f32 %v9837_v60, %v2801_v5  ;;  %v8038_v0 = vadd.f32 %v9844_v34, %v2803_v15  ;;  %v2806_v28 = vrot.slane %v7132_v35, 7  ;;  %v3738_v22 = vrot.slane %v7340_v33, 1  ;;  %v2536_v62 = vpop.f32.mrb[79].mxu1  ;;  %v3468_v19 = vpop.f32.mrb[79].mxu0 }
 0x236   : > { %7666 = vmatmul.mubr.f32.gmra.mrb[184].mxu0 %v9829_v55  ;;  %v2804_v50 = vrot.slane %v2536_v62, 7  ;;  %v3736_v14 = vrot.slane %v3468_v19, 1  ;;  %v10155_v38 = vadd.f32 %v8028_v49, %v3733_v21  ;;  %v8425_v62 = vld [vmem:[#allocation2 + $0xd0] sm:$0xff] }
 0x237   : > { %7562 = vmatmul.mubr.f32.gmra.mrb[40].mxu1 %v9829_v55  ;;  %7668 = vmatprep.mubr.f32.mxu0 %v8423_v10  ;;  %v10157_v2 = vadd.f32 %v8043_v59, %v3735_v9  ;;  %v8424_v9 = vld [vmem:[#allocation2 + $0xc8] sm:$0xff] }
 0x238   : > { %7564 = vmatprep.mubr.f32.mxu1 %v8423_v10  ;;  %v2805_v60 = vsel %vm1296_vm2, %v2802_v47, %v2804_v50  ;;  %v2807_v34 = vsel %vm1296_vm2, %v2804_v50, %v2806_v28  ;;  %v3737_v48 = vsel %vm2181_vm3, %v3734_v30, %v3736_v14  ;;  %v3739_v58 = vsel %vm2181_vm3, %v3736_v14, %v3738_v22  ;;  %v7135_v17 = vpop.f32.mrb[80].mxu1  ;;  %v7343_v5 = vpop.f32.mrb[80].mxu0 }
 0x239   : > { %v8053_v55 = vadd.f32 %v9847_v24, %v2805_v60  ;;  %v8048_v15 = vadd.f32 %v9858_v61, %v2807_v34  ;;  %v2810_v35 = vrot.slane %v7135_v17, 7  ;;  %v3742_v33 = vrot.slane %v7343_v5, 1  ;;  %v2546_v49 = vpop.f32.mrb[81].mxu1  ;;  %v3478_v21 = vpop.f32.mrb[81].mxu0 }
 0x23a   : > { %7669 = vmatmul.mubr.f32.gmra.mrb[186].mxu0 %v8424_v9  ;;  %v2808_v47 = vrot.slane %v2546_v49, 7  ;;  %v3740_v59 = vrot.slane %v3478_v21, 1  ;;  %v10165_v30 = vadd.f32 %v8038_v0, %v3737_v48 }
 0x23b   : > { %7565 = vmatmul.mubr.f32.gmra.mrb[42].mxu1 %v8424_v9  ;;  %7671 = vmatprep.mubr.f32.mxu0 %v8425_v62  ;;  %v10167_v19 = vadd.f32 %v8053_v55, %v3739_v58 }
 0x23c   : > { %7567 = vmatprep.mubr.f32.mxu1 %v8425_v62  ;;  %v2809_v24 = vsel %vm1296_vm2, %v2806_v28, %v2808_v47  ;;  %v2811_v61 = vsel %vm1296_vm2, %v2808_v47, %v2810_v35  ;;  %v3741_v50 = vsel %vm2181_vm3, %v3738_v22, %v3740_v59  ;;  %v3743_v14 = vsel %vm2181_vm3, %v3740_v59, %v3742_v33  ;;  %v7138_v10 = vpop.f32.mrb[82].mxu1  ;;  %v7346_v60 = vpop.f32.mrb[82].mxu0 }
 0x23d   : > { %v8063_v34 = vadd.f32 %v9861_v20, %v2809_v24  ;;  %v8058_v17 = vadd.f32 %v9874_v8, %v2811_v61  ;;  %v2814_v5 = vrot.slane %v7138_v10, 7  ;;  %v3746_v49 = vrot.slane %v7346_v60, 1  ;;  %v2556_v0 = vpop.f32.mrb[83].mxu1  ;;  %v3488_v48 = vpop.f32.mrb[83].mxu0 }
 0x23e   : > { %7672 = vmatmul.mubr.f32.gmra.mrb[188].mxu0 %v9851_v41  ;;  %v2812_v28 = vrot.slane %v2556_v0, 7  ;;  %v3744_v58 = vrot.slane %v3488_v48, 1  ;;  %v10179_v22 = vadd.f32 %v8048_v15, %v3741_v50 }
 0x23f   : > { %7568 = vmatmul.mubr.f32.gmra.mrb[44].mxu1 %v9851_v41  ;;  %7674 = vmatprep.mubr.f32.mxu0 %v9853_v7  ;;  %v10181_v55 = vadd.f32 %v8063_v34, %v3743_v14 }
 0x240   : > { %7570 = vmatprep.mubr.f32.mxu1 %v9853_v7  ;;  %v2813_v20 = vsel %vm1296_vm2, %v2810_v35, %v2812_v28  ;;  %v2815_v8 = vsel %vm1296_vm2, %v2812_v28, %v2814_v5  ;;  %v3745_v21 = vsel %vm2181_vm3, %v3742_v33, %v3744_v58  ;;  %v3747_v9 = vsel %vm2181_vm3, %v3744_v58, %v3746_v49  ;;  %v7141_v47 = vpop.f32.mrb[84].mxu1  ;;  %v7349_v41 = vpop.f32.mrb[84].mxu0 }
 0x241   : > { %v8073_v59 = vadd.f32 %v9877_v43, %v2813_v20  ;;  %v8068_v62 = vadd.f32 %v9889_v16, %v2815_v8  ;;  %v2818_v24 = vrot.slane %v7141_v47, 7  ;;  %v3750_v7 = vrot.slane %v7349_v41, 1  ;;  %v2566_v15 = vpop.f32.mrb[85].mxu1  ;;  %v3498_v61 = vpop.f32.mrb[85].mxu0  ;;  %v11095_v8 = vld [vmem:[#allocation40_spill] sm:$0xff] }
 0x242   : > { %7675 = vmatmul.mubr.f32.gmra.mrb[190].mxu0 %v9867_v3  ;;  %v2816_v35 = vrot.slane %v2566_v15, 7  ;;  %v3748_v50 = vrot.slane %v3498_v61, 1  ;;  %v10193_v33 = vadd.f32 %v8058_v17, %v3745_v21 }
 0x243   : > { %7571 = vmatmul.mubr.f32.gmra.mrb[46].mxu1 %v9867_v3  ;;  %7677 = vmatprep.mubr.f32.mxu0 %v9869_v39  ;;  %v10195_v14 = vadd.f32 %v8073_v59, %v3747_v9 }
 0x244   : > { %7573 = vmatprep.mubr.f32.mxu1 %v9869_v39  ;;  %v2817_v43 = vsel %vm1296_vm2, %v2814_v5, %v2816_v35  ;;  %v2819_v16 = vsel %vm1296_vm2, %v2816_v35, %v2818_v24  ;;  %v3749_v10 = vsel %vm2181_vm3, %v3746_v49, %v3748_v50  ;;  %v3751_v60 = vsel %vm2181_vm3, %v3748_v50, %v3750_v7  ;;  %v7144_v34 = vpop.f32.mrb[86].mxu1  ;;  %v7352_v3 = vpop.f32.mrb[86].mxu0 }
 0x245   : > { %v8083_v0 = vadd.f32 %v9892_v53, %v2817_v43  ;;  %v8078_v48 = vadd.f32 %v9903_v37, %v2819_v16  ;;  %v2822_v28 = vrot.slane %v7144_v34, 7  ;;  %v3754_v39 = vrot.slane %v7352_v3, 1  ;;  %v2576_v17 = vpop.f32.mrb[87].mxu1  ;;  %v3508_v58 = vpop.f32.mrb[87].mxu0  ;;  %v11096_v43 = vld [vmem:[#allocation41_spill] sm:$0xff] }
 0x246   : > { %7678 = vmatmul.mubr.f32.gmra.mrb[192].mxu0 %v9882_v13  ;;  %v2820_v5 = vrot.slane %v2576_v17, 7  ;;  %v3752_v20 = vrot.slane %v3508_v58, 1  ;;  %v10207_v49 = vadd.f32 %v8068_v62, %v3749_v10  ;;  %v11097_v10 = vld [vmem:[#allocation42_spill] sm:$0xff] }
 0x247   : > { %7574 = vmatmul.mubr.f32.gmra.mrb[48].mxu1 %v9882_v13  ;;  %7680 = vmatprep.mubr.f32.mxu0 %v11095_v8  ;;  %v10209_v21 = vadd.f32 %v8083_v0, %v3751_v60 }
 0x248   : > { %7576 = vmatprep.mubr.f32.mxu1 %v11095_v8  ;;  %v2821_v53 = vsel %vm1296_vm2, %v2818_v24, %v2820_v5  ;;  %v2823_v37 = vsel %vm1296_vm2, %v2820_v5, %v2822_v28  ;;  %v3753_v9 = vsel %vm2181_vm3, %v3750_v7, %v3752_v20  ;;  %v3755_v47 = vsel %vm2181_vm3, %v3752_v20, %v3754_v39  ;;  %v7147_v41 = vpop.f32.mrb[88].mxu1  ;;  %v7355_v13 = vpop.f32.mrb[88].mxu0 }
 0x249   : > { %v8093_v59 = vadd.f32 %v9906_v40, %v2821_v53  ;;  %v8088_v15 = vadd.f32 %v9917_v23, %v2823_v37  ;;  %v2826_v61 = vrot.slane %v7147_v41, 7  ;;  %v3758_v35 = vrot.slane %v7355_v13, 1  ;;  %v2586_v62 = vpop.f32.mrb[89].mxu1  ;;  %v3518_v50 = vpop.f32.mrb[89].mxu0  ;;  %v11098_v37 = vld [vmem:[#allocation43_spill] sm:$0xff] }
 0x24a   : > { %7681 = vmatmul.mubr.f32.gmra.mrb[194].mxu0 %v11096_v43  ;;  %v2824_v24 = vrot.slane %v2586_v62, 7  ;;  %v3756_v16 = vrot.slane %v3518_v50, 1  ;;  %v10221_v7 = vadd.f32 %v8078_v48, %v3753_v9 }
 0x24b   : > { %7577 = vmatmul.mubr.f32.gmra.mrb[50].mxu1 %v11096_v43  ;;  %7683 = vmatprep.mubr.f32.mxu0 %v11097_v10  ;;  %v10223_v60 = vadd.f32 %v8093_v59, %v3755_v47  ;;  %v11099_v47 = vld [vmem:[#allocation44_spill] sm:$0xff] }
 0x24c   : > { %7579 = vmatprep.mubr.f32.mxu1 %v11097_v10  ;;  %v2825_v40 = vsel %vm1296_vm2, %v2822_v28, %v2824_v24  ;;  %v2827_v23 = vsel %vm1296_vm2, %v2824_v24, %v2826_v61  ;;  %v3757_v34 = vsel %vm2181_vm3, %v3754_v39, %v3756_v16  ;;  %v3759_v3 = vsel %vm2181_vm3, %v3756_v16, %v3758_v35  ;;  %v7150_v0 = vpop.f32.mrb[90].mxu1  ;;  %v7358_v17 = vpop.f32.mrb[90].mxu0 }
 0x24d   : > { %v8103_v58 = vadd.f32 %v9920_v57, %v2825_v40  ;;  %v8098_v5 = vadd.f32 %v9931_v54, %v2827_v23  ;;  %v2830_v20 = vrot.slane %v7150_v0, 7  ;;  %v3762_v8 = vrot.slane %v7358_v17, 1  ;;  %v2596_v48 = vpop.f32.mrb[91].mxu1  ;;  %v3528_v53 = vpop.f32.mrb[91].mxu0  ;;  %v11100_v23 = vld [vmem:[#allocation45_spill] sm:$0xff] }
 0x24e   : > { %7684 = vmatmul.mubr.f32.gmra.mrb[196].mxu0 %v11098_v37  ;;  %v2828_v28 = vrot.slane %v2596_v48, 7  ;;  %v3760_v9 = vrot.slane %v3528_v53, 1  ;;  %v10235_v39 = vadd.f32 %v8088_v15, %v3757_v34 }
 0x24f   : > { %7580 = vmatmul.mubr.f32.gmra.mrb[52].mxu1 %v11098_v37  ;;  %7686 = vmatprep.mubr.f32.mxu0 %v11099_v47  ;;  %v10237_v41 = vadd.f32 %v8103_v58, %v3759_v3  ;;  %v11101_v3 = vld [vmem:[#allocation46_spill] sm:$0xff] }
 0x250   : > { %7582 = vmatprep.mubr.f32.mxu1 %v11099_v47  ;;  %v2829_v57 = vsel %vm1296_vm2, %v2826_v61, %v2828_v28  ;;  %v2831_v54 = vsel %vm1296_vm2, %v2828_v28, %v2830_v20  ;;  %v3761_v13 = vsel %vm2181_vm3, %v3758_v35, %v3760_v9  ;;  %v3763_v59 = vsel %vm2181_vm3, %v3760_v9, %v3762_v8  ;;  %v7153_v62 = vpop.f32.mrb[92].mxu1  ;;  %v7361_v50 = vpop.f32.mrb[92].mxu0 }
 0x251   : > { %v8113_v43 = vadd.f32 %v9934_v45, %v2829_v57  ;;  %v8108_v24 = vadd.f32 %v9945_v4, %v2831_v54  ;;  %v2834_v16 = vrot.slane %v7153_v62, 7  ;;  %v3766_v10 = vrot.slane %v7361_v50, 1  ;;  %v2606_v15 = vpop.f32.mrb[93].mxu1  ;;  %v3538_v40 = vpop.f32.mrb[93].mxu0  ;;  %v11102_v54 = vld [vmem:[#allocation47_spill] sm:$0xff] }
 0x252   : > { %7687 = vmatmul.mubr.f32.gmra.mrb[198].mxu0 %v11100_v23  ;;  %v2832_v61 = vrot.slane %v2606_v15, 7  ;;  %v3764_v34 = vrot.slane %v3538_v40, 1  ;;  %v10249_v35 = vadd.f32 %v8098_v5, %v3761_v13 }
 0x253   : > { %7583 = vmatmul.mubr.f32.gmra.mrb[54].mxu1 %v11100_v23  ;;  %7689 = vmatprep.mubr.f32.mxu0 %v11101_v3  ;;  %v10251_v0 = vadd.f32 %v8113_v43, %v3763_v59  ;;  %v11103_v59 = vld [vmem:[#allocation48_spill] sm:$0xff] }
 0x254   : > { %7585 = vmatprep.mubr.f32.mxu1 %v11101_v3  ;;  %v2833_v45 = vsel %vm1296_vm2, %v2830_v20, %v2832_v61  ;;  %v2835_v4 = vsel %vm1296_vm2, %v2832_v61, %v2834_v16  ;;  %v3765_v17 = vsel %vm2181_vm3, %v3762_v8, %v3764_v34  ;;  %v3767_v58 = vsel %vm2181_vm3, %v3764_v34, %v3766_v10  ;;  %v7156_v48 = vpop.f32.mrb[94].mxu1  ;;  %v7364_v53 = vpop.f32.mrb[94].mxu0 }
 0x255   : > { %v8123_v37 = vadd.f32 %v9948_v27, %v2833_v45  ;;  %v8118_v28 = vadd.f32 %v9959_v1, %v2835_v4  ;;  %v2838_v9 = vrot.slane %v7156_v48, 7  ;;  %v3770_v47 = vrot.slane %v7364_v53, 1  ;;  %v2616_v5 = vpop.f32.mrb[95].mxu1  ;;  %v3548_v57 = vpop.f32.mrb[95].mxu0  ;;  %v11104_v4 = vld [vmem:[#allocation49_spill] sm:$0xff] }
 0x256   : > { %7690 = vmatmul.mubr.f32.gmra.mrb[200].mxu0 %v11102_v54  ;;  %v2836_v20 = vrot.slane %v2616_v5, 7  ;;  %v3768_v13 = vrot.slane %v3548_v57, 1  ;;  %v10263_v8 = vadd.f32 %v8108_v24, %v3765_v17 }
 0x257   : > { %7586 = vmatmul.mubr.f32.gmra.mrb[56].mxu1 %v11102_v54  ;;  %7692 = vmatprep.mubr.f32.mxu0 %v11103_v59  ;;  %v10265_v62 = vadd.f32 %v8123_v37, %v3767_v58  ;;  %v11105_v58 = vld [vmem:[#allocation50_spill] sm:$0xff] }
 0x258   : > { %7588 = vmatprep.mubr.f32.mxu1 %v11103_v59  ;;  %v2837_v27 = vsel %vm1296_vm2, %v2834_v16, %v2836_v20  ;;  %v2839_v1 = vsel %vm1296_vm2, %v2836_v20, %v2838_v9  ;;  %v3769_v50 = vsel %vm2181_vm3, %v3766_v10, %v3768_v13  ;;  %v3771_v43 = vsel %vm2181_vm3, %v3768_v13, %v3770_v47  ;;  %v7159_v15 = vpop.f32.mrb[96].mxu1  ;;  %v7367_v40 = vpop.f32.mrb[96].mxu0 }
 0x259   : > { %v8133_v23 = vadd.f32 %v9962_v63, %v2837_v27  ;;  %v8128_v61 = vadd.f32 %v9973_v6, %v2839_v1  ;;  %v2842_v34 = vrot.slane %v7159_v15, 7  ;;  %v3774_v3 = vrot.slane %v7367_v40, 1  ;;  %v2626_v24 = vpop.f32.mrb[97].mxu1  ;;  %v3558_v45 = vpop.f32.mrb[97].mxu0  ;;  %v11106_v1 = vld [vmem:[#allocation51_spill] sm:$0xff] }
 0x25a   : > { %7693 = vmatmul.mubr.f32.gmra.mrb[202].mxu0 %v11104_v4  ;;  %v2840_v16 = vrot.slane %v2626_v24, 7  ;;  %v3772_v17 = vrot.slane %v3558_v45, 1  ;;  %v10277_v10 = vadd.f32 %v8118_v28, %v3769_v50 }
 0x25b   : > { %7589 = vmatmul.mubr.f32.gmra.mrb[58].mxu1 %v11104_v4  ;;  %7695 = vmatprep.mubr.f32.mxu0 %v11105_v58  ;;  %v10279_v48 = vadd.f32 %v8133_v23, %v3771_v43  ;;  %v11107_v43 = vld [vmem:[#allocation52_spill] sm:$0xff] }
 0x25c   : > { %7591 = vmatprep.mubr.f32.mxu1 %v11105_v58  ;;  %v2841_v63 = vsel %vm1296_vm2, %v2838_v9, %v2840_v16  ;;  %v2843_v6 = vsel %vm1296_vm2, %v2840_v16, %v2842_v34  ;;  %v3773_v53 = vsel %vm2181_vm3, %v3770_v47, %v3772_v17  ;;  %v3775_v37 = vsel %vm2181_vm3, %v3772_v17, %v3774_v3  ;;  %v7162_v5 = vpop.f32.mrb[98].mxu1  ;;  %v7370_v57 = vpop.f32.mrb[98].mxu0 }
 0x25d   : > { %v8143_v54 = vadd.f32 %v9976_v32, %v2841_v63  ;;  %v8138_v20 = vadd.f32 %v9987_v18, %v2843_v6  ;;  %v2846_v13 = vrot.slane %v7162_v5, 7  ;;  %v3778_v59 = vrot.slane %v7370_v57, 1  ;;  %v2636_v28 = vpop.f32.mrb[99].mxu1  ;;  %v3568_v27 = vpop.f32.mrb[99].mxu0 }
 0x25e   : > { %7696 = vmatmul.mubr.f32.gmra.mrb[204].mxu0 %v11106_v1  ;;  %v2844_v9 = vrot.slane %v2636_v28, 7  ;;  %v3776_v50 = vrot.slane %v3568_v27, 1  ;;  %v10291_v47 = vadd.f32 %v8128_v61, %v3773_v53  ;;  %v11108_v53 = vld [vmem:[#allocation53_spill] sm:$0xff] }
 0x25f   : > { %7592 = vmatmul.mubr.f32.gmra.mrb[60].mxu1 %v11106_v1  ;;  %7698 = vmatprep.mubr.f32.mxu0 %v11107_v43  ;;  %v10293_v15 = vadd.f32 %v8143_v54, %v3775_v37 }
 0x260   : > { %7594 = vmatprep.mubr.f32.mxu1 %v11107_v43  ;;  %v2845_v32 = vsel %vm1296_vm2, %v2842_v34, %v2844_v9  ;;  %v2847_v18 = vsel %vm1296_vm2, %v2844_v9, %v2846_v13  ;;  %v3777_v40 = vsel %vm2181_vm3, %v3774_v3, %v3776_v50  ;;  %v3779_v23 = vsel %vm2181_vm3, %v3776_v50, %v3778_v59  ;;  %v7165_v24 = vpop.f32.mrb[100].mxu1  ;;  %v7373_v45 = vpop.f32.mrb[100].mxu0 }
 0x261   : > { %v8153_v4 = vadd.f32 %v9990_v52, %v2845_v32  ;;  %v8148_v16 = vadd.f32 %v9999_v26, %v2847_v18  ;;  %v2850_v17 = vrot.slane %v7165_v24, 7  ;;  %v3782_v58 = vrot.slane %v7373_v45, 1  ;;  %v2646_v61 = vpop.f32.mrb[101].mxu1  ;;  %v3578_v63 = vpop.f32.mrb[101].mxu0  ;;  %v8426_v32 = vld [vmem:[#allocation2 + $0x1b0] sm:$0xff] }
 0x262   : > { %7699 = vmatmul.mubr.f32.gmra.mrb[206].mxu0 %v9980_v42  ;;  %v2848_v34 = vrot.slane %v2646_v61, 7  ;;  %v3780_v6 = vrot.slane %v3578_v63, 1  ;;  %v10305_v3 = vadd.f32 %v8138_v20, %v3777_v40 }
 0x263   : > { %7595 = vmatmul.mubr.f32.gmra.mrb[62].mxu1 %v9980_v42  ;;  %7701 = vmatprep.mubr.f32.mxu0 %v11108_v53  ;;  %v10307_v37 = vadd.f32 %v8153_v4, %v3779_v23 }
 0x264   : > { %7597 = vmatprep.mubr.f32.mxu1 %v11108_v53  ;;  %v2849_v52 = vsel %vm1296_vm2, %v2846_v13, %v2848_v34  ;;  %v2851_v26 = vsel %vm1296_vm2, %v2848_v34, %v2850_v17  ;;  %v3781_v5 = vsel %vm2181_vm3, %v3778_v59, %v3780_v6  ;;  %v3783_v57 = vsel %vm2181_vm3, %v3780_v6, %v3782_v58  ;;  %v7168_v54 = vpop.f32.mrb[102].mxu1  ;;  %v7376_v42 = vpop.f32.mrb[102].mxu0  ;;  %v8427_v6 = vld [vmem:[#allocation2 + $0x1b8] sm:$0xff] }
 0x265   : > { %v8163_v28 = vadd.f32 %v10002_v29, %v2849_v52  ;;  %v8158_v27 = vadd.f32 %v10009_v12, %v2851_v26  ;;  %v2854_v1 = vrot.slane %v7168_v54, 7  ;;  %v3786_v9 = vrot.slane %v7376_v42, 1  ;;  %v2656_v20 = vpop.f32.mrb[103].mxu1  ;;  %v3588_v50 = vpop.f32.mrb[103].mxu0  ;;  %v8428_v52 = vld [vmem:[#allocation2 + $0x1c0] sm:$0xff] }
 0x266   : > { %7702 = vmatmul.mubr.f32.gmra.mrb[208].mxu0 %v9994_v56  ;;  %v2852_v13 = vrot.slane %v2656_v20, 7  ;;  %v3784_v43 = vrot.slane %v3588_v50, 1  ;;  %v10317_v59 = vadd.f32 %v8148_v16, %v3781_v5 }
 0x267   : > { %7598 = vmatmul.mubr.f32.gmra.mrb[64].mxu1 %v9994_v56  ;;  %7704 = vmatprep.mubr.f32.mxu0 %v8426_v32  ;;  %v10319_v18 = vadd.f32 %v8163_v28, %v3783_v57 }
 0x268   : > { %7600 = vmatprep.mubr.f32.mxu1 %v8426_v32  ;;  %v2853_v29 = vsel %vm1296_vm2, %v2850_v17, %v2852_v13  ;;  %v2855_v12 = vsel %vm1296_vm2, %v2852_v13, %v2854_v1  ;;  %v3785_v40 = vsel %vm2181_vm3, %v3782_v58, %v3784_v43  ;;  %v3787_v23 = vsel %vm2181_vm3, %v3784_v43, %v3786_v9  ;;  %v7171_v24 = vpop.f32.mrb[104].mxu1  ;;  %v7379_v45 = vpop.f32.mrb[104].mxu0  ;;  %v11109_v32 = vld [vmem:[#allocation54_spill] sm:$0xff] }
 0x269   : > { %v8173_v56 = vadd.f32 %v10012_v51, %v2853_v29  ;;  %v8168_v4 = vadd.f32 %v10023_v25, %v2855_v12  ;;  %v2858_v61 = vrot.slane %v7171_v24, 7  ;;  %v3790_v63 = vrot.slane %v7379_v45, 1  ;;  %v2666_v16 = vpop.f32.mrb[105].mxu1  ;;  %v3598_v34 = vpop.f32.mrb[105].mxu0  ;;  %v11110_v12 = vld [vmem:[#allocation55_spill] sm:$0xff] }
 0x26a   : > { %7705 = vmatmul.mubr.f32.gmra.mrb[210].mxu0 %v8427_v6  ;;  %v2856_v17 = vrot.slane %v2666_v16, 7  ;;  %v3788_v53 = vrot.slane %v3598_v34, 1  ;;  %v10327_v58 = vadd.f32 %v8158_v27, %v3785_v40  ;;  %v11111_v16 = vld [vmem:[#allocation57_spill] sm:$0xff] }
 0x26b   : > { %7601 = vmatmul.mubr.f32.gmra.mrb[66].mxu1 %v8427_v6  ;;  %7707 = vmatprep.mubr.f32.mxu0 %v8428_v52  ;;  %v10329_v26 = vadd.f32 %v8173_v56, %v3787_v23  ;;  %v11112_v6 = vld [vmem:[#allocation58_spill] sm:$0xff] }
 0x26c   : > { %7603 = vmatprep.mubr.f32.mxu1 %v8428_v52  ;;  %v2857_v51 = vsel %vm1296_vm2, %v2854_v1, %v2856_v17  ;;  %v2859_v25 = vsel %vm1296_vm2, %v2856_v17, %v2858_v61  ;;  %v3789_v5 = vsel %vm2181_vm3, %v3786_v9, %v3788_v53  ;;  %v3791_v57 = vsel %vm2181_vm3, %v3788_v53, %v3790_v63  ;;  %v7174_v54 = vpop.f32.mrb[106].mxu1  ;;  %v7382_v42 = vpop.f32.mrb[106].mxu0 }
 0x26d   : > { %v8183_v28 = vadd.f32 %v10026_v31, %v2857_v51  ;;  %v8178_v20 = vadd.f32 %v10037_v46, %v2859_v25  ;;  %v2862_v50 = vrot.slane %v7174_v54, 7  ;;  %v3794_v13 = vrot.slane %v7382_v42, 1  ;;  %v2676_v27 = vpop.f32.mrb[107].mxu1  ;;  %v3608_v43 = vpop.f32.mrb[107].mxu0  ;;  %v11113_v25 = vld [vmem:[#allocation56_spill] sm:$0xff] }
 0x26e   : > { %7708 = vmatmul.mubr.f32.gmra.mrb[212].mxu0 %v11109_v32  ;;  %v2860_v1 = vrot.slane %v2676_v27, 7  ;;  %v3792_v29 = vrot.slane %v3608_v43, 1  ;;  %v10341_v9 = vadd.f32 %v8168_v4, %v3789_v5 }
 0x26f   : > { %7604 = vmatmul.mubr.f32.gmra.mrb[68].mxu1 %v11109_v32  ;;  %7710 = vmatprep.mubr.f32.mxu0 %v11110_v12  ;;  %v10343_v40 = vadd.f32 %v8183_v28, %v3791_v57 }
 0x270   : > { %7606 = vmatprep.mubr.f32.mxu1 %v11110_v12  ;;  %v2861_v31 = vsel %vm1296_vm2, %v2858_v61, %v2860_v1  ;;  %v2863_v46 = vsel %vm1296_vm2, %v2860_v1, %v2862_v50  ;;  %v3793_v23 = vsel %vm2181_vm3, %v3790_v63, %v3792_v29  ;;  %v3795_v24 = vsel %vm2181_vm3, %v3792_v29, %v3794_v13  ;;  %v7177_v45 = vpop.f32.mrb[108].mxu1  ;;  %v7385_v56 = vpop.f32.mrb[108].mxu0  ;;  %v11114_v1 = vld [vmem:[#allocation16_spill] sm:$0xff]  ;;  %v11115_v12 = vld [vmem:[#allocation15_spill] sm:$0xff] }
 0x271   : > { %v8193_v34 = vadd.f32 %v11111_v16, %v2861_v31  ;;  %v8188_v17 = vadd.f32 %v11112_v6, %v2863_v46  ;;  %v2866_v53 = vrot.slane %v7177_v45, 7  ;;  %v3798_v52 = vrot.slane %v7385_v56, 1  ;;  %v2686_v4 = vpop.f32.mrb[109].mxu1  ;;  %v3618_v51 = vpop.f32.mrb[109].mxu0 }
 0x272   : > { %7711 = vmatmul.mubr.f32.gmra.mrb[214].mxu0 %v11113_v25  ;;  %v2864_v61 = vrot.slane %v2686_v4, 7  ;;  %v3796_v5 = vrot.slane %v3618_v51, 1  ;;  %v10353_v57 = vadd.f32 %v8178_v20, %v3793_v23 }
 0x273   : > { %7607 = vmatmul.mubr.f32.gmra.mrb[70].mxu1 %v11113_v25  ;;  %v10355_v63 = vadd.f32 %v8193_v34, %v3795_v24 }
 0x274   : > { %v2865_v54 = vsel %vm1296_vm2, %v2862_v50, %v2864_v61  ;;  %v2867_v42 = vsel %vm1296_vm2, %v2864_v61, %v2866_v53  ;;  %v3797_v28 = vsel %vm2181_vm3, %v3794_v13, %v3796_v5  ;;  %v3799_v27 = vsel %vm2181_vm3, %v3796_v5, %v3798_v52  ;;  %v7180_v43 = vpop.f32.mrb[110].mxu1  ;;  %v7388_v32 = vpop.f32.mrb[110].mxu0  ;;  %v11116_v61 = vld [vmem:[#allocation18_spill] sm:$0xff] }
 0x275   : > { %v8203_v29 = vadd.f32 %v11114_v1, %v2865_v54  ;;  %v8198_v31 = vadd.f32 %v11115_v12, %v2867_v42  ;;  %v2870_v46 = vrot.slane %v7180_v43, 7  ;;  %v3802_v45 = vrot.slane %v7388_v32, 1  ;;  %v2696_v20 = vpop.f32.mrb[111].mxu1  ;;  %v3628_v23 = vpop.f32.mrb[111].mxu0  ;;  %v11117_v54 = vld [vmem:[#allocation17_spill] sm:$0xff] }
 0x276   : > { %v2868_v24 = vrot.slane %v2696_v20, 7  ;;  %v3800_v56 = vrot.slane %v3628_v23, 1  ;;  %v10363_v16 = vadd.f32 %v8188_v17, %v3797_v28 }
 0x277   : > { %v10365_v50 = vadd.f32 %v8203_v29, %v3799_v27 }
 0x278   : > { %v2869_v13 = vsel %vm1296_vm2, %v2866_v53, %v2868_v24  ;;  %v2871_v34 = vsel %vm1296_vm2, %v2868_v24, %v2870_v46  ;;  %v3801_v6 = vsel %vm2181_vm3, %v3798_v52, %v3800_v56  ;;  %v3803_v4 = vsel %vm2181_vm3, %v3800_v56, %v3802_v45  ;;  %v7183_v51 = vpop.f32.mrb[112].mxu1  ;;  %v7391_v25 = vpop.f32.mrb[112].mxu0 }
 0x279   : > { %v8213_v5 = vadd.f32 %v11116_v61, %v2869_v13  ;;  %v8208_v42 = vadd.f32 %v11117_v54, %v2871_v34  ;;  %v2874_v43 = vrot.slane %v7183_v51, 7  ;;  %v3806_v32 = vrot.slane %v7391_v25, 1  ;;  %v2706_v17 = vpop.f32.mrb[113].mxu1  ;;  %v3638_v28 = vpop.f32.mrb[113].mxu0  ;;  %v11119_v13 = vld [vmem:[#allocation21_spill] sm:$0xff]  ;;  %v11120_v51 = vld [vmem:[#allocation19_spill] sm:$0xff] }
 0x27a   : > { %v2872_v27 = vrot.slane %v2706_v17, 7  ;;  %v3804_v1 = vrot.slane %v3638_v28, 1  ;;  %v10373_v29 = vadd.f32 %v8198_v31, %v3801_v6 }
 0x27b   : > { %v10375_v53 = vadd.f32 %v8213_v5, %v3803_v4 }
 0x27c   : > { %v2873_v52 = vsel %vm1296_vm2, %v2870_v46, %v2872_v27  ;;  %v2875_v12 = vsel %vm1296_vm2, %v2872_v27, %v2874_v43  ;;  %v3805_v20 = vsel %vm2181_vm3, %v3802_v45, %v3804_v1  ;;  %v3807_v23 = vsel %vm2181_vm3, %v3804_v1, %v3806_v32  ;;  %v7186_v24 = vpop.f32.mrb[114].mxu1  ;;  %v7394_v56 = vpop.f32.mrb[114].mxu0 }
 0x27d   : > { %11118 = vst [vmem:[#allocation29_spill] sm:$0xff] %v10375_v53  ;;  %v8223_v34 = vadd.f32 %v11119_v13, %v2873_v52  ;;  %v8218_v25 = vadd.f32 %v11120_v51, %v2875_v12  ;;  %v2878_v61 = vrot.slane %v7186_v24, 7  ;;  %v3810_v54 = vrot.slane %v7394_v56, 1  ;;  %v2716_v31 = vpop.f32.mrb[115].mxu1  ;;  %v3648_v6 = vpop.f32.mrb[115].mxu0  ;;  %v11122_v24 = vld [vmem:[#allocation20_spill] sm:$0xff] }
 0x27e   : > { %v2876_v4 = vrot.slane %v2716_v31, 7  ;;  %v3808_v5 = vrot.slane %v3648_v6, 1  ;;  %v10383_v17 = vadd.f32 %v8208_v42, %v3805_v20  ;;  %v11123_v13 = vld [vmem:[#allocation22_spill] sm:$0xff] }
 0x27f   : > { %v10385_v46 = vadd.f32 %v8223_v34, %v3807_v23 }
 0x280   : > { %v2877_v45 = vsel %vm1296_vm2, %v2874_v43, %v2876_v4  ;;  %v2879_v28 = vsel %vm1296_vm2, %v2876_v4, %v2878_v61  ;;  %v3809_v27 = vsel %vm2181_vm3, %v3806_v32, %v3808_v5  ;;  %v3811_v1 = vsel %vm2181_vm3, %v3808_v5, %v3810_v54  ;;  %v7189_v52 = vpop.f32.mrb[116].mxu1  ;;  %v7397_v12 = vpop.f32.mrb[116].mxu0 }
 0x281   : > { %11121 = vst [vmem:[#allocation27_spill] sm:$0xff] %v10385_v46  ;;  %v8233_v56 = vadd.f32 %v11122_v24, %v2877_v45  ;;  %v8228_v51 = vadd.f32 %v11123_v13, %v2879_v28  ;;  %v2882_v31 = vrot.slane %v7189_v52, 7  ;;  %v3814_v6 = vrot.slane %v7397_v12, 1  ;;  %v2726_v42 = vpop.f32.mrb[117].mxu1  ;;  %v3658_v20 = vpop.f32.mrb[117].mxu0  ;;  %v11126_v52 = vld [vmem:[#allocation25_spill] sm:$0xff] }
 0x282   : > { %v2880_v23 = vrot.slane %v2726_v42, 7  ;;  %v3812_v34 = vrot.slane %v3658_v20, 1  ;;  %v10393_v46 = vadd.f32 %v8218_v25, %v3809_v27  ;;  %v11127_v13 = vld [vmem:[#allocation24_spill] sm:$0xff] }
 0x283   : > { %v10395_v43 = vadd.f32 %v8233_v56, %v3811_v1 }
 0x284   : > { %11124 = vst [vmem:[#allocation28_spill] sm:$0xff] %v10393_v46  ;;  %v2881_v32 = vsel %vm1296_vm2, %v2878_v61, %v2880_v23  ;;  %v2883_v4 = vsel %vm1296_vm2, %v2880_v23, %v2882_v31  ;;  %v3813_v5 = vsel %vm2181_vm3, %v3810_v54, %v3812_v34  ;;  %v3815_v45 = vsel %vm2181_vm3, %v3812_v34, %v3814_v6  ;;  %v7192_v24 = vpop.f32.mrb[118].mxu1  ;;  %v7400_v28 = vpop.f32.mrb[118].mxu0 }
 0x285   : > { %11125 = vst [vmem:[#allocation30_spill] sm:$0xff] %v10395_v43  ;;  %v8243_v12 = vadd.f32 %v11126_v52, %v2881_v32  ;;  %v8238_v53 = vadd.f32 %v11127_v13, %v2883_v4  ;;  %v2886_v42 = vrot.slane %v7192_v24, 7  ;;  %v3818_v20 = vrot.slane %v7400_v28, 1  ;;  %v2736_v25 = vpop.f32.mrb[119].mxu1  ;;  %v3668_v27 = vpop.f32.mrb[119].mxu0  ;;  %v11128_v4 = vld [vmem:[#allocation26_spill] sm:$0xff] }
 0x286   : > { %v2884_v1 = vrot.slane %v2736_v25, 7  ;;  %v3816_v56 = vrot.slane %v3668_v27, 1  ;;  %v10403_v43 = vadd.f32 %v8228_v51, %v3813_v5  ;;  %v11129_v28 = vld [vmem:[#allocation23_spill] sm:$0xff] }
 0x287   : > { %v10405_v61 = vadd.f32 %v8243_v12, %v3815_v45  ;;  %v3868_v51 = vsel %vm2181_vm3, %v3818_v20, 0.0 }
 0x288   : > { %v2885_v54 = vsel %vm1296_vm2, %v2882_v31, %v2884_v1  ;;  %v2887_v23 = vsel %vm1296_vm2, %v2884_v1, %v2886_v42  ;;  %v3817_v34 = vsel %vm2181_vm3, %v3814_v6, %v3816_v56  ;;  %v3819_v32 = vsel %vm2181_vm3, %v3816_v56, %v3818_v20  ;;  %v7435_v52 = vpop.f32.mrb[120].mxu0 }
 0x289   : > { %v8253_v24 = vadd.f32 %v11128_v4, %v2885_v54  ;;  %v8248_v13 = vadd.f32 %v11129_v28, %v2887_v23  ;;  %v4337_v46 = vrot.slane %v7435_v52, 7  ;;  %v4049_v25 = vpop.f32.mrb[121].mxu0  ;;  %v10413_v27 = vadd.f32 %v8238_v53, %v3817_v34 }
 0x28a   : > { %v4336_v5 = vrot.slane %v4049_v25, 7 }
 0x28b   : > { %v10416_v45 = vadd.f32 %v8248_v13, %v3868_v51  ;;  %v10418_v31 = vadd.f32 %v8253_v24, %v3819_v32 }
 0x28c   : > { %v4479_v6 = vsel %vm1296_vm2, 0.0, %v4336_v5  ;;  %v7438_v12 = vpop.f32.mrb[122].mxu0  ;;  %v4338_v42 = vsel %vm1296_vm2, %v4336_v5, %v4337_v46 }
 0x28d   : > { %v4341_v1 = vrot.slane %v7438_v12, 7  ;;  %v4059_v56 = vpop.f32.mrb[123].mxu0  ;;  %v10423_v54 = vadd.f32 %v10143_v11, %v4338_v42  ;;  %v10426_v53 = vadd.f32 %v10131_v44, %v4479_v6 }
 0x28e   : > { %v4339_v23 = vrot.slane %v4059_v56, 7 }
 0x290   : > { %v7441_v20 = vpop.f32.mrb[124].mxu0  ;;  %v4342_v34 = vsel %vm1296_vm2, %v4339_v23, %v4341_v1  ;;  %v4340_v32 = vsel %vm1296_vm2, %v4337_v46, %v4339_v23 }
 0x291   : > { %v4345_v52 = vrot.slane %v7441_v20, 7  ;;  %v4069_v4 = vpop.f32.mrb[125].mxu0  ;;  %v10431_v24 = vadd.f32 %v10155_v38, %v4342_v34  ;;  %v10434_v28 = vadd.f32 %v10145_v36, %v4340_v32 }
 0x292   : > { %v4343_v13 = vrot.slane %v4069_v4, 7 }
 0x294   : > { %v7444_v11 = vpop.f32.mrb[126].mxu0  ;;  %v4346_v25 = vsel %vm1296_vm2, %v4343_v13, %v4345_v52  ;;  %v4344_v44 = vsel %vm1296_vm2, %v4341_v1, %v4343_v13 }
 0x295   : > { %v4349_v51 = vrot.slane %v7444_v11, 7  ;;  %v4079_v5 = vpop.f32.mrb[127].mxu0  ;;  %v10439_v6 = vadd.f32 %v10165_v30, %v4346_v25  ;;  %v10442_v46 = vadd.f32 %v10157_v2, %v4344_v44 }
 0x296   : > { %v4347_v12 = vrot.slane %v4079_v5, 7 }
 0x298   : > { %v4350_v42 = vsel %vm1296_vm2, %v4347_v12, %v4349_v51  ;;  %v4348_v36 = vsel %vm1296_vm2, %v4345_v52, %v4347_v12 }
 0x299   : > { %v7447_v38 = vpop.f32.mrb[128].mxu0  ;;  %v10447_v20 = vadd.f32 %v10179_v22, %v4350_v42  ;;  %v10450_v1 = vadd.f32 %v10167_v19, %v4348_v36 }
 0x29a   : > { %v4353_v56 = vrot.slane %v7447_v38, 7  ;;  %v4089_v23 = vpop.f32.mrb[129].mxu0 }
 0x29b   : > { %v4351_v34 = vrot.slane %v4089_v23, 7 }
 0x29d   : > { %v7450_v30 = vpop.f32.mrb[130].mxu0  ;;  %v4354_v32 = vsel %vm1296_vm2, %v4351_v34, %v4353_v56  ;;  %v4352_v2 = vsel %vm1296_vm2, %v4349_v51, %v4351_v34 }
 0x29e   : > { %v4357_v4 = vrot.slane %v7450_v30, 7  ;;  %v4099_v13 = vpop.f32.mrb[131].mxu0  ;;  %v10455_v11 = vadd.f32 %v10193_v33, %v4354_v32  ;;  %v10458_v52 = vadd.f32 %v10181_v55, %v4352_v2 }
 0x29f   : > { %v4355_v25 = vrot.slane %v4099_v13, 7 }
 0x2a1   : > { %v7453_v22 = vpop.f32.mrb[132].mxu0  ;;  %v4358_v44 = vsel %vm1296_vm2, %v4355_v25, %v4357_v4  ;;  %v4356_v19 = vsel %vm1296_vm2, %v4353_v56, %v4355_v25 }
 0x2a2   : > { %v4361_v5 = vrot.slane %v7453_v22, 7  ;;  %v4109_v12 = vpop.f32.mrb[133].mxu0  ;;  %v10463_v38 = vadd.f32 %v10207_v49, %v4358_v44  ;;  %v10466_v51 = vadd.f32 %v10195_v14, %v4356_v19 }
 0x2a3   : > { %v4359_v42 = vrot.slane %v4109_v12, 7 }
 0x2a5   : > { %v7456_v33 = vpop.f32.mrb[134].mxu0  ;;  %v4362_v36 = vsel %vm1296_vm2, %v4359_v42, %v4361_v5  ;;  %v4360_v55 = vsel %vm1296_vm2, %v4357_v4, %v4359_v42 }
 0x2a6   : > { %v4365_v23 = vrot.slane %v7456_v33, 7  ;;  %v4119_v34 = vpop.f32.mrb[135].mxu0  ;;  %v10471_v30 = vadd.f32 %v10221_v7, %v4362_v36  ;;  %v10474_v56 = vadd.f32 %v10209_v21, %v4360_v55 }
 0x2a7   : > { %v4363_v32 = vrot.slane %v4119_v34, 7 }
 0x2a9   : > { %v7459_v49 = vpop.f32.mrb[136].mxu0  ;;  %v4366_v2 = vsel %vm1296_vm2, %v4363_v32, %v4365_v23  ;;  %v4364_v14 = vsel %vm1296_vm2, %v4361_v5, %v4363_v32 }
 0x2aa   : > { %v4369_v13 = vrot.slane %v7459_v49, 7  ;;  %v4129_v25 = vpop.f32.mrb[137].mxu0  ;;  %v10479_v22 = vadd.f32 %v10235_v39, %v4366_v2  ;;  %v10482_v4 = vadd.f32 %v10223_v60, %v4364_v14 }
 0x2ab   : > { %v4367_v44 = vrot.slane %v4129_v25, 7 }
 0x2ad   : > { %v7462_v7 = vpop.f32.mrb[138].mxu0  ;;  %v4370_v19 = vsel %vm1296_vm2, %v4367_v44, %v4369_v13  ;;  %v4368_v21 = vsel %vm1296_vm2, %v4365_v23, %v4367_v44 }
 0x2ae   : > { %v4373_v12 = vrot.slane %v7462_v7, 7  ;;  %v4139_v42 = vpop.f32.mrb[139].mxu0  ;;  %v10487_v33 = vadd.f32 %v10249_v35, %v4370_v19  ;;  %v10490_v5 = vadd.f32 %v10237_v41, %v4368_v21 }
 0x2af   : > { %v4371_v36 = vrot.slane %v4139_v42, 7 }
 0x2b1   : > { %v7465_v39 = vpop.f32.mrb[140].mxu0  ;;  %v4374_v55 = vsel %vm1296_vm2, %v4371_v36, %v4373_v12  ;;  %v4372_v60 = vsel %vm1296_vm2, %v4369_v13, %v4371_v36 }
 0x2b2   : > { %v4377_v34 = vrot.slane %v7465_v39, 7  ;;  %v4149_v32 = vpop.f32.mrb[141].mxu0  ;;  %v10495_v49 = vadd.f32 %v10263_v8, %v4374_v55  ;;  %v10498_v23 = vadd.f32 %v10251_v0, %v4372_v60 }
 0x2b3   : > { %v4375_v2 = vrot.slane %v4149_v32, 7 }
 0x2b5   : > { %v7468_v35 = vpop.f32.mrb[142].mxu0  ;;  %v4378_v14 = vsel %vm1296_vm2, %v4375_v2, %v4377_v34  ;;  %v4376_v41 = vsel %vm1296_vm2, %v4373_v12, %v4375_v2 }
 0x2b6   : > { %v4381_v25 = vrot.slane %v7468_v35, 7  ;;  %v4159_v44 = vpop.f32.mrb[143].mxu0  ;;  %v10503_v7 = vadd.f32 %v10277_v10, %v4378_v14  ;;  %v10506_v13 = vadd.f32 %v10265_v62, %v4376_v41 }
 0x2b7   : > { %v4379_v19 = vrot.slane %v4159_v44, 7 }
 0x2b9   : > { %v7471_v8 = vpop.f32.mrb[144].mxu0  ;;  %v4382_v21 = vsel %vm1296_vm2, %v4379_v19, %v4381_v25  ;;  %v4380_v0 = vsel %vm1296_vm2, %v4377_v34, %v4379_v19 }
 0x2ba   : > { %v4385_v42 = vrot.slane %v7471_v8, 7  ;;  %v4169_v36 = vpop.f32.mrb[145].mxu0  ;;  %v10511_v39 = vadd.f32 %v10291_v47, %v4382_v21  ;;  %v10514_v12 = vadd.f32 %v10279_v48, %v4380_v0 }
 0x2bb   : > { %v4383_v55 = vrot.slane %v4169_v36, 7 }
 0x2bd   : > { %v7474_v10 = vpop.f32.mrb[146].mxu0  ;;  %v4386_v60 = vsel %vm1296_vm2, %v4383_v55, %v4385_v42  ;;  %v4384_v62 = vsel %vm1296_vm2, %v4381_v25, %v4383_v55 }
 0x2be   : > { %v4389_v32 = vrot.slane %v7474_v10, 7  ;;  %v4179_v2 = vpop.f32.mrb[147].mxu0  ;;  %v10519_v35 = vadd.f32 %v10305_v3, %v4386_v60  ;;  %v10522_v34 = vadd.f32 %v10293_v15, %v4384_v62 }
 0x2bf   : > { %v4387_v14 = vrot.slane %v4179_v2, 7 }
 0x2c1   : > { %v7477_v47 = vpop.f32.mrb[148].mxu0  ;;  %v4390_v41 = vsel %vm1296_vm2, %v4387_v14, %v4389_v32  ;;  %v4388_v48 = vsel %vm1296_vm2, %v4385_v42, %v4387_v14 }
 0x2c2   : > { %v4393_v44 = vrot.slane %v7477_v47, 7  ;;  %v4189_v19 = vpop.f32.mrb[149].mxu0  ;;  %v10527_v8 = vadd.f32 %v10317_v59, %v4390_v41  ;;  %v10530_v25 = vadd.f32 %v10307_v37, %v4388_v48 }
 0x2c3   : > { %v4391_v21 = vrot.slane %v4189_v19, 7 }
 0x2c5   : > { %v7480_v3 = vpop.f32.mrb[150].mxu0  ;;  %v4394_v0 = vsel %vm1296_vm2, %v4391_v21, %v4393_v44  ;;  %v4392_v15 = vsel %vm1296_vm2, %v4389_v32, %v4391_v21 }
 0x2c6   : > { %v4397_v36 = vrot.slane %v7480_v3, 7  ;;  %v4199_v55 = vpop.f32.mrb[151].mxu0  ;;  %v10535_v10 = vadd.f32 %v10327_v58, %v4394_v0  ;;  %v10538_v42 = vadd.f32 %v10319_v18, %v4392_v15 }
 0x2c7   : > { %v4395_v60 = vrot.slane %v4199_v55, 7 }
 0x2c9   : > { %v7483_v59 = vpop.f32.mrb[152].mxu0  ;;  %v4398_v62 = vsel %vm1296_vm2, %v4395_v60, %v4397_v36  ;;  %v4396_v37 = vsel %vm1296_vm2, %v4393_v44, %v4395_v60 }
 0x2ca   : > { %v4401_v2 = vrot.slane %v7483_v59, 7  ;;  %v4209_v14 = vpop.f32.mrb[153].mxu0  ;;  %v10543_v47 = vadd.f32 %v10341_v9, %v4398_v62  ;;  %v10546_v32 = vadd.f32 %v10329_v26, %v4396_v37 }
 0x2cb   : > { %v4399_v41 = vrot.slane %v4209_v14, 7 }
 0x2cd   : > { %v7486_v58 = vpop.f32.mrb[154].mxu0  ;;  %v4402_v48 = vsel %vm1296_vm2, %v4399_v41, %v4401_v2  ;;  %v4400_v18 = vsel %vm1296_vm2, %v4397_v36, %v4399_v41 }
 0x2ce   : > { %v4405_v19 = vrot.slane %v7486_v58, 7  ;;  %v4219_v21 = vpop.f32.mrb[155].mxu0  ;;  %v10551_v3 = vadd.f32 %v10353_v57, %v4402_v48  ;;  %v10554_v44 = vadd.f32 %v10343_v40, %v4400_v18 }
 0x2cf   : > { %v4403_v0 = vrot.slane %v4219_v21, 7 }
 0x2d1   : > { %v7489_v9 = vpop.f32.mrb[156].mxu0  ;;  %v4406_v15 = vsel %vm1296_vm2, %v4403_v0, %v4405_v19  ;;  %v4404_v26 = vsel %vm1296_vm2, %v4401_v2, %v4403_v0 }
 0x2d2   : > { %v4409_v55 = vrot.slane %v7489_v9, 7  ;;  %v4229_v60 = vpop.f32.mrb[157].mxu0  ;;  %v10559_v59 = vadd.f32 %v10363_v16, %v4406_v15  ;;  %v10562_v36 = vadd.f32 %v10355_v63, %v4404_v26 }
 0x2d3   : > { %v4407_v62 = vrot.slane %v4229_v60, 7 }
 0x2d5   : > { %v7492_v57 = vpop.f32.mrb[158].mxu0  ;;  %v4410_v37 = vsel %vm1296_vm2, %v4407_v62, %v4409_v55  ;;  %v4408_v40 = vsel %vm1296_vm2, %v4405_v19, %v4407_v62  ;;  %v11130_v19 = vld [vmem:[#allocation29_spill] sm:$0xff] }
 0x2d6   : > { %v4413_v14 = vrot.slane %v7492_v57, 7  ;;  %v4239_v41 = vpop.f32.mrb[159].mxu0  ;;  %v10567_v58 = vadd.f32 %v10373_v29, %v4410_v37  ;;  %v10570_v2 = vadd.f32 %v10365_v50, %v4408_v40  ;;  %v11131_v37 = vld [vmem:[#allocation28_spill] sm:$0xff] }
 0x2d7   : > { %v4411_v48 = vrot.slane %v4239_v41, 7 }
 0x2d9   : > { %v7495_v16 = vpop.f32.mrb[160].mxu0  ;;  %v4414_v18 = vsel %vm1296_vm2, %v4411_v48, %v4413_v14  ;;  %v4412_v63 = vsel %vm1296_vm2, %v4409_v55, %v4411_v48  ;;  %v11132_v55 = vld [vmem:[#allocation27_spill] sm:$0xff] }
 0x2da   : > { %v4417_v21 = vrot.slane %v7495_v16, 7  ;;  %v4249_v0 = vpop.f32.mrb[161].mxu0  ;;  %v10575_v9 = vadd.f32 %v10383_v17, %v4414_v18  ;;  %v10578_v15 = vadd.f32 %v11130_v19, %v4412_v63 }
 0x2db   : > { %v4415_v26 = vrot.slane %v4249_v0, 7 }
 0x2dd   : > { %v7498_v29 = vpop.f32.mrb[162].mxu0  ;;  %v4418_v60 = vsel %vm1296_vm2, %v4415_v26, %v4417_v21  ;;  %v4416_v50 = vsel %vm1296_vm2, %v4413_v14, %v4415_v26  ;;  %v11135_v14 = vld [vmem:[#allocation30_spill] sm:$0xff] }
 0x2de   : > { %v4421_v62 = vrot.slane %v7498_v29, 7  ;;  %v4259_v57 = vpop.f32.mrb[163].mxu0  ;;  %v10583_v40 = vadd.f32 %v11131_v37, %v4418_v60  ;;  %v10586_v41 = vadd.f32 %v11132_v55, %v4416_v50 }
 0x2df   : > { %v4419_v48 = vrot.slane %v4259_v57, 7 }
 0x2e0   : > { %11133 = vst [vmem:[#allocation33_spill] sm:$0xff] %v10586_v41 }
 0x2e1   : > { %v7501_v17 = vpop.f32.mrb[164].mxu0  ;;  %v4422_v16 = vsel %vm1296_vm2, %v4419_v48, %v4421_v62  ;;  %v4420_v18 = vsel %vm1296_vm2, %v4417_v21, %v4419_v48 }
 0x2e2   : > { %v4425_v63 = vrot.slane %v7501_v17, 7  ;;  %v4269_v0 = vpop.f32.mrb[165].mxu0  ;;  %v10591_v19 = vadd.f32 %v10403_v43, %v4422_v16  ;;  %v10594_v26 = vadd.f32 %v11135_v14, %v4420_v18 }
 0x2e3   : > { %v4423_v29 = vrot.slane %v4269_v0, 7 }
 0x2e4   : > { %11134 = vst [vmem:[#allocation31_spill] sm:$0xff] %v10591_v19  ;;  %11136 = vst [vmem:[#allocation32_spill] sm:$0xff] %v10594_v26 }
 0x2e5   : > { %v7504_v60 = vpop.f32.mrb[166].mxu0  ;;  %v4426_v37 = vsel %vm1296_vm2, %v4423_v29, %v4425_v63  ;;  %v4424_v50 = vsel %vm1296_vm2, %v4421_v62, %v4423_v29 }
 0x2e6   : > { %v4429_v57 = vrot.slane %v7504_v60, 7  ;;  %v4279_v55 = vpop.f32.mrb[167].mxu0  ;;  %v10599_v41 = vadd.f32 %v10413_v27, %v4426_v37  ;;  %v10602_v21 = vadd.f32 %v10405_v61, %v4424_v50 }
 0x2e7   : > { %v4427_v48 = vrot.slane %v4279_v55, 7 }
 0x2e8   : > { %11137 = vst [vmem:[#allocation38_spill] sm:$0xff] %v10599_v41  ;;  %11138 = vst [vmem:[#allocation34_spill] sm:$0xff] %v10602_v21 }
 0x2e9   : > { %v7643_v17 = vpop.f32.mrb[168].mxu0  ;;  %v4430_v16 = vsel %vm1296_vm2, %v4427_v48, %v4429_v57  ;;  %v4428_v18 = vsel %vm1296_vm2, %v4425_v63, %v4427_v48 }
 0x2ea   : > { %v7539_v43 = vpop.f32.mrb[24].mxu1  ;;  %v5269_v14 = vrot.slane %v7643_v17, 1  ;;  %v4981_v62 = vpop.f32.mrb[169].mxu0  ;;  %v10608_v29 = vadd.f32 %v10416_v45, %v4430_v16  ;;  %v10611_v27 = vadd.f32 %v10418_v31, %v4428_v18 }
 0x2eb   : > { %v8021_v0 = vadd.f32 %v10423_v54, %v7539_v43  ;;  %v4611_v26 = vpop.f32.mrb[25].mxu1  ;;  %v5268_v60 = vrot.slane %v4981_v62, 1 }
 0x2ec   : > { %11139 = vst [vmem:[#allocation37_spill] sm:$0xff] %v10608_v29  ;;  %11140 = vst [vmem:[#allocation35_spill] sm:$0xff] %v10611_v27  ;;  %v8026_v61 = vadd.f32 %v10426_v53, %v4611_v26 }
 0x2ed   : > { %v5270_v37 = vsel %vm2181_vm3, %v5268_v60, %v5269_v14  ;;  %v7646_v57 = vpop.f32.mrb[170].mxu0 }
 0x2ee   : > { %v7542_v50 = vpop.f32.mrb[26].mxu1  ;;  %v5412_v63 = vadd.f32 %v8026_v61, %v5270_v37  ;;  %v5273_v55 = vrot.slane %v7646_v57, 1  ;;  %v4991_v43 = vpop.f32.mrb[171].mxu0 }
 0x2ef   : > { %v8031_v54 = vadd.f32 %v10431_v24, %v7542_v50  ;;  %v4621_v48 = vpop.f32.mrb[27].mxu1  ;;  %v5271_v45 = vrot.slane %v4991_v43, 1 }
 0x2f0   : > { %v8036_v17 = vadd.f32 %v10434_v28, %v4621_v48  ;;  %v5460_v31 = vsel %vm469_vm0, %v5412_v63, 0.0 }
 0x2f1   : > { %5508 = vst [vmem:[%s8525_s10] sm:$0xff] %v5460_v31  ;;  %v5272_v53 = vsel %vm2181_vm3, %v5269_v14, %v5271_v45  ;;  %v5274_v26 = vsel %vm2181_vm3, %v5271_v45, %v5273_v55  ;;  %v7649_v62 = vpop.f32.mrb[172].mxu0  ;;  %v5609_v63 = vmul.f32 %v5460_v31, %v5460_v31 }
 0x2f2   : > { %v7545_v18 = vpop.f32.mrb[28].mxu1  ;;  %v5413_v61 = vadd.f32 %v8021_v0, %v5272_v53  ;;  %v5414_v24 = vadd.f32 %v8036_v17, %v5274_v26  ;;  %v5277_v37 = vrot.slane %v7649_v62, 1  ;;  %v5001_v28 = vpop.f32.mrb[173].mxu0 }
 0x2f3   : > { %v8041_v60 = vadd.f32 %v10439_v6, %v7545_v18  ;;  %v4631_v50 = vpop.f32.mrb[29].mxu1  ;;  %v5275_v48 = vrot.slane %v5001_v28, 1 }
 0x2f4   : > { %v8046_v57 = vadd.f32 %v10442_v46, %v4631_v50  ;;  %v5462_v27 = vsel %vm474_vm1, %v5414_v24, 0.0  ;;  %5509 = vst [vmem:[%s8525_s10 + $0x8] sm:$0xff] %v5413_v61  ;;  %v5556_v14 = vadd.f32 %v5460_v31, %v5413_v61  ;;  %v5610_v45 = vmul.f32 %v5413_v61, %v5413_v61 }
 0x2f5   : > { %5510 = vst [vmem:[%s8525_s10 + $0x10] sm:$0xff] %v5462_v27  ;;  %v5611_v29 = vmul.f32 %v5462_v27, %v5462_v27  ;;  %v5276_v0 = vsel %vm2181_vm3, %v5273_v55, %v5275_v48  ;;  %v5278_v6 = vsel %vm2181_vm3, %v5275_v48, %v5277_v37  ;;  %v7652_v53 = vpop.f32.mrb[174].mxu0 }
 0x2f6   : > { %v7548_v17 = vpop.f32.mrb[30].mxu1  ;;  %v5557_v26 = vadd.f32 %v5556_v14, %v5462_v27  ;;  %v5657_v46 = vadd.f32 %v5610_v45, %v5609_v63  ;;  %v5415_v18 = vadd.f32 %v8031_v54, %v5276_v0  ;;  %v5416_v62 = vadd.f32 %v8046_v57, %v5278_v6  ;;  %v5011_v28 = vpop.f32.mrb[175].mxu0 }
 0x2f7   : > { %v4641_v50 = vpop.f32.mrb[31].mxu1  ;;  %v8051_v24 = vadd.f32 %v10447_v20, %v7548_v17  ;;  %v5281_v31 = vrot.slane %v7652_v53, 1  ;;  %v5279_v21 = vrot.slane %v5011_v28, 1 }
 0x2f8   : > { %v8056_v61 = vadd.f32 %v10450_v1, %v4641_v50  ;;  %v5658_v41 = vadd.f32 %v5657_v46, %v5611_v29  ;;  %v5463_v55 = vsel %vm469_vm0, %v5415_v18, 0.0  ;;  %5512 = vst [vmem:[%s8525_s10 + $0x20] sm:$0xff] %v5416_v62  ;;  %v5613_v48 = vmul.f32 %v5416_v62, %v5416_v62 }
 0x2f9   : > { %5511 = vst [vmem:[%s8525_s10 + $0x18] sm:$0xff] %v5463_v55  ;;  %v5558_v19 = vadd.f32 %v5557_v26, %v5463_v55  ;;  %v5612_v27 = vmul.f32 %v5463_v55, %v5463_v55  ;;  %v5280_v54 = vsel %vm2181_vm3, %v5277_v37, %v5279_v21  ;;  %v5282_v57 = vsel %vm2181_vm3, %v5279_v21, %v5281_v31  ;;  %v7655_v20 = vpop.f32.mrb[176].mxu0 }
 0x2fa   : > { %v7551_v63 = vpop.f32.mrb[32].mxu1  ;;  %v5417_v14 = vadd.f32 %v8041_v60, %v5280_v54  ;;  %v5418_v1 = vadd.f32 %v8056_v61, %v5282_v57  ;;  %v5285_v45 = vrot.slane %v7655_v20, 1  ;;  %v5021_v6 = vpop.f32.mrb[177].mxu0 }
 0x2fb   : > { %v8061_v29 = vadd.f32 %v10455_v11, %v7551_v63  ;;  %v4651_v0 = vpop.f32.mrb[33].mxu1  ;;  %v5559_v17 = vadd.f32 %v5558_v19, %v5416_v62  ;;  %v5659_v53 = vadd.f32 %v5658_v41, %v5612_v27  ;;  %v5283_v46 = vrot.slane %v5021_v6, 1 }
 0x2fc   : > { %v8066_v26 = vadd.f32 %v10458_v52, %v4651_v0  ;;  %v5465_v37 = vsel %vm474_vm1, %v5417_v14, 0.0  ;;  %v5466_v21 = vsel %vm469_vm0, %v5418_v1, 0.0 }
 0x2fd   : > { %v5660_v18 = vadd.f32 %v5659_v53, %v5613_v48  ;;  %5513 = vst [vmem:[%s8525_s10 + $0x28] sm:$0xff] %v5465_v37  ;;  %5514 = vst [vmem:[%s8525_s10 + $0x30] sm:$0xff] %v5466_v21  ;;  %v5560_v60 = vadd.f32 %v5559_v17, %v5465_v37  ;;  %v5614_v50 = vmul.f32 %v5465_v37, %v5465_v37  ;;  %v7658_v61 = vpop.f32.mrb[178].mxu0 }
 0x2fe   : > { %v5615_v11 = vmul.f32 %v5466_v21, %v5466_v21  ;;  %v7554_v28 = vpop.f32.mrb[34].mxu1  ;;  %v5284_v41 = vsel %vm2181_vm3, %v5281_v31, %v5283_v46  ;;  %v5286_v52 = vsel %vm2181_vm3, %v5283_v46, %v5285_v45  ;;  %v5289_v62 = vrot.slane %v7658_v61, 1  ;;  %v5031_v27 = vpop.f32.mrb[179].mxu0 }
 0x2ff   : > { %v8071_v19 = vadd.f32 %v10463_v38, %v7554_v28  ;;  %v4661_v55 = vpop.f32.mrb[35].mxu1  ;;  %v5561_v54 = vadd.f32 %v5560_v60, %v5466_v21  ;;  %v5661_v48 = vadd.f32 %v5660_v18, %v5614_v50  ;;  %v5419_v57 = vadd.f32 %v8051_v24, %v5284_v41 }
 0x300   : > { %v5420_v63 = vadd.f32 %v8066_v26, %v5286_v52  ;;  %v8076_v20 = vadd.f32 %v10466_v51, %v4661_v55  ;;  %v5287_v14 = vrot.slane %v5031_v27, 1 }
 0x301   : > { %v5662_v1 = vadd.f32 %v5661_v48, %v5615_v11  ;;  %5515 = vst [vmem:[%s8525_s10 + $0x38] sm:$0xff] %v5419_v57  ;;  %v5562_v31 = vadd.f32 %v5561_v54, %v5419_v57  ;;  %v5616_v6 = vmul.f32 %v5419_v57, %v5419_v57  ;;  %v7661_v38 = vpop.f32.mrb[180].mxu0 }
 0x302   : > { %v5468_v0 = vsel %vm474_vm1, %v5420_v63, 0.0  ;;  %v7557_v17 = vpop.f32.mrb[36].mxu1  ;;  %v5288_v46 = vsel %vm2181_vm3, %v5285_v45, %v5287_v14  ;;  %v5290_v24 = vsel %vm2181_vm3, %v5287_v14, %v5289_v62  ;;  %v5041_v37 = vpop.f32.mrb[181].mxu0  ;;  %v5293_v11 = vrot.slane %v7661_v38, 1 }
 0x303   : > { %5516 = vst [vmem:[%s8525_s10 + $0x40] sm:$0xff] %v5468_v0  ;;  %v5617_v53 = vmul.f32 %v5468_v0, %v5468_v0  ;;  %v8081_v26 = vadd.f32 %v10471_v30, %v7557_v17  ;;  %v4671_v51 = vpop.f32.mrb[37].mxu1  ;;  %v5563_v21 = vadd.f32 %v5562_v31, %v5468_v0  ;;  %v5663_v18 = vadd.f32 %v5662_v1, %v5616_v6 }
 0x304   : > { %v5421_v60 = vadd.f32 %v8061_v29, %v5288_v46  ;;  %v5422_v50 = vadd.f32 %v8076_v20, %v5290_v24  ;;  %v8086_v28 = vadd.f32 %v10474_v56, %v4671_v51  ;;  %v5291_v61 = vrot.slane %v5041_v37, 1 }
 0x305   : > { %v5664_v41 = vadd.f32 %v5663_v18, %v5617_v53  ;;  %v7664_v27 = vpop.f32.mrb[182].mxu0 }
 0x306   : > { %v5469_v52 = vsel %vm469_vm0, %v5421_v60, 0.0  ;;  %5518 = vst [vmem:[%s8525_s10 + $0x50] sm:$0xff] %v5422_v50  ;;  %v5619_v45 = vmul.f32 %v5422_v50, %v5422_v50  ;;  %v7560_v55 = vpop.f32.mrb[38].mxu1  ;;  %v5292_v48 = vsel %vm2181_vm3, %v5289_v62, %v5291_v61  ;;  %v5294_v29 = vsel %vm2181_vm3, %v5291_v61, %v5293_v11  ;;  %v5051_v56 = vpop.f32.mrb[183].mxu0 }
 0x307   : > { %5517 = vst [vmem:[%s8525_s10 + $0x48] sm:$0xff] %v5469_v52  ;;  %v5564_v30 = vadd.f32 %v5563_v21, %v5469_v52  ;;  %v5618_v54 = vmul.f32 %v5469_v52, %v5469_v52  ;;  %v4681_v57 = vpop.f32.mrb[39].mxu1  ;;  %v5423_v63 = vadd.f32 %v8071_v19, %v5292_v48  ;;  %v5424_v20 = vadd.f32 %v8086_v28, %v5294_v29 }
 0x308   : > { %v8091_v14 = vadd.f32 %v10479_v22, %v7560_v55  ;;  %v5297_v1 = vrot.slane %v7664_v27, 1  ;;  %v8096_v6 = vadd.f32 %v10482_v4, %v4681_v57  ;;  %v5295_v17 = vrot.slane %v5051_v56, 1 }
 0x309   : > { %v5565_v0 = vadd.f32 %v5564_v30, %v5422_v50  ;;  %v5665_v31 = vadd.f32 %v5664_v41, %v5618_v54  ;;  %v5471_v38 = vsel %vm474_vm1, %v5423_v63, 0.0  ;;  %v5472_v62 = vsel %vm469_vm0, %v5424_v20, 0.0  ;;  %v7667_v46 = vpop.f32.mrb[184].mxu0 }
 0x30a   : > { %v7563_v53 = vpop.f32.mrb[40].mxu1  ;;  %5519 = vst [vmem:[%s8525_s10 + $0x58] sm:$0xff] %v5471_v38  ;;  %5520 = vst [vmem:[%s8525_s10 + $0x60] sm:$0xff] %v5472_v62  ;;  %v5620_v51 = vmul.f32 %v5471_v38, %v5471_v38  ;;  %v5621_v22 = vmul.f32 %v5472_v62, %v5472_v62  ;;  %v5061_v21 = vpop.f32.mrb[185].mxu0  ;;  %v5296_v4 = vsel %vm2181_vm3, %v5293_v11, %v5295_v17  ;;  %v5301_v50 = vrot.slane %v7667_v46, 1 }
 0x30b   : > { %v5666_v24 = vadd.f32 %v5665_v31, %v5619_v45  ;;  %v5566_v19 = vadd.f32 %v5565_v0, %v5471_v38  ;;  %v4691_v37 = vpop.f32.mrb[41].mxu1  ;;  %v5298_v18 = vsel %vm2181_vm3, %v5295_v17, %v5297_v1  ;;  %v8101_v60 = vadd.f32 %v10487_v33, %v7563_v53 }
 0x30c   : > { %v5425_v41 = vadd.f32 %v8081_v26, %v5296_v4  ;;  %v5426_v52 = vadd.f32 %v8096_v6, %v5298_v18  ;;  %v8106_v45 = vadd.f32 %v10490_v5, %v4691_v37  ;;  %v5299_v55 = vrot.slane %v5061_v21, 1 }
 0x30d   : > { %v5567_v28 = vadd.f32 %v5566_v19, %v5472_v62  ;;  %v5667_v61 = vadd.f32 %v5666_v24, %v5620_v51  ;;  %v7670_v30 = vpop.f32.mrb[186].mxu0 }
 0x30e   : > { %v7566_v27 = vpop.f32.mrb[42].mxu1  ;;  %v5474_v48 = vsel %vm474_vm1, %v5426_v52, 0.0  ;;  %5521 = vst [vmem:[%s8525_s10 + $0x68] sm:$0xff] %v5425_v41  ;;  %v5622_v29 = vmul.f32 %v5425_v41, %v5425_v41  ;;  %v5071_v33 = vpop.f32.mrb[187].mxu0  ;;  %v5300_v26 = vsel %vm2181_vm3, %v5297_v1, %v5299_v55  ;;  %v5302_v63 = vsel %vm2181_vm3, %v5299_v55, %v5301_v50 }
 0x30f   : > { %v5668_v54 = vadd.f32 %v5667_v61, %v5621_v22  ;;  %v5568_v11 = vadd.f32 %v5567_v28, %v5425_v41  ;;  %v4701_v57 = vpop.f32.mrb[43].mxu1  ;;  %5522 = vst [vmem:[%s8525_s10 + $0x70] sm:$0xff] %v5474_v48  ;;  %v5623_v56 = vmul.f32 %v5474_v48, %v5474_v48  ;;  %v8111_v5 = vadd.f32 %v10495_v49, %v7566_v27 }
 0x310   : > { %v5427_v31 = vadd.f32 %v8091_v14, %v5300_v26  ;;  %v5428_v6 = vadd.f32 %v8106_v45, %v5302_v63  ;;  %v5305_v17 = vrot.slane %v7670_v30, 1  ;;  %v8116_v38 = vadd.f32 %v10498_v23, %v4701_v57 }
 0x311   : > { %v5569_v20 = vadd.f32 %v5568_v11, %v5474_v48  ;;  %v5669_v0 = vadd.f32 %v5668_v54, %v5622_v29  ;;  %v5303_v62 = vrot.slane %v5071_v33, 1  ;;  %v7673_v46 = vpop.f32.mrb[188].mxu0 }
 0x312   : > { %v7569_v53 = vpop.f32.mrb[44].mxu1  ;;  %v5475_v19 = vsel %vm469_vm0, %v5427_v31, 0.0  ;;  %5524 = vst [vmem:[%s8525_s10 + $0x80] sm:$0xff] %v5428_v6  ;;  %v5081_v49 = vpop.f32.mrb[189].mxu0  ;;  %v5309_v18 = vrot.slane %v7673_v46, 1  ;;  %v5625_v41 = vmul.f32 %v5428_v6, %v5428_v6 }
 0x313   : > { %v5670_v24 = vadd.f32 %v5669_v0, %v5623_v56  ;;  %v8121_v1 = vadd.f32 %v10503_v7, %v7569_v53  ;;  %v4711_v51 = vpop.f32.mrb[45].mxu1  ;;  %5523 = vst [vmem:[%s8525_s10 + $0x78] sm:$0xff] %v5475_v19  ;;  %v5570_v22 = vadd.f32 %v5569_v20, %v5475_v19  ;;  %v5624_v37 = vmul.f32 %v5475_v19, %v5475_v19 }
 0x314   : > { %v5304_v14 = vsel %vm2181_vm3, %v5301_v50, %v5303_v62  ;;  %v5306_v21 = vsel %vm2181_vm3, %v5303_v62, %v5305_v17  ;;  %v8126_v28 = vadd.f32 %v10506_v13, %v4711_v51  ;;  %v5307_v7 = vrot.slane %v5081_v49, 1 }
 0x315   : > { %v5429_v23 = vadd.f32 %v8101_v60, %v5304_v14  ;;  %v5430_v4 = vadd.f32 %v8116_v38, %v5306_v21  ;;  %v5571_v61 = vadd.f32 %v5570_v22, %v5428_v6  ;;  %v5671_v52 = vadd.f32 %v5670_v24, %v5624_v37  ;;  %v7676_v55 = vpop.f32.mrb[190].mxu0 }
 0x316   : > { %v7572_v45 = vpop.f32.mrb[46].mxu1  ;;  %v5313_v30 = vrot.slane %v7676_v55, 1  ;;  %v5091_v48 = vpop.f32.mrb[191].mxu0  ;;  %v5308_v33 = vsel %vm2181_vm3, %v5305_v17, %v5307_v7  ;;  %v5310_v56 = vsel %vm2181_vm3, %v5307_v7, %v5309_v18 }
 0x317   : > { %v5477_v27 = vsel %vm474_vm1, %v5429_v23, 0.0  ;;  %v5478_v50 = vsel %vm469_vm0, %v5430_v4, 0.0  ;;  %v8131_v60 = vadd.f32 %v10511_v39, %v7572_v45  ;;  %v4721_v54 = vpop.f32.mrb[47].mxu1  ;;  %v5672_v11 = vadd.f32 %v5671_v52, %v5625_v41 }
 0x318   : > { %5525 = vst [vmem:[%s8525_s10 + $0x88] sm:$0xff] %v5477_v27  ;;  %5526 = vst [vmem:[%s8525_s10 + $0x90] sm:$0xff] %v5478_v50  ;;  %v5572_v13 = vadd.f32 %v5571_v61, %v5477_v27  ;;  %v5626_v29 = vmul.f32 %v5477_v27, %v5477_v27  ;;  %v5627_v57 = vmul.f32 %v5478_v50, %v5478_v50  ;;  %v5311_v63 = vrot.slane %v5091_v48, 1 }
 0x319   : > { %v8136_v26 = vadd.f32 %v10514_v12, %v4721_v54  ;;  %v5431_v0 = vadd.f32 %v8111_v5, %v5308_v33  ;;  %v5432_v31 = vadd.f32 %v8126_v28, %v5310_v56  ;;  %v7679_v38 = vpop.f32.mrb[192].mxu0 }
 0x31a   : > { %v5573_v20 = vadd.f32 %v5572_v13, %v5478_v50  ;;  %v5673_v39 = vadd.f32 %v5672_v11, %v5626_v29  ;;  %v7575_v6 = vpop.f32.mrb[48].mxu1  ;;  %v5312_v62 = vsel %vm2181_vm3, %v5309_v18, %v5311_v63  ;;  %v5314_v53 = vsel %vm2181_vm3, %v5311_v63, %v5313_v30  ;;  %v5101_v24 = vpop.f32.mrb[193].mxu0 }
 0x31b   : > { %v8141_v46 = vadd.f32 %v10519_v35, %v7575_v6  ;;  %v4731_v17 = vpop.f32.mrb[49].mxu1  ;;  %v5480_v12 = vsel %vm474_vm1, %v5432_v31, 0.0  ;;  %5527 = vst [vmem:[%s8525_s10 + $0x98] sm:$0xff] %v5431_v0  ;;  %v5628_v49 = vmul.f32 %v5431_v0, %v5431_v0  ;;  %v5433_v5 = vadd.f32 %v8121_v1, %v5312_v62 }
 0x31c   : > { %v5674_v19 = vadd.f32 %v5673_v39, %v5627_v57  ;;  %v5574_v51 = vadd.f32 %v5573_v20, %v5431_v0  ;;  %5528 = vst [vmem:[%s8525_s10 + $0xa0] sm:$0xff] %v5480_v12  ;;  %v5434_v22 = vadd.f32 %v8136_v26, %v5314_v53  ;;  %v5317_v37 = vrot.slane %v7679_v38, 1 }
 0x31d   : > { %v8146_v14 = vadd.f32 %v10522_v34, %v4731_v17  ;;  %v5629_v23 = vmul.f32 %v5480_v12, %v5480_v12  ;;  %v5315_v4 = vrot.slane %v5101_v24, 1  ;;  %v7682_v28 = vpop.f32.mrb[194].mxu0  ;;  %v5481_v61 = vsel %vm469_vm0, %v5433_v5, 0.0 }
 0x31e   : > { %v5575_v21 = vadd.f32 %v5574_v51, %v5480_v12  ;;  %v5675_v35 = vadd.f32 %v5674_v19, %v5628_v49  ;;  %v7578_v18 = vpop.f32.mrb[50].mxu1  ;;  %5530 = vst [vmem:[%s8525_s10 + $0xb0] sm:$0xff] %v5434_v22  ;;  %v5321_v52 = vrot.slane %v7682_v28, 1  ;;  %v5111_v1 = vpop.f32.mrb[195].mxu0  ;;  %5529 = vst [vmem:[%s8525_s10 + $0xa8] sm:$0xff] %v5481_v61  ;;  %v5630_v27 = vmul.f32 %v5481_v61, %v5481_v61 }
 0x31f   : > { %v8151_v41 = vadd.f32 %v10527_v8, %v7578_v18  ;;  %v4741_v7 = vpop.f32.mrb[51].mxu1  ;;  %v5316_v34 = vsel %vm2181_vm3, %v5313_v30, %v5315_v4  ;;  %v5318_v50 = vsel %vm2181_vm3, %v5315_v4, %v5317_v37  ;;  %v5319_v11 = vrot.slane %v5111_v1, 1 }
 0x320   : > { %v5676_v45 = vadd.f32 %v5675_v35, %v5629_v23  ;;  %v5576_v55 = vadd.f32 %v5575_v21, %v5481_v61  ;;  %v5435_v54 = vadd.f32 %v8131_v60, %v5316_v34  ;;  %v8156_v48 = vadd.f32 %v10530_v25, %v4741_v7 }
 0x321   : > { %v5631_v29 = vmul.f32 %v5434_v22, %v5434_v22  ;;  %v5436_v57 = vadd.f32 %v8146_v14, %v5318_v50  ;;  %v7685_v56 = vpop.f32.mrb[196].mxu0  ;;  %v5320_v63 = vsel %vm2181_vm3, %v5317_v37, %v5319_v11  ;;  %v5322_v30 = vsel %vm2181_vm3, %v5319_v11, %v5321_v52 }
 0x322   : > { %v5577_v13 = vadd.f32 %v5576_v55, %v5434_v22  ;;  %v5677_v8 = vadd.f32 %v5676_v45, %v5630_v27  ;;  %v7581_v33 = vpop.f32.mrb[52].mxu1  ;;  %v5483_v26 = vsel %vm474_vm1, %v5435_v54, 0.0  ;;  %v5121_v25 = vpop.f32.mrb[197].mxu0  ;;  %v5437_v62 = vadd.f32 %v8141_v46, %v5320_v63 }
 0x323   : > { %v8161_v60 = vadd.f32 %v10535_v10, %v7581_v33  ;;  %v4751_v20 = vpop.f32.mrb[53].mxu1  ;;  %v5484_v0 = vsel %vm469_vm0, %v5436_v57, 0.0  ;;  %5531 = vst [vmem:[%s8525_s10 + $0xb8] sm:$0xff] %v5483_v26  ;;  %v5632_v6 = vmul.f32 %v5483_v26, %v5483_v26  ;;  %v5438_v53 = vadd.f32 %v8156_v48, %v5322_v30 }
 0x324   : > { %v5678_v39 = vadd.f32 %v5677_v8, %v5631_v29  ;;  %v5578_v31 = vadd.f32 %v5577_v13, %v5483_v26  ;;  %5532 = vst [vmem:[%s8525_s10 + $0xc0] sm:$0xff] %v5484_v0  ;;  %v5633_v38 = vmul.f32 %v5484_v0, %v5484_v0  ;;  %v5325_v17 = vrot.slane %v7685_v56, 1  ;;  %5533 = vst [vmem:[%s8525_s10 + $0xc8] sm:$0xff] %v5437_v62 }
 0x325   : > { %v8166_v10 = vadd.f32 %v10538_v42, %v4751_v20  ;;  %v5323_v12 = vrot.slane %v5121_v25, 1  ;;  %v7688_v49 = vpop.f32.mrb[198].mxu0  ;;  %v5486_v5 = vsel %vm474_vm1, %v5438_v53, 0.0  ;;  %v5634_v22 = vmul.f32 %v5437_v62, %v5437_v62 }
 0x326   : > { %v5579_v24 = vadd.f32 %v5578_v31, %v5484_v0  ;;  %v5679_v19 = vadd.f32 %v5678_v39, %v5632_v6  ;;  %v7584_v51 = vpop.f32.mrb[54].mxu1  ;;  %v5329_v14 = vrot.slane %v7688_v49, 1  ;;  %v5131_v46 = vpop.f32.mrb[199].mxu0  ;;  %5534 = vst [vmem:[%s8525_s10 + $0xd0] sm:$0xff] %v5486_v5  ;;  %v5635_v1 = vmul.f32 %v5486_v5, %v5486_v5 }
 0x327   : > { %v8171_v37 = vadd.f32 %v10543_v47, %v7584_v51  ;;  %v4761_v21 = vpop.f32.mrb[55].mxu1  ;;  %v5324_v4 = vsel %vm2181_vm3, %v5321_v52, %v5323_v12  ;;  %v5326_v42 = vsel %vm2181_vm3, %v5323_v12, %v5325_v17  ;;  %v5327_v61 = vrot.slane %v5131_v46, 1 }
 0x328   : > { %v5680_v23 = vadd.f32 %v5679_v19, %v5633_v38  ;;  %v5580_v35 = vadd.f32 %v5579_v24, %v5437_v62  ;;  %v5439_v18 = vadd.f32 %v8151_v41, %v5324_v4  ;;  %v8176_v28 = vadd.f32 %v10546_v32, %v4761_v21 }
 0x329   : > { %v5440_v47 = vadd.f32 %v8166_v10, %v5326_v42  ;;  %v7691_v27 = vpop.f32.mrb[200].mxu0  ;;  %v5328_v50 = vsel %vm2181_vm3, %v5325_v17, %v5327_v61  ;;  %v5330_v52 = vsel %vm2181_vm3, %v5327_v61, %v5329_v14 }
 0x32a   : > { %v5581_v7 = vadd.f32 %v5580_v35, %v5486_v5  ;;  %v5681_v45 = vadd.f32 %v5680_v23, %v5634_v22  ;;  %v7587_v55 = vpop.f32.mrb[56].mxu1  ;;  %v5487_v34 = vsel %vm469_vm0, %v5439_v18, 0.0  ;;  %v5141_v48 = vpop.f32.mrb[201].mxu0  ;;  %v5441_v29 = vadd.f32 %v8161_v60, %v5328_v50 }
 0x32b   : > { %v8181_v41 = vadd.f32 %v10551_v3, %v7587_v55  ;;  %v4771_v54 = vpop.f32.mrb[57].mxu1  ;;  %5535 = vst [vmem:[%s8525_s10 + $0xd8] sm:$0xff] %v5487_v34  ;;  %5536 = vst [vmem:[%s8525_s10 + $0xe0] sm:$0xff] %v5440_v47  ;;  %v5636_v13 = vmul.f32 %v5487_v34, %v5487_v34  ;;  %v5442_v8 = vadd.f32 %v8176_v28, %v5330_v52  ;;  %v5333_v57 = vrot.slane %v7691_v27, 1 }
 0x32c   : > { %v5682_v32 = vadd.f32 %v5681_v45, %v5635_v1  ;;  %v5582_v11 = vadd.f32 %v5581_v7, %v5487_v34  ;;  %v8186_v33 = vadd.f32 %v10554_v44, %v4771_v54  ;;  %v5637_v26 = vmul.f32 %v5440_v47, %v5440_v47 }
 0x32d   : > { %v5331_v30 = vrot.slane %v5141_v48, 1  ;;  %v7694_v3 = vpop.f32.mrb[202].mxu0  ;;  %v5489_v25 = vsel %vm474_vm1, %v5441_v29, 0.0  ;;  %v5490_v39 = vsel %vm469_vm0, %v5442_v8, 0.0 }
 0x32e   : > { %v5583_v56 = vadd.f32 %v5582_v11, %v5440_v47  ;;  %v5683_v63 = vadd.f32 %v5682_v32, %v5636_v13  ;;  %v7590_v20 = vpop.f32.mrb[58].mxu1  ;;  %v5337_v0 = vrot.slane %v7694_v3, 1  ;;  %v5151_v6 = vpop.f32.mrb[203].mxu0  ;;  %5537 = vst [vmem:[%s8525_s10 + $0xe8] sm:$0xff] %v5489_v25  ;;  %5538 = vst [vmem:[%s8525_s10 + $0xf0] sm:$0xff] %v5490_v39  ;;  %v5638_v62 = vmul.f32 %v5489_v25, %v5489_v25 }
 0x32f   : > { %v8191_v60 = vadd.f32 %v10559_v59, %v7590_v20  ;;  %v4781_v31 = vpop.f32.mrb[59].mxu1  ;;  %v5639_v53 = vmul.f32 %v5490_v39, %v5490_v39  ;;  %v5332_v17 = vsel %vm2181_vm3, %v5329_v14, %v5331_v30  ;;  %v5334_v24 = vsel %vm2181_vm3, %v5331_v30, %v5333_v57 }
 0x330   : > { %v5684_v38 = vadd.f32 %v5683_v63, %v5637_v26  ;;  %v5584_v44 = vadd.f32 %v5583_v56, %v5489_v25  ;;  %v8196_v19 = vadd.f32 %v10562_v36, %v4781_v31  ;;  %v5335_v10 = vrot.slane %v5151_v6, 1 }
 0x331   : > { %v5443_v51 = vadd.f32 %v8171_v37, %v5332_v17  ;;  %v5444_v49 = vadd.f32 %v8186_v33, %v5334_v24  ;;  %v7697_v22 = vpop.f32.mrb[204].mxu0 }
 0x332   : > { %v5585_v12 = vadd.f32 %v5584_v44, %v5490_v39  ;;  %v5685_v59 = vadd.f32 %v5684_v38, %v5638_v62  ;;  %v7593_v5 = vpop.f32.mrb[60].mxu1  ;;  %v5336_v21 = vsel %vm2181_vm3, %v5333_v57, %v5335_v10  ;;  %v5338_v46 = vsel %vm2181_vm3, %v5335_v10, %v5337_v0  ;;  %v5161_v35 = vpop.f32.mrb[205].mxu0  ;;  %v11143_v10 = vld [vmem:[#allocation33_spill] sm:$0xff] }
 0x333   : > { %v8201_v23 = vadd.f32 %v10567_v58, %v7593_v5  ;;  %v4791_v14 = vpop.f32.mrb[61].mxu1  ;;  %v5492_v36 = vsel %vm474_vm1, %v5444_v49, 0.0  ;;  %5539 = vst [vmem:[%s8525_s10 + $0xf8] sm:$0xff] %v5443_v51  ;;  %v5640_v18 = vmul.f32 %v5443_v51, %v5443_v51  ;;  %v5445_v37 = vadd.f32 %v8181_v41, %v5336_v21 }
 0x334   : > { %v5686_v4 = vadd.f32 %v5685_v59, %v5639_v53  ;;  %v5586_v42 = vadd.f32 %v5585_v12, %v5443_v51  ;;  %5540 = vst [vmem:[%s8525_s10 + $0x100] sm:$0xff] %v5492_v36  ;;  %v5446_v28 = vadd.f32 %v8196_v19, %v5338_v46  ;;  %v5341_v61 = vrot.slane %v7697_v22, 1  ;;  %v11144_v22 = vld [vmem:[#allocation31_spill] sm:$0xff] }
 0x335   : > { %v8206_v7 = vadd.f32 %v10570_v2, %v4791_v14  ;;  %v5641_v45 = vmul.f32 %v5492_v36, %v5492_v36  ;;  %v5339_v47 = vrot.slane %v5161_v35, 1  ;;  %v7700_v27 = vpop.f32.mrb[206].mxu0  ;;  %v5493_v34 = vsel %vm469_vm0, %v5445_v37, 0.0  ;;  %v11145_v37 = vld [vmem:[#allocation32_spill] sm:$0xff] }
 0x336   : > { %v5587_v1 = vadd.f32 %v5586_v42, %v5492_v36  ;;  %v5687_v58 = vadd.f32 %v5686_v4, %v5640_v18  ;;  %v7596_v55 = vpop.f32.mrb[62].mxu1  ;;  %5542 = vst [vmem:[%s8525_s10 + $0x110] sm:$0xff] %v5446_v28  ;;  %v5345_v52 = vrot.slane %v7700_v27, 1  ;;  %v5171_v41 = vpop.f32.mrb[207].mxu0  ;;  %5541 = vst [vmem:[%s8525_s10 + $0x108] sm:$0xff] %v5493_v34  ;;  %v5642_v11 = vmul.f32 %v5493_v34, %v5493_v34 }
 0x337   : > { %v8211_v50 = vadd.f32 %v10575_v9, %v7596_v55  ;;  %v4801_v54 = vpop.f32.mrb[63].mxu1  ;;  %v5340_v2 = vsel %vm2181_vm3, %v5337_v0, %v5339_v47  ;;  %v5342_v13 = vsel %vm2181_vm3, %v5339_v47, %v5341_v61  ;;  %v5343_v57 = vrot.slane %v5171_v41, 1 }
 0x338   : > { %v5688_v48 = vadd.f32 %v5687_v58, %v5641_v45  ;;  %v5588_v32 = vadd.f32 %v5587_v1, %v5493_v34  ;;  %v5447_v29 = vadd.f32 %v8191_v60, %v5340_v2  ;;  %v8216_v8 = vadd.f32 %v10578_v15, %v4801_v54  ;;  %v11146_v54 = vld [vmem:[#allocation38_spill] sm:$0xff] }
 0x339   : > { %v5643_v56 = vmul.f32 %v5446_v28, %v5446_v28  ;;  %v5448_v26 = vadd.f32 %v8206_v7, %v5342_v13  ;;  %v7703_v30 = vpop.f32.mrb[208].mxu0  ;;  %v5344_v3 = vsel %vm2181_vm3, %v5341_v61, %v5343_v57  ;;  %v5346_v25 = vsel %vm2181_vm3, %v5343_v57, %v5345_v52  ;;  %v11147_v57 = vld [vmem:[#allocation34_spill] sm:$0xff] }
 0x33a   : > { %v5589_v33 = vadd.f32 %v5588_v32, %v5446_v28  ;;  %v5689_v9 = vadd.f32 %v5688_v48, %v5642_v11  ;;  %v7599_v63 = vpop.f32.mrb[64].mxu1  ;;  %v5495_v20 = vsel %vm474_vm1, %v5447_v29, 0.0  ;;  %v5181_v15 = vpop.f32.mrb[209].mxu0  ;;  %v5449_v62 = vadd.f32 %v8201_v23, %v5344_v3 }
 0x33b   : > { %v8221_v39 = vadd.f32 %v10583_v40, %v7599_v63  ;;  %v4811_v60 = vpop.f32.mrb[65].mxu1  ;;  %v5496_v31 = vsel %vm469_vm0, %v5448_v26, 0.0  ;;  %5543 = vst [vmem:[%s8525_s10 + $0x118] sm:$0xff] %v5495_v20  ;;  %v5644_v38 = vmul.f32 %v5495_v20, %v5495_v20  ;;  %v5450_v53 = vadd.f32 %v8216_v8, %v5346_v25 }
 0x33c   : > { %v5690_v0 = vadd.f32 %v5689_v9, %v5643_v56  ;;  %v5590_v6 = vadd.f32 %v5589_v33, %v5495_v20  ;;  %5544 = vst [vmem:[%s8525_s10 + $0x120] sm:$0xff] %v5496_v31  ;;  %v5645_v44 = vmul.f32 %v5496_v31, %v5496_v31  ;;  %v5349_v17 = vrot.slane %v7703_v30, 1  ;;  %5545 = vst [vmem:[%s8525_s10 + $0x128] sm:$0xff] %v5449_v62 }
 0x33d   : > { %v8226_v40 = vadd.f32 %v11143_v10, %v4811_v60  ;;  %v5347_v12 = vrot.slane %v5181_v15, 1  ;;  %v7706_v51 = vpop.f32.mrb[210].mxu0  ;;  %v5498_v49 = vsel %vm474_vm1, %v5450_v53, 0.0  ;;  %v5646_v5 = vmul.f32 %v5449_v62, %v5449_v62  ;;  %v11148_v60 = vld [vmem:[#allocation37_spill] sm:$0xff] }
 0x33e   : > { %v5591_v24 = vadd.f32 %v5590_v6, %v5496_v31  ;;  %v5691_v19 = vadd.f32 %v5690_v0, %v5644_v38  ;;  %v7602_v59 = vpop.f32.mrb[66].mxu1  ;;  %v5353_v46 = vrot.slane %v7706_v51, 1  ;;  %v5191_v23 = vpop.f32.mrb[211].mxu0  ;;  %5546 = vst [vmem:[%s8525_s10 + $0x130] sm:$0xff] %v5498_v49  ;;  %v5647_v1 = vmul.f32 %v5498_v49, %v5498_v49 }
 0x33f   : > { %v8231_v21 = vadd.f32 %v11144_v22, %v7602_v59  ;;  %v4821_v14 = vpop.f32.mrb[67].mxu1  ;;  %v5348_v36 = vsel %vm2181_vm3, %v5345_v52, %v5347_v12  ;;  %v5350_v42 = vsel %vm2181_vm3, %v5347_v12, %v5349_v17  ;;  %v5351_v61 = vrot.slane %v5191_v23, 1 }
 0x340   : > { %v5692_v35 = vadd.f32 %v5691_v19, %v5645_v44  ;;  %v5592_v4 = vadd.f32 %v5591_v24, %v5449_v62  ;;  %v5451_v18 = vadd.f32 %v8211_v50, %v5348_v36  ;;  %v8236_v28 = vadd.f32 %v11145_v37, %v4821_v14  ;;  %v11149_v19 = vld [vmem:[#allocation35_spill] sm:$0xff] }
 0x341   : > { %v5452_v58 = vadd.f32 %v8226_v40, %v5350_v42  ;;  %v7709_v55 = vpop.f32.mrb[212].mxu0  ;;  %v5352_v34 = vsel %vm2181_vm3, %v5349_v17, %v5351_v61  ;;  %v5354_v52 = vsel %vm2181_vm3, %v5351_v61, %v5353_v46 }
 0x342   : > { %v5593_v7 = vadd.f32 %v5592_v4, %v5498_v49  ;;  %v5693_v45 = vadd.f32 %v5692_v35, %v5646_v5  ;;  %v7605_v47 = vpop.f32.mrb[68].mxu1  ;;  %v5499_v27 = vsel %vm469_vm0, %v5451_v18, 0.0  ;;  %v5201_v48 = vpop.f32.mrb[213].mxu0  ;;  %v5453_v13 = vadd.f32 %v8221_v39, %v5352_v34 }
 0x343   : > { %v8241_v50 = vadd.f32 %v11146_v54, %v7605_v47  ;;  %v4831_v41 = vpop.f32.mrb[69].mxu1  ;;  %5547 = vst [vmem:[%s8525_s10 + $0x138] sm:$0xff] %v5499_v27  ;;  %5548 = vst [vmem:[%s8525_s10 + $0x140] sm:$0xff] %v5452_v58  ;;  %v5648_v2 = vmul.f32 %v5499_v27, %v5499_v27  ;;  %v5454_v29 = vadd.f32 %v8236_v28, %v5354_v52  ;;  %v5357_v8 = vrot.slane %v7709_v55, 1 }
 0x344   : > { %v5694_v32 = vadd.f32 %v5693_v45, %v5647_v1  ;;  %v5594_v11 = vadd.f32 %v5593_v7, %v5499_v27  ;;  %v8246_v33 = vadd.f32 %v11147_v57, %v4831_v41  ;;  %v5649_v9 = vmul.f32 %v5452_v58, %v5452_v58 }
 0x345   : > { %v5355_v63 = vrot.slane %v5201_v48, 1  ;;  %v7712_v20 = vpop.f32.mrb[214].mxu0  ;;  %v5501_v3 = vsel %vm474_vm1, %v5453_v13, 0.0  ;;  %v5502_v25 = vsel %vm469_vm0, %v5454_v29, 0.0 }
 0x346   : > { %v5595_v56 = vadd.f32 %v5594_v11, %v5452_v58  ;;  %v5695_v26 = vadd.f32 %v5694_v32, %v5648_v2  ;;  %v7608_v30 = vpop.f32.mrb[70].mxu1  ;;  %v5361_v15 = vrot.slane %v7712_v20, 1  ;;  %v5211_v31 = vpop.f32.mrb[215].mxu0  ;;  %5549 = vst [vmem:[%s8525_s10 + $0x148] sm:$0xff] %v5501_v3  ;;  %5550 = vst [vmem:[%s8525_s10 + $0x150] sm:$0xff] %v5502_v25  ;;  %v5650_v44 = vmul.f32 %v5501_v3, %v5501_v3  ;;  %v5858_v20 = vld [vmem:[%s8525_s10 + $0x28] sm:$0xff] (%p8513_p4) }
 0x347   : > { %v8251_v39 = vadd.f32 %v11148_v60, %v7608_v30  ;;  %v4841_v0 = vpop.f32.mrb[71].mxu1  ;;  %v5651_v62 = vmul.f32 %v5502_v25, %v5502_v25  ;;  %v5356_v53 = vsel %vm2181_vm3, %v5353_v46, %v5355_v63  ;;  %v5358_v17 = vsel %vm2181_vm3, %v5355_v63, %v5357_v8  ;;  %v5854_v63 = vld [vmem:[%s8525_s10 + $0x18] sm:$0xff] (%p8513_p4)  ;;  %v5856_v30 = vld [vmem:[%s8525_s10 + $0x20] sm:$0xff] (%p8513_p4)  ;;  %5859 = vst [vmem:[%s10829_s30 + $0x28] sm:$0xff] (%p8513_p4), %v5858_v20 }
 0x348   : > { %v5696_v6 = vadd.f32 %v5695_v26, %v5649_v9  ;;  %v5596_v38 = vadd.f32 %v5595_v56, %v5501_v3  ;;  %v5411_v24 = vsel %vm2181_vm3, %v5361_v15, 0.0  ;;  %v8256_v10 = vadd.f32 %v11149_v19, %v4841_v0  ;;  %v5848_v56 = vld [vmem:[%s8525_s10] sm:$0xff] (%p8513_p4)  ;;  %v5850_v9 = vld [vmem:[%s8525_s10 + $0x8] sm:$0xff] (%p8513_p4)  ;;  %v5852_v26 = vld [vmem:[%s8525_s10 + $0x10] sm:$0xff] (%p8513_p4)  ;;  %5855 = vst [vmem:[%s10829_s30 + $0x18] sm:$0xff] (%p8513_p4), %v5854_v63 }
 0x349   : > { %v5455_v59 = vadd.f32 %v8231_v21, %v5356_v53  ;;  %v5456_v51 = vadd.f32 %v8246_v33, %v5358_v17  ;;  %v5459_v49 = vadd.f32 %v8251_v39, %v5411_v24  ;;  %v5359_v5 = vrot.slane %v5211_v31, 1  ;;  %5849 = vst [vmem:[%s10829_s30] sm:$0xff] (%p8513_p4), %v5848_v56  ;;  %5851 = vst [vmem:[%s10829_s30 + $0x8] sm:$0xff] (%p8513_p4), %v5850_v9  ;;  %v5860_v3 = vld [vmem:[%s8525_s10 + $0x30] sm:$0xff] (%p8513_p4)  ;;  %v5864_v60 = vld [vmem:[%s8525_s10 + $0x40] sm:$0xff] (%p8513_p4) }
 0x34a   : > { %v5597_v40 = vadd.f32 %v5596_v38, %v5502_v25  ;;  %v5697_v12 = vadd.f32 %v5696_v6, %v5650_v44  ;;  %5853 = vst [vmem:[%s10829_s30 + $0x10] sm:$0xff] (%p8513_p4), %v5852_v26  ;;  %5857 = vst [vmem:[%s10829_s30 + $0x20] sm:$0xff] (%p8513_p4), %v5856_v30  ;;  %v5862_v25 = vld [vmem:[%s8525_s10 + $0x38] sm:$0xff] (%p8513_p4)  ;;  %v5866_v39 = vld [vmem:[%s8525_s10 + $0x48] sm:$0xff] (%p8513_p4) }
 0x34b   : > { %v5504_v14 = vsel %vm474_vm1, %v5456_v51, 0.0  ;;  %5551 = vst [vmem:[%s8525_s10 + $0x158] sm:$0xff] %v5455_v59  ;;  %v5652_v23 = vmul.f32 %v5455_v59, %v5455_v59  ;;  %v5507_v35 = vsel %vm474_vm1, %v5459_v49, 0.0  ;;  %v5360_v4 = vsel %vm2181_vm3, %v5357_v8, %v5359_v5  ;;  %5861 = vst [vmem:[%s10829_s30 + $0x30] sm:$0xff] (%p8513_p4), %v5860_v3  ;;  %v5870_v0 = vld [vmem:[%s8525_s10 + $0x58] sm:$0xff] (%p8513_p4)  ;;  %v5872_v31 = vld [vmem:[%s8525_s10 + $0x60] sm:$0xff] (%p8513_p4) }
 0x34c   : > { %v5698_v22 = vadd.f32 %v5697_v12, %v5651_v62  ;;  %v5598_v46 = vadd.f32 %v5597_v40, %v5455_v59  ;;  %5552 = vst [vmem:[%s8525_s10 + $0x160] sm:$0xff] %v5504_v14  ;;  %v5362_v21 = vsel %vm2181_vm3, %v5359_v5, %v5361_v15  ;;  %v5653_v42 = vmul.f32 %v5504_v14, %v5504_v14  ;;  %v5868_v15 = vld [vmem:[%s8525_s10 + $0x50] sm:$0xff] (%p8513_p4)  ;;  %v5874_v6 = vld [vmem:[%s8525_s10 + $0x68] sm:$0xff] (%p8513_p4)  ;;  %v5878_v44 = vld [vmem:[%s8525_s10 + $0x78] sm:$0xff] (%p8513_p4) }
 0x34d   : > { %5555 = vst [vmem:[%s8525_s10 + $0x178] sm:$0xff] %v5507_v35  ;;  %v5457_v37 = vadd.f32 %v8241_v50, %v5360_v4  ;;  %v5458_v28 = vadd.f32 %v8256_v10, %v5362_v21  ;;  %v5656_v55 = vmul.f32 %v5507_v35, %v5507_v35  ;;  %5863 = vst [vmem:[%s10829_s30 + $0x38] sm:$0xff] (%p8513_p4), %v5862_v25  ;;  %v5876_v38 = vld [vmem:[%s8525_s10 + $0x70] sm:$0xff] (%p8513_p4)  ;;  %v5880_v62 = vld [vmem:[%s8525_s10 + $0x80] sm:$0xff] (%p8513_p4) }
 0x34e   : > { %v5599_v36 = vadd.f32 %v5598_v46, %v5504_v14  ;;  %v5699_v18 = vadd.f32 %v5698_v22, %v5652_v23  ;;  %5865 = vst [vmem:[%s10829_s30 + $0x40] sm:$0xff] (%p8513_p4), %v5864_v60  ;;  %5867 = vst [vmem:[%s10829_s30 + $0x48] sm:$0xff] (%p8513_p4), %v5866_v39  ;;  %v5882_v53 = vld [vmem:[%s8525_s10 + $0x88] sm:$0xff] (%p8513_p4)  ;;  %v5884_v17 = vld [vmem:[%s8525_s10 + $0x90] sm:$0xff] (%p8513_p4) }
 0x34f   : > { %v5505_v7 = vsel %vm469_vm0, %v5457_v37, 0.0  ;;  %5554 = vst [vmem:[%s8525_s10 + $0x170] sm:$0xff] %v5458_v28  ;;  %v5655_v58 = vmul.f32 %v5458_v28, %v5458_v28  ;;  %5869 = vst [vmem:[%s10829_s30 + $0x50] sm:$0xff] (%p8513_p4), %v5868_v15  ;;  %v5886_v24 = vld [vmem:[%s8525_s10 + $0x98] sm:$0xff] (%p8513_p4)  ;;  %v5888_v19 = vld [vmem:[%s8525_s10 + $0xa0] sm:$0xff] (%p8513_p4) }
 0x350   : > { %v5700_v61 = vadd.f32 %v5699_v18, %v5653_v42  ;;  %5553 = vst [vmem:[%s8525_s10 + $0x168] sm:$0xff] %v5505_v7  ;;  %v5600_v1 = vadd.f32 %v5599_v36, %v5505_v7  ;;  %v5654_v45 = vmul.f32 %v5505_v7, %v5505_v7  ;;  %5871 = vst [vmem:[%s10829_s30 + $0x58] sm:$0xff] (%p8513_p4), %v5870_v0  ;;  %v5890_v10 = vld [vmem:[%s8525_s10 + $0xa8] sm:$0xff] (%p8513_p4)  ;;  %v5892_v40 = vld [vmem:[%s8525_s10 + $0xb0] sm:$0xff] (%p8513_p4) }
 0x351   : > { %5873 = vst [vmem:[%s10829_s30 + $0x60] sm:$0xff] (%p8513_p4), %v5872_v31  ;;  %5875 = vst [vmem:[%s10829_s30 + $0x68] sm:$0xff] (%p8513_p4), %v5874_v6  ;;  %v5894_v12 = vld [vmem:[%s8525_s10 + $0xb8] sm:$0xff] (%p8513_p4)  ;;  %v5896_v59 = vld [vmem:[%s8525_s10 + $0xc0] sm:$0xff] (%p8513_p4) }
 0x352   : > { %v5601_v43 = vadd.f32 %v5600_v1, %v5458_v28  ;;  %v5701_v47 = vadd.f32 %v5700_v61, %v5654_v45  ;;  %5877 = vst [vmem:[%s10829_s30 + $0x70] sm:$0xff] (%p8513_p4), %v5876_v38  ;;  %5879 = vst [vmem:[%s10829_s30 + $0x78] sm:$0xff] (%p8513_p4), %v5878_v44  ;;  %v5898_v51 = vld [vmem:[%s8525_s10 + $0xc8] sm:$0xff] (%p8513_p4)  ;;  %v5900_v49 = vld [vmem:[%s8525_s10 + $0xd0] sm:$0xff] (%p8513_p4) }
 0x353   : > { %5881 = vst [vmem:[%s10829_s30 + $0x80] sm:$0xff] (%p8513_p4), %v5880_v62  ;;  %5883 = vst [vmem:[%s10829_s30 + $0x88] sm:$0xff] (%p8513_p4), %v5882_v53  ;;  %v5902_v5 = vld [vmem:[%s8525_s10 + $0xd8] sm:$0xff] (%p8513_p4)  ;;  %v5904_v22 = vld [vmem:[%s8525_s10 + $0xe0] sm:$0xff] (%p8513_p4) }
 0x354   : > { %v5602_v27 = vadd.f32 %v5601_v43, %v5507_v35  ;;  %v5702_v34 = vadd.f32 %v5701_v47, %v5655_v58  ;;  %5885 = vst [vmem:[%s10829_s30 + $0x90] sm:$0xff] (%p8513_p4), %v5884_v17  ;;  %5887 = vst [vmem:[%s10829_s30 + $0x98] sm:$0xff] (%p8513_p4), %v5886_v24  ;;  %v5906_v14 = vld [vmem:[%s8525_s10 + $0xe8] sm:$0xff] (%p8513_p4)  ;;  %v5908_v46 = vld [vmem:[%s8525_s10 + $0xf0] sm:$0xff] (%p8513_p4) }
 0x355   : > { %5889 = vst [vmem:[%s10829_s30 + $0xa0] sm:$0xff] (%p8513_p4), %v5888_v19  ;;  %5891 = vst [vmem:[%s10829_s30 + $0xa8] sm:$0xff] (%p8513_p4), %v5890_v10  ;;  %v5910_v23 = vld [vmem:[%s8525_s10 + $0xf8] sm:$0xff] (%p8513_p4)  ;;  %v5912_v35 = vld [vmem:[%s8525_s10 + $0x100] sm:$0xff] (%p8513_p4) }
 0x356   : > { %v5603_v52 = vrot.slane %v5602_v27, 4  ;;  %v5703_v54 = vadd.f32 %v5702_v34, %v5656_v55  ;;  %5893 = vst [vmem:[%s10829_s30 + $0xb0] sm:$0xff] (%p8513_p4), %v5892_v40  ;;  %5895 = vst [vmem:[%s10829_s30 + $0xb8] sm:$0xff] (%p8513_p4), %v5894_v12  ;;  %v5914_v4 = vld [vmem:[%s8525_s10 + $0x108] sm:$0xff] (%p8513_p4)  ;;  %v5916_v21 = vld [vmem:[%s8525_s10 + $0x110] sm:$0xff] (%p8513_p4) }
 0x357   : > { %5897 = vst [vmem:[%s10829_s30 + $0x180] sm:$0xff] (%p8513_p4), %v5896_v59  ;;  %5899 = vst [vmem:[%s10829_s30 + $0x188] sm:$0xff] (%p8513_p4), %v5898_v51  ;;  %v5918_v36 = vld [vmem:[%s8525_s10 + $0x118] sm:$0xff] (%p8513_p4)  ;;  %v5920_v42 = vld [vmem:[%s8525_s10 + $0x120] sm:$0xff] (%p8513_p4) }
 0x358   : > { %v5604_v41 = vadd.f32 %v5603_v52, %v5602_v27  ;;  %v5704_v50 = vrot.slane %v5703_v54, 4  ;;  %5901 = vst [vmem:[%s10829_s30 + $0x190] sm:$0xff] (%p8513_p4), %v5900_v49  ;;  %5903 = vst [vmem:[%s10829_s30 + $0x198] sm:$0xff] (%p8513_p4), %v5902_v5  ;;  %v5922_v18 = vld [vmem:[%s8525_s10 + $0x128] sm:$0xff] (%p8513_p4)  ;;  %v5924_v37 = vld [vmem:[%s8525_s10 + $0x130] sm:$0xff] (%p8513_p4) }
 0x359   : > { %5905 = vst [vmem:[%s10829_s30 + $0x1a0] sm:$0xff] (%p8513_p4), %v5904_v22  ;;  %5907 = vst [vmem:[%s10829_s30 + $0x1a8] sm:$0xff] (%p8513_p4), %v5906_v14  ;;  %v5926_v28 = vld [vmem:[%s8525_s10 + $0x138] sm:$0xff] (%p8513_p4)  ;;  %v5928_v61 = vld [vmem:[%s8525_s10 + $0x140] sm:$0xff] (%p8513_p4) }
 0x35a   : > { %v5605_v48 = vrot.slane %v5604_v41, 2  ;;  %v5705_v32 = vadd.f32 %v5704_v50, %v5703_v54  ;;  %5909 = vst [vmem:[%s10829_s30 + $0x1b0] sm:$0xff] (%p8513_p4), %v5908_v46  ;;  %5911 = vst [vmem:[%s10829_s30 + $0x1b8] sm:$0xff] (%p8513_p4), %v5910_v23  ;;  %v5930_v7 = vld [vmem:[%s8525_s10 + $0x148] sm:$0xff] (%p8513_p4)  ;;  %v5932_v1 = vld [vmem:[%s8525_s10 + $0x150] sm:$0xff] (%p8513_p4) }
 0x35b   : > { %5913 = vst [vmem:[%s10829_s30 + $0x1c0] sm:$0xff] (%p8513_p4), %v5912_v35  ;;  %5915 = vst [vmem:[%s10829_s30 + $0x1c8] sm:$0xff] (%p8513_p4), %v5914_v4  ;;  %v5934_v45 = vld [vmem:[%s8525_s10 + $0x158] sm:$0xff] (%p8513_p4)  ;;  %v5936_v43 = vld [vmem:[%s8525_s10 + $0x160] sm:$0xff] (%p8513_p4) }
 0x35c   : > { %v5606_v11 = vadd.f32 %v5605_v48, %v5604_v41  ;;  %v5706_v16 = vrot.slane %v5705_v32, 2  ;;  %5917 = vst [vmem:[%s10829_s30 + $0x1d0] sm:$0xff] (%p8513_p4), %v5916_v21  ;;  %5919 = vst [vmem:[%s10829_s30 + $0x1d8] sm:$0xff] (%p8513_p4), %v5918_v36  ;;  %v5938_v58 = vld [vmem:[%s8525_s10 + $0x168] sm:$0xff] (%p8513_p4)  ;;  %v5940_v47 = vld [vmem:[%s8525_s10 + $0x170] sm:$0xff] (%p8513_p4) }
 0x35d   : > { %5921 = vst [vmem:[%s10829_s30 + $0x1e0] sm:$0xff] (%p8513_p4), %v5920_v42  ;;  %5923 = vst [vmem:[%s10829_s30 + $0x1e8] sm:$0xff] (%p8513_p4), %v5922_v18  ;;  %v5942_v55 = vld [vmem:[%s8525_s10 + $0x178] sm:$0xff] (%p8513_p4) }
 0x35e   : > { %v5607_v2 = vrot.slane %v5606_v11, 1  ;;  %v5707_v13 = vadd.f32 %v5706_v16, %v5705_v32  ;;  %5925 = vst [vmem:[%s10829_s30 + $0x1f0] sm:$0xff] (%p8513_p4), %v5924_v37  ;;  %5927 = vst [vmem:[%s10829_s30 + $0x1f8] sm:$0xff] (%p8513_p4), %v5926_v28 }
 0x35f   : > { %5722 = sbr.rel (!%p8513_p4) target bundleno = 870 (0x366), region = 157  ;;  %5929 = vst [vmem:[%s10829_s30 + $0x200] sm:$0xff] (%p8513_p4), %v5928_v61  ;;  %5931 = vst [vmem:[%s10829_s30 + $0x208] sm:$0xff] (%p8513_p4), %v5930_v7 }
 0x360   : > { %v5708_v29 = vrot.slane %v5707_v13, 1  ;;  %v5608_v8 = vadd.f32 %v5607_v2, %v5606_v11  ;;  %5933 = vst [vmem:[%s10829_s30 + $0x210] sm:$0xff] (%p8513_p4), %v5932_v1  ;;  %5935 = vst [vmem:[%s10829_s30 + $0x218] sm:$0xff] (%p8513_p4), %v5934_v45 }
 0x361   : > { %5937 = vst [vmem:[%s10829_s30 + $0x220] sm:$0xff] (%p8513_p4), %v5936_v43  ;;  %5939 = vst [vmem:[%s10829_s30 + $0x228] sm:$0xff] (%p8513_p4), %v5938_v58 }
 0x362   : > { %v5709_v57 = vadd.f32 %v5708_v29, %v5707_v13  ;;  %5941 = vst [vmem:[%s10829_s30 + $0x230] sm:$0xff] (%p8513_p4), %v5940_v47  ;;  %5943 = vst [vmem:[%s10829_s30 + $0x238] sm:$0xff] (%p8513_p4), %v5942_v55 }
 0x364   : > { %v5710_v33 = vsel %vm1296_vm2, %v5608_v8, %v5709_v57 }
 0x365   : > { %5711 = vst [vmem:[%s8523_s9] sm:$0x3] %v5710_v33 }
 0x366 PF: > { %p13_p12 = scmp.ge.s32.totalorder %s8504_s22, 4   ;;  %s11150_s18 = smov %s8453_s19 }
 0x367   : > { %s11151_s19 = smov %s8511_s25  ;;  %s11152_s20 = smov %s8504_s22 }
 0x368   :  { %15 = sbr.rel (!%p13_p12) target bundleno = 2 (0x2), region = 270 }

</bundles_post_ra>
